<compile_context>
chip_gen: v7x
topology: tpu7x:2x2x1
jax: 0.10.0
libtpu: 0.0.40
codegen_flags: <defaults>
</compile_context>

<pallas_src>
import functools

import jax
import jax.numpy as jnp
from jax import lax
from jax.experimental import pallas as pl
from jax.experimental.pallas import tpu as pltpu

Z_PAD = 128  # lane-padded latent width used inside the fused mid kernel


# ----------------------------------------------------------------------------
# Pallas kernels
# ----------------------------------------------------------------------------
def _gemm_bias_act_kernel(a_ref, w_ref, b_ref, o_ref, *, relu: bool):
    """One (tm, N) tile of (A @ W + bias), optionally ReLU'd.

    A/W are bf16 (MXU-native); accumulation and the bias/ReLU epilogue stay in
    f32; cast happens only at the store.
    """
    acc = jnp.dot(a_ref[...], w_ref[...], preferred_element_type=jnp.float32)
    acc = acc + b_ref[...]                  # (1, N) f32 bias broadcasts over rows
    if relu:
        acc = jnp.maximum(acc, 0.0)
    o_ref[...] = acc.astype(o_ref.dtype)


def _mid_kernel(h4_ref, eps_ref, we5_ref, be5_ref, wmu_ref, bmu_ref,
                wlv_ref, blv_ref, wd_ref, bd_ref, wd1_ref, bd1_ref,
                mu_ref, lv_ref, o1_ref):
    """Fused middle of the network (5 PyTorch layers, one launch):

    e5 4x4 conv on the 4x4 map (== GEMM) + ReLU  ->  efc Linear  ->
    split mu/logvar  ->  z = mu + exp(logvar/2)*eps  ->  dfc Linear + ReLU ->
    d1 ConvTranspose on a 1x1 input (== GEMM) + ReLU.
    Latent math stays in f32; the two big GEMMs use bf16 operands.
    """
    h5 = jnp.dot(h4_ref[...], we5_ref[...], preferred_element_type=jnp.float32)
    h5 = jnp.maximum(h5 + be5_ref[...], 0.0)                       # (B, 256) f32
    mu = jnp.dot(h5, wmu_ref[...], preferred_element_type=jnp.float32) + bmu_ref[...]
    lv = jnp.dot(h5, wlv_ref[...], preferred_element_type=jnp.float32) + blv_ref[...]
    z = mu + jnp.exp(lv * 0.5) * eps_ref[...]       # padded lanes stay exactly 0
    hd = jnp.dot(z, wd_ref[...], preferred_element_type=jnp.float32) + bd_ref[...]
    hd = jnp.maximum(hd, 0.0)                                      # (B, 256) f32
    o1 = jnp.dot(hd.astype(jnp.bfloat16), wd1_ref[...],
                 preferred_element_type=jnp.float32) + bd1_ref[...]
    mu_ref[...] = mu
    lv_ref[...] = lv
    o1_ref[...] = jnp.maximum(o1, 0.0).astype(o1_ref.dtype)


# ----------------------------------------------------------------------------
# Pallas wrappers
# ----------------------------------------------------------------------------
def _choose_tm(m):
    """Single M tile when possible (grid is a serial loop on v5e/v6e); at most
    2 tiles for the big M=2048 layers so both v7x TensorCores get work."""
    if m <= 1024:
        return m
    for tm in (1024, 512, 256, 128):
        if m % tm == 0:
            return tm
    return m


def pallas_gemm(a, w, b, *, relu, out_dtype=jnp.bfloat16):
    """a:(M,K) @ w:(K,N) + b:(1,N) -> (M,N) with fused bias/ReLU epilogue."""
    M, K = a.shape
    Kw, N = w.shape
    assert K == Kw, (K, Kw)
    tm = _choose_tm(M)

    return pl.pallas_call(
        functools.partial(_gemm_bias_act_kernel, relu=relu),
        out_shape=jax.ShapeDtypeStruct((M, N), out_dtype),
        grid_spec=pltpu.PrefetchScalarGridSpec(
            num_scalar_prefetch=0,
            grid=(M // tm,),
            in_specs=[
                pl.BlockSpec((tm, K), lambda i: (i, 0)),   # K = full extent
                pl.BlockSpec((K, N), lambda i: (0, 0)),    # whole weight, reused
                pl.BlockSpec((1, N), lambda i: (0, 0)),
            ],
            out_specs=pl.BlockSpec((tm, N), lambda i: (i, 0)),
        ),
        compiler_params=pltpu.CompilerParams(dimension_semantics=("parallel",)),
    )(a.astype(jnp.bfloat16), w, b)


# ----------------------------------------------------------------------------
# Conv / ConvTranspose lowering (thin XLA glue around the Pallas GEMM)
# ----------------------------------------------------------------------------
def conv2d_gemm(x, layer, *, stride, padding, k, relu, out_dtype=jnp.bfloat16):
    """Conv2d as im2col (XLA slices) + fused Pallas GEMM. NHWC activations.

    `k` is a static literal (the previous revision read it from the jitted
    pytree, which produced a tracer and crashed)."""
    B, H, W, Cin = x.shape
    cout = layer["w"].shape[1]                       # static: derived from shape
    Ho = (H + 2 * padding - k) // stride + 1
    Wo = (W + 2 * padding - k) // stride + 1
    xp = jnp.pad(x, ((0, 0), (padding, padding), (padding, padding), (0, 0)))
    patches = [
        xp[:, ki:ki + stride * Ho:stride, kj:kj + stride * Wo:stride, :]
        for ki in range(k) for kj in range(k)
    ]
    a = jnp.concatenate(patches, axis=-1).reshape(B * Ho * Wo, k * k * Cin)
    out = pallas_gemm(a, layer["w"], layer["b"], relu=relu, out_dtype=out_dtype)
    return out.reshape(B, Ho, Wo, cout)


def conv_transpose2x_gemm(x, layer, *, relu, out_dtype=jnp.bfloat16):
    """ConvTranspose2d(k=4, stride=2, pad=1) via sub-pixel phase GEMM.

    out[:, 2m+p, 2n+q, :] is a small conv of x per phase (p,q); the four phase
    weights are packed side-by-side along N (see prepare_params), so a single
    GEMM of (B*H*W, 9*Cin) x (9*Cin, 4*Cout) produces all phases with no
    input-dilation zeros fed to the MXU.
    """
    B, H, W, Cin = x.shape
    cout = layer["w"].shape[1] // 4                  # static: derived from shape
    xp = jnp.pad(x, ((0, 0), (1, 1), (1, 1), (0, 0)))
    patches = [xp[:, di:di + H, dj:dj + W, :] for di in range(3) for dj in range(3)]
    a = jnp.concatenate(patches, axis=-1).reshape(B * H * W, 9 * Cin)
    out = pallas_gemm(a, layer["w"], layer["b"], relu=relu, out_dtype=out_dtype)
    out = out.reshape(B, H, W, 2, 2, cout)
    return out.transpose(0, 1, 3, 2, 4, 5).reshape(B, 2 * H, 2 * W, cout)


# ----------------------------------------------------------------------------
# Parameter init (PyTorch layout) and one-time repack for the kernels
# ----------------------------------------------------------------------------
def _he(key, shape, fan_in):
    return jax.random.normal(key, shape, jnp.float32) * jnp.sqrt(2.0 / fan_in)


def init_vae_params(key, z_dim=15, nc=1):
    """kaiming_normal weights, zero biases, PyTorch tensor layouts."""
    ks = jax.random.split(key, 12)
    p = {}
    enc = [(32, nc, 4), (32, 32, 4), (64, 32, 4), (64, 64, 4), (256, 64, 4)]
    for n, (co, ci, k) in enumerate(enc, 1):
        p[f"e{n}_w"] = _he(ks[n - 1], (co, ci, k, k), ci * k * k)
        p[f"e{n}_b"] = jnp.zeros((co,), jnp.float32)
    p["efc_w"] = _he(ks[5], (256, 2 * z_dim), 256)
    p["efc_b"] = jnp.zeros((2 * z_dim,), jnp.float32)
    p["dfc_w"] = _he(ks[6], (z_dim, 256), z_dim)
    p["dfc_b"] = jnp.zeros((256,), jnp.float32)
    dec = [(256, 64, 4), (64, 64, 4), (64, 32, 4), (32, 32, 4), (32, nc, 4)]
    for n, (ci, co, k) in enumerate(dec, 1):
        p[f"d{n}_w"] = _he(ks[6 + n], (ci, co, k, k), co * k * k)
        p[f"d{n}_b"] = jnp.zeros((co,), jnp.float32)
    return p


# (output phase p, window offset di in the pad-1 input, kernel tap k) for a
# stride-2, kernel-4, pad-1 transposed conv:  out[2m+p] = sum_di xpad[m+di]*w[k]
_PHASE_TAPS = ((0, 0, 3), (0, 1, 1), (1, 1, 2), (1, 2, 0))


def _pack_gemm(w_kn, bias_n):
    """GEMM weight to bf16, bias to (1, N) f32.  N stays exact (full-dim lane
    block), so no output slicing is needed downstream."""
    return {"w": w_kn.astype(jnp.bfloat16),
            "b": bias_n.astype(jnp.float32).reshape(1, -1)}


def _pack_convT_s2_weight(w_iohw):
    """(Cin,Cout,4,4) ConvTranspose weight -> (9*Cin, 4*Cout) phase GEMM weight."""
    Cin, Cout = w_iohw.shape[:2]
    w9 = jnp.zeros((3, 3, Cin, 2, 2, Cout), jnp.float32)
    for p, di, kr in _PHASE_TAPS:
        for q, dj, kc in _PHASE_TAPS:
            w9 = w9.at[di, dj, :, p, q, :].set(w_iohw[:, :, kr, kc])
    return w9.reshape(9 * Cin, 4 * Cout)


def prepare_params(params, z_dim=15):
    """One-time weight repack.  NOTE: every leaf is a jnp array (no Python-int
    metadata), so the dict can be passed straight through jax.jit."""
    prep = {}
    for n in range(1, 5):                                    # encoder convs e1..e4
        w = params[f"e{n}_w"]                                # (Cout,Cin,kh,kw)
        co, ci, kh, kw = w.shape
        wg = jnp.transpose(w, (2, 3, 1, 0)).reshape(kh * kw * ci, co)
        prep[f"e{n}"] = _pack_gemm(wg, params[f"e{n}_b"])

    # fused middle: e5 GEMM, efc (split mu/logvar), dfc, d1 GEMM
    w5 = params["e5_w"]
    co, ci, kh, kw = w5.shape
    we5 = jnp.transpose(w5, (2, 3, 1, 0)).reshape(kh * kw * ci, co)
    efc_w, efc_b = params["efc_w"], params["efc_b"]
    wd1 = params["d1_w"]                     # d1: 1x1 spatial input -> plain GEMM
    ci1, co1, kh1, kw1 = wd1.shape
    wd1g = jnp.transpose(wd1, (0, 2, 3, 1)).reshape(ci1, kh1 * kw1 * co1)
    prep["mid"] = {
        "we5": we5.astype(jnp.bfloat16),
        "be5": params["e5_b"].astype(jnp.float32).reshape(1, -1),
        "wmu": jnp.pad(efc_w[:, :z_dim], ((0, 0), (0, Z_PAD - z_dim))),
        "wlv": jnp.pad(efc_w[:, z_dim:], ((0, 0), (0, Z_PAD - z_dim))),
        "bmu": jnp.pad(efc_b[:z_dim], (0, Z_PAD - z_dim)).reshape(1, Z_PAD),
        "blv": jnp.pad(efc_b[z_dim:], (0, Z_PAD - z_dim)).reshape(1, Z_PAD),
        "wd": jnp.pad(params["dfc_w"], ((0, Z_PAD - z_dim), (0, 0))),
        "bd": params["dfc_b"].reshape(1, -1),
        "wd1": wd1g.astype(jnp.bfloat16),
        "bd1": jnp.tile(params["d1_b"], kh1 * kw1).astype(jnp.float32).reshape(1, -1),
    }

    for n in range(2, 6):                                    # stride-2 ConvT layers
        w = params[f"d{n}_w"]
        prep[f"d{n}"] = _pack_gemm(_pack_convT_s2_weight(w),
                                   jnp.tile(params[f"d{n}_b"], 4))
    return prep


# ----------------------------------------------------------------------------
# VAE forward
# ----------------------------------------------------------------------------
def vae_forward(prep, x_nchw, eps, z_dim=15):
    """Returns (x_recon [NCHW], mu, logvar), matching the PyTorch module."""
    B = x_nchw.shape[0]
    x = jnp.transpose(x_nchw, (0, 2, 3, 1)).astype(jnp.bfloat16)       # -> NHWC

    # ---- encoder convs: 64 -> 32 -> 16 -> 8 -> 4 ----
    h = conv2d_gemm(x, prep["e1"], stride=2, padding=1, k=4, relu=True)
    h = conv2d_gemm(h, prep["e2"], stride=2, padding=1, k=4, relu=True)
    h = conv2d_gemm(h, prep["e3"], stride=2, padding=1, k=4, relu=True)
    h = conv2d_gemm(h, prep["e4"], stride=2, padding=1, k=4, relu=True)

    # ---- fused middle: e5 + efc + reparametrize + dfc + d1 (one Pallas call)
    mid = prep["mid"]
    h4 = h.reshape(B, -1)                                     # (B, 1024) bf16
    eps_p = jnp.pad(eps.astype(jnp.float32), ((0, 0), (0, Z_PAD - z_dim)))
    n_d1 = mid["wd1"].shape[1]                                # static (1024)
    mu_p, lv_p, o1 = pl.pallas_call(
        _mid_kernel,
        out_shape=(
            jax.ShapeDtypeStruct((B, Z_PAD), jnp.float32),
            jax.ShapeDtypeStruct((B, Z_PAD), jnp.float32),
            jax.ShapeDtypeStruct((B, n_d1), jnp.bfloat16),
        ),
    )(h4, eps_p, mid["we5"], mid["be5"], mid["wmu"], mid["bmu"],
      mid["wlv"], mid["blv"], mid["wd"], mid["bd"], mid["wd1"], mid["bd1"])

    # ---- decoder: 4 -> 8 -> 16 -> 32 -> 64 ----
    h = o1.reshape(B, 4, 4, n_d1 // 16)
    h = conv_transpose2x_gemm(h, prep["d2"], relu=True)
    h = conv_transpose2x_gemm(h, prep["d3"], relu=True)
    h = conv_transpose2x_gemm(h, prep["d4"], relu=True)
    h = conv_transpose2x_gemm(h, prep["d5"], relu=False, out_dtype=jnp.float32)

    x_recon = jnp.transpose(h, (0, 3, 1, 2))                           # -> NCHW
    return x_recon, mu_p[:, :z_dim], lv_p[:, :z_dim]


# ----------------------------------------------------------------------------
# Pure-JAX f32 reference (validation only)
# ----------------------------------------------------------------------------
def reference_forward(params, x_nchw, eps, z_dim=15):
    dn = ("NCHW", "OIHW", "NCHW")
    hp = lax.Precision.HIGHEST

    def conv(h, w, b, stride, pad):
        out = lax.conv_general_dilated(h, w, (stride, stride), [(pad, pad)] * 2,
                                       dimension_numbers=dn, precision=hp)
        return out + b.reshape(1, -1, 1, 1)

    def convT(h, w_iohw, b, stride, pad):
        k = w_iohw.shape[2]
        w = jnp.transpose(w_iohw[:, :, ::-1, ::-1], (1, 0, 2, 3))
        out = lax.conv_general_dilated(h, w, (1, 1),
                                       [(k - 1 - pad, k - 1 - pad)] * 2,
                                       lhs_dilation=(stride, stride),
                                       dimension_numbers=dn, precision=hp)
        return out + b.reshape(1, -1, 1, 1)

    B = x_nchw.shape[0]
    h = x_nchw.astype(jnp.float32)
    h = jax.nn.relu(conv(h, params["e1_w"], params["e1_b"], 2, 1))
    h = jax.nn.relu(conv(h, params["e2_w"], params["e2_b"], 2, 1))
    h = jax.nn.relu(conv(h, params["e3_w"], params["e3_b"], 2, 1))
    h = jax.nn.relu(conv(h, params["e4_w"], params["e4_b"], 2, 1))
    h = jax.nn.relu(conv(h, params["e5_w"], params["e5_b"], 1, 0))
    h = h.reshape(B, 256)
    dist = jnp.dot(h, params["efc_w"], precision=hp) + params["efc_b"]
    mu, logvar = dist[:, :z_dim], dist[:, z_dim:]
    z = mu + jnp.exp(logvar / 2.0) * eps
    h = jax.nn.relu(jnp.dot(z, params["dfc_w"], precision=hp) + params["dfc_b"])
    h = h.reshape(B, 256, 1, 1)
    h = jax.nn.relu(convT(h, params["d1_w"], params["d1_b"], 1, 0))
    h = jax.nn.relu(convT(h, params["d2_w"], params["d2_b"], 2, 1))
    h = jax.nn.relu(convT(h, params["d3_w"], params["d3_b"], 2, 1))
    h = jax.nn.relu(convT(h, params["d4_w"], params["d4_b"], 2, 1))
    h = convT(h, params["d5_w"], params["d5_b"], 2, 1)
    return h, mu, logvar


def _rel_err(a, b):
    a = a.astype(jnp.float32).ravel()
    b = b.astype(jnp.float32).ravel()
    return float(jnp.linalg.norm(a - b) / (jnp.linalg.norm(b) + 1e-12))


# ----------------------------------------------------------------------------
# main
# ----------------------------------------------------------------------------
if __name__ == "__main__":
    Z_DIM, NC, BATCH = 15, 1, 2
    key = jax.random.PRNGKey(0)
    k_params, k_x, k_eps = jax.random.split(key, 3)

    params = init_vae_params(k_params, z_dim=Z_DIM, nc=NC)
    prep = prepare_params(params, z_dim=Z_DIM)          # one-time weight repack

    # architecture requires 64x64 spatial input (encoder reduces it to 1x1)
    x = jax.random.normal(k_x, (BATCH, NC, 64, 64), jnp.float32)
    # deterministic eps replacing torch's std.data.new(...).normal_()
    eps = jax.random.normal(k_eps, (BATCH, Z_DIM), jnp.float32)

    fwd = jax.jit(functools.partial(vae_forward, z_dim=Z_DIM))
    x_recon, mu, logvar = fwd(prep, x, eps)
    jax.block_until_ready((x_recon, mu, logvar))

    assert x_recon.shape == (BATCH, NC, 64, 64)
    assert mu.shape == (BATCH, Z_DIM) and logvar.shape == (BATCH, Z_DIM)

    # validate against the pure-JAX f32 reference (loose: matmul inputs are bf16)
    xr_ref, mu_ref, lv_ref = jax.jit(
        functools.partial(reference_forward, z_dim=Z_DIM))(params, x, eps)
    assert _rel_err(mu, mu_ref) < 0.1, ("mu mismatch", _rel_err(mu, mu_ref))
    assert _rel_err(logvar, lv_ref) < 0.1, ("logvar mismatch", _rel_err(logvar, lv_ref))
    assert _rel_err(x_recon, xr_ref) < 0.1, ("x_recon mismatch", _rel_err(x_recon, xr_ref))

    print("KERNEL_OK")
</pallas_src>

<mosaic_0001>
module attributes {stable_mosaic.version = 11 : i64} {
  func.func @_gemm_bias_act_kernel(%arg0: i32, %arg1: memref<1024x16xbf16, #tpu.memory_space<vmem>>, %arg2: memref<16x32xbf16, #tpu.memory_space<vmem>>, %arg3: memref<1x32xf32, #tpu.memory_space<vmem>>, %arg4: memref<1024x32xbf16, #tpu.memory_space<vmem>>) attributes {dimension_semantics = [#tpu.dimension_semantics<parallel>], iteration_bounds = array<i64: 2>, scalar_prefetch = 0 : i64, scratch_operands = 0 : i64, tpu.core_type = #tpu.core_type<tc>, window_params = [{transform_indices = @transform_0, window_bounds = array<i64: 1024, 16>}, {pipeline_mode = #tpu.pipeline_mode<synchronous>, transform_indices = @transform_1, window_bounds = array<i64: 16, 32>}, {pipeline_mode = #tpu.pipeline_mode<synchronous>, transform_indices = @transform_2, window_bounds = array<i64: 1, 32>}, {transform_indices = @transform_3, window_bounds = array<i64: 1024, 32>}]} {
    %c0 = arith.constant 0 : index
    %c0_0 = arith.constant 0 : index
    %0 = vector.load %arg1[%c0, %c0_0] : memref<1024x16xbf16, #tpu.memory_space<vmem>>, vector<1024x16xbf16>
    %c0_1 = arith.constant 0 : index
    %c0_2 = arith.constant 0 : index
    %1 = vector.load %arg2[%c0_1, %c0_2] : memref<16x32xbf16, #tpu.memory_space<vmem>>, vector<16x32xbf16>
    %cst = arith.constant dense<0.000000e+00> : vector<1024x32xf32>
    %2 = tpu.matmul %0, %1, %cst {dimension_numbers = #tpu.dot_dimension_numbers<[1], [0], [0], [1], [0, 0, 1, 1], [], []>} : vector<1024x16xbf16>, vector<16x32xbf16>, vector<1024x32xf32> -> vector<1024x32xf32>
    %c0_3 = arith.constant 0 : index
    %c0_4 = arith.constant 0 : index
    %3 = vector.load %arg3[%c0_3, %c0_4] : memref<1x32xf32, #tpu.memory_space<vmem>>, vector<1x32xf32>
    %4 = vector.broadcast %3 : vector<1x32xf32> to vector<1024x32xf32>
    %5 = arith.addf %2, %4 : vector<1024x32xf32>
    %cst_5 = arith.constant 0.000000e+00 : f32
    %6 = vector.broadcast %cst_5 : f32 to vector<1024x32xf32>
    %7 = arith.maximumf %5, %6 : vector<1024x32xf32>
    %8 = arith.truncf %7 : vector<1024x32xf32> to vector<1024x32xbf16>
    %c0_6 = arith.constant 0 : index
    %c0_7 = arith.constant 0 : index
    %9 = vector.load %arg4[%c0_6, %c0_7] : memref<1024x32xbf16, #tpu.memory_space<vmem>>, vector<1024x32xbf16>
    tpu.vector_store %arg4[%c0_6, %c0_7], %8 {strides = array<i32>} : memref<1024x32xbf16, #tpu.memory_space<vmem>>, vector<1024x32xbf16>,
    return
  }
  func.func @transform_0(%arg0: i32) -> (i32, i32) {
    %c0_i32 = arith.constant 0 : i32
    %c0_i32_0 = arith.constant 0 : i32
    return %arg0, %c0_i32 : i32, i32
  }
  func.func @transform_1(%arg0: i32) -> (i32, i32) {
    %c0_i32 = arith.constant 0 : i32
    %c0_i32_0 = arith.constant 0 : i32
    %c0_i32_1 = arith.constant 0 : i32
    return %c0_i32, %c0_i32_0 : i32, i32
  }
  func.func @transform_2(%arg0: i32) -> (i32, i32) {
    %c0_i32 = arith.constant 0 : i32
    %c0_i32_0 = arith.constant 0 : i32
    %c0_i32_1 = arith.constant 0 : i32
    return %c0_i32, %c0_i32_0 : i32, i32
  }
  func.func @transform_3(%arg0: i32) -> (i32, i32) {
    %c0_i32 = arith.constant 0 : i32
    %c0_i32_0 = arith.constant 0 : i32
    return %arg0, %c0_i32 : i32, i32
  }
}

module attributes {stable_mosaic.version = 11 : i64} {
  func.func @_gemm_bias_act_kernel(%arg0: i32, %arg1: memref<512x512xbf16, #tpu.memory_space<vmem>>, %arg2: memref<512x32xbf16, #tpu.memory_space<vmem>>, %arg3: memref<1x32xf32, #tpu.memory_space<vmem>>, %arg4: memref<512x32xbf16, #tpu.memory_space<vmem>>) attributes {dimension_semantics = [#tpu.dimension_semantics<parallel>], iteration_bounds = array<i64: 1>, scalar_prefetch = 0 : i64, scratch_operands = 0 : i64, tpu.core_type = #tpu.core_type<tc>, window_params = [{transform_indices = @transform_0, window_bounds = array<i64: 512, 512>}, {pipeline_mode = #tpu.pipeline_mode<synchronous>, transform_indices = @transform_1, window_bounds = array<i64: 512, 32>}, {pipeline_mode = #tpu.pipeline_mode<synchronous>, transform_indices = @transform_2, window_bounds = array<i64: 1, 32>}, {transform_indices = @transform_3, window_bounds = array<i64: 512, 32>}]} {
    %c0 = arith.constant 0 : index
    %c0_0 = arith.constant 0 : index
    %0 = vector.load %arg1[%c0, %c0_0] : memref<512x512xbf16, #tpu.memory_space<vmem>>, vector<512x512xbf16>
    %c0_1 = arith.constant 0 : index
    %c0_2 = arith.constant 0 : index
    %1 = vector.load %arg2[%c0_1, %c0_2] : memref<512x32xbf16, #tpu.memory_space<vmem>>, vector<512x32xbf16>
    %cst = arith.constant dense<0.000000e+00> : vector<512x32xf32>
    %2 = tpu.matmul %0, %1, %cst {dimension_numbers = #tpu.dot_dimension_numbers<[1], [0], [0], [1], [0, 0, 1, 1], [], []>} : vector<512x512xbf16>, vector<512x32xbf16>, vector<512x32xf32> -> vector<512x32xf32>
    %c0_3 = arith.constant 0 : index
    %c0_4 = arith.constant 0 : index
    %3 = vector.load %arg3[%c0_3, %c0_4] : memref<1x32xf32, #tpu.memory_space<vmem>>, vector<1x32xf32>
    %4 = vector.broadcast %3 : vector<1x32xf32> to vector<512x32xf32>
    %5 = arith.addf %2, %4 : vector<512x32xf32>
    %cst_5 = arith.constant 0.000000e+00 : f32
    %6 = vector.broadcast %cst_5 : f32 to vector<512x32xf32>
    %7 = arith.maximumf %5, %6 : vector<512x32xf32>
    %8 = arith.truncf %7 : vector<512x32xf32> to vector<512x32xbf16>
    %c0_6 = arith.constant 0 : index
    %c0_7 = arith.constant 0 : index
    %9 = vector.load %arg4[%c0_6, %c0_7] : memref<512x32xbf16, #tpu.memory_space<vmem>>, vector<512x32xbf16>
    tpu.vector_store %arg4[%c0_6, %c0_7], %8 {strides = array<i32>} : memref<512x32xbf16, #tpu.memory_space<vmem>>, vector<512x32xbf16>,
    return
  }
  func.func @transform_0(%arg0: i32) -> (i32, i32) {
    %c0_i32 = arith.constant 0 : i32
    %c0_i32_0 = arith.constant 0 : i32
    return %arg0, %c0_i32 : i32, i32
  }
  func.func @transform_1(%arg0: i32) -> (i32, i32) {
    %c0_i32 = arith.constant 0 : i32
    %c0_i32_0 = arith.constant 0 : i32
    %c0_i32_1 = arith.constant 0 : i32
    return %c0_i32, %c0_i32_0 : i32, i32
  }
  func.func @transform_2(%arg0: i32) -> (i32, i32) {
    %c0_i32 = arith.constant 0 : i32
    %c0_i32_0 = arith.constant 0 : i32
    %c0_i32_1 = arith.constant 0 : i32
    return %c0_i32, %c0_i32_0 : i32, i32
  }
  func.func @transform_3(%arg0: i32) -> (i32, i32) {
    %c0_i32 = arith.constant 0 : i32
    %c0_i32_0 = arith.constant 0 : i32
    return %arg0, %c0_i32 : i32, i32
  }
}

module attributes {stable_mosaic.version = 11 : i64} {
  func.func @_gemm_bias_act_kernel(%arg0: i32, %arg1: memref<128x512xbf16, #tpu.memory_space<vmem>>, %arg2: memref<512x64xbf16, #tpu.memory_space<vmem>>, %arg3: memref<1x64xf32, #tpu.memory_space<vmem>>, %arg4: memref<128x64xbf16, #tpu.memory_space<vmem>>) attributes {dimension_semantics = [#tpu.dimension_semantics<parallel>], iteration_bounds = array<i64: 1>, scalar_prefetch = 0 : i64, scratch_operands = 0 : i64, tpu.core_type = #tpu.core_type<tc>, window_params = [{transform_indices = @transform_0, window_bounds = array<i64: 128, 512>}, {pipeline_mode = #tpu.pipeline_mode<synchronous>, transform_indices = @transform_1, window_bounds = array<i64: 512, 64>}, {pipeline_mode = #tpu.pipeline_mode<synchronous>, transform_indices = @transform_2, window_bounds = array<i64: 1, 64>}, {transform_indices = @transform_3, window_bounds = array<i64: 128, 64>}]} {
    %c0 = arith.constant 0 : index
    %c0_0 = arith.constant 0 : index
    %0 = vector.load %arg1[%c0, %c0_0] : memref<128x512xbf16, #tpu.memory_space<vmem>>, vector<128x512xbf16>
    %c0_1 = arith.constant 0 : index
    %c0_2 = arith.constant 0 : index
    %1 = vector.load %arg2[%c0_1, %c0_2] : memref<512x64xbf16, #tpu.memory_space<vmem>>, vector<512x64xbf16>
    %cst = arith.constant dense<0.000000e+00> : vector<128x64xf32>
    %2 = tpu.matmul %0, %1, %cst {dimension_numbers = #tpu.dot_dimension_numbers<[1], [0], [0], [1], [0, 0, 1, 1], [], []>} : vector<128x512xbf16>, vector<512x64xbf16>, vector<128x64xf32> -> vector<128x64xf32>
    %c0_3 = arith.constant 0 : index
    %c0_4 = arith.constant 0 : index
    %3 = vector.load %arg3[%c0_3, %c0_4] : memref<1x64xf32, #tpu.memory_space<vmem>>, vector<1x64xf32>
    %4 = vector.broadcast %3 : vector<1x64xf32> to vector<128x64xf32>
    %5 = arith.addf %2, %4 : vector<128x64xf32>
    %cst_5 = arith.constant 0.000000e+00 : f32
    %6 = vector.broadcast %cst_5 : f32 to vector<128x64xf32>
    %7 = arith.maximumf %5, %6 : vector<128x64xf32>
    %8 = arith.truncf %7 : vector<128x64xf32> to vector<128x64xbf16>
    %c0_6 = arith.constant 0 : index
    %c0_7 = arith.constant 0 : index
    %9 = vector.load %arg4[%c0_6, %c0_7] : memref<128x64xbf16, #tpu.memory_space<vmem>>, vector<128x64xbf16>
    tpu.vector_store %arg4[%c0_6, %c0_7], %8 {strides = array<i32>} : memref<128x64xbf16, #tpu.memory_space<vmem>>, vector<128x64xbf16>,
    return
  }
  func.func @transform_0(%arg0: i32) -> (i32, i32) {
    %c0_i32 = arith.constant 0 : i32
    %c0_i32_0 = arith.constant 0 : i32
    return %arg0, %c0_i32 : i32, i32
  }
  func.func @transform_1(%arg0: i32) -> (i32, i32) {
    %c0_i32 = arith.constant 0 : i32
    %c0_i32_0 = arith.constant 0 : i32
    %c0_i32_1 = arith.constant 0 : i32
    return %c0_i32, %c0_i32_0 : i32, i32
  }
  func.func @transform_2(%arg0: i32) -> (i32, i32) {
    %c0_i32 = arith.constant 0 : i32
    %c0_i32_0 = arith.constant 0 : i32
    %c0_i32_1 = arith.constant 0 : i32
    return %c0_i32, %c0_i32_0 : i32, i32
  }
  func.func @transform_3(%arg0: i32) -> (i32, i32) {
    %c0_i32 = arith.constant 0 : i32
    %c0_i32_0 = arith.constant 0 : i32
    return %arg0, %c0_i32 : i32, i32
  }
}

module attributes {stable_mosaic.version = 11 : i64} {
  func.func @_gemm_bias_act_kernel(%arg0: i32, %arg1: memref<32x1024xbf16, #tpu.memory_space<vmem>>, %arg2: memref<1024x64xbf16, #tpu.memory_space<vmem>>, %arg3: memref<1x64xf32, #tpu.memory_space<vmem>>, %arg4: memref<32x64xbf16, #tpu.memory_space<vmem>>) attributes {dimension_semantics = [#tpu.dimension_semantics<parallel>], iteration_bounds = array<i64: 1>, scalar_prefetch = 0 : i64, scratch_operands = 0 : i64, tpu.core_type = #tpu.core_type<tc>, window_params = [{transform_indices = @transform_0, window_bounds = array<i64: 32, 1024>}, {pipeline_mode = #tpu.pipeline_mode<synchronous>, transform_indices = @transform_1, window_bounds = array<i64: 1024, 64>}, {pipeline_mode = #tpu.pipeline_mode<synchronous>, transform_indices = @transform_2, window_bounds = array<i64: 1, 64>}, {transform_indices = @transform_3, window_bounds = array<i64: 32, 64>}]} {
    %c0 = arith.constant 0 : index
    %c0_0 = arith.constant 0 : index
    %0 = vector.load %arg1[%c0, %c0_0] : memref<32x1024xbf16, #tpu.memory_space<vmem>>, vector<32x1024xbf16>
    %c0_1 = arith.constant 0 : index
    %c0_2 = arith.constant 0 : index
    %1 = vector.load %arg2[%c0_1, %c0_2] : memref<1024x64xbf16, #tpu.memory_space<vmem>>, vector<1024x64xbf16>
    %cst = arith.constant dense<0.000000e+00> : vector<32x64xf32>
    %2 = tpu.matmul %0, %1, %cst {dimension_numbers = #tpu.dot_dimension_numbers<[1], [0], [0], [1], [0, 0, 1, 1], [], []>} : vector<32x1024xbf16>, vector<1024x64xbf16>, vector<32x64xf32> -> vector<32x64xf32>
    %c0_3 = arith.constant 0 : index
    %c0_4 = arith.constant 0 : index
    %3 = vector.load %arg3[%c0_3, %c0_4] : memref<1x64xf32, #tpu.memory_space<vmem>>, vector<1x64xf32>
    %4 = vector.broadcast %3 : vector<1x64xf32> to vector<32x64xf32>
    %5 = arith.addf %2, %4 : vector<32x64xf32>
    %cst_5 = arith.constant 0.000000e+00 : f32
    %6 = vector.broadcast %cst_5 : f32 to vector<32x64xf32>
    %7 = arith.maximumf %5, %6 : vector<32x64xf32>
    %8 = arith.truncf %7 : vector<32x64xf32> to vector<32x64xbf16>
    %c0_6 = arith.constant 0 : index
    %c0_7 = arith.constant 0 : index
    %9 = vector.load %arg4[%c0_6, %c0_7] : memref<32x64xbf16, #tpu.memory_space<vmem>>, vector<32x64xbf16>
    tpu.vector_store %arg4[%c0_6, %c0_7], %8 {strides = array<i32>} : memref<32x64xbf16, #tpu.memory_space<vmem>>, vector<32x64xbf16>,
    return
  }
  func.func @transform_0(%arg0: i32) -> (i32, i32) {
    %c0_i32 = arith.constant 0 : i32
    %c0_i32_0 = arith.constant 0 : i32
    return %arg0, %c0_i32 : i32, i32
  }
  func.func @transform_1(%arg0: i32) -> (i32, i32) {
    %c0_i32 = arith.constant 0 : i32
    %c0_i32_0 = arith.constant 0 : i32
    %c0_i32_1 = arith.constant 0 : i32
    return %c0_i32, %c0_i32_0 : i32, i32
  }
  func.func @transform_2(%arg0: i32) -> (i32, i32) {
    %c0_i32 = arith.constant 0 : i32
    %c0_i32_0 = arith.constant 0 : i32
    %c0_i32_1 = arith.constant 0 : i32
    return %c0_i32, %c0_i32_0 : i32, i32
  }
  func.func @transform_3(%arg0: i32) -> (i32, i32) {
    %c0_i32 = arith.constant 0 : i32
    %c0_i32_0 = arith.constant 0 : i32
    return %arg0, %c0_i32 : i32, i32
  }
}

module attributes {stable_mosaic.version = 11 : i64} {
  func.func @_mid_kernel(%arg0: memref<2x1024xbf16, #tpu.memory_space<vmem>>, %arg1: memref<2x128xf32, #tpu.memory_space<vmem>>, %arg2: memref<1024x256xbf16, #tpu.memory_space<vmem>>, %arg3: memref<1x256xf32, #tpu.memory_space<vmem>>, %arg4: memref<256x128xf32, #tpu.memory_space<vmem>>, %arg5: memref<1x128xf32, #tpu.memory_space<vmem>>, %arg6: memref<256x128xf32, #tpu.memory_space<vmem>>, %arg7: memref<1x128xf32, #tpu.memory_space<vmem>>, %arg8: memref<128x256xf32, #tpu.memory_space<vmem>>, %arg9: memref<1x256xf32, #tpu.memory_space<vmem>>, %arg10: memref<256x1024xbf16, #tpu.memory_space<vmem>>, %arg11: memref<1x1024xf32, #tpu.memory_space<vmem>>, %arg12: memref<2x128xf32, #tpu.memory_space<vmem>>, %arg13: memref<2x128xf32, #tpu.memory_space<vmem>>, %arg14: memref<2x1024xbf16, #tpu.memory_space<vmem>>) attributes {dimension_semantics = [], scalar_prefetch = 0 : i64, scratch_operands = 0 : i64, tpu.core_type = #tpu.core_type<tc>} {
    %c0 = arith.constant 0 : index
    %c0_0 = arith.constant 0 : index
    %0 = vector.load %arg0[%c0, %c0_0] : memref<2x1024xbf16, #tpu.memory_space<vmem>>, vector<2x1024xbf16>
    %c0_1 = arith.constant 0 : index
    %c0_2 = arith.constant 0 : index
    %1 = vector.load %arg2[%c0_1, %c0_2] : memref<1024x256xbf16, #tpu.memory_space<vmem>>, vector<1024x256xbf16>
    %cst = arith.constant dense<0.000000e+00> : vector<2x256xf32>
    %2 = tpu.matmul %0, %1, %cst {dimension_numbers = #tpu.dot_dimension_numbers<[1], [0], [0], [1], [0, 0, 1, 1], [], []>} : vector<2x1024xbf16>, vector<1024x256xbf16>, vector<2x256xf32> -> vector<2x256xf32>
    %c0_3 = arith.constant 0 : index
    %c0_4 = arith.constant 0 : index
    %3 = vector.load %arg3[%c0_3, %c0_4] : memref<1x256xf32, #tpu.memory_space<vmem>>, vector<1x256xf32>
    %4 = vector.broadcast %3 : vector<1x256xf32> to vector<2x256xf32>
    %5 = arith.addf %2, %4 : vector<2x256xf32>
    %cst_5 = arith.constant 0.000000e+00 : f32
    %6 = vector.broadcast %cst_5 : f32 to vector<2x256xf32>
    %7 = arith.maximumf %5, %6 : vector<2x256xf32>
    %c0_6 = arith.constant 0 : index
    %c0_7 = arith.constant 0 : index
    %8 = vector.load %arg4[%c0_6, %c0_7] : memref<256x128xf32, #tpu.memory_space<vmem>>, vector<256x128xf32>
    %cst_8 = arith.constant dense<0.000000e+00> : vector<2x128xf32>
    %9 = tpu.matmul %7, %8, %cst_8 {dimension_numbers = #tpu.dot_dimension_numbers<[1], [0], [0], [1], [0, 0, 1, 1], [], []>} : vector<2x256xf32>, vector<256x128xf32>, vector<2x128xf32> -> vector<2x128xf32>
    %c0_9 = arith.constant 0 : index
    %c0_10 = arith.constant 0 : index
    %10 = vector.load %arg5[%c0_9, %c0_10] : memref<1x128xf32, #tpu.memory_space<vmem>>, vector<1x128xf32>
    %11 = vector.broadcast %10 : vector<1x128xf32> to vector<2x128xf32>
    %12 = arith.addf %9, %11 : vector<2x128xf32>
    %c0_11 = arith.constant 0 : index
    %c0_12 = arith.constant 0 : index
    %13 = vector.load %arg6[%c0_11, %c0_12] : memref<256x128xf32, #tpu.memory_space<vmem>>, vector<256x128xf32>
    %cst_13 = arith.constant dense<0.000000e+00> : vector<2x128xf32>
    %14 = tpu.matmul %7, %13, %cst_13 {dimension_numbers = #tpu.dot_dimension_numbers<[1], [0], [0], [1], [0, 0, 1, 1], [], []>} : vector<2x256xf32>, vector<256x128xf32>, vector<2x128xf32> -> vector<2x128xf32>
    %c0_14 = arith.constant 0 : index
    %c0_15 = arith.constant 0 : index
    %15 = vector.load %arg7[%c0_14, %c0_15] : memref<1x128xf32, #tpu.memory_space<vmem>>, vector<1x128xf32>
    %16 = vector.broadcast %15 : vector<1x128xf32> to vector<2x128xf32>
    %17 = arith.addf %14, %16 : vector<2x128xf32>
    %cst_16 = arith.constant 5.000000e-01 : f32
    %18 = vector.broadcast %cst_16 : f32 to vector<2x128xf32>
    %19 = arith.mulf %17, %18 : vector<2x128xf32>
    %20 = math.exp %19 : vector<2x128xf32>
    %c0_17 = arith.constant 0 : index
    %c0_18 = arith.constant 0 : index
    %21 = vector.load %arg1[%c0_17, %c0_18] : memref<2x128xf32, #tpu.memory_space<vmem>>, vector<2x128xf32>
    %22 = arith.mulf %20, %21 : vector<2x128xf32>
    %23 = arith.addf %12, %22 : vector<2x128xf32>
    %c0_19 = arith.constant 0 : index
    %c0_20 = arith.constant 0 : index
    %24 = vector.load %arg8[%c0_19, %c0_20] : memref<128x256xf32, #tpu.memory_space<vmem>>, vector<128x256xf32>
    %cst_21 = arith.constant dense<0.000000e+00> : vector<2x256xf32>
    %25 = tpu.matmul %23, %24, %cst_21 {dimension_numbers = #tpu.dot_dimension_numbers<[1], [0], [0], [1], [0, 0, 1, 1], [], []>} : vector<2x128xf32>, vector<128x256xf32>, vector<2x256xf32> -> vector<2x256xf32>
    %c0_22 = arith.constant 0 : index
    %c0_23 = arith.constant 0 : index
    %26 = vector.load %arg9[%c0_22, %c0_23] : memref<1x256xf32, #tpu.memory_space<vmem>>, vector<1x256xf32>
    %27 = vector.broadcast %26 : vector<1x256xf32> to vector<2x256xf32>
    %28 = arith.addf %25, %27 : vector<2x256xf32>
    %cst_24 = arith.constant 0.000000e+00 : f32
    %29 = vector.broadcast %cst_24 : f32 to vector<2x256xf32>
    %30 = arith.maximumf %28, %29 : vector<2x256xf32>
    %31 = arith.truncf %30 : vector<2x256xf32> to vector<2x256xbf16>
    %c0_25 = arith.constant 0 : index
    %c0_26 = arith.constant 0 : index
    %32 = vector.load %arg10[%c0_25, %c0_26] : memref<256x1024xbf16, #tpu.memory_space<vmem>>, vector<256x1024xbf16>
    %cst_27 = arith.constant dense<0.000000e+00> : vector<2x1024xf32>
    %33 = tpu.matmul %31, %32, %cst_27 {dimension_numbers = #tpu.dot_dimension_numbers<[1], [0], [0], [1], [0, 0, 1, 1], [], []>} : vector<2x256xbf16>, vector<256x1024xbf16>, vector<2x1024xf32> -> vector<2x1024xf32>
    %c0_28 = arith.constant 0 : index
    %c0_29 = arith.constant 0 : index
    %34 = vector.load %arg11[%c0_28, %c0_29] : memref<1x1024xf32, #tpu.memory_space<vmem>>, vector<1x1024xf32>
    %35 = vector.broadcast %34 : vector<1x1024xf32> to vector<2x1024xf32>
    %36 = arith.addf %33, %35 : vector<2x1024xf32>
    %c0_30 = arith.constant 0 : index
    %c0_31 = arith.constant 0 : index
    %37 = vector.load %arg12[%c0_30, %c0_31] : memref<2x128xf32, #tpu.memory_space<vmem>>, vector<2x128xf32>
    tpu.vector_store %arg12[%c0_30, %c0_31], %12 {strides = array<i32>} : memref<2x128xf32, #tpu.memory_space<vmem>>, vector<2x128xf32>,
    %c0_32 = arith.constant 0 : index
    %c0_33 = arith.constant 0 : index
    %38 = vector.load %arg13[%c0_32, %c0_33] : memref<2x128xf32, #tpu.memory_space<vmem>>, vector<2x128xf32>
    tpu.vector_store %arg13[%c0_32, %c0_33], %17 {strides = array<i32>} : memref<2x128xf32, #tpu.memory_space<vmem>>, vector<2x128xf32>,
    %cst_34 = arith.constant 0.000000e+00 : f32
    %39 = vector.broadcast %cst_34 : f32 to vector<2x1024xf32>
    %40 = arith.maximumf %36, %39 : vector<2x1024xf32>
    %41 = arith.truncf %40 : vector<2x1024xf32> to vector<2x1024xbf16>
    %c0_35 = arith.constant 0 : index
    %c0_36 = arith.constant 0 : index
    %42 = vector.load %arg14[%c0_35, %c0_36] : memref<2x1024xbf16, #tpu.memory_space<vmem>>, vector<2x1024xbf16>
    tpu.vector_store %arg14[%c0_35, %c0_36], %41 {strides = array<i32>} : memref<2x1024xbf16, #tpu.memory_space<vmem>>, vector<2x1024xbf16>,
    return
  }
}

module attributes {stable_mosaic.version = 11 : i64} {
  func.func @_gemm_bias_act_kernel(%arg0: i32, %arg1: memref<32x576xbf16, #tpu.memory_space<vmem>>, %arg2: memref<576x256xbf16, #tpu.memory_space<vmem>>, %arg3: memref<1x256xf32, #tpu.memory_space<vmem>>, %arg4: memref<32x256xbf16, #tpu.memory_space<vmem>>) attributes {dimension_semantics = [#tpu.dimension_semantics<parallel>], iteration_bounds = array<i64: 1>, scalar_prefetch = 0 : i64, scratch_operands = 0 : i64, tpu.core_type = #tpu.core_type<tc>, window_params = [{transform_indices = @transform_0, window_bounds = array<i64: 32, 576>}, {pipeline_mode = #tpu.pipeline_mode<synchronous>, transform_indices = @transform_1, window_bounds = array<i64: 576, 256>}, {pipeline_mode = #tpu.pipeline_mode<synchronous>, transform_indices = @transform_2, window_bounds = array<i64: 1, 256>}, {transform_indices = @transform_3, window_bounds = array<i64: 32, 256>}]} {
    %c0 = arith.constant 0 : index
    %c0_0 = arith.constant 0 : index
    %0 = vector.load %arg1[%c0, %c0_0] : memref<32x576xbf16, #tpu.memory_space<vmem>>, vector<32x576xbf16>
    %c0_1 = arith.constant 0 : index
    %c0_2 = arith.constant 0 : index
    %1 = vector.load %arg2[%c0_1, %c0_2] : memref<576x256xbf16, #tpu.memory_space<vmem>>, vector<576x256xbf16>
    %cst = arith.constant dense<0.000000e+00> : vector<32x256xf32>
    %2 = tpu.matmul %0, %1, %cst {dimension_numbers = #tpu.dot_dimension_numbers<[1], [0], [0], [1], [0, 0, 1, 1], [], []>} : vector<32x576xbf16>, vector<576x256xbf16>, vector<32x256xf32> -> vector<32x256xf32>
    %c0_3 = arith.constant 0 : index
    %c0_4 = arith.constant 0 : index
    %3 = vector.load %arg3[%c0_3, %c0_4] : memref<1x256xf32, #tpu.memory_space<vmem>>, vector<1x256xf32>
    %4 = vector.broadcast %3 : vector<1x256xf32> to vector<32x256xf32>
    %5 = arith.addf %2, %4 : vector<32x256xf32>
    %cst_5 = arith.constant 0.000000e+00 : f32
    %6 = vector.broadcast %cst_5 : f32 to vector<32x256xf32>
    %7 = arith.maximumf %5, %6 : vector<32x256xf32>
    %8 = arith.truncf %7 : vector<32x256xf32> to vector<32x256xbf16>
    %c0_6 = arith.constant 0 : index
    %c0_7 = arith.constant 0 : index
    %9 = vector.load %arg4[%c0_6, %c0_7] : memref<32x256xbf16, #tpu.memory_space<vmem>>, vector<32x256xbf16>
    tpu.vector_store %arg4[%c0_6, %c0_7], %8 {strides = array<i32>} : memref<32x256xbf16, #tpu.memory_space<vmem>>, vector<32x256xbf16>,
    return
  }
  func.func @transform_0(%arg0: i32) -> (i32, i32) {
    %c0_i32 = arith.constant 0 : i32
    %c0_i32_0 = arith.constant 0 : i32
    return %arg0, %c0_i32 : i32, i32
  }
  func.func @transform_1(%arg0: i32) -> (i32, i32) {
    %c0_i32 = arith.constant 0 : i32
    %c0_i32_0 = arith.constant 0 : i32
    %c0_i32_1 = arith.constant 0 : i32
    return %c0_i32, %c0_i32_0 : i32, i32
  }
  func.func @transform_2(%arg0: i32) -> (i32, i32) {
    %c0_i32 = arith.constant 0 : i32
    %c0_i32_0 = arith.constant 0 : i32
    %c0_i32_1 = arith.constant 0 : i32
    return %c0_i32, %c0_i32_0 : i32, i32
  }
  func.func @transform_3(%arg0: i32) -> (i32, i32) {
    %c0_i32 = arith.constant 0 : i32
    %c0_i32_0 = arith.constant 0 : i32
    return %arg0, %c0_i32 : i32, i32
  }
}

module attributes {stable_mosaic.version = 11 : i64} {
  func.func @_gemm_bias_act_kernel(%arg0: i32, %arg1: memref<128x576xbf16, #tpu.memory_space<vmem>>, %arg2: memref<576x128xbf16, #tpu.memory_space<vmem>>, %arg3: memref<1x128xf32, #tpu.memory_space<vmem>>, %arg4: memref<128x128xbf16, #tpu.memory_space<vmem>>) attributes {dimension_semantics = [#tpu.dimension_semantics<parallel>], iteration_bounds = array<i64: 1>, scalar_prefetch = 0 : i64, scratch_operands = 0 : i64, tpu.core_type = #tpu.core_type<tc>, window_params = [{transform_indices = @transform_0, window_bounds = array<i64: 128, 576>}, {pipeline_mode = #tpu.pipeline_mode<synchronous>, transform_indices = @transform_1, window_bounds = array<i64: 576, 128>}, {pipeline_mode = #tpu.pipeline_mode<synchronous>, transform_indices = @transform_2, window_bounds = array<i64: 1, 128>}, {transform_indices = @transform_3, window_bounds = array<i64: 128, 128>}]} {
    %c0 = arith.constant 0 : index
    %c0_0 = arith.constant 0 : index
    %0 = vector.load %arg1[%c0, %c0_0] : memref<128x576xbf16, #tpu.memory_space<vmem>>, vector<128x576xbf16>
    %c0_1 = arith.constant 0 : index
    %c0_2 = arith.constant 0 : index
    %1 = vector.load %arg2[%c0_1, %c0_2] : memref<576x128xbf16, #tpu.memory_space<vmem>>, vector<576x128xbf16>
    %cst = arith.constant dense<0.000000e+00> : vector<128x128xf32>
    %2 = tpu.matmul %0, %1, %cst {dimension_numbers = #tpu.dot_dimension_numbers<[1], [0], [0], [1], [0, 0, 1, 1], [], []>} : vector<128x576xbf16>, vector<576x128xbf16>, vector<128x128xf32> -> vector<128x128xf32>
    %c0_3 = arith.constant 0 : index
    %c0_4 = arith.constant 0 : index
    %3 = vector.load %arg3[%c0_3, %c0_4] : memref<1x128xf32, #tpu.memory_space<vmem>>, vector<1x128xf32>
    %4 = vector.broadcast %3 : vector<1x128xf32> to vector<128x128xf32>
    %5 = arith.addf %2, %4 : vector<128x128xf32>
    %cst_5 = arith.constant 0.000000e+00 : f32
    %6 = vector.broadcast %cst_5 : f32 to vector<128x128xf32>
    %7 = arith.maximumf %5, %6 : vector<128x128xf32>
    %8 = arith.truncf %7 : vector<128x128xf32> to vector<128x128xbf16>
    %c0_6 = arith.constant 0 : index
    %c0_7 = arith.constant 0 : index
    %9 = vector.load %arg4[%c0_6, %c0_7] : memref<128x128xbf16, #tpu.memory_space<vmem>>, vector<128x128xbf16>
    tpu.vector_store %arg4[%c0_6, %c0_7], %8 {strides = array<i32>} : memref<128x128xbf16, #tpu.memory_space<vmem>>, vector<128x128xbf16>,
    return
  }
  func.func @transform_0(%arg0: i32) -> (i32, i32) {
    %c0_i32 = arith.constant 0 : i32
    %c0_i32_0 = arith.constant 0 : i32
    return %arg0, %c0_i32 : i32, i32
  }
  func.func @transform_1(%arg0: i32) -> (i32, i32) {
    %c0_i32 = arith.constant 0 : i32
    %c0_i32_0 = arith.constant 0 : i32
    %c0_i32_1 = arith.constant 0 : i32
    return %c0_i32, %c0_i32_0 : i32, i32
  }
  func.func @transform_2(%arg0: i32) -> (i32, i32) {
    %c0_i32 = arith.constant 0 : i32
    %c0_i32_0 = arith.constant 0 : i32
    %c0_i32_1 = arith.constant 0 : i32
    return %c0_i32, %c0_i32_0 : i32, i32
  }
  func.func @transform_3(%arg0: i32) -> (i32, i32) {
    %c0_i32 = arith.constant 0 : i32
    %c0_i32_0 = arith.constant 0 : i32
    return %arg0, %c0_i32 : i32, i32
  }
}

module attributes {stable_mosaic.version = 11 : i64} {
  func.func @_gemm_bias_act_kernel(%arg0: i32, %arg1: memref<512x288xbf16, #tpu.memory_space<vmem>>, %arg2: memref<288x128xbf16, #tpu.memory_space<vmem>>, %arg3: memref<1x128xf32, #tpu.memory_space<vmem>>, %arg4: memref<512x128xbf16, #tpu.memory_space<vmem>>) attributes {dimension_semantics = [#tpu.dimension_semantics<parallel>], iteration_bounds = array<i64: 1>, scalar_prefetch = 0 : i64, scratch_operands = 0 : i64, tpu.core_type = #tpu.core_type<tc>, window_params = [{transform_indices = @transform_0, window_bounds = array<i64: 512, 288>}, {pipeline_mode = #tpu.pipeline_mode<synchronous>, transform_indices = @transform_1, window_bounds = array<i64: 288, 128>}, {pipeline_mode = #tpu.pipeline_mode<synchronous>, transform_indices = @transform_2, window_bounds = array<i64: 1, 128>}, {transform_indices = @transform_3, window_bounds = array<i64: 512, 128>}]} {
    %c0 = arith.constant 0 : index
    %c0_0 = arith.constant 0 : index
    %0 = vector.load %arg1[%c0, %c0_0] : memref<512x288xbf16, #tpu.memory_space<vmem>>, vector<512x288xbf16>
    %c0_1 = arith.constant 0 : index
    %c0_2 = arith.constant 0 : index
    %1 = vector.load %arg2[%c0_1, %c0_2] : memref<288x128xbf16, #tpu.memory_space<vmem>>, vector<288x128xbf16>
    %cst = arith.constant dense<0.000000e+00> : vector<512x128xf32>
    %2 = tpu.matmul %0, %1, %cst {dimension_numbers = #tpu.dot_dimension_numbers<[1], [0], [0], [1], [0, 0, 1, 1], [], []>} : vector<512x288xbf16>, vector<288x128xbf16>, vector<512x128xf32> -> vector<512x128xf32>
    %c0_3 = arith.constant 0 : index
    %c0_4 = arith.constant 0 : index
    %3 = vector.load %arg3[%c0_3, %c0_4] : memref<1x128xf32, #tpu.memory_space<vmem>>, vector<1x128xf32>
    %4 = vector.broadcast %3 : vector<1x128xf32> to vector<512x128xf32>
    %5 = arith.addf %2, %4 : vector<512x128xf32>
    %cst_5 = arith.constant 0.000000e+00 : f32
    %6 = vector.broadcast %cst_5 : f32 to vector<512x128xf32>
    %7 = arith.maximumf %5, %6 : vector<512x128xf32>
    %8 = arith.truncf %7 : vector<512x128xf32> to vector<512x128xbf16>
    %c0_6 = arith.constant 0 : index
    %c0_7 = arith.constant 0 : index
    %9 = vector.load %arg4[%c0_6, %c0_7] : memref<512x128xbf16, #tpu.memory_space<vmem>>, vector<512x128xbf16>
    tpu.vector_store %arg4[%c0_6, %c0_7], %8 {strides = array<i32>} : memref<512x128xbf16, #tpu.memory_space<vmem>>, vector<512x128xbf16>,
    return
  }
  func.func @transform_0(%arg0: i32) -> (i32, i32) {
    %c0_i32 = arith.constant 0 : i32
    %c0_i32_0 = arith.constant 0 : i32
    return %arg0, %c0_i32 : i32, i32
  }
  func.func @transform_1(%arg0: i32) -> (i32, i32) {
    %c0_i32 = arith.constant 0 : i32
    %c0_i32_0 = arith.constant 0 : i32
    %c0_i32_1 = arith.constant 0 : i32
    return %c0_i32, %c0_i32_0 : i32, i32
  }
  func.func @transform_2(%arg0: i32) -> (i32, i32) {
    %c0_i32 = arith.constant 0 : i32
    %c0_i32_0 = arith.constant 0 : i32
    %c0_i32_1 = arith.constant 0 : i32
    return %c0_i32, %c0_i32_0 : i32, i32
  }
  func.func @transform_3(%arg0: i32) -> (i32, i32) {
    %c0_i32 = arith.constant 0 : i32
    %c0_i32_0 = arith.constant 0 : i32
    return %arg0, %c0_i32 : i32, i32
  }
}

module attributes {stable_mosaic.version = 11 : i64} {
  func.func @_gemm_bias_act_kernel(%arg0: i32, %arg1: memref<1024x288xbf16, #tpu.memory_space<vmem>>, %arg2: memref<288x4xbf16, #tpu.memory_space<vmem>>, %arg3: memref<1x4xf32, #tpu.memory_space<vmem>>, %arg4: memref<1024x4xf32, #tpu.memory_space<vmem>>) attributes {dimension_semantics = [#tpu.dimension_semantics<parallel>], iteration_bounds = array<i64: 2>, scalar_prefetch = 0 : i64, scratch_operands = 0 : i64, tpu.core_type = #tpu.core_type<tc>, window_params = [{transform_indices = @transform_0, window_bounds = array<i64: 1024, 288>}, {pipeline_mode = #tpu.pipeline_mode<synchronous>, transform_indices = @transform_1, window_bounds = array<i64: 288, 4>}, {pipeline_mode = #tpu.pipeline_mode<synchronous>, transform_indices = @transform_2, window_bounds = array<i64: 1, 4>}, {transform_indices = @transform_3, window_bounds = array<i64: 1024, 4>}]} {
    %c0 = arith.constant 0 : index
    %c0_0 = arith.constant 0 : index
    %0 = vector.load %arg1[%c0, %c0_0] : memref<1024x288xbf16, #tpu.memory_space<vmem>>, vector<1024x288xbf16>
    %c0_1 = arith.constant 0 : index
    %c0_2 = arith.constant 0 : index
    %1 = vector.load %arg2[%c0_1, %c0_2] : memref<288x4xbf16, #tpu.memory_space<vmem>>, vector<288x4xbf16>
    %cst = arith.constant dense<0.000000e+00> : vector<1024x4xf32>
    %2 = tpu.matmul %0, %1, %cst {dimension_numbers = #tpu.dot_dimension_numbers<[1], [0], [0], [1], [0, 0, 1, 1], [], []>} : vector<1024x288xbf16>, vector<288x4xbf16>, vector<1024x4xf32> -> vector<1024x4xf32>
    %c0_3 = arith.constant 0 : index
    %c0_4 = arith.constant 0 : index
    %3 = vector.load %arg3[%c0_3, %c0_4] : memref<1x4xf32, #tpu.memory_space<vmem>>, vector<1x4xf32>
    %4 = vector.broadcast %3 : vector<1x4xf32> to vector<1024x4xf32>
    %5 = arith.addf %2, %4 : vector<1024x4xf32>
    %c0_5 = arith.constant 0 : index
    %c0_6 = arith.constant 0 : index
    %6 = vector.load %arg4[%c0_5, %c0_6] : memref<1024x4xf32, #tpu.memory_space<vmem>>, vector<1024x4xf32>
    tpu.vector_store %arg4[%c0_5, %c0_6], %5 {strides = array<i32>} : memref<1024x4xf32, #tpu.memory_space<vmem>>, vector<1024x4xf32>,
    return
  }
  func.func @transform_0(%arg0: i32) -> (i32, i32) {
    %c0_i32 = arith.constant 0 : i32
    %c0_i32_0 = arith.constant 0 : i32
    return %arg0, %c0_i32 : i32, i32
  }
  func.func @transform_1(%arg0: i32) -> (i32, i32) {
    %c0_i32 = arith.constant 0 : i32
    %c0_i32_0 = arith.constant 0 : i32
    %c0_i32_1 = arith.constant 0 : i32
    return %c0_i32, %c0_i32_0 : i32, i32
  }
  func.func @transform_2(%arg0: i32) -> (i32, i32) {
    %c0_i32 = arith.constant 0 : i32
    %c0_i32_0 = arith.constant 0 : i32
    %c0_i32_1 = arith.constant 0 : i32
    return %c0_i32, %c0_i32_0 : i32, i32
  }
  func.func @transform_3(%arg0: i32) -> (i32, i32) {
    %c0_i32 = arith.constant 0 : i32
    %c0_i32_0 = arith.constant 0 : i32
    return %arg0, %c0_i32 : i32, i32
  }
}

</mosaic_0001>

<bundles_post_ra>
// kernel: vae_forward.9
= control target key start
LH: loop header
LB: loop body
LE: loop exit
PB: predicated region body
PF: predicated region fallthrough
CT: control target
= control target key end

     0   :  { %8 = vsyncpa [#allocation3], 0  ;;  %s3666_s0 = inlined_call_operand.vmem [shape: bf16[2048,16], index: 0, kind: input, shape index: {}]   ;;  %s3667_s1 = inlined_call_operand.hbm [shape: bf16[16,32], index: 1, kind: input, shape index: {}]   ;;  %s3668_s2 = inlined_call_operand.hbm [shape: f32[1,32], index: 2, kind: input, shape index: {}]   ;;  %s3669_s3 = inlined_call_operand.vmem [shape: bf16[2048,32], index: 3, kind: output, shape index: {}]  }
   0x1   :  { %9 = vsyncpa [#allocation5], 0  ;;  %s3042_s12 = smov 0  }
   0x2 LB: > { %s2251_s13 = sadd.s32 4294967295, %s3016_s12   ;;  %p2253_p0 = scmp.ge.s32.totalorder %s3016_s12, 1  ;;  %s3016_s12 = sphi %s3042_s12, %s15_s12  }
   0x3   : > { %p114_p1 = scmp.lt.s32.totalorder %s3016_s12, 3  ;;  %s3018_s14 = smov [#allocation2]  }
   0x4   : > { %s126_s15 = sshll.u32 %s3018_s14, 4  ;;  %p3056_p3 = scmp.eq.s32.totalorder %s2251_s13, 0  ;;  %s127_s15 = int_to_ptr.vmem [resolvable:$true] %s126_s15 }
   0x5   : > { %p3050_p2 = pnand %p2253_p0, %p114_p1  ;;  %s3019_s18 = smov [#allocation4]  }
   0x6   : > { %s3674_s17 = scalar_select %p3056_p3, 1, 0 }
   0x7   : > { %s3673_s16 = scalar_select %p3050_p2, 1, 0 }
   0x8   : > { %p2857_p4 = pneg %p3050_p2  ;;  %s140_s19 = sshll.u32 %s3019_s18, 4  ;;  %s3068_s19 = int_to_ptr.vmem [resolvable:$true] %s140_s19 }
   0x9   : > { %s2946_s23 = scalar_lea.hbm %s3667_s1, 128 }
   0xa   : > { %p3064_p5 = pnand %p3056_p3, %p2857_p4  ;;  %p2947_p6 = scmp.ne.s32.totalorder %s3667_s1, %s2946_s23 }
   0xb   : > { %p2953_p10 = scmp.lt.u32.totalorder %s2946_s23, %s3667_s1 }
   0xc   : > { %p2948_p7 = pneg %p3064_p5 }
   0xe   : > { %p2949_p8 = pnand %p2948_p7, %p2947_p6 }
  0x10   : > { %p2950_p9 = pneg %p2949_p8 }
  0x12   : > { %p2955_p11 = pnand %p2953_p10, %p2950_p9 }
  0x14   : > { %2958 = shalt.err (!%p2955_p11)
}
  0x15   : > { %s2959_s28 = scalar_lea.vmem %s127_s15, 128  ;;  %p2967_p1 = scmp.lt.s32.totalorder %s127_s15, %s127_s15 }
  0x16   : > { %p2960_p12 = scmp.ne.s32.totalorder %s127_s15, %s2959_s28  ;;  %p2968_p4 = scmp.lt.s32.totalorder %s2959_s28, %s2959_s28 }
  0x18   : > { %p2962_p13 = pnand %p2960_p12, %p2948_p7  ;;  %p2969_p3 = por %p2968_p4, %p2967_p1 }
  0x1a   : > { %p2963_p0 = pneg %p2962_p13 }
  0x1c   : > { %p2970_p2 = pnand %p2969_p3, %p2963_p0 }
  0x1e   : > { %2973 = shalt.err (!%p2970_p2)
}
  0x1f   : > { %s3020_s29 = smov 64   ;;  %s3021_s30 = smov 4  }
  0x20   : > { %2860 = dma.hbm_to_vmem [thread:$0]  (!%p3064_p5), %s3667_s1, 128, %s127_s15, [#allocation3], %s3020_s29, %s3020_s29, %s3021_s30  }
  0x21   : > { %s2974_s8 = scalar_lea.hbm %s3668_s2, 16 }
  0x22   : > { %p2975_p6 = scmp.ne.s32.totalorder %s3668_s2, %s2974_s8  ;;  %p2981_p8 = scmp.lt.u32.totalorder %s2974_s8, %s3668_s2 }
  0x24   : > { %p2977_p2 = pnand %p2975_p6, %p2948_p7 }
  0x26   : > { %p2978_p3 = pneg %p2977_p2 }
  0x28   : > { %p2983_p9 = pnand %p2981_p8, %p2978_p3 }
  0x2a   : > { %2986 = shalt.err (!%p2983_p9)
}
  0x2b   : > { %s2987_s15 = scalar_lea.vmem %s3068_s19, 16  ;;  %s2994_s18 = scalar_lea.vmem %s3068_s19, 32 }
  0x2c   : > { %p2988_p10 = scmp.ne.s32.totalorder %s3068_s19, %s2987_s15  ;;  %p2995_p13 = scmp.lt.s32.totalorder %s3068_s19, %s3068_s19 }
  0x2d   : > { %p2996_p0 = scmp.lt.s32.totalorder %s2994_s18, %s2987_s15 }
  0x2e   : > { %p2990_p11 = pnand %p2988_p10, %p2948_p7 }
  0x2f   : > { %p2997_p1 = por %p2996_p0, %p2995_p13 }
  0x30   : > { %p2991_p12 = pneg %p2990_p11 }
  0x32   : > { %p2998_p4 = pnand %p2997_p1, %p2991_p12 }
  0x34   : > { %3001 = shalt.err (!%p2998_p4)
}
  0x35   : > { %2863 = dma.hbm_to_vmem [thread:$0]  (!%p3064_p5), %s3668_s2, 16, %s3068_s19, [#allocation5]  }
  0x36   : > { %p3676_p6 = scmp.ne.s32.totalorder %s3673_s16, 0 }
  0x37   : > { %p3677_p7 = scmp.ne.s32.totalorder (!%p3676_p6), %s3674_s17, 0 }
  0x38   : > { %162 = sbr.rel (%p3676_p6) target bundleno = 417 (0x1a1), region = 32 }
  0x3f   : > { %3007 = dma.done.wait (%p3677_p7), [#allocation3], 128  }
  0x40   : > { %3009 = vsyncadd (%p3677_p7), [#allocation3], 4294967168 }
  0x41   : > { %3011 = dma.done.wait (%p3677_p7), [#allocation5], 16  }
  0x42   : > { %3013 = vsyncadd (%p3677_p7), [#allocation5], 4294967280  ;;  %s2260_s20 = sshll.u32 %s2251_s13, 7  ;;  %v2880_v0 = vld [vmem:[#allocation2] sm:$0xff]   ;;  %vm666_vm0 = vcmask 130048   ;;  %vm2044_vm1 = vcmask 257024  }
  0x43   : > { %p191_p2 = scmp.lt.s32.totalorder %s2260_s20, 255  ;;  %2717 = vmatprep.subr.bf16.mxu0 %v2880_v0  ;;  %2847 = vmatprep.subr.bf16.mxu1 %v2880_v0 }
  0x44   : > { %2718 = vmatpush3.bf16.msra.mxu0 %v2880_v0  ;;  %2848 = vmatpush3.bf16.msra.mxu1 %v2880_v0 }
  0x45   : > { %s3679_s20 = smov (!%p191_p2, %s2260_s20), 255 }
  0x46   : > { %s2261_s16 = sshll.u32 %s3679_s20, 2 }
  0x47   : > { %s3138_s24 = scalar_lea.vmem %s3666_s0, %s2261_s16  ;;  %s3281_s25 = scalar_lea.vmem %s3669_s3, %s2261_s16 }
  0x48   : > { %v2881_v1 = vld [vmem:[%s3138_s24] sm:$0xff]   ;;  %v2883_v3 = vld [vmem:[%s3138_s24 + $0x8] sm:$0xff]   ;;  %v2885_v5 = vld [vmem:[%s3138_s24 + $0x10] sm:$0xff]  }
  0x49   : > { %v2882_v2 = vld [vmem:[%s3138_s24 + $0x100] sm:$0xff]   ;;  %2719 = vmatprep.mubr.msk.bf16.mxu0 %vm666_vm0, %v2881_v1  ;;  %v2884_v4 = vld [vmem:[%s3138_s24 + $0x108] sm:$0xff]   ;;  %v2886_v6 = vld [vmem:[%s3138_s24 + $0x110] sm:$0xff]  }
  0x4a   : > { %2783 = vmatprep.mubr.msk.bf16.mxu1 %vm666_vm0, %v2882_v2  ;;  %2720 = vmatmul.mubr.msk.bf16.vlgmr.msra.gmra.mrb[0].mxu0 %vm666_vm0, %v2883_v3  ;;  %v2887_v7 = vld [vmem:[%s3138_s24 + $0x18] sm:$0xff]   ;;  %v2889_v9 = vld [vmem:[%s3138_s24 + $0x20] sm:$0xff]   ;;  %v2891_v11 = vld [vmem:[%s3138_s24 + $0x28] sm:$0xff]  }
  0x4b   : > { %2784 = vmatmul.mubr.msk.bf16.vlgmr.msra.gmra.mrb[0].mxu1 %vm666_vm0, %v2884_v4  ;;  %2723 = vmatprep.mubr.msk.bf16.mxu0 %vm666_vm0, %v2885_v5  ;;  %v2888_v8 = vld [vmem:[%s3138_s24 + $0x118] sm:$0xff]   ;;  %v2890_v10 = vld [vmem:[%s3138_s24 + $0x120] sm:$0xff]   ;;  %v2892_v12 = vld [vmem:[%s3138_s24 + $0x128] sm:$0xff]  }
  0x4c   : > { %2787 = vmatprep.mubr.msk.bf16.mxu1 %vm666_vm0, %v2886_v6  ;;  %v2893_v13 = vld [vmem:[%s3138_s24 + $0x30] sm:$0xff]   ;;  %v2895_v15 = vld [vmem:[%s3138_s24 + $0x38] sm:$0xff]   ;;  %v2897_v17 = vld [vmem:[%s3138_s24 + $0x40] sm:$0xff]  }
  0x4d   : > { %v2894_v14 = vld [vmem:[%s3138_s24 + $0x130] sm:$0xff]   ;;  %v2896_v16 = vld [vmem:[%s3138_s24 + $0x138] sm:$0xff]   ;;  %v2898_v18 = vld [vmem:[%s3138_s24 + $0x140] sm:$0xff]  }
  0x4e   : > { %v2899_v19 = vld [vmem:[%s3138_s24 + $0x48] sm:$0xff]   ;;  %v2901_v21 = vld [vmem:[%s3138_s24 + $0x50] sm:$0xff]   ;;  %v2903_v23 = vld [vmem:[%s3138_s24 + $0x58] sm:$0xff]  }
  0x4f   : > { %v2900_v20 = vld [vmem:[%s3138_s24 + $0x148] sm:$0xff]   ;;  %v2902_v22 = vld [vmem:[%s3138_s24 + $0x150] sm:$0xff]   ;;  %v2904_v24 = vld [vmem:[%s3138_s24 + $0x158] sm:$0xff]  }
  0x50   : > { %v2905_v25 = vld [vmem:[%s3138_s24 + $0x60] sm:$0xff]   ;;  %v2907_v27 = vld [vmem:[%s3138_s24 + $0x68] sm:$0xff]   ;;  %v2909_v29 = vld [vmem:[%s3138_s24 + $0x70] sm:$0xff]  }
  0x51   : > { %v2906_v26 = vld [vmem:[%s3138_s24 + $0x160] sm:$0xff]   ;;  %v2908_v28 = vld [vmem:[%s3138_s24 + $0x168] sm:$0xff]   ;;  %v2910_v30 = vld [vmem:[%s3138_s24 + $0x170] sm:$0xff]  }
  0x52   : > { %2724 = vmatmul.mubr.msk.bf16.gmra.mrb[4].mxu0 %vm666_vm0, %v2887_v7  ;;  %v2911_v31 = vld [vmem:[%s3138_s24 + $0x78] sm:$0xff]   ;;  %v2913_v33 = vld [vmem:[%s3138_s24 + $0x80] sm:$0xff]   ;;  %v2915_v35 = vld [vmem:[%s3138_s24 + $0x88] sm:$0xff]  }
  0x53   : > { %2788 = vmatmul.mubr.msk.bf16.gmra.mrb[4].mxu1 %vm666_vm0, %v2888_v8  ;;  %2727 = vmatprep.mubr.msk.bf16.mxu0 %vm666_vm0, %v2889_v9  ;;  %v2912_v32 = vld [vmem:[%s3138_s24 + $0x178] sm:$0xff]   ;;  %v2914_v34 = vld [vmem:[%s3138_s24 + $0x180] sm:$0xff]   ;;  %v2916_v36 = vld [vmem:[%s3138_s24 + $0x188] sm:$0xff]  }
  0x54   : > { %2791 = vmatprep.mubr.msk.bf16.mxu1 %vm666_vm0, %v2890_v10  ;;  %v2917_v37 = vld [vmem:[%s3138_s24 + $0x90] sm:$0xff]   ;;  %v2919_v39 = vld [vmem:[%s3138_s24 + $0x98] sm:$0xff]   ;;  %v2921_v41 = vld [vmem:[%s3138_s24 + $0xa0] sm:$0xff]  }
  0x55   : > { %v2918_v38 = vld [vmem:[%s3138_s24 + $0x190] sm:$0xff]   ;;  %v2920_v40 = vld [vmem:[%s3138_s24 + $0x198] sm:$0xff]   ;;  %v2922_v42 = vld [vmem:[%s3138_s24 + $0x1a0] sm:$0xff]  }
  0x56   : > { %v2923_v43 = vld [vmem:[%s3138_s24 + $0xa8] sm:$0xff]   ;;  %v2925_v45 = vld [vmem:[%s3138_s24 + $0xb0] sm:$0xff]   ;;  %v2927_v47 = vld [vmem:[%s3138_s24 + $0xb8] sm:$0xff]  }
  0x57   : > { %v2924_v44 = vld [vmem:[%s3138_s24 + $0x1a8] sm:$0xff]   ;;  %v2926_v46 = vld [vmem:[%s3138_s24 + $0x1b0] sm:$0xff]   ;;  %v2928_v48 = vld [vmem:[%s3138_s24 + $0x1b8] sm:$0xff]  }
  0x58   : > { %v2929_v49 = vld [vmem:[%s3138_s24 + $0xc0] sm:$0xff]   ;;  %v2931_v51 = vld [vmem:[%s3138_s24 + $0xc8] sm:$0xff]   ;;  %v2933_v53 = vld [vmem:[%s3138_s24 + $0xd0] sm:$0xff]  }
  0x59   : > { %v2930_v50 = vld [vmem:[%s3138_s24 + $0x1c0] sm:$0xff]   ;;  %v2932_v52 = vld [vmem:[%s3138_s24 + $0x1c8] sm:$0xff]   ;;  %v2934_v54 = vld [vmem:[%s3138_s24 + $0x1d0] sm:$0xff]  }
  0x5a   : > { %2728 = vmatmul.mubr.msk.bf16.gmra.mrb[8].mxu0 %vm666_vm0, %v2891_v11  ;;  %v2935_v55 = vld [vmem:[%s3138_s24 + $0xd8] sm:$0xff]   ;;  %v2937_v57 = vld [vmem:[%s3138_s24 + $0xe0] sm:$0xff]   ;;  %v2939_v59 = vld [vmem:[%s3138_s24 + $0xe8] sm:$0xff]  }
  0x5b   : > { %2792 = vmatmul.mubr.msk.bf16.gmra.mrb[8].mxu1 %vm666_vm0, %v2892_v12  ;;  %2731 = vmatprep.mubr.msk.bf16.mxu0 %vm666_vm0, %v2893_v13  ;;  %v2936_v56 = vld [vmem:[%s3138_s24 + $0x1d8] sm:$0xff]   ;;  %v2938_v58 = vld [vmem:[%s3138_s24 + $0x1e0] sm:$0xff]   ;;  %v2940_v60 = vld [vmem:[%s3138_s24 + $0x1e8] sm:$0xff]  }
  0x5c   : > { %2795 = vmatprep.mubr.msk.bf16.mxu1 %vm666_vm0, %v2894_v14  ;;  %v2941_v61 = vld [vmem:[%s3138_s24 + $0xf0] sm:$0xff]   ;;  %v2943_v63 = vld [vmem:[%s3138_s24 + $0xf8] sm:$0xff]   ;;  %v3268_v1 = vld [vmem:[#allocation4] ss:$0 sm:$0xff] }
  0x5d   : > { %v2942_v62 = vld [vmem:[%s3138_s24 + $0x1f0] sm:$0xff]   ;;  %v2944_v0 = vld [vmem:[%s3138_s24 + $0x1f8] sm:$0xff]  }
  0x62   : > { %2732 = vmatmul.mubr.msk.bf16.gmra.mrb[12].mxu0 %vm666_vm0, %v2895_v15 }
  0x63   : > { %2796 = vmatmul.mubr.msk.bf16.gmra.mrb[12].mxu1 %vm666_vm0, %v2896_v16  ;;  %2735 = vmatprep.mubr.msk.bf16.mxu0 %vm666_vm0, %v2897_v17 }
  0x64   : > { %2799 = vmatprep.mubr.msk.bf16.mxu1 %vm666_vm0, %v2898_v18 }
  0x6a   : > { %2736 = vmatmul.mubr.msk.bf16.gmra.mrb[16].mxu0 %vm666_vm0, %v2899_v19 }
  0x6b   : > { %2800 = vmatmul.mubr.msk.bf16.gmra.mrb[16].mxu1 %vm666_vm0, %v2900_v20  ;;  %2739 = vmatprep.mubr.msk.bf16.mxu0 %vm666_vm0, %v2901_v21 }
  0x6c   : > { %2803 = vmatprep.mubr.msk.bf16.mxu1 %vm666_vm0, %v2902_v22 }
  0x72   : > { %2740 = vmatmul.mubr.msk.bf16.gmra.mrb[20].mxu0 %vm666_vm0, %v2903_v23 }
  0x73   : > { %2804 = vmatmul.mubr.msk.bf16.gmra.mrb[20].mxu1 %vm666_vm0, %v2904_v24  ;;  %2743 = vmatprep.mubr.msk.bf16.mxu0 %vm666_vm0, %v2905_v25 }
  0x74   : > { %2807 = vmatprep.mubr.msk.bf16.mxu1 %vm666_vm0, %v2906_v26 }
  0x7a   : > { %2744 = vmatmul.mubr.msk.bf16.gmra.mrb[24].mxu0 %vm666_vm0, %v2907_v27 }
  0x7b   : > { %2808 = vmatmul.mubr.msk.bf16.gmra.mrb[24].mxu1 %vm666_vm0, %v2908_v28  ;;  %2747 = vmatprep.mubr.msk.bf16.mxu0 %vm666_vm0, %v2909_v29 }
  0x7c   : > { %2811 = vmatprep.mubr.msk.bf16.mxu1 %vm666_vm0, %v2910_v30 }
  0x82   : > { %2748 = vmatmul.mubr.msk.bf16.gmra.mrb[28].mxu0 %vm666_vm0, %v2911_v31 }
  0x83   : > { %2812 = vmatmul.mubr.msk.bf16.gmra.mrb[28].mxu1 %vm666_vm0, %v2912_v32  ;;  %2751 = vmatprep.mubr.msk.bf16.mxu0 %vm666_vm0, %v2913_v33 }
  0x84   : > { %2815 = vmatprep.mubr.msk.bf16.mxu1 %vm666_vm0, %v2914_v34 }
  0x8a   : > { %2752 = vmatmul.mubr.msk.bf16.gmra.mrb[32].mxu0 %vm666_vm0, %v2915_v35 }
  0x8b   : > { %2816 = vmatmul.mubr.msk.bf16.gmra.mrb[32].mxu1 %vm666_vm0, %v2916_v36  ;;  %2755 = vmatprep.mubr.msk.bf16.mxu0 %vm666_vm0, %v2917_v37 }
  0x8c   : > { %2819 = vmatprep.mubr.msk.bf16.mxu1 %vm666_vm0, %v2918_v38 }
  0x92   : > { %2756 = vmatmul.mubr.msk.bf16.gmra.mrb[36].mxu0 %vm666_vm0, %v2919_v39 }
  0x93   : > { %2820 = vmatmul.mubr.msk.bf16.gmra.mrb[36].mxu1 %vm666_vm0, %v2920_v40  ;;  %2759 = vmatprep.mubr.msk.bf16.mxu0 %vm666_vm0, %v2921_v41 }
  0x94   : > { %2823 = vmatprep.mubr.msk.bf16.mxu1 %vm666_vm0, %v2922_v42 }
  0x9a   : > { %2760 = vmatmul.mubr.msk.bf16.gmra.mrb[40].mxu0 %vm666_vm0, %v2923_v43 }
  0x9b   : > { %2824 = vmatmul.mubr.msk.bf16.gmra.mrb[40].mxu1 %vm666_vm0, %v2924_v44  ;;  %2763 = vmatprep.mubr.msk.bf16.mxu0 %vm666_vm0, %v2925_v45 }
  0x9c   : > { %2827 = vmatprep.mubr.msk.bf16.mxu1 %vm666_vm0, %v2926_v46 }
  0xa2   : > { %2764 = vmatmul.mubr.msk.bf16.gmra.mrb[44].mxu0 %vm666_vm0, %v2927_v47 }
  0xa3   : > { %2828 = vmatmul.mubr.msk.bf16.gmra.mrb[44].mxu1 %vm666_vm0, %v2928_v48  ;;  %2767 = vmatprep.mubr.msk.bf16.mxu0 %vm666_vm0, %v2929_v49 }
  0xa4   : > { %2831 = vmatprep.mubr.msk.bf16.mxu1 %vm666_vm0, %v2930_v50 }
  0xaa   : > { %2768 = vmatmul.mubr.msk.bf16.gmra.mrb[48].mxu0 %vm666_vm0, %v2931_v51 }
  0xab   : > { %2832 = vmatmul.mubr.msk.bf16.gmra.mrb[48].mxu1 %vm666_vm0, %v2932_v52  ;;  %2771 = vmatprep.mubr.msk.bf16.mxu0 %vm666_vm0, %v2933_v53 }
  0xac   : > { %2835 = vmatprep.mubr.msk.bf16.mxu1 %vm666_vm0, %v2934_v54 }
  0xb2   : > { %2772 = vmatmul.mubr.msk.bf16.gmra.mrb[52].mxu0 %vm666_vm0, %v2935_v55 }
  0xb3   : > { %2836 = vmatmul.mubr.msk.bf16.gmra.mrb[52].mxu1 %vm666_vm0, %v2936_v56  ;;  %2775 = vmatprep.mubr.msk.bf16.mxu0 %vm666_vm0, %v2937_v57 }
  0xb4   : > { %2839 = vmatprep.mubr.msk.bf16.mxu1 %vm666_vm0, %v2938_v58 }
  0xba   : > { %2776 = vmatmul.mubr.msk.bf16.gmra.mrb[56].mxu0 %vm666_vm0, %v2939_v59 }
  0xbb   : > { %2840 = vmatmul.mubr.msk.bf16.gmra.mrb[56].mxu1 %vm666_vm0, %v2940_v60  ;;  %2779 = vmatprep.mubr.msk.bf16.mxu0 %vm666_vm0, %v2941_v61 }
  0xbc   : > { %2843 = vmatprep.mubr.msk.bf16.mxu1 %vm666_vm0, %v2942_v62 }
  0xc2   : > { %2780 = vmatmul.mubr.msk.bf16.gmra.mrb[60].mxu0 %vm666_vm0, %v2943_v63 }
  0xc3   : > { %2844 = vmatmul.mubr.msk.bf16.gmra.mrb[60].mxu1 %vm666_vm0, %v2944_v0 }
 0x11d   : > { %v2721_v2 = vpop.f32.mrb[0].mxu0 }
 0x11e   : > { %v2785_v3 = vpop.f32.mrb[0].mxu1  ;;  %v902_v4 = vadd.f32 %v2721_v2, %v3268_v1  ;;  %v893_v6 = vpop.f32.mrb[1].mxu0 }
 0x11f   : > { %v1158_v5 = vadd.f32 %v2785_v3, %v3268_v1  ;;  %v1149_v7 = vpop.f32.mrb[1].mxu1  ;;  %v894_v8 = vadd.f32 %v3268_v1, %v893_v6  ;;  %v2722_v10 = vpop.f32.mrb[2].mxu0 }
 0x120   : > { %v1150_v9 = vadd.f32 %v3268_v1, %v1149_v7  ;;  %v2786_v11 = vpop.f32.mrb[2].mxu1  ;;  %v1406_v12 = vmax.f32 %v902_v4, 0.0  ;;  %v905_v14 = vadd.f32 %v2722_v10, %v3268_v1  ;;  %v896_v16 = vpop.f32.mrb[3].mxu0 }
 0x121   : > { %v1470_v13 = vmax.f32 %v1158_v5, 0.0  ;;  %v1161_v15 = vadd.f32 %v2786_v11, %v3268_v1  ;;  %v1152_v17 = vpop.f32.mrb[3].mxu1  ;;  %v1404_v18 = vmax.f32 %v894_v8, 0.0  ;;  %v897_v20 = vadd.f32 %v3268_v1, %v896_v16 }
 0x122   : > { %v1468_v19 = vmax.f32 %v1150_v9, 0.0  ;;  %v1153_v21 = vadd.f32 %v3268_v1, %v1152_v17  ;;  %v2526_v22 = vpack.c.bf16 %v1406_v12, %v1406_v12  ;;  %v1407_v24 = vmax.f32 %v905_v14, 0.0 }
 0x123   : > { %v2590_v23 = vpack.c.bf16 %v1470_v13, %v1470_v13  ;;  %v1471_v25 = vmax.f32 %v1161_v15, 0.0  ;;  %v2524_v26 = vpack.c.bf16 %v1404_v18, %v1404_v18  ;;  %v1405_v28 = vmax.f32 %v897_v20, 0.0 }
 0x124   : > { %v2588_v27 = vpack.c.bf16 %v1468_v19, %v1468_v19  ;;  %v1469_v29 = vmax.f32 %v1153_v21, 0.0  ;;  %2047 = vst.msk [vmem:[%s3281_s25 + $0x8] sm:$0xf] %vm2044_vm1, %v2526_v22  ;;  %v2527_v30 = vpack.c.bf16 %v1407_v24, %v1407_v24 }
 0x125   : > { %2111 = vst.msk [vmem:[%s3281_s25 + $0x108] sm:$0xf] %vm2044_vm1, %v2590_v23  ;;  %v2591_v31 = vpack.c.bf16 %v1471_v25, %v1471_v25  ;;  %2045 = vst.msk [vmem:[%s3281_s25] sm:$0xf] %vm2044_vm1, %v2524_v26  ;;  %v2525_v32 = vpack.c.bf16 %v1405_v28, %v1405_v28  ;;  %v2725_v34 = vpop.f32.mrb[4].mxu0 }
 0x126   : > { %2109 = vst.msk [vmem:[%s3281_s25 + $0x100] sm:$0xf] %vm2044_vm1, %v2588_v27  ;;  %v2589_v33 = vpack.c.bf16 %v1469_v29, %v1469_v29  ;;  %v2789_v35 = vpop.f32.mrb[4].mxu1  ;;  %2048 = vst.msk [vmem:[%s3281_s25 + $0xc] sm:$0xf] %vm2044_vm1, %v2527_v30  ;;  %v918_v36 = vadd.f32 %v2725_v34, %v3268_v1  ;;  %v909_v38 = vpop.f32.mrb[5].mxu0 }
 0x127   : > { %2112 = vst.msk [vmem:[%s3281_s25 + $0x10c] sm:$0xf] %vm2044_vm1, %v2591_v31  ;;  %v1174_v37 = vadd.f32 %v2789_v35, %v3268_v1  ;;  %v1165_v39 = vpop.f32.mrb[5].mxu1  ;;  %2046 = vst.msk [vmem:[%s3281_s25 + $0x4] sm:$0xf] %vm2044_vm1, %v2525_v32  ;;  %v910_v40 = vadd.f32 %v3268_v1, %v909_v38  ;;  %v2726_v42 = vpop.f32.mrb[6].mxu0 }
 0x128   : > { %2110 = vst.msk [vmem:[%s3281_s25 + $0x104] sm:$0xf] %vm2044_vm1, %v2589_v33  ;;  %v1166_v41 = vadd.f32 %v3268_v1, %v1165_v39  ;;  %v2790_v43 = vpop.f32.mrb[6].mxu1  ;;  %v1410_v44 = vmax.f32 %v918_v36, 0.0  ;;  %v921_v46 = vadd.f32 %v2726_v42, %v3268_v1  ;;  %v912_v48 = vpop.f32.mrb[7].mxu0 }
 0x129   : > { %v1474_v45 = vmax.f32 %v1174_v37, 0.0  ;;  %v1177_v47 = vadd.f32 %v2790_v43, %v3268_v1  ;;  %v1168_v49 = vpop.f32.mrb[7].mxu1  ;;  %v1408_v50 = vmax.f32 %v910_v40, 0.0  ;;  %v913_v52 = vadd.f32 %v3268_v1, %v912_v48 }
 0x12a   : > { %v1472_v51 = vmax.f32 %v1166_v41, 0.0  ;;  %v1169_v53 = vadd.f32 %v3268_v1, %v1168_v49  ;;  %v2530_v54 = vpack.c.bf16 %v1410_v44, %v1410_v44  ;;  %v1411_v56 = vmax.f32 %v921_v46, 0.0 }
 0x12b   : > { %v2594_v55 = vpack.c.bf16 %v1474_v45, %v1474_v45  ;;  %v1475_v57 = vmax.f32 %v1177_v47, 0.0  ;;  %v2528_v58 = vpack.c.bf16 %v1408_v50, %v1408_v50  ;;  %v1409_v60 = vmax.f32 %v913_v52, 0.0 }
 0x12c   : > { %v2592_v59 = vpack.c.bf16 %v1472_v51, %v1472_v51  ;;  %v1473_v61 = vmax.f32 %v1169_v53, 0.0  ;;  %2051 = vst.msk [vmem:[%s3281_s25 + $0x18] sm:$0xf] %vm2044_vm1, %v2530_v54  ;;  %v2531_v62 = vpack.c.bf16 %v1411_v56, %v1411_v56 }
 0x12d   : > { %2115 = vst.msk [vmem:[%s3281_s25 + $0x118] sm:$0xf] %vm2044_vm1, %v2594_v55  ;;  %v2595_v63 = vpack.c.bf16 %v1475_v57, %v1475_v57  ;;  %2049 = vst.msk [vmem:[%s3281_s25 + $0x10] sm:$0xf] %vm2044_vm1, %v2528_v58  ;;  %v2529_v0 = vpack.c.bf16 %v1409_v60, %v1409_v60  ;;  %v2729_v3 = vpop.f32.mrb[8].mxu0 }
 0x12e   : > { %2113 = vst.msk [vmem:[%s3281_s25 + $0x110] sm:$0xf] %vm2044_vm1, %v2592_v59  ;;  %v2593_v2 = vpack.c.bf16 %v1473_v61, %v1473_v61  ;;  %v2793_v4 = vpop.f32.mrb[8].mxu1  ;;  %2052 = vst.msk [vmem:[%s3281_s25 + $0x1c] sm:$0xf] %vm2044_vm1, %v2531_v62  ;;  %v934_v5 = vadd.f32 %v2729_v3, %v3268_v1  ;;  %v925_v7 = vpop.f32.mrb[9].mxu0 }
 0x12f   : > { %2116 = vst.msk [vmem:[%s3281_s25 + $0x11c] sm:$0xf] %vm2044_vm1, %v2595_v63  ;;  %v1190_v6 = vadd.f32 %v2793_v4, %v3268_v1  ;;  %v1181_v8 = vpop.f32.mrb[9].mxu1  ;;  %2050 = vst.msk [vmem:[%s3281_s25 + $0x14] sm:$0xf] %vm2044_vm1, %v2529_v0  ;;  %v926_v9 = vadd.f32 %v3268_v1, %v925_v7  ;;  %v2730_v11 = vpop.f32.mrb[10].mxu0 }
 0x130   : > { %2114 = vst.msk [vmem:[%s3281_s25 + $0x114] sm:$0xf] %vm2044_vm1, %v2593_v2  ;;  %v1182_v10 = vadd.f32 %v3268_v1, %v1181_v8  ;;  %v2794_v12 = vpop.f32.mrb[10].mxu1  ;;  %v1414_v13 = vmax.f32 %v934_v5, 0.0  ;;  %v937_v15 = vadd.f32 %v2730_v11, %v3268_v1  ;;  %v928_v17 = vpop.f32.mrb[11].mxu0 }
 0x131   : > { %v1478_v14 = vmax.f32 %v1190_v6, 0.0  ;;  %v1193_v16 = vadd.f32 %v2794_v12, %v3268_v1  ;;  %v1184_v18 = vpop.f32.mrb[11].mxu1  ;;  %v1412_v19 = vmax.f32 %v926_v9, 0.0  ;;  %v929_v21 = vadd.f32 %v3268_v1, %v928_v17 }
 0x132   : > { %v1476_v20 = vmax.f32 %v1182_v10, 0.0  ;;  %v1185_v22 = vadd.f32 %v3268_v1, %v1184_v18  ;;  %v2534_v23 = vpack.c.bf16 %v1414_v13, %v1414_v13  ;;  %v1415_v25 = vmax.f32 %v937_v15, 0.0 }
 0x133   : > { %v2598_v24 = vpack.c.bf16 %v1478_v14, %v1478_v14  ;;  %v1479_v26 = vmax.f32 %v1193_v16, 0.0  ;;  %v2532_v27 = vpack.c.bf16 %v1412_v19, %v1412_v19  ;;  %v1413_v29 = vmax.f32 %v929_v21, 0.0 }
 0x134   : > { %v2596_v28 = vpack.c.bf16 %v1476_v20, %v1476_v20  ;;  %v1477_v30 = vmax.f32 %v1185_v22, 0.0  ;;  %2055 = vst.msk [vmem:[%s3281_s25 + $0x28] sm:$0xf] %vm2044_vm1, %v2534_v23  ;;  %v2535_v31 = vpack.c.bf16 %v1415_v25, %v1415_v25 }
 0x135   : > { %2119 = vst.msk [vmem:[%s3281_s25 + $0x128] sm:$0xf] %vm2044_vm1, %v2598_v24  ;;  %v2599_v32 = vpack.c.bf16 %v1479_v26, %v1479_v26  ;;  %2053 = vst.msk [vmem:[%s3281_s25 + $0x20] sm:$0xf] %vm2044_vm1, %v2532_v27  ;;  %v2533_v33 = vpack.c.bf16 %v1413_v29, %v1413_v29  ;;  %v2733_v35 = vpop.f32.mrb[12].mxu0 }
 0x136   : > { %2117 = vst.msk [vmem:[%s3281_s25 + $0x120] sm:$0xf] %vm2044_vm1, %v2596_v28  ;;  %v2597_v34 = vpack.c.bf16 %v1477_v30, %v1477_v30  ;;  %v2797_v36 = vpop.f32.mrb[12].mxu1  ;;  %2056 = vst.msk [vmem:[%s3281_s25 + $0x2c] sm:$0xf] %vm2044_vm1, %v2535_v31  ;;  %v950_v37 = vadd.f32 %v2733_v35, %v3268_v1  ;;  %v941_v39 = vpop.f32.mrb[13].mxu0 }
 0x137   : > { %2120 = vst.msk [vmem:[%s3281_s25 + $0x12c] sm:$0xf] %vm2044_vm1, %v2599_v32  ;;  %v1206_v38 = vadd.f32 %v2797_v36, %v3268_v1  ;;  %v1197_v40 = vpop.f32.mrb[13].mxu1  ;;  %2054 = vst.msk [vmem:[%s3281_s25 + $0x24] sm:$0xf] %vm2044_vm1, %v2533_v33  ;;  %v942_v41 = vadd.f32 %v3268_v1, %v941_v39  ;;  %v2734_v43 = vpop.f32.mrb[14].mxu0 }
 0x138   : > { %2118 = vst.msk [vmem:[%s3281_s25 + $0x124] sm:$0xf] %vm2044_vm1, %v2597_v34  ;;  %v1198_v42 = vadd.f32 %v3268_v1, %v1197_v40  ;;  %v2798_v44 = vpop.f32.mrb[14].mxu1  ;;  %v1418_v45 = vmax.f32 %v950_v37, 0.0  ;;  %v953_v47 = vadd.f32 %v2734_v43, %v3268_v1  ;;  %v944_v49 = vpop.f32.mrb[15].mxu0 }
 0x139   : > { %v1482_v46 = vmax.f32 %v1206_v38, 0.0  ;;  %v1209_v48 = vadd.f32 %v2798_v44, %v3268_v1  ;;  %v1200_v50 = vpop.f32.mrb[15].mxu1  ;;  %v1416_v51 = vmax.f32 %v942_v41, 0.0  ;;  %v945_v53 = vadd.f32 %v3268_v1, %v944_v49 }
 0x13a   : > { %v1480_v52 = vmax.f32 %v1198_v42, 0.0  ;;  %v1201_v54 = vadd.f32 %v3268_v1, %v1200_v50  ;;  %v2538_v55 = vpack.c.bf16 %v1418_v45, %v1418_v45  ;;  %v1419_v57 = vmax.f32 %v953_v47, 0.0 }
 0x13b   : > { %v2602_v56 = vpack.c.bf16 %v1482_v46, %v1482_v46  ;;  %v1483_v58 = vmax.f32 %v1209_v48, 0.0  ;;  %v2536_v59 = vpack.c.bf16 %v1416_v51, %v1416_v51  ;;  %v1417_v61 = vmax.f32 %v945_v53, 0.0 }
 0x13c   : > { %v2600_v60 = vpack.c.bf16 %v1480_v52, %v1480_v52  ;;  %v1481_v62 = vmax.f32 %v1201_v54, 0.0  ;;  %2059 = vst.msk [vmem:[%s3281_s25 + $0x38] sm:$0xf] %vm2044_vm1, %v2538_v55  ;;  %v2539_v63 = vpack.c.bf16 %v1419_v57, %v1419_v57 }
 0x13d   : > { %2123 = vst.msk [vmem:[%s3281_s25 + $0x138] sm:$0xf] %vm2044_vm1, %v2602_v56  ;;  %v2603_v0 = vpack.c.bf16 %v1483_v58, %v1483_v58  ;;  %2057 = vst.msk [vmem:[%s3281_s25 + $0x30] sm:$0xf] %vm2044_vm1, %v2536_v59  ;;  %v2537_v2 = vpack.c.bf16 %v1417_v61, %v1417_v61  ;;  %v2737_v4 = vpop.f32.mrb[16].mxu0 }
 0x13e   : > { %2121 = vst.msk [vmem:[%s3281_s25 + $0x130] sm:$0xf] %vm2044_vm1, %v2600_v60  ;;  %v2601_v3 = vpack.c.bf16 %v1481_v62, %v1481_v62  ;;  %v2801_v5 = vpop.f32.mrb[16].mxu1  ;;  %2060 = vst.msk [vmem:[%s3281_s25 + $0x3c] sm:$0xf] %vm2044_vm1, %v2539_v63  ;;  %v966_v6 = vadd.f32 %v2737_v4, %v3268_v1  ;;  %v957_v8 = vpop.f32.mrb[17].mxu0 }
 0x13f   : > { %2124 = vst.msk [vmem:[%s3281_s25 + $0x13c] sm:$0xf] %vm2044_vm1, %v2603_v0  ;;  %v1222_v7 = vadd.f32 %v2801_v5, %v3268_v1  ;;  %v1213_v9 = vpop.f32.mrb[17].mxu1  ;;  %2058 = vst.msk [vmem:[%s3281_s25 + $0x34] sm:$0xf] %vm2044_vm1, %v2537_v2  ;;  %v958_v10 = vadd.f32 %v3268_v1, %v957_v8  ;;  %v2738_v12 = vpop.f32.mrb[18].mxu0 }
 0x140   : > { %2122 = vst.msk [vmem:[%s3281_s25 + $0x134] sm:$0xf] %vm2044_vm1, %v2601_v3  ;;  %v1214_v11 = vadd.f32 %v3268_v1, %v1213_v9  ;;  %v2802_v13 = vpop.f32.mrb[18].mxu1  ;;  %v1422_v14 = vmax.f32 %v966_v6, 0.0  ;;  %v969_v16 = vadd.f32 %v2738_v12, %v3268_v1  ;;  %v960_v18 = vpop.f32.mrb[19].mxu0 }
 0x141   : > { %v1486_v15 = vmax.f32 %v1222_v7, 0.0  ;;  %v1225_v17 = vadd.f32 %v2802_v13, %v3268_v1  ;;  %v1216_v19 = vpop.f32.mrb[19].mxu1  ;;  %v1420_v20 = vmax.f32 %v958_v10, 0.0  ;;  %v961_v22 = vadd.f32 %v3268_v1, %v960_v18 }
 0x142   : > { %v1484_v21 = vmax.f32 %v1214_v11, 0.0  ;;  %v1217_v23 = vadd.f32 %v3268_v1, %v1216_v19  ;;  %v2542_v24 = vpack.c.bf16 %v1422_v14, %v1422_v14  ;;  %v1423_v26 = vmax.f32 %v969_v16, 0.0 }
 0x143   : > { %v2606_v25 = vpack.c.bf16 %v1486_v15, %v1486_v15  ;;  %v1487_v27 = vmax.f32 %v1225_v17, 0.0  ;;  %v2540_v28 = vpack.c.bf16 %v1420_v20, %v1420_v20  ;;  %v1421_v30 = vmax.f32 %v961_v22, 0.0 }
 0x144   : > { %v2604_v29 = vpack.c.bf16 %v1484_v21, %v1484_v21  ;;  %v1485_v31 = vmax.f32 %v1217_v23, 0.0  ;;  %2063 = vst.msk [vmem:[%s3281_s25 + $0x48] sm:$0xf] %vm2044_vm1, %v2542_v24  ;;  %v2543_v32 = vpack.c.bf16 %v1423_v26, %v1423_v26 }
 0x145   : > { %2127 = vst.msk [vmem:[%s3281_s25 + $0x148] sm:$0xf] %vm2044_vm1, %v2606_v25  ;;  %v2607_v33 = vpack.c.bf16 %v1487_v27, %v1487_v27  ;;  %2061 = vst.msk [vmem:[%s3281_s25 + $0x40] sm:$0xf] %vm2044_vm1, %v2540_v28  ;;  %v2541_v34 = vpack.c.bf16 %v1421_v30, %v1421_v30  ;;  %v2741_v36 = vpop.f32.mrb[20].mxu0 }
 0x146   : > { %2125 = vst.msk [vmem:[%s3281_s25 + $0x140] sm:$0xf] %vm2044_vm1, %v2604_v29  ;;  %v2605_v35 = vpack.c.bf16 %v1485_v31, %v1485_v31  ;;  %v2805_v37 = vpop.f32.mrb[20].mxu1  ;;  %2064 = vst.msk [vmem:[%s3281_s25 + $0x4c] sm:$0xf] %vm2044_vm1, %v2543_v32  ;;  %v982_v38 = vadd.f32 %v2741_v36, %v3268_v1  ;;  %v973_v40 = vpop.f32.mrb[21].mxu0 }
 0x147   : > { %2128 = vst.msk [vmem:[%s3281_s25 + $0x14c] sm:$0xf] %vm2044_vm1, %v2607_v33  ;;  %v1238_v39 = vadd.f32 %v2805_v37, %v3268_v1  ;;  %v1229_v41 = vpop.f32.mrb[21].mxu1  ;;  %2062 = vst.msk [vmem:[%s3281_s25 + $0x44] sm:$0xf] %vm2044_vm1, %v2541_v34  ;;  %v974_v42 = vadd.f32 %v3268_v1, %v973_v40  ;;  %v2742_v44 = vpop.f32.mrb[22].mxu0 }
 0x148   : > { %2126 = vst.msk [vmem:[%s3281_s25 + $0x144] sm:$0xf] %vm2044_vm1, %v2605_v35  ;;  %v1230_v43 = vadd.f32 %v3268_v1, %v1229_v41  ;;  %v2806_v45 = vpop.f32.mrb[22].mxu1  ;;  %v1426_v46 = vmax.f32 %v982_v38, 0.0  ;;  %v985_v48 = vadd.f32 %v2742_v44, %v3268_v1  ;;  %v976_v50 = vpop.f32.mrb[23].mxu0 }
 0x149   : > { %v1490_v47 = vmax.f32 %v1238_v39, 0.0  ;;  %v1241_v49 = vadd.f32 %v2806_v45, %v3268_v1  ;;  %v1232_v51 = vpop.f32.mrb[23].mxu1  ;;  %v1424_v52 = vmax.f32 %v974_v42, 0.0  ;;  %v977_v54 = vadd.f32 %v3268_v1, %v976_v50 }
 0x14a   : > { %v1488_v53 = vmax.f32 %v1230_v43, 0.0  ;;  %v1233_v55 = vadd.f32 %v3268_v1, %v1232_v51  ;;  %v2546_v56 = vpack.c.bf16 %v1426_v46, %v1426_v46  ;;  %v1427_v58 = vmax.f32 %v985_v48, 0.0 }
 0x14b   : > { %v2610_v57 = vpack.c.bf16 %v1490_v47, %v1490_v47  ;;  %v1491_v59 = vmax.f32 %v1241_v49, 0.0  ;;  %v2544_v60 = vpack.c.bf16 %v1424_v52, %v1424_v52  ;;  %v1425_v62 = vmax.f32 %v977_v54, 0.0 }
 0x14c   : > { %v2608_v61 = vpack.c.bf16 %v1488_v53, %v1488_v53  ;;  %v1489_v63 = vmax.f32 %v1233_v55, 0.0  ;;  %2067 = vst.msk [vmem:[%s3281_s25 + $0x58] sm:$0xf] %vm2044_vm1, %v2546_v56  ;;  %v2547_v0 = vpack.c.bf16 %v1427_v58, %v1427_v58 }
 0x14d   : > { %2131 = vst.msk [vmem:[%s3281_s25 + $0x158] sm:$0xf] %vm2044_vm1, %v2610_v57  ;;  %v2611_v2 = vpack.c.bf16 %v1491_v59, %v1491_v59  ;;  %2065 = vst.msk [vmem:[%s3281_s25 + $0x50] sm:$0xf] %vm2044_vm1, %v2544_v60  ;;  %v2545_v3 = vpack.c.bf16 %v1425_v62, %v1425_v62  ;;  %v2745_v5 = vpop.f32.mrb[24].mxu0 }
 0x14e   : > { %2129 = vst.msk [vmem:[%s3281_s25 + $0x150] sm:$0xf] %vm2044_vm1, %v2608_v61  ;;  %v2609_v4 = vpack.c.bf16 %v1489_v63, %v1489_v63  ;;  %v2809_v6 = vpop.f32.mrb[24].mxu1  ;;  %2068 = vst.msk [vmem:[%s3281_s25 + $0x5c] sm:$0xf] %vm2044_vm1, %v2547_v0  ;;  %v998_v7 = vadd.f32 %v2745_v5, %v3268_v1  ;;  %v989_v9 = vpop.f32.mrb[25].mxu0 }
 0x14f   : > { %2132 = vst.msk [vmem:[%s3281_s25 + $0x15c] sm:$0xf] %vm2044_vm1, %v2611_v2  ;;  %v1254_v8 = vadd.f32 %v2809_v6, %v3268_v1  ;;  %v1245_v10 = vpop.f32.mrb[25].mxu1  ;;  %2066 = vst.msk [vmem:[%s3281_s25 + $0x54] sm:$0xf] %vm2044_vm1, %v2545_v3  ;;  %v990_v11 = vadd.f32 %v3268_v1, %v989_v9  ;;  %v2746_v13 = vpop.f32.mrb[26].mxu0 }
 0x150   : > { %2130 = vst.msk [vmem:[%s3281_s25 + $0x154] sm:$0xf] %vm2044_vm1, %v2609_v4  ;;  %v1246_v12 = vadd.f32 %v3268_v1, %v1245_v10  ;;  %v2810_v14 = vpop.f32.mrb[26].mxu1  ;;  %v1430_v15 = vmax.f32 %v998_v7, 0.0  ;;  %v1001_v17 = vadd.f32 %v2746_v13, %v3268_v1  ;;  %v992_v19 = vpop.f32.mrb[27].mxu0 }
 0x151   : > { %v1494_v16 = vmax.f32 %v1254_v8, 0.0  ;;  %v1257_v18 = vadd.f32 %v2810_v14, %v3268_v1  ;;  %v1248_v20 = vpop.f32.mrb[27].mxu1  ;;  %v1428_v21 = vmax.f32 %v990_v11, 0.0  ;;  %v993_v23 = vadd.f32 %v3268_v1, %v992_v19 }
 0x152   : > { %v1492_v22 = vmax.f32 %v1246_v12, 0.0  ;;  %v1249_v24 = vadd.f32 %v3268_v1, %v1248_v20  ;;  %v2550_v25 = vpack.c.bf16 %v1430_v15, %v1430_v15  ;;  %v1431_v27 = vmax.f32 %v1001_v17, 0.0 }
 0x153   : > { %v2614_v26 = vpack.c.bf16 %v1494_v16, %v1494_v16  ;;  %v1495_v28 = vmax.f32 %v1257_v18, 0.0  ;;  %v2548_v29 = vpack.c.bf16 %v1428_v21, %v1428_v21  ;;  %v1429_v31 = vmax.f32 %v993_v23, 0.0 }
 0x154   : > { %v2612_v30 = vpack.c.bf16 %v1492_v22, %v1492_v22  ;;  %v1493_v32 = vmax.f32 %v1249_v24, 0.0  ;;  %2071 = vst.msk [vmem:[%s3281_s25 + $0x68] sm:$0xf] %vm2044_vm1, %v2550_v25  ;;  %v2551_v33 = vpack.c.bf16 %v1431_v27, %v1431_v27 }
 0x155   : > { %2135 = vst.msk [vmem:[%s3281_s25 + $0x168] sm:$0xf] %vm2044_vm1, %v2614_v26  ;;  %v2615_v34 = vpack.c.bf16 %v1495_v28, %v1495_v28  ;;  %2069 = vst.msk [vmem:[%s3281_s25 + $0x60] sm:$0xf] %vm2044_vm1, %v2548_v29  ;;  %v2549_v35 = vpack.c.bf16 %v1429_v31, %v1429_v31  ;;  %v2749_v37 = vpop.f32.mrb[28].mxu0 }
 0x156   : > { %2133 = vst.msk [vmem:[%s3281_s25 + $0x160] sm:$0xf] %vm2044_vm1, %v2612_v30  ;;  %v2613_v36 = vpack.c.bf16 %v1493_v32, %v1493_v32  ;;  %v2813_v38 = vpop.f32.mrb[28].mxu1  ;;  %2072 = vst.msk [vmem:[%s3281_s25 + $0x6c] sm:$0xf] %vm2044_vm1, %v2551_v33  ;;  %v1014_v39 = vadd.f32 %v2749_v37, %v3268_v1  ;;  %v1005_v41 = vpop.f32.mrb[29].mxu0 }
 0x157   : > { %2136 = vst.msk [vmem:[%s3281_s25 + $0x16c] sm:$0xf] %vm2044_vm1, %v2615_v34  ;;  %v1270_v40 = vadd.f32 %v2813_v38, %v3268_v1  ;;  %v1261_v42 = vpop.f32.mrb[29].mxu1  ;;  %2070 = vst.msk [vmem:[%s3281_s25 + $0x64] sm:$0xf] %vm2044_vm1, %v2549_v35  ;;  %v1006_v43 = vadd.f32 %v3268_v1, %v1005_v41  ;;  %v2750_v45 = vpop.f32.mrb[30].mxu0 }
 0x158   : > { %2134 = vst.msk [vmem:[%s3281_s25 + $0x164] sm:$0xf] %vm2044_vm1, %v2613_v36  ;;  %v1262_v44 = vadd.f32 %v3268_v1, %v1261_v42  ;;  %v2814_v46 = vpop.f32.mrb[30].mxu1  ;;  %v1434_v47 = vmax.f32 %v1014_v39, 0.0  ;;  %v1017_v49 = vadd.f32 %v2750_v45, %v3268_v1  ;;  %v1008_v51 = vpop.f32.mrb[31].mxu0 }
 0x159   : > { %v1498_v48 = vmax.f32 %v1270_v40, 0.0  ;;  %v1273_v50 = vadd.f32 %v2814_v46, %v3268_v1  ;;  %v1264_v52 = vpop.f32.mrb[31].mxu1  ;;  %v1432_v53 = vmax.f32 %v1006_v43, 0.0  ;;  %v1009_v55 = vadd.f32 %v3268_v1, %v1008_v51 }
 0x15a   : > { %v1496_v54 = vmax.f32 %v1262_v44, 0.0  ;;  %v1265_v56 = vadd.f32 %v3268_v1, %v1264_v52  ;;  %v2554_v57 = vpack.c.bf16 %v1434_v47, %v1434_v47  ;;  %v1435_v59 = vmax.f32 %v1017_v49, 0.0 }
 0x15b   : > { %v2618_v58 = vpack.c.bf16 %v1498_v48, %v1498_v48  ;;  %v1499_v60 = vmax.f32 %v1273_v50, 0.0  ;;  %v2552_v61 = vpack.c.bf16 %v1432_v53, %v1432_v53  ;;  %v1433_v63 = vmax.f32 %v1009_v55, 0.0 }
 0x15c   : > { %v2616_v62 = vpack.c.bf16 %v1496_v54, %v1496_v54  ;;  %v1497_v0 = vmax.f32 %v1265_v56, 0.0  ;;  %2075 = vst.msk [vmem:[%s3281_s25 + $0x78] sm:$0xf] %vm2044_vm1, %v2554_v57  ;;  %v2555_v2 = vpack.c.bf16 %v1435_v59, %v1435_v59 }
 0x15d   : > { %2139 = vst.msk [vmem:[%s3281_s25 + $0x178] sm:$0xf] %vm2044_vm1, %v2618_v58  ;;  %v2619_v3 = vpack.c.bf16 %v1499_v60, %v1499_v60  ;;  %2073 = vst.msk [vmem:[%s3281_s25 + $0x70] sm:$0xf] %vm2044_vm1, %v2552_v61  ;;  %v2553_v4 = vpack.c.bf16 %v1433_v63, %v1433_v63  ;;  %v2753_v6 = vpop.f32.mrb[32].mxu0 }
 0x15e   : > { %2137 = vst.msk [vmem:[%s3281_s25 + $0x170] sm:$0xf] %vm2044_vm1, %v2616_v62  ;;  %v2617_v5 = vpack.c.bf16 %v1497_v0, %v1497_v0  ;;  %v2817_v7 = vpop.f32.mrb[32].mxu1  ;;  %2076 = vst.msk [vmem:[%s3281_s25 + $0x7c] sm:$0xf] %vm2044_vm1, %v2555_v2  ;;  %v1030_v8 = vadd.f32 %v2753_v6, %v3268_v1  ;;  %v1021_v10 = vpop.f32.mrb[33].mxu0 }
 0x15f   : > { %2140 = vst.msk [vmem:[%s3281_s25 + $0x17c] sm:$0xf] %vm2044_vm1, %v2619_v3  ;;  %v1286_v9 = vadd.f32 %v2817_v7, %v3268_v1  ;;  %v1277_v11 = vpop.f32.mrb[33].mxu1  ;;  %2074 = vst.msk [vmem:[%s3281_s25 + $0x74] sm:$0xf] %vm2044_vm1, %v2553_v4  ;;  %v1022_v12 = vadd.f32 %v3268_v1, %v1021_v10  ;;  %v2754_v14 = vpop.f32.mrb[34].mxu0 }
 0x160   : > { %2138 = vst.msk [vmem:[%s3281_s25 + $0x174] sm:$0xf] %vm2044_vm1, %v2617_v5  ;;  %v1278_v13 = vadd.f32 %v3268_v1, %v1277_v11  ;;  %v2818_v15 = vpop.f32.mrb[34].mxu1  ;;  %v1438_v16 = vmax.f32 %v1030_v8, 0.0  ;;  %v1033_v18 = vadd.f32 %v2754_v14, %v3268_v1  ;;  %v1024_v20 = vpop.f32.mrb[35].mxu0 }
 0x161   : > { %v1502_v17 = vmax.f32 %v1286_v9, 0.0  ;;  %v1289_v19 = vadd.f32 %v2818_v15, %v3268_v1  ;;  %v1280_v21 = vpop.f32.mrb[35].mxu1  ;;  %v1436_v22 = vmax.f32 %v1022_v12, 0.0  ;;  %v1025_v24 = vadd.f32 %v3268_v1, %v1024_v20 }
 0x162   : > { %v1500_v23 = vmax.f32 %v1278_v13, 0.0  ;;  %v1281_v25 = vadd.f32 %v3268_v1, %v1280_v21  ;;  %v2558_v26 = vpack.c.bf16 %v1438_v16, %v1438_v16  ;;  %v1439_v28 = vmax.f32 %v1033_v18, 0.0 }
 0x163   : > { %v2622_v27 = vpack.c.bf16 %v1502_v17, %v1502_v17  ;;  %v1503_v29 = vmax.f32 %v1289_v19, 0.0  ;;  %v2556_v30 = vpack.c.bf16 %v1436_v22, %v1436_v22  ;;  %v1437_v32 = vmax.f32 %v1025_v24, 0.0 }
 0x164   : > { %v2620_v31 = vpack.c.bf16 %v1500_v23, %v1500_v23  ;;  %v1501_v33 = vmax.f32 %v1281_v25, 0.0  ;;  %2079 = vst.msk [vmem:[%s3281_s25 + $0x88] sm:$0xf] %vm2044_vm1, %v2558_v26  ;;  %v2559_v34 = vpack.c.bf16 %v1439_v28, %v1439_v28 }
 0x165   : > { %2143 = vst.msk [vmem:[%s3281_s25 + $0x188] sm:$0xf] %vm2044_vm1, %v2622_v27  ;;  %v2623_v35 = vpack.c.bf16 %v1503_v29, %v1503_v29  ;;  %2077 = vst.msk [vmem:[%s3281_s25 + $0x80] sm:$0xf] %vm2044_vm1, %v2556_v30  ;;  %v2557_v36 = vpack.c.bf16 %v1437_v32, %v1437_v32  ;;  %v2757_v38 = vpop.f32.mrb[36].mxu0 }
 0x166   : > { %2141 = vst.msk [vmem:[%s3281_s25 + $0x180] sm:$0xf] %vm2044_vm1, %v2620_v31  ;;  %v2621_v37 = vpack.c.bf16 %v1501_v33, %v1501_v33  ;;  %v2821_v39 = vpop.f32.mrb[36].mxu1  ;;  %2080 = vst.msk [vmem:[%s3281_s25 + $0x8c] sm:$0xf] %vm2044_vm1, %v2559_v34  ;;  %v1046_v40 = vadd.f32 %v2757_v38, %v3268_v1  ;;  %v1037_v42 = vpop.f32.mrb[37].mxu0 }
 0x167   : > { %2144 = vst.msk [vmem:[%s3281_s25 + $0x18c] sm:$0xf] %vm2044_vm1, %v2623_v35  ;;  %v1302_v41 = vadd.f32 %v2821_v39, %v3268_v1  ;;  %v1293_v43 = vpop.f32.mrb[37].mxu1  ;;  %2078 = vst.msk [vmem:[%s3281_s25 + $0x84] sm:$0xf] %vm2044_vm1, %v2557_v36  ;;  %v1038_v44 = vadd.f32 %v3268_v1, %v1037_v42  ;;  %v2758_v46 = vpop.f32.mrb[38].mxu0 }
 0x168   : > { %2142 = vst.msk [vmem:[%s3281_s25 + $0x184] sm:$0xf] %vm2044_vm1, %v2621_v37  ;;  %v1294_v45 = vadd.f32 %v3268_v1, %v1293_v43  ;;  %v2822_v47 = vpop.f32.mrb[38].mxu1  ;;  %v1442_v48 = vmax.f32 %v1046_v40, 0.0  ;;  %v1049_v50 = vadd.f32 %v2758_v46, %v3268_v1  ;;  %v1040_v52 = vpop.f32.mrb[39].mxu0 }
 0x169   : > { %v1506_v49 = vmax.f32 %v1302_v41, 0.0  ;;  %v1305_v51 = vadd.f32 %v2822_v47, %v3268_v1  ;;  %v1296_v53 = vpop.f32.mrb[39].mxu1  ;;  %v1440_v54 = vmax.f32 %v1038_v44, 0.0  ;;  %v1041_v56 = vadd.f32 %v3268_v1, %v1040_v52 }
 0x16a   : > { %v1504_v55 = vmax.f32 %v1294_v45, 0.0  ;;  %v1297_v57 = vadd.f32 %v3268_v1, %v1296_v53  ;;  %v2562_v58 = vpack.c.bf16 %v1442_v48, %v1442_v48  ;;  %v1443_v60 = vmax.f32 %v1049_v50, 0.0 }
 0x16b   : > { %v2626_v59 = vpack.c.bf16 %v1506_v49, %v1506_v49  ;;  %v1507_v61 = vmax.f32 %v1305_v51, 0.0  ;;  %v2560_v62 = vpack.c.bf16 %v1440_v54, %v1440_v54  ;;  %v1441_v0 = vmax.f32 %v1041_v56, 0.0 }
 0x16c   : > { %v2624_v63 = vpack.c.bf16 %v1504_v55, %v1504_v55  ;;  %v1505_v2 = vmax.f32 %v1297_v57, 0.0  ;;  %2083 = vst.msk [vmem:[%s3281_s25 + $0x98] sm:$0xf] %vm2044_vm1, %v2562_v58  ;;  %v2563_v3 = vpack.c.bf16 %v1443_v60, %v1443_v60 }
 0x16d   : > { %2147 = vst.msk [vmem:[%s3281_s25 + $0x198] sm:$0xf] %vm2044_vm1, %v2626_v59  ;;  %v2627_v4 = vpack.c.bf16 %v1507_v61, %v1507_v61  ;;  %2081 = vst.msk [vmem:[%s3281_s25 + $0x90] sm:$0xf] %vm2044_vm1, %v2560_v62  ;;  %v2561_v5 = vpack.c.bf16 %v1441_v0, %v1441_v0  ;;  %v2761_v7 = vpop.f32.mrb[40].mxu0 }
 0x16e   : > { %2145 = vst.msk [vmem:[%s3281_s25 + $0x190] sm:$0xf] %vm2044_vm1, %v2624_v63  ;;  %v2625_v6 = vpack.c.bf16 %v1505_v2, %v1505_v2  ;;  %v2825_v8 = vpop.f32.mrb[40].mxu1  ;;  %2084 = vst.msk [vmem:[%s3281_s25 + $0x9c] sm:$0xf] %vm2044_vm1, %v2563_v3  ;;  %v1062_v9 = vadd.f32 %v2761_v7, %v3268_v1  ;;  %v1053_v11 = vpop.f32.mrb[41].mxu0 }
 0x16f   : > { %2148 = vst.msk [vmem:[%s3281_s25 + $0x19c] sm:$0xf] %vm2044_vm1, %v2627_v4  ;;  %v1318_v10 = vadd.f32 %v2825_v8, %v3268_v1  ;;  %v1309_v12 = vpop.f32.mrb[41].mxu1  ;;  %2082 = vst.msk [vmem:[%s3281_s25 + $0x94] sm:$0xf] %vm2044_vm1, %v2561_v5  ;;  %v1054_v13 = vadd.f32 %v3268_v1, %v1053_v11  ;;  %v2762_v15 = vpop.f32.mrb[42].mxu0 }
 0x170   : > { %2146 = vst.msk [vmem:[%s3281_s25 + $0x194] sm:$0xf] %vm2044_vm1, %v2625_v6  ;;  %v1310_v14 = vadd.f32 %v3268_v1, %v1309_v12  ;;  %v2826_v16 = vpop.f32.mrb[42].mxu1  ;;  %v1446_v17 = vmax.f32 %v1062_v9, 0.0  ;;  %v1065_v19 = vadd.f32 %v2762_v15, %v3268_v1  ;;  %v1056_v21 = vpop.f32.mrb[43].mxu0 }
 0x171   : > { %v1510_v18 = vmax.f32 %v1318_v10, 0.0  ;;  %v1321_v20 = vadd.f32 %v2826_v16, %v3268_v1  ;;  %v1312_v22 = vpop.f32.mrb[43].mxu1  ;;  %v1444_v23 = vmax.f32 %v1054_v13, 0.0  ;;  %v1057_v25 = vadd.f32 %v3268_v1, %v1056_v21 }
 0x172   : > { %v1508_v24 = vmax.f32 %v1310_v14, 0.0  ;;  %v1313_v26 = vadd.f32 %v3268_v1, %v1312_v22  ;;  %v2566_v27 = vpack.c.bf16 %v1446_v17, %v1446_v17  ;;  %v1447_v29 = vmax.f32 %v1065_v19, 0.0 }
 0x173   : > { %v2630_v28 = vpack.c.bf16 %v1510_v18, %v1510_v18  ;;  %v1511_v30 = vmax.f32 %v1321_v20, 0.0  ;;  %v2564_v31 = vpack.c.bf16 %v1444_v23, %v1444_v23  ;;  %v1445_v33 = vmax.f32 %v1057_v25, 0.0 }
 0x174   : > { %v2628_v32 = vpack.c.bf16 %v1508_v24, %v1508_v24  ;;  %v1509_v34 = vmax.f32 %v1313_v26, 0.0  ;;  %2087 = vst.msk [vmem:[%s3281_s25 + $0xa8] sm:$0xf] %vm2044_vm1, %v2566_v27  ;;  %v2567_v35 = vpack.c.bf16 %v1447_v29, %v1447_v29 }
 0x175   : > { %2151 = vst.msk [vmem:[%s3281_s25 + $0x1a8] sm:$0xf] %vm2044_vm1, %v2630_v28  ;;  %v2631_v36 = vpack.c.bf16 %v1511_v30, %v1511_v30  ;;  %2085 = vst.msk [vmem:[%s3281_s25 + $0xa0] sm:$0xf] %vm2044_vm1, %v2564_v31  ;;  %v2565_v37 = vpack.c.bf16 %v1445_v33, %v1445_v33  ;;  %v2765_v39 = vpop.f32.mrb[44].mxu0 }
 0x176   : > { %2149 = vst.msk [vmem:[%s3281_s25 + $0x1a0] sm:$0xf] %vm2044_vm1, %v2628_v32  ;;  %v2629_v38 = vpack.c.bf16 %v1509_v34, %v1509_v34  ;;  %v2829_v40 = vpop.f32.mrb[44].mxu1  ;;  %2088 = vst.msk [vmem:[%s3281_s25 + $0xac] sm:$0xf] %vm2044_vm1, %v2567_v35  ;;  %v1078_v41 = vadd.f32 %v2765_v39, %v3268_v1  ;;  %v1069_v43 = vpop.f32.mrb[45].mxu0 }
 0x177   : > { %2152 = vst.msk [vmem:[%s3281_s25 + $0x1ac] sm:$0xf] %vm2044_vm1, %v2631_v36  ;;  %v1334_v42 = vadd.f32 %v2829_v40, %v3268_v1  ;;  %v1325_v44 = vpop.f32.mrb[45].mxu1  ;;  %2086 = vst.msk [vmem:[%s3281_s25 + $0xa4] sm:$0xf] %vm2044_vm1, %v2565_v37  ;;  %v1070_v45 = vadd.f32 %v3268_v1, %v1069_v43  ;;  %v2766_v47 = vpop.f32.mrb[46].mxu0 }
 0x178   : > { %2150 = vst.msk [vmem:[%s3281_s25 + $0x1a4] sm:$0xf] %vm2044_vm1, %v2629_v38  ;;  %v1326_v46 = vadd.f32 %v3268_v1, %v1325_v44  ;;  %v2830_v48 = vpop.f32.mrb[46].mxu1  ;;  %v1450_v49 = vmax.f32 %v1078_v41, 0.0  ;;  %v1081_v51 = vadd.f32 %v2766_v47, %v3268_v1  ;;  %v1072_v53 = vpop.f32.mrb[47].mxu0 }
 0x179   : > { %v1514_v50 = vmax.f32 %v1334_v42, 0.0  ;;  %v1337_v52 = vadd.f32 %v2830_v48, %v3268_v1  ;;  %v1328_v54 = vpop.f32.mrb[47].mxu1  ;;  %v1448_v55 = vmax.f32 %v1070_v45, 0.0  ;;  %v1073_v57 = vadd.f32 %v3268_v1, %v1072_v53  ;;  %v3585_v41 = vld [vmem:[#allocation4] ss:$0 sm:$0xff] }
 0x17a   : > { %v1512_v56 = vmax.f32 %v1326_v46, 0.0  ;;  %v1329_v58 = vadd.f32 %v3268_v1, %v1328_v54  ;;  %v2570_v59 = vpack.c.bf16 %v1450_v49, %v1450_v49  ;;  %v1451_v61 = vmax.f32 %v1081_v51, 0.0 }
 0x17b   : > { %v2634_v60 = vpack.c.bf16 %v1514_v50, %v1514_v50  ;;  %v1515_v62 = vmax.f32 %v1337_v52, 0.0  ;;  %v2568_v63 = vpack.c.bf16 %v1448_v55, %v1448_v55  ;;  %v1449_v2 = vmax.f32 %v1073_v57, 0.0 }
 0x17c   : > { %v2632_v0 = vpack.c.bf16 %v1512_v56, %v1512_v56  ;;  %v1513_v3 = vmax.f32 %v1329_v58, 0.0  ;;  %2091 = vst.msk [vmem:[%s3281_s25 + $0xb8] sm:$0xf] %vm2044_vm1, %v2570_v59  ;;  %v2571_v4 = vpack.c.bf16 %v1451_v61, %v1451_v61 }
 0x17d   : > { %2155 = vst.msk [vmem:[%s3281_s25 + $0x1b8] sm:$0xf] %vm2044_vm1, %v2634_v60  ;;  %v2635_v5 = vpack.c.bf16 %v1515_v62, %v1515_v62  ;;  %2089 = vst.msk [vmem:[%s3281_s25 + $0xb0] sm:$0xf] %vm2044_vm1, %v2568_v63  ;;  %v2569_v6 = vpack.c.bf16 %v1449_v2, %v1449_v2  ;;  %v2769_v8 = vpop.f32.mrb[48].mxu0 }
 0x17e   : > { %2153 = vst.msk [vmem:[%s3281_s25 + $0x1b0] sm:$0xf] %vm2044_vm1, %v2632_v0  ;;  %v2633_v7 = vpack.c.bf16 %v1513_v3, %v1513_v3  ;;  %v2833_v9 = vpop.f32.mrb[48].mxu1  ;;  %2092 = vst.msk [vmem:[%s3281_s25 + $0xbc] sm:$0xf] %vm2044_vm1, %v2571_v4  ;;  %v1094_v10 = vadd.f32 %v2769_v8, %v3268_v1  ;;  %v1085_v12 = vpop.f32.mrb[49].mxu0 }
 0x17f   : > { %2156 = vst.msk [vmem:[%s3281_s25 + $0x1bc] sm:$0xf] %vm2044_vm1, %v2635_v5  ;;  %v1350_v11 = vadd.f32 %v2833_v9, %v3268_v1  ;;  %v1341_v13 = vpop.f32.mrb[49].mxu1  ;;  %2090 = vst.msk [vmem:[%s3281_s25 + $0xb4] sm:$0xf] %vm2044_vm1, %v2569_v6  ;;  %v1086_v14 = vadd.f32 %v3268_v1, %v1085_v12  ;;  %v2770_v16 = vpop.f32.mrb[50].mxu0 }
 0x180   : > { %2154 = vst.msk [vmem:[%s3281_s25 + $0x1b4] sm:$0xf] %vm2044_vm1, %v2633_v7  ;;  %v1342_v15 = vadd.f32 %v3268_v1, %v1341_v13  ;;  %v2834_v17 = vpop.f32.mrb[50].mxu1  ;;  %v1454_v18 = vmax.f32 %v1094_v10, 0.0  ;;  %v1097_v20 = vadd.f32 %v2770_v16, %v3268_v1  ;;  %v1088_v22 = vpop.f32.mrb[51].mxu0 }
 0x181   : > { %v1518_v19 = vmax.f32 %v1350_v11, 0.0  ;;  %v1353_v21 = vadd.f32 %v2834_v17, %v3268_v1  ;;  %v1344_v23 = vpop.f32.mrb[51].mxu1  ;;  %v1452_v24 = vmax.f32 %v1086_v14, 0.0  ;;  %v1089_v26 = vadd.f32 %v3268_v1, %v1088_v22 }
 0x182   : > { %v1516_v25 = vmax.f32 %v1342_v15, 0.0  ;;  %v1345_v27 = vadd.f32 %v3268_v1, %v1344_v23  ;;  %v2574_v28 = vpack.c.bf16 %v1454_v18, %v1454_v18  ;;  %v1455_v30 = vmax.f32 %v1097_v20, 0.0 }
 0x183   : > { %v2638_v29 = vpack.c.bf16 %v1518_v19, %v1518_v19  ;;  %v1519_v31 = vmax.f32 %v1353_v21, 0.0  ;;  %v2572_v32 = vpack.c.bf16 %v1452_v24, %v1452_v24  ;;  %v1453_v34 = vmax.f32 %v1089_v26, 0.0 }
 0x184   : > { %v2636_v33 = vpack.c.bf16 %v1516_v25, %v1516_v25  ;;  %v1517_v35 = vmax.f32 %v1345_v27, 0.0  ;;  %2095 = vst.msk [vmem:[%s3281_s25 + $0xc8] sm:$0xf] %vm2044_vm1, %v2574_v28  ;;  %v2575_v36 = vpack.c.bf16 %v1455_v30, %v1455_v30 }
 0x185   : > { %2159 = vst.msk [vmem:[%s3281_s25 + $0x1c8] sm:$0xf] %vm2044_vm1, %v2638_v29  ;;  %v2639_v37 = vpack.c.bf16 %v1519_v31, %v1519_v31  ;;  %2093 = vst.msk [vmem:[%s3281_s25 + $0xc0] sm:$0xf] %vm2044_vm1, %v2572_v32  ;;  %v2573_v1 = vpack.c.bf16 %v1453_v34, %v1453_v34  ;;  %v2773_v39 = vpop.f32.mrb[52].mxu0 }
 0x186   : > { %2157 = vst.msk [vmem:[%s3281_s25 + $0x1c0] sm:$0xf] %vm2044_vm1, %v2636_v33  ;;  %v2637_v38 = vpack.c.bf16 %v1517_v35, %v1517_v35  ;;  %v2837_v40 = vpop.f32.mrb[52].mxu1  ;;  %2096 = vst.msk [vmem:[%s3281_s25 + $0xcc] sm:$0xf] %vm2044_vm1, %v2575_v36  ;;  %v1110_v42 = vadd.f32 %v3585_v41, %v2773_v39  ;;  %v1101_v44 = vpop.f32.mrb[53].mxu0 }
 0x187   : > { %2160 = vst.msk [vmem:[%s3281_s25 + $0x1cc] sm:$0xf] %vm2044_vm1, %v2639_v37  ;;  %v1366_v43 = vadd.f32 %v3585_v41, %v2837_v40  ;;  %v1357_v45 = vpop.f32.mrb[53].mxu1  ;;  %2094 = vst.msk [vmem:[%s3281_s25 + $0xc4] sm:$0xf] %vm2044_vm1, %v2573_v1  ;;  %v1102_v46 = vadd.f32 %v3585_v41, %v1101_v44  ;;  %v2774_v48 = vpop.f32.mrb[54].mxu0 }
 0x188   : > { %2158 = vst.msk [vmem:[%s3281_s25 + $0x1c4] sm:$0xf] %vm2044_vm1, %v2637_v38  ;;  %v1358_v47 = vadd.f32 %v3585_v41, %v1357_v45  ;;  %v2838_v49 = vpop.f32.mrb[54].mxu1  ;;  %v1458_v50 = vmax.f32 %v1110_v42, 0.0  ;;  %v1113_v52 = vadd.f32 %v3585_v41, %v2774_v48  ;;  %v1104_v54 = vpop.f32.mrb[55].mxu0 }
 0x189   : > { %v1522_v51 = vmax.f32 %v1366_v43, 0.0  ;;  %v1369_v53 = vadd.f32 %v3585_v41, %v2838_v49  ;;  %v1360_v55 = vpop.f32.mrb[55].mxu1  ;;  %v1456_v56 = vmax.f32 %v1102_v46, 0.0  ;;  %v1105_v58 = vadd.f32 %v3585_v41, %v1104_v54 }
 0x18a   : > { %v1520_v57 = vmax.f32 %v1358_v47, 0.0  ;;  %v1361_v59 = vadd.f32 %v3585_v41, %v1360_v55  ;;  %v2578_v60 = vpack.c.bf16 %v1458_v50, %v1458_v50  ;;  %v1459_v62 = vmax.f32 %v1113_v52, 0.0 }
 0x18b   : > { %v2642_v61 = vpack.c.bf16 %v1522_v51, %v1522_v51  ;;  %v1523_v63 = vmax.f32 %v1369_v53, 0.0  ;;  %v2576_v0 = vpack.c.bf16 %v1456_v56, %v1456_v56  ;;  %v1457_v3 = vmax.f32 %v1105_v58, 0.0 }
 0x18c   : > { %v2640_v2 = vpack.c.bf16 %v1520_v57, %v1520_v57  ;;  %v1521_v4 = vmax.f32 %v1361_v59, 0.0  ;;  %2099 = vst.msk [vmem:[%s3281_s25 + $0xd8] sm:$0xf] %vm2044_vm1, %v2578_v60  ;;  %v2579_v5 = vpack.c.bf16 %v1459_v62, %v1459_v62 }
 0x18d   : > { %2163 = vst.msk [vmem:[%s3281_s25 + $0x1d8] sm:$0xf] %vm2044_vm1, %v2642_v61  ;;  %v2643_v6 = vpack.c.bf16 %v1523_v63, %v1523_v63  ;;  %2097 = vst.msk [vmem:[%s3281_s25 + $0xd0] sm:$0xf] %vm2044_vm1, %v2576_v0  ;;  %v2577_v7 = vpack.c.bf16 %v1457_v3, %v1457_v3  ;;  %v2777_v9 = vpop.f32.mrb[56].mxu0 }
 0x18e   : > { %2161 = vst.msk [vmem:[%s3281_s25 + $0x1d0] sm:$0xf] %vm2044_vm1, %v2640_v2  ;;  %v2641_v8 = vpack.c.bf16 %v1521_v4, %v1521_v4  ;;  %v2841_v10 = vpop.f32.mrb[56].mxu1  ;;  %2100 = vst.msk [vmem:[%s3281_s25 + $0xdc] sm:$0xf] %vm2044_vm1, %v2579_v5  ;;  %v1126_v11 = vadd.f32 %v3585_v41, %v2777_v9  ;;  %v1117_v13 = vpop.f32.mrb[57].mxu0 }
 0x18f   : > { %2164 = vst.msk [vmem:[%s3281_s25 + $0x1dc] sm:$0xf] %vm2044_vm1, %v2643_v6  ;;  %v1382_v12 = vadd.f32 %v3585_v41, %v2841_v10  ;;  %v1373_v14 = vpop.f32.mrb[57].mxu1  ;;  %2098 = vst.msk [vmem:[%s3281_s25 + $0xd4] sm:$0xf] %vm2044_vm1, %v2577_v7  ;;  %v1118_v15 = vadd.f32 %v3585_v41, %v1117_v13  ;;  %v2778_v17 = vpop.f32.mrb[58].mxu0 }
 0x190   : > { %2162 = vst.msk [vmem:[%s3281_s25 + $0x1d4] sm:$0xf] %vm2044_vm1, %v2641_v8  ;;  %v1374_v16 = vadd.f32 %v3585_v41, %v1373_v14  ;;  %v2842_v18 = vpop.f32.mrb[58].mxu1  ;;  %v1462_v19 = vmax.f32 %v1126_v11, 0.0  ;;  %v1129_v21 = vadd.f32 %v3585_v41, %v2778_v17  ;;  %v1120_v23 = vpop.f32.mrb[59].mxu0 }
 0x191   : > { %v1526_v20 = vmax.f32 %v1382_v12, 0.0  ;;  %v1385_v22 = vadd.f32 %v3585_v41, %v2842_v18  ;;  %v1376_v24 = vpop.f32.mrb[59].mxu1  ;;  %v1460_v25 = vmax.f32 %v1118_v15, 0.0  ;;  %v1121_v27 = vadd.f32 %v3585_v41, %v1120_v23 }
 0x192   : > { %v1524_v26 = vmax.f32 %v1374_v16, 0.0  ;;  %v1377_v28 = vadd.f32 %v3585_v41, %v1376_v24  ;;  %v2582_v29 = vpack.c.bf16 %v1462_v19, %v1462_v19  ;;  %v1463_v31 = vmax.f32 %v1129_v21, 0.0 }
 0x193   : > { %v2646_v30 = vpack.c.bf16 %v1526_v20, %v1526_v20  ;;  %v1527_v32 = vmax.f32 %v1385_v22, 0.0  ;;  %v2580_v33 = vpack.c.bf16 %v1460_v25, %v1460_v25  ;;  %v1461_v35 = vmax.f32 %v1121_v27, 0.0 }
 0x194   : > { %v2644_v34 = vpack.c.bf16 %v1524_v26, %v1524_v26  ;;  %v1525_v36 = vmax.f32 %v1377_v28, 0.0  ;;  %2103 = vst.msk [vmem:[%s3281_s25 + $0xe8] sm:$0xf] %vm2044_vm1, %v2582_v29  ;;  %v2583_v37 = vpack.c.bf16 %v1463_v31, %v1463_v31 }
 0x195   : > { %2167 = vst.msk [vmem:[%s3281_s25 + $0x1e8] sm:$0xf] %vm2044_vm1, %v2646_v30  ;;  %v2647_v1 = vpack.c.bf16 %v1527_v32, %v1527_v32  ;;  %2101 = vst.msk [vmem:[%s3281_s25 + $0xe0] sm:$0xf] %vm2044_vm1, %v2580_v33  ;;  %v2581_v38 = vpack.c.bf16 %v1461_v35, %v1461_v35  ;;  %v2781_v40 = vpop.f32.mrb[60].mxu0 }
 0x196   : > { %2165 = vst.msk [vmem:[%s3281_s25 + $0x1e0] sm:$0xf] %vm2044_vm1, %v2644_v34  ;;  %v2645_v39 = vpack.c.bf16 %v1525_v36, %v1525_v36  ;;  %v2845_v42 = vpop.f32.mrb[60].mxu1  ;;  %2104 = vst.msk [vmem:[%s3281_s25 + $0xec] sm:$0xf] %vm2044_vm1, %v2583_v37  ;;  %v1142_v43 = vadd.f32 %v3585_v41, %v2781_v40  ;;  %v1133_v45 = vpop.f32.mrb[61].mxu0 }
 0x197   : > { %2168 = vst.msk [vmem:[%s3281_s25 + $0x1ec] sm:$0xf] %vm2044_vm1, %v2647_v1  ;;  %v1398_v44 = vadd.f32 %v3585_v41, %v2845_v42  ;;  %v1389_v46 = vpop.f32.mrb[61].mxu1  ;;  %2102 = vst.msk [vmem:[%s3281_s25 + $0xe4] sm:$0xf] %vm2044_vm1, %v2581_v38  ;;  %v1134_v47 = vadd.f32 %v3585_v41, %v1133_v45  ;;  %v2782_v49 = vpop.f32.mrb[62].mxu0 }
 0x198   : > { %2166 = vst.msk [vmem:[%s3281_s25 + $0x1e4] sm:$0xf] %vm2044_vm1, %v2645_v39  ;;  %v1390_v48 = vadd.f32 %v3585_v41, %v1389_v46  ;;  %v2846_v50 = vpop.f32.mrb[62].mxu1  ;;  %v1466_v51 = vmax.f32 %v1142_v43, 0.0  ;;  %v1145_v53 = vadd.f32 %v3585_v41, %v2782_v49  ;;  %v1136_v55 = vpop.f32.mrb[63].mxu0 }
 0x199   : > { %v1530_v52 = vmax.f32 %v1398_v44, 0.0  ;;  %v1401_v54 = vadd.f32 %v3585_v41, %v2846_v50  ;;  %v1392_v56 = vpop.f32.mrb[63].mxu1  ;;  %v1464_v57 = vmax.f32 %v1134_v47, 0.0  ;;  %v1137_v59 = vadd.f32 %v3585_v41, %v1136_v55 }
 0x19a   : > { %v1528_v58 = vmax.f32 %v1390_v48, 0.0  ;;  %v1393_v60 = vadd.f32 %v3585_v41, %v1392_v56  ;;  %v2586_v61 = vpack.c.bf16 %v1466_v51, %v1466_v51  ;;  %v1467_v63 = vmax.f32 %v1145_v53, 0.0 }
 0x19b   : > { %v2650_v62 = vpack.c.bf16 %v1530_v52, %v1530_v52  ;;  %v1531_v0 = vmax.f32 %v1401_v54, 0.0  ;;  %v2584_v2 = vpack.c.bf16 %v1464_v57, %v1464_v57  ;;  %v1465_v4 = vmax.f32 %v1137_v59, 0.0 }
 0x19c   : > { %v2648_v3 = vpack.c.bf16 %v1528_v58, %v1528_v58  ;;  %v1529_v5 = vmax.f32 %v1393_v60, 0.0  ;;  %2107 = vst.msk [vmem:[%s3281_s25 + $0xf8] sm:$0xf] %vm2044_vm1, %v2586_v61  ;;  %v2587_v6 = vpack.c.bf16 %v1467_v63, %v1467_v63 }
 0x19d   : > { %2171 = vst.msk [vmem:[%s3281_s25 + $0x1f8] sm:$0xf] %vm2044_vm1, %v2650_v62  ;;  %v2651_v7 = vpack.c.bf16 %v1531_v0, %v1531_v0  ;;  %2105 = vst.msk [vmem:[%s3281_s25 + $0xf0] sm:$0xf] %vm2044_vm1, %v2584_v2  ;;  %v2585_v41 = vpack.c.bf16 %v1465_v4, %v1465_v4 }
 0x19e   : > { %2169 = vst.msk [vmem:[%s3281_s25 + $0x1f0] sm:$0xf] %vm2044_vm1, %v2648_v3  ;;  %v2649_v8 = vpack.c.bf16 %v1529_v5, %v1529_v5  ;;  %2108 = vst.msk [vmem:[%s3281_s25 + $0xfc] sm:$0xf] %vm2044_vm1, %v2587_v6 }
 0x19f   : > { %2172 = vst.msk [vmem:[%s3281_s25 + $0x1fc] sm:$0xf] %vm2044_vm1, %v2651_v7  ;;  %2106 = vst.msk [vmem:[%s3281_s25 + $0xf4] sm:$0xf] %vm2044_vm1, %v2585_v41 }
 0x1a0   : > { %2170 = vst.msk [vmem:[%s3281_s25 + $0x1f4] sm:$0xf] %vm2044_vm1, %v2649_v8 }
 0x1a1 PF: > { %s15_s12 = sadd.s32 1, %s3016_s12  }
 0x1a2   : > { %p12_p5 = scmp.ge.s32.totalorder %s15_s12, 4  }
 0x1a4   :  { %14 = sbr.rel (!%p12_p5) target bundleno = 2 (0x2), region = 71 }
 0x1ab   :  { %2195 = vsyncpa [#allocation3], 1 }
 0x1ac   :  { %2197 = vsyncpa [#allocation3 + $0x1], 1 }
 0x1ad   :  { %2198 = vsyncpa [#allocation5], 1 }

// kernel: vae_forward.10
= control target key start
LH: loop header
LB: loop body
LE: loop exit
PB: predicated region body
PF: predicated region fallthrough
CT: control target
= control target key end

     0   :  { %v2656_v0 = vmov 0   ;;  %vm1944_vm0 = vcmask 257024   ;;  %s3519_s1 = inlined_call_operand.vmem [shape: bf16[512,32], index: 1, kind: input, shape index: {}]   ;;  %s3520_s0 = inlined_call_operand.vmem [shape: bf16[512,512], index: 0, kind: input, shape index: {}]   ;;  %s3521_s2 = inlined_call_operand.vmem [shape: f32[1,32], index: 2, kind: input, shape index: {}]   ;;  %s3522_s3 = inlined_call_operand.vmem [shape: bf16[512,32], index: 3, kind: output, shape index: {}]  }
   0x1   :  { %1046 = vmatprep.subr.bf16.mxu1 %v2656_v0  ;;  %1335 = vmatprep.subr.bf16.mxu0 %v2656_v0  ;;  %v2431_v1 = vld [vmem:[%s3519_s1] sm:$0xff]   ;;  %v2433_v3 = vld [vmem:[%s3519_s1 + $0x8] sm:$0xff]   ;;  %v2435_v5 = vld [vmem:[%s3519_s1 + $0x10] sm:$0xff]  }
   0x2   :  { %v2432_v2 = vld [vmem:[%s3519_s1 + $0x80] sm:$0xff]   ;;  %1047 = vmatpush1.bf16.msra.mxu1 %v2431_v1  ;;  %v2434_v4 = vld [vmem:[%s3519_s1 + $0x88] sm:$0xff]   ;;  %v2436_v6 = vld [vmem:[%s3519_s1 + $0x90] sm:$0xff]  }
   0x3   :  { %1336 = vmatpush1.bf16.msra.mxu0 %v2432_v2  ;;  %1048 = vmatprep.subr.bf16.mxu1 %v2656_v0  ;;  %v2437_v7 = vld [vmem:[%s3519_s1 + $0x18] sm:$0xff]   ;;  %v2439_v9 = vld [vmem:[%s3519_s1 + $0x20] sm:$0xff]   ;;  %v2441_v11 = vld [vmem:[%s3519_s1 + $0x28] sm:$0xff]  }
   0x4   :  { %1337 = vmatprep.subr.bf16.mxu0 %v2656_v0  ;;  %v2438_v8 = vld [vmem:[%s3519_s1 + $0x98] sm:$0xff]   ;;  %v2440_v10 = vld [vmem:[%s3519_s1 + $0xa0] sm:$0xff]   ;;  %v2442_v12 = vld [vmem:[%s3519_s1 + $0xa8] sm:$0xff]  }
   0x5   :  { %v2443_v13 = vld [vmem:[%s3519_s1 + $0x30] sm:$0xff]   ;;  %v2445_v15 = vld [vmem:[%s3519_s1 + $0x38] sm:$0xff]   ;;  %v2447_v17 = vld [vmem:[%s3519_s1 + $0x40] sm:$0xff]  }
   0x6   :  { %1049 = vmatpush1.bf16.msra.mxu1 %v2433_v3  ;;  %v2444_v14 = vld [vmem:[%s3519_s1 + $0xb0] sm:$0xff]   ;;  %v2446_v16 = vld [vmem:[%s3519_s1 + $0xb8] sm:$0xff]   ;;  %v2448_v18 = vld [vmem:[%s3519_s1 + $0xc0] sm:$0xff]  }
   0x7   :  { %1338 = vmatpush1.bf16.msra.mxu0 %v2434_v4  ;;  %1050 = vmatprep.subr.bf16.mxu1 %v2656_v0  ;;  %v2465_v19 = vld [vmem:[%s3520_s0 + $0x4] ss:$16 sps:$4 sm:$0xff]   ;;  %v2449_v20 = vld [vmem:[%s3519_s1 + $0x48] sm:$0xff]   ;;  %v2453_v25 = vld [vmem:[%s3519_s1 + $0x58] sm:$0xff]  }
   0x8   :  { %1339 = vmatprep.subr.bf16.mxu0 %v2656_v0  ;;  %v2468_v21 = vld [vmem:[%s3520_s0 + $0xc] ss:$16 sps:$4 sm:$0xff]   ;;  %1078 = vmatprep.mubr.bf16.mxu1 %v2465_v19  ;;  %v2451_v23 = vld [vmem:[%s3519_s1 + $0x50] sm:$0xff]   ;;  %v2455_v27 = vld [vmem:[%s3519_s1 + $0x60] sm:$0xff]  }
   0x9   :  { %v2450_v22 = vld [vmem:[%s3519_s1 + $0xc8] sm:$0xff]   ;;  %1367 = vmatprep.mubr.bf16.mxu0 %v2468_v21  ;;  %v2452_v24 = vld [vmem:[%s3519_s1 + $0xd0] sm:$0xff]   ;;  %v2454_v26 = vld [vmem:[%s3519_s1 + $0xd8] sm:$0xff]  }
   0xa   :  { %1051 = vmatpush1.bf16.msra.mxu1 %v2435_v5  ;;  %v2456_v28 = vld [vmem:[%s3519_s1 + $0xe0] sm:$0xff]   ;;  %v2457_v29 = vld [vmem:[%s3519_s1 + $0x68] sm:$0xff]   ;;  %v2459_v31 = vld [vmem:[%s3519_s1 + $0x70] sm:$0xff]  }
   0xb   :  { %1340 = vmatpush1.bf16.msra.mxu0 %v2436_v6  ;;  %1052 = vmatprep.subr.bf16.mxu1 %v2656_v0  ;;  %v2458_v30 = vld [vmem:[%s3519_s1 + $0xe8] sm:$0xff]   ;;  %v2460_v32 = vld [vmem:[%s3519_s1 + $0xf0] sm:$0xff]   ;;  %v2461_v33 = vld [vmem:[%s3519_s1 + $0x78] sm:$0xff]  }
   0xc   :  { %1341 = vmatprep.subr.bf16.mxu0 %v2656_v0  ;;  %v2462_v34 = vld [vmem:[%s3519_s1 + $0xf8] sm:$0xff]   ;;  %v2463_v35 = vld [vmem:[%s3520_s0] ss:$16 sps:$4 sm:$0xff]   ;;  %v2469_v37 = vld [vmem:[%s3520_s0 + $0x24] ss:$16 sps:$4 sm:$0xff]  }
   0xd   :  { %v2466_v36 = vld [vmem:[%s3520_s0 + $0x8] ss:$16 sps:$4 sm:$0xff]   ;;  %v2471_v38 = vld [vmem:[%s3520_s0 + $0x2c] ss:$16 sps:$4 sm:$0xff]   ;;  %v2473_v39 = vld [vmem:[%s3520_s0 + $0x20] ss:$16 sps:$4 sm:$0xff]  }
   0xe   :  { %1053 = vmatpush1.bf16.msra.mxu1 %v2437_v7  ;;  %v2474_v40 = vld [vmem:[%s3520_s0 + $0x28] ss:$16 sps:$4 sm:$0xff]   ;;  %v2475_v41 = vld [vmem:[%s3520_s0 + $0x44] ss:$16 sps:$4 sm:$0xff]   ;;  %v2477_v42 = vld [vmem:[%s3520_s0 + $0x4c] ss:$16 sps:$4 sm:$0xff]  }
   0xf   :  { %1342 = vmatpush1.bf16.msra.mxu0 %v2438_v8  ;;  %1054 = vmatprep.subr.bf16.mxu1 %v2656_v0  ;;  %v2479_v43 = vld [vmem:[%s3520_s0 + $0x40] ss:$16 sps:$4 sm:$0xff]   ;;  %v2480_v44 = vld [vmem:[%s3520_s0 + $0x48] ss:$16 sps:$4 sm:$0xff]   ;;  %v2481_v45 = vld [vmem:[%s3520_s0 + $0x64] ss:$16 sps:$4 sm:$0xff]  }
  0x10   :  { %1343 = vmatprep.subr.bf16.mxu0 %v2656_v0  ;;  %v2483_v46 = vld [vmem:[%s3520_s0 + $0x6c] ss:$16 sps:$4 sm:$0xff]   ;;  %v2485_v47 = vld [vmem:[%s3520_s0 + $0x60] ss:$16 sps:$4 sm:$0xff]   ;;  %v2486_v48 = vld [vmem:[%s3520_s0 + $0x68] ss:$16 sps:$4 sm:$0xff]  }
  0x11   :  { %v2487_v49 = vld [vmem:[%s3520_s0 + $0x84] ss:$16 sps:$4 sm:$0xff]   ;;  %v2489_v50 = vld [vmem:[%s3520_s0 + $0x8c] ss:$16 sps:$4 sm:$0xff]   ;;  %v2491_v51 = vld [vmem:[%s3520_s0 + $0x80] ss:$16 sps:$4 sm:$0xff]  }
  0x12   :  { %1055 = vmatpush1.bf16.msra.mxu1 %v2439_v9  ;;  %v2492_v52 = vld [vmem:[%s3520_s0 + $0x88] ss:$16 sps:$4 sm:$0xff]   ;;  %v2493_v53 = vld [vmem:[%s3520_s0 + $0xa4] ss:$16 sps:$4 sm:$0xff]   ;;  %v2495_v54 = vld [vmem:[%s3520_s0 + $0xac] ss:$16 sps:$4 sm:$0xff]  }
  0x13   :  { %1344 = vmatpush1.bf16.msra.mxu0 %v2440_v10  ;;  %1056 = vmatprep.subr.bf16.mxu1 %v2656_v0  ;;  %v2497_v55 = vld [vmem:[%s3520_s0 + $0xa0] ss:$16 sps:$4 sm:$0xff]   ;;  %v2498_v56 = vld [vmem:[%s3520_s0 + $0xa8] ss:$16 sps:$4 sm:$0xff]   ;;  %v2499_v57 = vld [vmem:[%s3520_s0 + $0xc4] ss:$16 sps:$4 sm:$0xff]  }
  0x14   :  { %1345 = vmatprep.subr.bf16.mxu0 %v2656_v0  ;;  %v2501_v58 = vld [vmem:[%s3520_s0 + $0xcc] ss:$16 sps:$4 sm:$0xff]   ;;  %v2503_v59 = vld [vmem:[%s3520_s0 + $0xc0] ss:$16 sps:$4 sm:$0xff]   ;;  %v2504_v60 = vld [vmem:[%s3520_s0 + $0xc8] ss:$16 sps:$4 sm:$0xff]  }
  0x15   :  { %v2505_v61 = vld [vmem:[%s3520_s0 + $0xe4] ss:$16 sps:$4 sm:$0xff]   ;;  %v2507_v62 = vld [vmem:[%s3520_s0 + $0xec] ss:$16 sps:$4 sm:$0xff]   ;;  %v2509_v63 = vld [vmem:[%s3520_s0 + $0xe0] ss:$16 sps:$4 sm:$0xff]  }
  0x16   :  { %1057 = vmatpush1.bf16.msra.mxu1 %v2441_v11  ;;  %v2511_v1 = vld [vmem:[%s3520_s0 + $0x104] ss:$16 sps:$4 sm:$0xff]   ;;  %v2513_v2 = vld [vmem:[%s3520_s0 + $0x10c] ss:$16 sps:$4 sm:$0xff]   ;;  %v2515_v3 = vld [vmem:[%s3520_s0 + $0x100] ss:$16 sps:$4 sm:$0xff]  }
  0x17   :  { %1346 = vmatpush1.bf16.msra.mxu0 %v2442_v12  ;;  %1058 = vmatprep.subr.bf16.mxu1 %v2656_v0  ;;  %v2516_v4 = vld [vmem:[%s3520_s0 + $0x108] ss:$16 sps:$4 sm:$0xff]   ;;  %v2517_v5 = vld [vmem:[%s3520_s0 + $0x124] ss:$16 sps:$4 sm:$0xff]   ;;  %v2519_v6 = vld [vmem:[%s3520_s0 + $0x12c] ss:$16 sps:$4 sm:$0xff]  }
  0x18   :  { %1347 = vmatprep.subr.bf16.mxu0 %v2656_v0  ;;  %v2521_v7 = vld [vmem:[%s3520_s0 + $0x120] ss:$16 sps:$4 sm:$0xff]   ;;  %v2522_v8 = vld [vmem:[%s3520_s0 + $0x128] ss:$16 sps:$4 sm:$0xff]   ;;  %v2523_v9 = vld [vmem:[%s3520_s0 + $0x144] ss:$16 sps:$4 sm:$0xff]  }
  0x19   :  { %v2525_v10 = vld [vmem:[%s3520_s0 + $0x14c] ss:$16 sps:$4 sm:$0xff]   ;;  %v2527_v11 = vld [vmem:[%s3520_s0 + $0x140] ss:$16 sps:$4 sm:$0xff]   ;;  %v2528_v12 = vld [vmem:[%s3520_s0 + $0x148] ss:$16 sps:$4 sm:$0xff]  }
  0x1a   :  { %1059 = vmatpush1.bf16.msra.mxu1 %v2443_v13  ;;  %v2529_v13 = vld [vmem:[%s3520_s0 + $0x164] ss:$16 sps:$4 sm:$0xff]   ;;  %v2539_v19 = vld [vmem:[%s3520_s0 + $0x180] ss:$16 sps:$4 sm:$0xff]  }
  0x1b   :  { %1348 = vmatpush1.bf16.msra.mxu0 %v2444_v14  ;;  %1060 = vmatprep.subr.bf16.mxu1 %v2656_v0  ;;  %v2531_v14 = vld [vmem:[%s3520_s0 + $0x16c] ss:$16 sps:$4 sm:$0xff]   ;;  %v2541_v21 = vld [vmem:[%s3520_s0 + $0x1a4] ss:$16 sps:$4 sm:$0xff]  }
  0x1c   :  { %1349 = vmatprep.subr.bf16.mxu0 %v2656_v0 }
  0x1e   :  { %1061 = vmatpush1.bf16.msra.mxu1 %v2445_v15  ;;  %v2533_v15 = vld [vmem:[%s3520_s0 + $0x160] ss:$16 sps:$4 sm:$0xff]  }
  0x1f   :  { %1350 = vmatpush1.bf16.msra.mxu0 %v2446_v16  ;;  %1062 = vmatprep.subr.bf16.mxu1 %v2656_v0  ;;  %v2534_v16 = vld [vmem:[%s3520_s0 + $0x168] ss:$16 sps:$4 sm:$0xff]  }
  0x20   :  { %1351 = vmatprep.subr.bf16.mxu0 %v2656_v0 }
  0x22   :  { %1063 = vmatpush1.bf16.msra.mxu1 %v2447_v17  ;;  %v2535_v17 = vld [vmem:[%s3520_s0 + $0x184] ss:$16 sps:$4 sm:$0xff]  }
  0x23   :  { %1352 = vmatpush1.bf16.msra.mxu0 %v2448_v18  ;;  %1064 = vmatprep.subr.bf16.mxu1 %v2656_v0  ;;  %v2537_v18 = vld [vmem:[%s3520_s0 + $0x18c] ss:$16 sps:$4 sm:$0xff]  }
  0x24   :  { %1353 = vmatprep.subr.bf16.mxu0 %v2656_v0 }
  0x26   :  { %1065 = vmatpush1.bf16.msra.mxu1 %v2449_v20  ;;  %v2540_v20 = vld [vmem:[%s3520_s0 + $0x188] ss:$16 sps:$4 sm:$0xff]  }
  0x27   :  { %1354 = vmatpush1.bf16.msra.mxu0 %v2450_v22  ;;  %1066 = vmatprep.subr.bf16.mxu1 %v2656_v0  ;;  %v2543_v22 = vld [vmem:[%s3520_s0 + $0x1ac] ss:$16 sps:$4 sm:$0xff]  }
  0x28   :  { %1355 = vmatprep.subr.bf16.mxu0 %v2656_v0 }
  0x2a   :  { %1067 = vmatpush1.bf16.msra.mxu1 %v2451_v23  ;;  %v2545_v23 = vld [vmem:[%s3520_s0 + $0x1a0] ss:$16 sps:$4 sm:$0xff]  }
  0x2b   :  { %1356 = vmatpush1.bf16.msra.mxu0 %v2452_v24  ;;  %1068 = vmatprep.subr.bf16.mxu1 %v2656_v0  ;;  %v2546_v24 = vld [vmem:[%s3520_s0 + $0x1a8] ss:$16 sps:$4 sm:$0xff]  }
  0x2c   :  { %1357 = vmatprep.subr.bf16.mxu0 %v2656_v0 }
  0x2e   :  { %1069 = vmatpush1.bf16.msra.mxu1 %v2453_v25  ;;  %v2547_v25 = vld [vmem:[%s3520_s0 + $0x1c4] ss:$16 sps:$4 sm:$0xff]  }
  0x2f   :  { %1358 = vmatpush1.bf16.msra.mxu0 %v2454_v26  ;;  %1070 = vmatprep.subr.bf16.mxu1 %v2656_v0  ;;  %v2549_v26 = vld [vmem:[%s3520_s0 + $0x1cc] ss:$16 sps:$4 sm:$0xff]  }
  0x30   :  { %1359 = vmatprep.subr.bf16.mxu0 %v2656_v0 }
  0x32   :  { %1071 = vmatpush1.bf16.msra.mxu1 %v2455_v27  ;;  %v2551_v27 = vld [vmem:[%s3520_s0 + $0x1c0] ss:$16 sps:$4 sm:$0xff]  }
  0x33   :  { %1360 = vmatpush1.bf16.msra.mxu0 %v2456_v28  ;;  %1072 = vmatprep.subr.bf16.mxu1 %v2656_v0  ;;  %v2552_v28 = vld [vmem:[%s3520_s0 + $0x1c8] ss:$16 sps:$4 sm:$0xff]  }
  0x34   :  { %1361 = vmatprep.subr.bf16.mxu0 %v2656_v0 }
  0x36   :  { %1073 = vmatpush1.bf16.msra.mxu1 %v2457_v29  ;;  %v2553_v29 = vld [vmem:[%s3520_s0 + $0x1e4] ss:$16 sps:$4 sm:$0xff]  }
  0x37   :  { %1362 = vmatpush1.bf16.msra.mxu0 %v2458_v30  ;;  %1074 = vmatprep.subr.bf16.mxu1 %v2656_v0  ;;  %v2555_v30 = vld [vmem:[%s3520_s0 + $0x1ec] ss:$16 sps:$4 sm:$0xff]  }
  0x38   :  { %1363 = vmatprep.subr.bf16.mxu0 %v2656_v0 }
  0x3a   :  { %1075 = vmatpush1.bf16.msra.mxu1 %v2459_v31  ;;  %v2557_v31 = vld [vmem:[%s3520_s0 + $0x1e0] ss:$16 sps:$4 sm:$0xff]  }
  0x3b   :  { %1364 = vmatpush1.bf16.msra.mxu0 %v2460_v32  ;;  %1076 = vmatprep.subr.bf16.mxu1 %v2656_v0  ;;  %v2558_v32 = vld [vmem:[%s3520_s0 + $0x1e8] ss:$16 sps:$4 sm:$0xff]  }
  0x3c   :  { %1365 = vmatprep.subr.bf16.mxu0 %v2656_v0  ;;  %v2510_v0 = vld [vmem:[%s3520_s0 + $0xe8] ss:$16 sps:$4 sm:$0xff]  }
  0x3e   :  { %1077 = vmatpush1.bf16.msra.mxu1 %v2461_v33  ;;  %v2559_v33 = vld [vmem:[%s3520_s0 + $0x204] ss:$16 sps:$4 sm:$0xff]  }
  0x3f   :  { %1366 = vmatpush1.bf16.msra.mxu0 %v2462_v34  ;;  %v2561_v34 = vld [vmem:[%s3520_s0 + $0x20c] ss:$16 sps:$4 sm:$0xff]  }
  0x41   :  { %1079 = vmatmul.mubr.bf16.vlgmr.msra.gmra.mrb[0].mxu1 %v2463_v35  ;;  %v2563_v35 = vld [vmem:[%s3520_s0 + $0x200] ss:$16 sps:$4 sm:$0xff]  }
  0x42   :  { %1368 = vmatmul.mubr.bf16.vlgmr.msra.gmra.mrb[0].mxu0 %v2466_v36  ;;  %1086 = vmatprep.mubr.bf16.mxu1 %v2469_v37  ;;  %v2564_v36 = vld [vmem:[%s3520_s0 + $0x208] ss:$16 sps:$4 sm:$0xff]   ;;  %v2565_v37 = vld [vmem:[%s3520_s0 + $0x224] ss:$16 sps:$4 sm:$0xff]  }
  0x43   :  { %1375 = vmatprep.mubr.bf16.mxu0 %v2471_v38  ;;  %v2567_v38 = vld [vmem:[%s3520_s0 + $0x22c] ss:$16 sps:$4 sm:$0xff]  }
  0x49   :  { %1087 = vmatmul.mubr.bf16.gmra.mrb[4].mxu1 %v2473_v39  ;;  %v2569_v39 = vld [vmem:[%s3520_s0 + $0x220] ss:$16 sps:$4 sm:$0xff]  }
  0x4a   :  { %1376 = vmatmul.mubr.bf16.gmra.mrb[4].mxu0 %v2474_v40  ;;  %1094 = vmatprep.mubr.bf16.mxu1 %v2475_v41  ;;  %v2570_v40 = vld [vmem:[%s3520_s0 + $0x228] ss:$16 sps:$4 sm:$0xff]   ;;  %v2571_v41 = vld [vmem:[%s3520_s0 + $0x244] ss:$16 sps:$4 sm:$0xff]  }
  0x4b   :  { %1383 = vmatprep.mubr.bf16.mxu0 %v2477_v42  ;;  %v2573_v42 = vld [vmem:[%s3520_s0 + $0x24c] ss:$16 sps:$4 sm:$0xff]  }
  0x51   :  { %1095 = vmatmul.mubr.bf16.gmra.mrb[8].mxu1 %v2479_v43  ;;  %v2575_v43 = vld [vmem:[%s3520_s0 + $0x240] ss:$16 sps:$4 sm:$0xff]  }
  0x52   :  { %1384 = vmatmul.mubr.bf16.gmra.mrb[8].mxu0 %v2480_v44  ;;  %1102 = vmatprep.mubr.bf16.mxu1 %v2481_v45  ;;  %v2576_v44 = vld [vmem:[%s3520_s0 + $0x248] ss:$16 sps:$4 sm:$0xff]   ;;  %v2577_v45 = vld [vmem:[%s3520_s0 + $0x264] ss:$16 sps:$4 sm:$0xff]  }
  0x53   :  { %1391 = vmatprep.mubr.bf16.mxu0 %v2483_v46  ;;  %v2579_v46 = vld [vmem:[%s3520_s0 + $0x26c] ss:$16 sps:$4 sm:$0xff]  }
  0x59   :  { %1103 = vmatmul.mubr.bf16.gmra.mrb[12].mxu1 %v2485_v47  ;;  %v2581_v47 = vld [vmem:[%s3520_s0 + $0x260] ss:$16 sps:$4 sm:$0xff]  }
  0x5a   :  { %1392 = vmatmul.mubr.bf16.gmra.mrb[12].mxu0 %v2486_v48  ;;  %1110 = vmatprep.mubr.bf16.mxu1 %v2487_v49  ;;  %v2582_v48 = vld [vmem:[%s3520_s0 + $0x268] ss:$16 sps:$4 sm:$0xff]   ;;  %v2583_v49 = vld [vmem:[%s3520_s0 + $0x284] ss:$16 sps:$4 sm:$0xff]  }
  0x5b   :  { %1399 = vmatprep.mubr.bf16.mxu0 %v2489_v50  ;;  %v2585_v50 = vld [vmem:[%s3520_s0 + $0x28c] ss:$16 sps:$4 sm:$0xff]  }
  0x61   :  { %1111 = vmatmul.mubr.bf16.gmra.mrb[16].mxu1 %v2491_v51  ;;  %v2587_v51 = vld [vmem:[%s3520_s0 + $0x280] ss:$16 sps:$4 sm:$0xff]  }
  0x62   :  { %1400 = vmatmul.mubr.bf16.gmra.mrb[16].mxu0 %v2492_v52  ;;  %1118 = vmatprep.mubr.bf16.mxu1 %v2493_v53  ;;  %v2588_v52 = vld [vmem:[%s3520_s0 + $0x288] ss:$16 sps:$4 sm:$0xff]   ;;  %v2589_v53 = vld [vmem:[%s3520_s0 + $0x2a4] ss:$16 sps:$4 sm:$0xff]  }
  0x63   :  { %1407 = vmatprep.mubr.bf16.mxu0 %v2495_v54  ;;  %v2591_v54 = vld [vmem:[%s3520_s0 + $0x2ac] ss:$16 sps:$4 sm:$0xff]  }
  0x69   :  { %1119 = vmatmul.mubr.bf16.gmra.mrb[20].mxu1 %v2497_v55  ;;  %v2593_v55 = vld [vmem:[%s3520_s0 + $0x2a0] ss:$16 sps:$4 sm:$0xff]  }
  0x6a   :  { %1408 = vmatmul.mubr.bf16.gmra.mrb[20].mxu0 %v2498_v56  ;;  %1126 = vmatprep.mubr.bf16.mxu1 %v2499_v57  ;;  %v2594_v56 = vld [vmem:[%s3520_s0 + $0x2a8] ss:$16 sps:$4 sm:$0xff]   ;;  %v2595_v57 = vld [vmem:[%s3520_s0 + $0x2c4] ss:$16 sps:$4 sm:$0xff]  }
  0x6b   :  { %1415 = vmatprep.mubr.bf16.mxu0 %v2501_v58  ;;  %v2597_v58 = vld [vmem:[%s3520_s0 + $0x2cc] ss:$16 sps:$4 sm:$0xff]  }
  0x71   :  { %1127 = vmatmul.mubr.bf16.gmra.mrb[24].mxu1 %v2503_v59  ;;  %v2599_v59 = vld [vmem:[%s3520_s0 + $0x2c0] ss:$16 sps:$4 sm:$0xff]  }
  0x72   :  { %1416 = vmatmul.mubr.bf16.gmra.mrb[24].mxu0 %v2504_v60  ;;  %1134 = vmatprep.mubr.bf16.mxu1 %v2505_v61  ;;  %v2600_v60 = vld [vmem:[%s3520_s0 + $0x2c8] ss:$16 sps:$4 sm:$0xff]   ;;  %v2601_v61 = vld [vmem:[%s3520_s0 + $0x2e4] ss:$16 sps:$4 sm:$0xff]  }
  0x73   :  { %1423 = vmatprep.mubr.bf16.mxu0 %v2507_v62  ;;  %v2603_v62 = vld [vmem:[%s3520_s0 + $0x2ec] ss:$16 sps:$4 sm:$0xff]  }
  0x79   :  { %1135 = vmatmul.mubr.bf16.gmra.mrb[28].mxu1 %v2509_v63  ;;  %v2605_v63 = vld [vmem:[%s3520_s0 + $0x2e0] ss:$16 sps:$4 sm:$0xff]  }
  0x7a   :  { %1424 = vmatmul.mubr.bf16.gmra.mrb[28].mxu0 %v2510_v0  ;;  %1142 = vmatprep.mubr.bf16.mxu1 %v2511_v1  ;;  %v2606_v0 = vld [vmem:[%s3520_s0 + $0x2e8] ss:$16 sps:$4 sm:$0xff]   ;;  %v2607_v1 = vld [vmem:[%s3520_s0 + $0x304] ss:$16 sps:$4 sm:$0xff]  }
  0x7b   :  { %1431 = vmatprep.mubr.bf16.mxu0 %v2513_v2  ;;  %v2609_v2 = vld [vmem:[%s3520_s0 + $0x30c] ss:$16 sps:$4 sm:$0xff]  }
  0x81   :  { %1143 = vmatmul.mubr.bf16.gmra.mrb[32].mxu1 %v2515_v3  ;;  %v2611_v3 = vld [vmem:[%s3520_s0 + $0x300] ss:$16 sps:$4 sm:$0xff]  }
  0x82   :  { %1432 = vmatmul.mubr.bf16.gmra.mrb[32].mxu0 %v2516_v4  ;;  %1150 = vmatprep.mubr.bf16.mxu1 %v2517_v5  ;;  %v2612_v4 = vld [vmem:[%s3520_s0 + $0x308] ss:$16 sps:$4 sm:$0xff]   ;;  %v2613_v5 = vld [vmem:[%s3520_s0 + $0x324] ss:$16 sps:$4 sm:$0xff]  }
  0x83   :  { %1439 = vmatprep.mubr.bf16.mxu0 %v2519_v6  ;;  %v2615_v6 = vld [vmem:[%s3520_s0 + $0x32c] ss:$16 sps:$4 sm:$0xff]  }
  0x89   :  { %1151 = vmatmul.mubr.bf16.gmra.mrb[36].mxu1 %v2521_v7  ;;  %v2617_v7 = vld [vmem:[%s3520_s0 + $0x320] ss:$16 sps:$4 sm:$0xff]  }
  0x8a   :  { %1440 = vmatmul.mubr.bf16.gmra.mrb[36].mxu0 %v2522_v8  ;;  %1158 = vmatprep.mubr.bf16.mxu1 %v2523_v9  ;;  %v2618_v8 = vld [vmem:[%s3520_s0 + $0x328] ss:$16 sps:$4 sm:$0xff]   ;;  %v2619_v9 = vld [vmem:[%s3520_s0 + $0x344] ss:$16 sps:$4 sm:$0xff]  }
  0x8b   :  { %1447 = vmatprep.mubr.bf16.mxu0 %v2525_v10  ;;  %v2621_v10 = vld [vmem:[%s3520_s0 + $0x34c] ss:$16 sps:$4 sm:$0xff]  }
  0x91   :  { %1159 = vmatmul.mubr.bf16.gmra.mrb[40].mxu1 %v2527_v11  ;;  %v2623_v11 = vld [vmem:[%s3520_s0 + $0x340] ss:$16 sps:$4 sm:$0xff]  }
  0x92   :  { %1448 = vmatmul.mubr.bf16.gmra.mrb[40].mxu0 %v2528_v12  ;;  %1166 = vmatprep.mubr.bf16.mxu1 %v2529_v13  ;;  %v2624_v12 = vld [vmem:[%s3520_s0 + $0x348] ss:$16 sps:$4 sm:$0xff]   ;;  %v2625_v13 = vld [vmem:[%s3520_s0 + $0x364] ss:$16 sps:$4 sm:$0xff]  }
  0x93   :  { %1455 = vmatprep.mubr.bf16.mxu0 %v2531_v14  ;;  %v2627_v14 = vld [vmem:[%s3520_s0 + $0x36c] ss:$16 sps:$4 sm:$0xff]  }
  0x99   :  { %1167 = vmatmul.mubr.bf16.gmra.mrb[44].mxu1 %v2533_v15  ;;  %v3138_v15 = vld [vmem:[%s3521_s2] ss:$0 sm:$0xff] }
  0x9a   :  { %1456 = vmatmul.mubr.bf16.gmra.mrb[44].mxu0 %v2534_v16  ;;  %1174 = vmatprep.mubr.bf16.mxu1 %v2535_v17 }
  0x9b   :  { %1463 = vmatprep.mubr.bf16.mxu0 %v2537_v18 }
  0xa1   :  { %1175 = vmatmul.mubr.bf16.gmra.mrb[48].mxu1 %v2539_v19 }
  0xa2   :  { %1464 = vmatmul.mubr.bf16.gmra.mrb[48].mxu0 %v2540_v20  ;;  %1182 = vmatprep.mubr.bf16.mxu1 %v2541_v21  ;;  %v2629_v20 = vld [vmem:[%s3520_s0 + $0x360] ss:$16 sps:$4 sm:$0xff]  }
  0xa3   :  { %1471 = vmatprep.mubr.bf16.mxu0 %v2543_v22 }
  0xa9   :  { %1183 = vmatmul.mubr.bf16.gmra.mrb[52].mxu1 %v2545_v23  ;;  %v2630_v23 = vld [vmem:[%s3520_s0 + $0x368] ss:$16 sps:$4 sm:$0xff]  }
  0xaa   :  { %1472 = vmatmul.mubr.bf16.gmra.mrb[52].mxu0 %v2546_v24  ;;  %1190 = vmatprep.mubr.bf16.mxu1 %v2547_v25  ;;  %v2631_v24 = vld [vmem:[%s3520_s0 + $0x384] ss:$16 sps:$4 sm:$0xff]  }
  0xab   :  { %1479 = vmatprep.mubr.bf16.mxu0 %v2549_v26 }
  0xb1   :  { %1191 = vmatmul.mubr.bf16.gmra.mrb[56].mxu1 %v2551_v27 }
  0xb2   :  { %1480 = vmatmul.mubr.bf16.gmra.mrb[56].mxu0 %v2552_v28  ;;  %1198 = vmatprep.mubr.bf16.mxu1 %v2553_v29  ;;  %v2633_v29 = vld [vmem:[%s3520_s0 + $0x38c] ss:$16 sps:$4 sm:$0xff]  }
  0xb3   :  { %1487 = vmatprep.mubr.bf16.mxu0 %v2555_v30 }
  0xb9   :  { %1199 = vmatmul.mubr.bf16.gmra.mrb[60].mxu1 %v2557_v31 }
  0xba   :  { %1488 = vmatmul.mubr.bf16.gmra.mrb[60].mxu0 %v2558_v32  ;;  %1206 = vmatprep.mubr.bf16.mxu1 %v2559_v33 }
  0xbb   :  { %1495 = vmatprep.mubr.bf16.mxu0 %v2561_v34 }
  0xc1   :  { %1207 = vmatmul.mubr.bf16.gmra.mrb[64].mxu1 %v2563_v35 }
  0xc2   :  { %1496 = vmatmul.mubr.bf16.gmra.mrb[64].mxu0 %v2564_v36  ;;  %1214 = vmatprep.mubr.bf16.mxu1 %v2565_v37 }
  0xc3   :  { %1503 = vmatprep.mubr.bf16.mxu0 %v2567_v38 }
  0xc9   :  { %1215 = vmatmul.mubr.bf16.gmra.mrb[68].mxu1 %v2569_v39 }
  0xca   :  { %1504 = vmatmul.mubr.bf16.gmra.mrb[68].mxu0 %v2570_v40  ;;  %1222 = vmatprep.mubr.bf16.mxu1 %v2571_v41  ;;  %v2635_v40 = vld [vmem:[%s3520_s0 + $0x380] ss:$16 sps:$4 sm:$0xff]  }
  0xcb   :  { %1511 = vmatprep.mubr.bf16.mxu0 %v2573_v42 }
  0xd1   :  { %1223 = vmatmul.mubr.bf16.gmra.mrb[72].mxu1 %v2575_v43  ;;  %v2636_v43 = vld [vmem:[%s3520_s0 + $0x388] ss:$16 sps:$4 sm:$0xff]  }
  0xd2   :  { %1512 = vmatmul.mubr.bf16.gmra.mrb[72].mxu0 %v2576_v44  ;;  %1230 = vmatprep.mubr.bf16.mxu1 %v2577_v45  ;;  %v2637_v44 = vld [vmem:[%s3520_s0 + $0x3a4] ss:$16 sps:$4 sm:$0xff]  }
  0xd3   :  { %1519 = vmatprep.mubr.bf16.mxu0 %v2579_v46 }
  0xd9   :  { %1231 = vmatmul.mubr.bf16.gmra.mrb[76].mxu1 %v2581_v47 }
  0xda   :  { %1520 = vmatmul.mubr.bf16.gmra.mrb[76].mxu0 %v2582_v48  ;;  %1238 = vmatprep.mubr.bf16.mxu1 %v2583_v49  ;;  %v2639_v49 = vld [vmem:[%s3520_s0 + $0x3ac] ss:$16 sps:$4 sm:$0xff]  }
  0xdb   :  { %1527 = vmatprep.mubr.bf16.mxu0 %v2585_v50 }
  0xe1   :  { %1239 = vmatmul.mubr.bf16.gmra.mrb[80].mxu1 %v2587_v51 }
  0xe2   :  { %1528 = vmatmul.mubr.bf16.gmra.mrb[80].mxu0 %v2588_v52  ;;  %1246 = vmatprep.mubr.bf16.mxu1 %v2589_v53 }
  0xe3   :  { %1535 = vmatprep.mubr.bf16.mxu0 %v2591_v54 }
  0xe9   :  { %1247 = vmatmul.mubr.bf16.gmra.mrb[84].mxu1 %v2593_v55 }
  0xea   :  { %1536 = vmatmul.mubr.bf16.gmra.mrb[84].mxu0 %v2594_v56  ;;  %1254 = vmatprep.mubr.bf16.mxu1 %v2595_v57 }
  0xeb   :  { %1543 = vmatprep.mubr.bf16.mxu0 %v2597_v58 }
  0xf1   :  { %1255 = vmatmul.mubr.bf16.gmra.mrb[88].mxu1 %v2599_v59 }
  0xf2   :  { %1544 = vmatmul.mubr.bf16.gmra.mrb[88].mxu0 %v2600_v60  ;;  %1262 = vmatprep.mubr.bf16.mxu1 %v2601_v61  ;;  %v2641_v60 = vld [vmem:[%s3520_s0 + $0x3a0] ss:$16 sps:$4 sm:$0xff]  }
  0xf3   :  { %1551 = vmatprep.mubr.bf16.mxu0 %v2603_v62 }
  0xf9   :  { %1263 = vmatmul.mubr.bf16.gmra.mrb[92].mxu1 %v2605_v63  ;;  %v2642_v63 = vld [vmem:[%s3520_s0 + $0x3a8] ss:$16 sps:$4 sm:$0xff]  }
  0xfa   :  { %1552 = vmatmul.mubr.bf16.gmra.mrb[92].mxu0 %v2606_v0  ;;  %1270 = vmatprep.mubr.bf16.mxu1 %v2607_v1  ;;  %v2643_v0 = vld [vmem:[%s3520_s0 + $0x3c4] ss:$16 sps:$4 sm:$0xff]  }
  0xfb   :  { %1559 = vmatprep.mubr.bf16.mxu0 %v2609_v2 }
 0x101   :  { %1271 = vmatmul.mubr.bf16.gmra.mrb[96].mxu1 %v2611_v3 }
 0x102   :  { %1560 = vmatmul.mubr.bf16.gmra.mrb[96].mxu0 %v2612_v4  ;;  %1278 = vmatprep.mubr.bf16.mxu1 %v2613_v5  ;;  %v2645_v5 = vld [vmem:[%s3520_s0 + $0x3cc] ss:$16 sps:$4 sm:$0xff]  }
 0x103   :  { %1567 = vmatprep.mubr.bf16.mxu0 %v2615_v6 }
 0x109   :  { %1279 = vmatmul.mubr.bf16.gmra.mrb[100].mxu1 %v2617_v7 }
 0x10a   :  { %1568 = vmatmul.mubr.bf16.gmra.mrb[100].mxu0 %v2618_v8  ;;  %1286 = vmatprep.mubr.bf16.mxu1 %v2619_v9 }
 0x10b   :  { %1575 = vmatprep.mubr.bf16.mxu0 %v2621_v10 }
 0x111   :  { %1287 = vmatmul.mubr.bf16.gmra.mrb[104].mxu1 %v2623_v11 }
 0x112   :  { %1576 = vmatmul.mubr.bf16.gmra.mrb[104].mxu0 %v2624_v12  ;;  %1294 = vmatprep.mubr.bf16.mxu1 %v2625_v13 }
 0x113   :  { %1583 = vmatprep.mubr.bf16.mxu0 %v2627_v14 }
 0x114   :  { %v1080_v16 = vpop.f32.mrb[0].mxu1 }
 0x115   :  { %v1081_v17 = vadd.f32 %v3138_v15, %v1080_v16  ;;  %v1369_v18 = vpop.f32.mrb[0].mxu0  ;;  %v1082_v19 = vpop.f32.mrb[1].mxu1 }
 0x116   :  { %v1371_v21 = vpop.f32.mrb[1].mxu0  ;;  %v1083_v22 = vpop.f32.mrb[2].mxu1 }
 0x117   :  { %v1370_v25 = vadd.f32 %v1369_v18, %v1081_v17  ;;  %v1084_v26 = vadd.f32 %v3138_v15, %v1083_v22  ;;  %v1372_v27 = vpop.f32.mrb[2].mxu0  ;;  %v1085_v28 = vpop.f32.mrb[3].mxu1  ;;  %v2647_v17 = vld [vmem:[%s3520_s0 + $0x3c0] ss:$16 sps:$4 sm:$0xff]   ;;  %v2649_v21 = vld [vmem:[%s3520_s0 + $0x3e4] ss:$16 sps:$4 sm:$0xff]  }
 0x118   :  { %v1374_v30 = vpop.f32.mrb[3].mxu0 }
 0x119   :  { %v1624_v31 = vmax.f32 %v1370_v25, 0.0  ;;  %v1373_v32 = vadd.f32 %v1372_v27, %v1084_v26  ;;  %1295 = vmatmul.mubr.bf16.gmra.mrb[108].mxu1 %v2629_v20  ;;  %v2648_v20 = vld [vmem:[%s3520_s0 + $0x3c8] ss:$16 sps:$4 sm:$0xff]   ;;  %v2651_v26 = vld [vmem:[%s3520_s0 + $0x3ec] ss:$16 sps:$4 sm:$0xff]  }
 0x11a   :  { %1584 = vmatmul.mubr.bf16.gmra.mrb[108].mxu0 %v2630_v23  ;;  %1302 = vmatprep.mubr.bf16.mxu1 %v2631_v24 }
 0x11b   :  { %v2238_v33 = vpack.c.bf16 %v1624_v31, %v1624_v31  ;;  %v1625_v34 = vmax.f32 %v1373_v32, 0.0  ;;  %1591 = vmatprep.mubr.bf16.mxu0 %v2633_v29 }
 0x11c   :  { %v1088_v35 = vpop.f32.mrb[4].mxu1 }
 0x11d   :  { %1945 = vst.msk [vmem:[%s3522_s3] sm:$0xf] %vm1944_vm0, %v2238_v33  ;;  %v2239_v36 = vpack.c.bf16 %v1625_v34, %v1625_v34  ;;  %v1089_v37 = vadd.f32 %v3138_v15, %v1088_v35  ;;  %v1377_v38 = vpop.f32.mrb[4].mxu0  ;;  %v1090_v39 = vpop.f32.mrb[5].mxu1 }
 0x11e   :  { %v1379_v41 = vpop.f32.mrb[5].mxu0  ;;  %v1091_v42 = vpop.f32.mrb[6].mxu1 }
 0x11f   :  { %1946 = vst.msk [vmem:[%s3522_s3 + $0x4] sm:$0xf] %vm1944_vm0, %v2239_v36  ;;  %v1378_v45 = vadd.f32 %v1377_v38, %v1089_v37  ;;  %v1092_v46 = vadd.f32 %v3138_v15, %v1091_v42  ;;  %v1380_v47 = vpop.f32.mrb[6].mxu0  ;;  %v1093_v48 = vpop.f32.mrb[7].mxu1  ;;  %v2653_v37 = vld [vmem:[%s3520_s0 + $0x3e0] ss:$16 sps:$4 sm:$0xff]  }
 0x120   :  { %v1382_v50 = vpop.f32.mrb[7].mxu0 }
 0x121   :  { %v1626_v51 = vmax.f32 %v1378_v45, 0.0  ;;  %v1381_v52 = vadd.f32 %v1380_v47, %v1092_v46  ;;  %1303 = vmatmul.mubr.bf16.gmra.mrb[112].mxu1 %v2635_v40  ;;  %v2654_v40 = vld [vmem:[%s3520_s0 + $0x3e8] ss:$16 sps:$4 sm:$0xff]  }
 0x122   :  { %1592 = vmatmul.mubr.bf16.gmra.mrb[112].mxu0 %v2636_v43  ;;  %1310 = vmatprep.mubr.bf16.mxu1 %v2637_v44 }
 0x123   :  { %v2240_v53 = vpack.c.bf16 %v1626_v51, %v1626_v51  ;;  %v1627_v54 = vmax.f32 %v1381_v52, 0.0  ;;  %1599 = vmatprep.mubr.bf16.mxu0 %v2639_v49 }
 0x124   :  { %v1096_v55 = vpop.f32.mrb[8].mxu1 }
 0x125   :  { %1947 = vst.msk [vmem:[%s3522_s3 + $0x8] sm:$0xf] %vm1944_vm0, %v2240_v53  ;;  %v2241_v56 = vpack.c.bf16 %v1627_v54, %v1627_v54  ;;  %v1097_v57 = vadd.f32 %v3138_v15, %v1096_v55  ;;  %v1385_v58 = vpop.f32.mrb[8].mxu0  ;;  %v1098_v59 = vpop.f32.mrb[9].mxu1 }
 0x126   :  { %v1387_v61 = vpop.f32.mrb[9].mxu0  ;;  %v1099_v62 = vpop.f32.mrb[10].mxu1 }
 0x127   :  { %1948 = vst.msk [vmem:[%s3522_s3 + $0xc] sm:$0xf] %vm1944_vm0, %v2241_v56  ;;  %v1386_v1 = vadd.f32 %v1385_v58, %v1097_v57  ;;  %v1100_v2 = vadd.f32 %v3138_v15, %v1099_v62  ;;  %v1388_v3 = vpop.f32.mrb[10].mxu0  ;;  %v1101_v4 = vpop.f32.mrb[11].mxu1 }
 0x128   :  { %v1390_v6 = vpop.f32.mrb[11].mxu0 }
 0x129   :  { %v1628_v7 = vmax.f32 %v1386_v1, 0.0  ;;  %v1389_v8 = vadd.f32 %v1388_v3, %v1100_v2  ;;  %1311 = vmatmul.mubr.bf16.gmra.mrb[116].mxu1 %v2641_v60 }
 0x12a   :  { %1600 = vmatmul.mubr.bf16.gmra.mrb[116].mxu0 %v2642_v63  ;;  %1318 = vmatprep.mubr.bf16.mxu1 %v2643_v0 }
 0x12b   :  { %v2242_v9 = vpack.c.bf16 %v1628_v7, %v1628_v7  ;;  %v1629_v10 = vmax.f32 %v1389_v8, 0.0  ;;  %1607 = vmatprep.mubr.bf16.mxu0 %v2645_v5 }
 0x12c   :  { %v1104_v11 = vpop.f32.mrb[12].mxu1 }
 0x12d   :  { %1949 = vst.msk [vmem:[%s3522_s3 + $0x10] sm:$0xf] %vm1944_vm0, %v2242_v9  ;;  %v2243_v12 = vpack.c.bf16 %v1629_v10, %v1629_v10  ;;  %v1105_v13 = vadd.f32 %v3138_v15, %v1104_v11  ;;  %v1393_v14 = vpop.f32.mrb[12].mxu0  ;;  %v1106_v16 = vpop.f32.mrb[13].mxu1 }
 0x12e   :  { %v1395_v18 = vpop.f32.mrb[13].mxu0  ;;  %v1107_v19 = vpop.f32.mrb[14].mxu1 }
 0x12f   :  { %1950 = vst.msk [vmem:[%s3522_s3 + $0x14] sm:$0xf] %vm1944_vm0, %v2243_v12  ;;  %v1394_v22 = vadd.f32 %v1393_v14, %v1105_v13  ;;  %v1108_v23 = vadd.f32 %v3138_v15, %v1107_v19  ;;  %v1396_v24 = vpop.f32.mrb[14].mxu0  ;;  %v1109_v25 = vpop.f32.mrb[15].mxu1 }
 0x130   :  { %v1398_v27 = vpop.f32.mrb[15].mxu0 }
 0x131   :  { %v1630_v28 = vmax.f32 %v1394_v22, 0.0  ;;  %v1397_v29 = vadd.f32 %v1396_v24, %v1108_v23  ;;  %1319 = vmatmul.mubr.bf16.gmra.mrb[120].mxu1 %v2647_v17 }
 0x132   :  { %1608 = vmatmul.mubr.bf16.gmra.mrb[120].mxu0 %v2648_v20  ;;  %1326 = vmatprep.mubr.bf16.mxu1 %v2649_v21 }
 0x133   :  { %v2244_v30 = vpack.c.bf16 %v1630_v28, %v1630_v28  ;;  %v1631_v31 = vmax.f32 %v1397_v29, 0.0  ;;  %1615 = vmatprep.mubr.bf16.mxu0 %v2651_v26 }
 0x134   :  { %v1112_v32 = vpop.f32.mrb[16].mxu1 }
 0x135   :  { %1951 = vst.msk [vmem:[%s3522_s3 + $0x18] sm:$0xf] %vm1944_vm0, %v2244_v30  ;;  %v2245_v33 = vpack.c.bf16 %v1631_v31, %v1631_v31  ;;  %v1113_v34 = vadd.f32 %v3138_v15, %v1112_v32  ;;  %v1401_v35 = vpop.f32.mrb[16].mxu0  ;;  %v1114_v36 = vpop.f32.mrb[17].mxu1 }
 0x136   :  { %v1403_v38 = vpop.f32.mrb[17].mxu0  ;;  %v1115_v39 = vpop.f32.mrb[18].mxu1 }
 0x137   :  { %1952 = vst.msk [vmem:[%s3522_s3 + $0x1c] sm:$0xf] %vm1944_vm0, %v2245_v33  ;;  %v1402_v41 = vadd.f32 %v1401_v35, %v1113_v34  ;;  %v1116_v42 = vadd.f32 %v3138_v15, %v1115_v39  ;;  %v1404_v43 = vpop.f32.mrb[18].mxu0  ;;  %v1117_v44 = vpop.f32.mrb[19].mxu1 }
 0x138   :  { %v1406_v45 = vpop.f32.mrb[19].mxu0 }
 0x139   :  { %v1632_v46 = vmax.f32 %v1402_v41, 0.0  ;;  %v1405_v47 = vadd.f32 %v1404_v43, %v1116_v42  ;;  %1327 = vmatmul.mubr.bf16.gmra.mrb[124].mxu1 %v2653_v37 }
 0x13a   :  { %1616 = vmatmul.mubr.bf16.gmra.mrb[124].mxu0 %v2654_v40 }
 0x13b   :  { %v2246_v48 = vpack.c.bf16 %v1632_v46, %v1632_v46  ;;  %v1633_v49 = vmax.f32 %v1405_v47, 0.0 }
 0x13c   :  { %v1120_v50 = vpop.f32.mrb[20].mxu1 }
 0x13d   :  { %1953 = vst.msk [vmem:[%s3522_s3 + $0x20] sm:$0xf] %vm1944_vm0, %v2246_v48  ;;  %v2247_v51 = vpack.c.bf16 %v1633_v49, %v1633_v49  ;;  %v1121_v52 = vadd.f32 %v3138_v15, %v1120_v50  ;;  %v1409_v53 = vpop.f32.mrb[20].mxu0  ;;  %v1122_v54 = vpop.f32.mrb[21].mxu1 }
 0x13e   :  { %v1411_v55 = vpop.f32.mrb[21].mxu0  ;;  %v1123_v56 = vpop.f32.mrb[22].mxu1 }
 0x13f   :  { %1954 = vst.msk [vmem:[%s3522_s3 + $0x24] sm:$0xf] %vm1944_vm0, %v2247_v51  ;;  %v1410_v57 = vadd.f32 %v1409_v53, %v1121_v52  ;;  %v1124_v58 = vadd.f32 %v3138_v15, %v1123_v56  ;;  %v1412_v59 = vpop.f32.mrb[22].mxu0  ;;  %v1125_v60 = vpop.f32.mrb[23].mxu1 }
 0x140   :  { %v1414_v61 = vpop.f32.mrb[23].mxu0 }
 0x141   :  { %v1634_v62 = vmax.f32 %v1410_v57, 0.0  ;;  %v1413_v63 = vadd.f32 %v1412_v59, %v1124_v58 }
 0x143   :  { %v2248_v0 = vpack.c.bf16 %v1634_v62, %v1634_v62  ;;  %v1635_v1 = vmax.f32 %v1413_v63, 0.0 }
 0x144   :  { %v1128_v2 = vpop.f32.mrb[24].mxu1 }
 0x145   :  { %1955 = vst.msk [vmem:[%s3522_s3 + $0x28] sm:$0xf] %vm1944_vm0, %v2248_v0  ;;  %v2249_v3 = vpack.c.bf16 %v1635_v1, %v1635_v1  ;;  %v1129_v4 = vadd.f32 %v3138_v15, %v1128_v2  ;;  %v1417_v5 = vpop.f32.mrb[24].mxu0  ;;  %v1130_v6 = vpop.f32.mrb[25].mxu1 }
 0x146   :  { %v1419_v7 = vpop.f32.mrb[25].mxu0  ;;  %v1131_v8 = vpop.f32.mrb[26].mxu1 }
 0x147   :  { %1956 = vst.msk [vmem:[%s3522_s3 + $0x2c] sm:$0xf] %vm1944_vm0, %v2249_v3  ;;  %v1418_v9 = vadd.f32 %v1417_v5, %v1129_v4  ;;  %v1132_v10 = vadd.f32 %v3138_v15, %v1131_v8  ;;  %v1420_v11 = vpop.f32.mrb[26].mxu0  ;;  %v1133_v12 = vpop.f32.mrb[27].mxu1 }
 0x148   :  { %v1422_v13 = vpop.f32.mrb[27].mxu0 }
 0x149   :  { %v1636_v14 = vmax.f32 %v1418_v9, 0.0  ;;  %v1421_v16 = vadd.f32 %v1420_v11, %v1132_v10 }
 0x14b   :  { %v2250_v17 = vpack.c.bf16 %v1636_v14, %v1636_v14  ;;  %v1637_v18 = vmax.f32 %v1421_v16, 0.0 }
 0x14c   :  { %v1136_v19 = vpop.f32.mrb[28].mxu1 }
 0x14d   :  { %1957 = vst.msk [vmem:[%s3522_s3 + $0x30] sm:$0xf] %vm1944_vm0, %v2250_v17  ;;  %v2251_v20 = vpack.c.bf16 %v1637_v18, %v1637_v18  ;;  %v1137_v21 = vadd.f32 %v3138_v15, %v1136_v19  ;;  %v1425_v22 = vpop.f32.mrb[28].mxu0  ;;  %v1138_v23 = vpop.f32.mrb[29].mxu1 }
 0x14e   :  { %v1427_v24 = vpop.f32.mrb[29].mxu0  ;;  %v1139_v25 = vpop.f32.mrb[30].mxu1 }
 0x14f   :  { %1958 = vst.msk [vmem:[%s3522_s3 + $0x34] sm:$0xf] %vm1944_vm0, %v2251_v20  ;;  %v1426_v26 = vadd.f32 %v1425_v22, %v1137_v21  ;;  %v1140_v27 = vadd.f32 %v3138_v15, %v1139_v25  ;;  %v1428_v28 = vpop.f32.mrb[30].mxu0  ;;  %v1141_v29 = vpop.f32.mrb[31].mxu1 }
 0x150   :  { %v1430_v30 = vpop.f32.mrb[31].mxu0 }
 0x151   :  { %v1638_v31 = vmax.f32 %v1426_v26, 0.0  ;;  %v1429_v32 = vadd.f32 %v1428_v28, %v1140_v27 }
 0x153   :  { %v2252_v33 = vpack.c.bf16 %v1638_v31, %v1638_v31  ;;  %v1639_v34 = vmax.f32 %v1429_v32, 0.0 }
 0x154   :  { %v1144_v35 = vpop.f32.mrb[32].mxu1 }
 0x155   :  { %1959 = vst.msk [vmem:[%s3522_s3 + $0x38] sm:$0xf] %vm1944_vm0, %v2252_v33  ;;  %v2253_v36 = vpack.c.bf16 %v1639_v34, %v1639_v34  ;;  %v1145_v37 = vadd.f32 %v3138_v15, %v1144_v35  ;;  %v1433_v38 = vpop.f32.mrb[32].mxu0  ;;  %v1146_v39 = vpop.f32.mrb[33].mxu1 }
 0x156   :  { %v1435_v40 = vpop.f32.mrb[33].mxu0  ;;  %v1147_v41 = vpop.f32.mrb[34].mxu1 }
 0x157   :  { %1960 = vst.msk [vmem:[%s3522_s3 + $0x3c] sm:$0xf] %vm1944_vm0, %v2253_v36  ;;  %v1434_v42 = vadd.f32 %v1433_v38, %v1145_v37  ;;  %v1148_v43 = vadd.f32 %v3138_v15, %v1147_v41  ;;  %v1436_v44 = vpop.f32.mrb[34].mxu0  ;;  %v1149_v45 = vpop.f32.mrb[35].mxu1 }
 0x158   :  { %v1438_v46 = vpop.f32.mrb[35].mxu0 }
 0x159   :  { %v1640_v47 = vmax.f32 %v1434_v42, 0.0  ;;  %v1437_v48 = vadd.f32 %v1436_v44, %v1148_v43 }
 0x15b   :  { %v2254_v49 = vpack.c.bf16 %v1640_v47, %v1640_v47  ;;  %v1641_v50 = vmax.f32 %v1437_v48, 0.0 }
 0x15c   :  { %v1152_v51 = vpop.f32.mrb[36].mxu1 }
 0x15d   :  { %1961 = vst.msk [vmem:[%s3522_s3 + $0x40] sm:$0xf] %vm1944_vm0, %v2254_v49  ;;  %v2255_v52 = vpack.c.bf16 %v1641_v50, %v1641_v50  ;;  %v1153_v53 = vadd.f32 %v3138_v15, %v1152_v51  ;;  %v1441_v54 = vpop.f32.mrb[36].mxu0  ;;  %v1154_v55 = vpop.f32.mrb[37].mxu1 }
 0x15e   :  { %v1443_v56 = vpop.f32.mrb[37].mxu0  ;;  %v1155_v57 = vpop.f32.mrb[38].mxu1 }
 0x15f   :  { %1962 = vst.msk [vmem:[%s3522_s3 + $0x44] sm:$0xf] %vm1944_vm0, %v2255_v52  ;;  %v1442_v58 = vadd.f32 %v1441_v54, %v1153_v53  ;;  %v1156_v59 = vadd.f32 %v3138_v15, %v1155_v57  ;;  %v1444_v60 = vpop.f32.mrb[38].mxu0  ;;  %v1157_v61 = vpop.f32.mrb[39].mxu1 }
 0x160   :  { %v1446_v62 = vpop.f32.mrb[39].mxu0 }
 0x161   :  { %v1642_v63 = vmax.f32 %v1442_v58, 0.0  ;;  %v1445_v0 = vadd.f32 %v1444_v60, %v1156_v59 }
 0x163   :  { %v2256_v1 = vpack.c.bf16 %v1642_v63, %v1642_v63  ;;  %v1643_v2 = vmax.f32 %v1445_v0, 0.0 }
 0x164   :  { %v1160_v3 = vpop.f32.mrb[40].mxu1 }
 0x165   :  { %1963 = vst.msk [vmem:[%s3522_s3 + $0x48] sm:$0xf] %vm1944_vm0, %v2256_v1  ;;  %v2257_v4 = vpack.c.bf16 %v1643_v2, %v1643_v2  ;;  %v1161_v5 = vadd.f32 %v3138_v15, %v1160_v3  ;;  %v1449_v6 = vpop.f32.mrb[40].mxu0  ;;  %v1162_v7 = vpop.f32.mrb[41].mxu1 }
 0x166   :  { %v1451_v8 = vpop.f32.mrb[41].mxu0  ;;  %v1163_v9 = vpop.f32.mrb[42].mxu1 }
 0x167   :  { %1964 = vst.msk [vmem:[%s3522_s3 + $0x4c] sm:$0xf] %vm1944_vm0, %v2257_v4  ;;  %v1450_v10 = vadd.f32 %v1449_v6, %v1161_v5  ;;  %v1164_v11 = vadd.f32 %v3138_v15, %v1163_v9  ;;  %v1452_v12 = vpop.f32.mrb[42].mxu0  ;;  %v1165_v13 = vpop.f32.mrb[43].mxu1 }
 0x168   :  { %v1454_v14 = vpop.f32.mrb[43].mxu0 }
 0x169   :  { %v1644_v16 = vmax.f32 %v1450_v10, 0.0  ;;  %v1453_v17 = vadd.f32 %v1452_v12, %v1164_v11 }
 0x16b   :  { %v2258_v18 = vpack.c.bf16 %v1644_v16, %v1644_v16  ;;  %v1645_v19 = vmax.f32 %v1453_v17, 0.0 }
 0x16c   :  { %v1168_v20 = vpop.f32.mrb[44].mxu1 }
 0x16d   :  { %1965 = vst.msk [vmem:[%s3522_s3 + $0x50] sm:$0xf] %vm1944_vm0, %v2258_v18  ;;  %v2259_v21 = vpack.c.bf16 %v1645_v19, %v1645_v19  ;;  %v1169_v22 = vadd.f32 %v3138_v15, %v1168_v20  ;;  %v1457_v23 = vpop.f32.mrb[44].mxu0  ;;  %v1170_v24 = vpop.f32.mrb[45].mxu1 }
 0x16e   :  { %v1459_v25 = vpop.f32.mrb[45].mxu0  ;;  %v1171_v26 = vpop.f32.mrb[46].mxu1 }
 0x16f   :  { %1966 = vst.msk [vmem:[%s3522_s3 + $0x54] sm:$0xf] %vm1944_vm0, %v2259_v21  ;;  %v1458_v27 = vadd.f32 %v1457_v23, %v1169_v22  ;;  %v1172_v28 = vadd.f32 %v3138_v15, %v1171_v26  ;;  %v1460_v29 = vpop.f32.mrb[46].mxu0  ;;  %v1173_v30 = vpop.f32.mrb[47].mxu1 }
 0x170   :  { %v1462_v31 = vpop.f32.mrb[47].mxu0 }
 0x171   :  { %v1646_v32 = vmax.f32 %v1458_v27, 0.0  ;;  %v1461_v33 = vadd.f32 %v1460_v29, %v1172_v28 }
 0x173   :  { %v2260_v34 = vpack.c.bf16 %v1646_v32, %v1646_v32  ;;  %v1647_v35 = vmax.f32 %v1461_v33, 0.0 }
 0x174   :  { %v1176_v36 = vpop.f32.mrb[48].mxu1 }
 0x175   :  { %1967 = vst.msk [vmem:[%s3522_s3 + $0x58] sm:$0xf] %vm1944_vm0, %v2260_v34  ;;  %v2261_v37 = vpack.c.bf16 %v1647_v35, %v1647_v35  ;;  %v1177_v38 = vadd.f32 %v3138_v15, %v1176_v36  ;;  %v1465_v39 = vpop.f32.mrb[48].mxu0  ;;  %v1178_v40 = vpop.f32.mrb[49].mxu1 }
 0x176   :  { %v1467_v41 = vpop.f32.mrb[49].mxu0  ;;  %v1179_v42 = vpop.f32.mrb[50].mxu1 }
 0x177   :  { %1968 = vst.msk [vmem:[%s3522_s3 + $0x5c] sm:$0xf] %vm1944_vm0, %v2261_v37  ;;  %v1466_v43 = vadd.f32 %v1465_v39, %v1177_v38  ;;  %v1180_v44 = vadd.f32 %v3138_v15, %v1179_v42  ;;  %v1468_v45 = vpop.f32.mrb[50].mxu0  ;;  %v1181_v46 = vpop.f32.mrb[51].mxu1 }
 0x178   :  { %v1470_v47 = vpop.f32.mrb[51].mxu0 }
 0x179   :  { %v1648_v48 = vmax.f32 %v1466_v43, 0.0  ;;  %v1469_v49 = vadd.f32 %v1468_v45, %v1180_v44 }
 0x17b   :  { %v2262_v50 = vpack.c.bf16 %v1648_v48, %v1648_v48  ;;  %v1649_v51 = vmax.f32 %v1469_v49, 0.0 }
 0x17c   :  { %v1184_v52 = vpop.f32.mrb[52].mxu1 }
 0x17d   :  { %1969 = vst.msk [vmem:[%s3522_s3 + $0x60] sm:$0xf] %vm1944_vm0, %v2262_v50  ;;  %v2263_v53 = vpack.c.bf16 %v1649_v51, %v1649_v51  ;;  %v1185_v54 = vadd.f32 %v3138_v15, %v1184_v52  ;;  %v1473_v55 = vpop.f32.mrb[52].mxu0  ;;  %v1186_v56 = vpop.f32.mrb[53].mxu1 }
 0x17e   :  { %v1475_v57 = vpop.f32.mrb[53].mxu0  ;;  %v1187_v58 = vpop.f32.mrb[54].mxu1 }
 0x17f   :  { %1970 = vst.msk [vmem:[%s3522_s3 + $0x64] sm:$0xf] %vm1944_vm0, %v2263_v53  ;;  %v1474_v59 = vadd.f32 %v1473_v55, %v1185_v54  ;;  %v1188_v60 = vadd.f32 %v3138_v15, %v1187_v58  ;;  %v1476_v61 = vpop.f32.mrb[54].mxu0  ;;  %v1189_v62 = vpop.f32.mrb[55].mxu1 }
 0x180   :  { %v1478_v63 = vpop.f32.mrb[55].mxu0 }
 0x181   :  { %v1650_v0 = vmax.f32 %v1474_v59, 0.0  ;;  %v1477_v1 = vadd.f32 %v1476_v61, %v1188_v60 }
 0x183   :  { %v2264_v2 = vpack.c.bf16 %v1650_v0, %v1650_v0  ;;  %v1651_v3 = vmax.f32 %v1477_v1, 0.0 }
 0x184   :  { %v1192_v4 = vpop.f32.mrb[56].mxu1 }
 0x185   :  { %1971 = vst.msk [vmem:[%s3522_s3 + $0x68] sm:$0xf] %vm1944_vm0, %v2264_v2  ;;  %v2265_v5 = vpack.c.bf16 %v1651_v3, %v1651_v3  ;;  %v1193_v6 = vadd.f32 %v3138_v15, %v1192_v4  ;;  %v1481_v7 = vpop.f32.mrb[56].mxu0  ;;  %v1194_v8 = vpop.f32.mrb[57].mxu1 }
 0x186   :  { %v1483_v9 = vpop.f32.mrb[57].mxu0  ;;  %v1195_v10 = vpop.f32.mrb[58].mxu1 }
 0x187   :  { %1972 = vst.msk [vmem:[%s3522_s3 + $0x6c] sm:$0xf] %vm1944_vm0, %v2265_v5  ;;  %v1482_v11 = vadd.f32 %v1481_v7, %v1193_v6  ;;  %v1196_v12 = vadd.f32 %v3138_v15, %v1195_v10  ;;  %v1484_v13 = vpop.f32.mrb[58].mxu0  ;;  %v1197_v14 = vpop.f32.mrb[59].mxu1 }
 0x188   :  { %v1486_v16 = vpop.f32.mrb[59].mxu0 }
 0x189   :  { %v1652_v17 = vmax.f32 %v1482_v11, 0.0  ;;  %v1485_v18 = vadd.f32 %v1484_v13, %v1196_v12 }
 0x18b   :  { %v2266_v19 = vpack.c.bf16 %v1652_v17, %v1652_v17  ;;  %v1653_v20 = vmax.f32 %v1485_v18, 0.0 }
 0x18c   :  { %v1200_v21 = vpop.f32.mrb[60].mxu1 }
 0x18d   :  { %1973 = vst.msk [vmem:[%s3522_s3 + $0x70] sm:$0xf] %vm1944_vm0, %v2266_v19  ;;  %v2267_v22 = vpack.c.bf16 %v1653_v20, %v1653_v20  ;;  %v1201_v23 = vadd.f32 %v3138_v15, %v1200_v21  ;;  %v1489_v24 = vpop.f32.mrb[60].mxu0  ;;  %v1202_v25 = vpop.f32.mrb[61].mxu1 }
 0x18e   :  { %v1491_v26 = vpop.f32.mrb[61].mxu0  ;;  %v1203_v27 = vpop.f32.mrb[62].mxu1 }
 0x18f   :  { %1974 = vst.msk [vmem:[%s3522_s3 + $0x74] sm:$0xf] %vm1944_vm0, %v2267_v22  ;;  %v1490_v28 = vadd.f32 %v1489_v24, %v1201_v23  ;;  %v1204_v29 = vadd.f32 %v3138_v15, %v1203_v27  ;;  %v1492_v30 = vpop.f32.mrb[62].mxu0  ;;  %v1205_v31 = vpop.f32.mrb[63].mxu1 }
 0x190   :  { %v1494_v32 = vpop.f32.mrb[63].mxu0 }
 0x191   :  { %v1654_v33 = vmax.f32 %v1490_v28, 0.0  ;;  %v1493_v34 = vadd.f32 %v1492_v30, %v1204_v29 }
 0x193   :  { %v2268_v35 = vpack.c.bf16 %v1654_v33, %v1654_v33  ;;  %v1655_v36 = vmax.f32 %v1493_v34, 0.0 }
 0x194   :  { %v1208_v37 = vpop.f32.mrb[64].mxu1 }
 0x195   :  { %1975 = vst.msk [vmem:[%s3522_s3 + $0x78] sm:$0xf] %vm1944_vm0, %v2268_v35  ;;  %v2269_v38 = vpack.c.bf16 %v1655_v36, %v1655_v36  ;;  %v1209_v39 = vadd.f32 %v3138_v15, %v1208_v37  ;;  %v1497_v40 = vpop.f32.mrb[64].mxu0  ;;  %v1210_v41 = vpop.f32.mrb[65].mxu1 }
 0x196   :  { %v1499_v42 = vpop.f32.mrb[65].mxu0  ;;  %v1211_v43 = vpop.f32.mrb[66].mxu1 }
 0x197   :  { %1976 = vst.msk [vmem:[%s3522_s3 + $0x7c] sm:$0xf] %vm1944_vm0, %v2269_v38  ;;  %v1498_v44 = vadd.f32 %v1497_v40, %v1209_v39  ;;  %v1212_v45 = vadd.f32 %v3138_v15, %v1211_v43  ;;  %v1500_v46 = vpop.f32.mrb[66].mxu0  ;;  %v1213_v47 = vpop.f32.mrb[67].mxu1 }
 0x198   :  { %v1502_v48 = vpop.f32.mrb[67].mxu0 }
 0x199   :  { %v1656_v49 = vmax.f32 %v1498_v44, 0.0  ;;  %v1501_v50 = vadd.f32 %v1500_v46, %v1212_v45 }
 0x19b   :  { %v2270_v51 = vpack.c.bf16 %v1656_v49, %v1656_v49  ;;  %v1657_v52 = vmax.f32 %v1501_v50, 0.0 }
 0x19c   :  { %v1216_v53 = vpop.f32.mrb[68].mxu1 }
 0x19d   :  { %1977 = vst.msk [vmem:[%s3522_s3 + $0x80] sm:$0xf] %vm1944_vm0, %v2270_v51  ;;  %v2271_v54 = vpack.c.bf16 %v1657_v52, %v1657_v52  ;;  %v1217_v55 = vadd.f32 %v3138_v15, %v1216_v53  ;;  %v1505_v56 = vpop.f32.mrb[68].mxu0  ;;  %v1218_v57 = vpop.f32.mrb[69].mxu1 }
 0x19e   :  { %v1507_v58 = vpop.f32.mrb[69].mxu0  ;;  %v1219_v59 = vpop.f32.mrb[70].mxu1 }
 0x19f   :  { %1978 = vst.msk [vmem:[%s3522_s3 + $0x84] sm:$0xf] %vm1944_vm0, %v2271_v54  ;;  %v1506_v60 = vadd.f32 %v1505_v56, %v1217_v55  ;;  %v1220_v61 = vadd.f32 %v3138_v15, %v1219_v59  ;;  %v1508_v62 = vpop.f32.mrb[70].mxu0  ;;  %v1221_v63 = vpop.f32.mrb[71].mxu1 }
 0x1a0   :  { %v1510_v0 = vpop.f32.mrb[71].mxu0 }
 0x1a1   :  { %v1658_v1 = vmax.f32 %v1506_v60, 0.0  ;;  %v1509_v2 = vadd.f32 %v1508_v62, %v1220_v61 }
 0x1a3   :  { %v2272_v3 = vpack.c.bf16 %v1658_v1, %v1658_v1  ;;  %v1659_v4 = vmax.f32 %v1509_v2, 0.0 }
 0x1a4   :  { %v1224_v5 = vpop.f32.mrb[72].mxu1 }
 0x1a5   :  { %1979 = vst.msk [vmem:[%s3522_s3 + $0x88] sm:$0xf] %vm1944_vm0, %v2272_v3  ;;  %v2273_v6 = vpack.c.bf16 %v1659_v4, %v1659_v4  ;;  %v1225_v7 = vadd.f32 %v3138_v15, %v1224_v5  ;;  %v1513_v8 = vpop.f32.mrb[72].mxu0  ;;  %v1226_v9 = vpop.f32.mrb[73].mxu1 }
 0x1a6   :  { %v1515_v10 = vpop.f32.mrb[73].mxu0  ;;  %v1227_v11 = vpop.f32.mrb[74].mxu1 }
 0x1a7   :  { %1980 = vst.msk [vmem:[%s3522_s3 + $0x8c] sm:$0xf] %vm1944_vm0, %v2273_v6  ;;  %v1514_v12 = vadd.f32 %v1513_v8, %v1225_v7  ;;  %v1228_v13 = vadd.f32 %v3138_v15, %v1227_v11  ;;  %v1516_v14 = vpop.f32.mrb[74].mxu0  ;;  %v1229_v16 = vpop.f32.mrb[75].mxu1 }
 0x1a8   :  { %v1518_v17 = vpop.f32.mrb[75].mxu0 }
 0x1a9   :  { %v1660_v18 = vmax.f32 %v1514_v12, 0.0  ;;  %v1517_v19 = vadd.f32 %v1516_v14, %v1228_v13 }
 0x1ab   :  { %v2274_v20 = vpack.c.bf16 %v1660_v18, %v1660_v18  ;;  %v1661_v21 = vmax.f32 %v1517_v19, 0.0 }
 0x1ac   :  { %v1232_v22 = vpop.f32.mrb[76].mxu1 }
 0x1ad   :  { %1981 = vst.msk [vmem:[%s3522_s3 + $0x90] sm:$0xf] %vm1944_vm0, %v2274_v20  ;;  %v2275_v23 = vpack.c.bf16 %v1661_v21, %v1661_v21  ;;  %v1233_v24 = vadd.f32 %v3138_v15, %v1232_v22  ;;  %v1521_v25 = vpop.f32.mrb[76].mxu0  ;;  %v1234_v26 = vpop.f32.mrb[77].mxu1 }
 0x1ae   :  { %v1523_v27 = vpop.f32.mrb[77].mxu0  ;;  %v1235_v28 = vpop.f32.mrb[78].mxu1 }
 0x1af   :  { %1982 = vst.msk [vmem:[%s3522_s3 + $0x94] sm:$0xf] %vm1944_vm0, %v2275_v23  ;;  %v1522_v29 = vadd.f32 %v1521_v25, %v1233_v24  ;;  %v1236_v30 = vadd.f32 %v3138_v15, %v1235_v28  ;;  %v1524_v31 = vpop.f32.mrb[78].mxu0  ;;  %v1237_v32 = vpop.f32.mrb[79].mxu1 }
 0x1b0   :  { %v1526_v33 = vpop.f32.mrb[79].mxu0 }
 0x1b1   :  { %v1662_v34 = vmax.f32 %v1522_v29, 0.0  ;;  %v1525_v35 = vadd.f32 %v1524_v31, %v1236_v30 }
 0x1b3   :  { %v2276_v36 = vpack.c.bf16 %v1662_v34, %v1662_v34  ;;  %v1663_v37 = vmax.f32 %v1525_v35, 0.0 }
 0x1b4   :  { %v1240_v38 = vpop.f32.mrb[80].mxu1 }
 0x1b5   :  { %1983 = vst.msk [vmem:[%s3522_s3 + $0x98] sm:$0xf] %vm1944_vm0, %v2276_v36  ;;  %v2277_v39 = vpack.c.bf16 %v1663_v37, %v1663_v37  ;;  %v1241_v40 = vadd.f32 %v3138_v15, %v1240_v38  ;;  %v1529_v41 = vpop.f32.mrb[80].mxu0  ;;  %v1242_v42 = vpop.f32.mrb[81].mxu1 }
 0x1b6   :  { %v1531_v43 = vpop.f32.mrb[81].mxu0  ;;  %v1243_v44 = vpop.f32.mrb[82].mxu1 }
 0x1b7   :  { %1984 = vst.msk [vmem:[%s3522_s3 + $0x9c] sm:$0xf] %vm1944_vm0, %v2277_v39  ;;  %v1530_v45 = vadd.f32 %v1529_v41, %v1241_v40  ;;  %v1244_v46 = vadd.f32 %v3138_v15, %v1243_v44  ;;  %v1532_v47 = vpop.f32.mrb[82].mxu0  ;;  %v1245_v48 = vpop.f32.mrb[83].mxu1 }
 0x1b8   :  { %v1534_v49 = vpop.f32.mrb[83].mxu0 }
 0x1b9   :  { %v1664_v50 = vmax.f32 %v1530_v45, 0.0  ;;  %v1533_v51 = vadd.f32 %v1532_v47, %v1244_v46 }
 0x1bb   :  { %v2278_v52 = vpack.c.bf16 %v1664_v50, %v1664_v50  ;;  %v1665_v53 = vmax.f32 %v1533_v51, 0.0 }
 0x1bc   :  { %v1248_v54 = vpop.f32.mrb[84].mxu1 }
 0x1bd   :  { %1985 = vst.msk [vmem:[%s3522_s3 + $0xa0] sm:$0xf] %vm1944_vm0, %v2278_v52  ;;  %v2279_v55 = vpack.c.bf16 %v1665_v53, %v1665_v53  ;;  %v1249_v56 = vadd.f32 %v3138_v15, %v1248_v54  ;;  %v1537_v57 = vpop.f32.mrb[84].mxu0  ;;  %v1250_v58 = vpop.f32.mrb[85].mxu1 }
 0x1be   :  { %v1539_v59 = vpop.f32.mrb[85].mxu0  ;;  %v1251_v60 = vpop.f32.mrb[86].mxu1 }
 0x1bf   :  { %1986 = vst.msk [vmem:[%s3522_s3 + $0xa4] sm:$0xf] %vm1944_vm0, %v2279_v55  ;;  %v1538_v61 = vadd.f32 %v1537_v57, %v1249_v56  ;;  %v1252_v62 = vadd.f32 %v3138_v15, %v1251_v60  ;;  %v1540_v63 = vpop.f32.mrb[86].mxu0  ;;  %v1253_v0 = vpop.f32.mrb[87].mxu1 }
 0x1c0   :  { %v1542_v1 = vpop.f32.mrb[87].mxu0 }
 0x1c1   :  { %v1666_v2 = vmax.f32 %v1538_v61, 0.0  ;;  %v1541_v3 = vadd.f32 %v1540_v63, %v1252_v62 }
 0x1c3   :  { %v2280_v4 = vpack.c.bf16 %v1666_v2, %v1666_v2  ;;  %v1667_v5 = vmax.f32 %v1541_v3, 0.0 }
 0x1c4   :  { %v1256_v6 = vpop.f32.mrb[88].mxu1 }
 0x1c5   :  { %1987 = vst.msk [vmem:[%s3522_s3 + $0xa8] sm:$0xf] %vm1944_vm0, %v2280_v4  ;;  %v2281_v7 = vpack.c.bf16 %v1667_v5, %v1667_v5  ;;  %v1257_v8 = vadd.f32 %v3138_v15, %v1256_v6  ;;  %v1545_v9 = vpop.f32.mrb[88].mxu0  ;;  %v1258_v10 = vpop.f32.mrb[89].mxu1 }
 0x1c6   :  { %v1547_v11 = vpop.f32.mrb[89].mxu0  ;;  %v1259_v12 = vpop.f32.mrb[90].mxu1 }
 0x1c7   :  { %1988 = vst.msk [vmem:[%s3522_s3 + $0xac] sm:$0xf] %vm1944_vm0, %v2281_v7  ;;  %v1546_v13 = vadd.f32 %v1545_v9, %v1257_v8  ;;  %v1260_v14 = vadd.f32 %v3138_v15, %v1259_v12  ;;  %v1548_v16 = vpop.f32.mrb[90].mxu0  ;;  %v1261_v17 = vpop.f32.mrb[91].mxu1 }
 0x1c8   :  { %v1550_v18 = vpop.f32.mrb[91].mxu0 }
 0x1c9   :  { %v1668_v19 = vmax.f32 %v1546_v13, 0.0  ;;  %v1549_v20 = vadd.f32 %v1548_v16, %v1260_v14  ;;  %v3458_v16 = vld [vmem:[%s3521_s2] ss:$0 sm:$0xff] }
 0x1cb   :  { %v2282_v21 = vpack.c.bf16 %v1668_v19, %v1668_v19  ;;  %v1669_v22 = vmax.f32 %v1549_v20, 0.0 }
 0x1cc   :  { %v1264_v23 = vpop.f32.mrb[92].mxu1 }
 0x1cd   :  { %1989 = vst.msk [vmem:[%s3522_s3 + $0xb0] sm:$0xf] %vm1944_vm0, %v2282_v21  ;;  %v2283_v24 = vpack.c.bf16 %v1669_v22, %v1669_v22  ;;  %v1265_v25 = vadd.f32 %v3138_v15, %v1264_v23  ;;  %v1553_v26 = vpop.f32.mrb[92].mxu0  ;;  %v1266_v27 = vpop.f32.mrb[93].mxu1 }
 0x1ce   :  { %v1555_v28 = vpop.f32.mrb[93].mxu0  ;;  %v1267_v29 = vpop.f32.mrb[94].mxu1 }
 0x1cf   :  { %1990 = vst.msk [vmem:[%s3522_s3 + $0xb4] sm:$0xf] %vm1944_vm0, %v2283_v24  ;;  %v1554_v30 = vadd.f32 %v1553_v26, %v1265_v25  ;;  %v1268_v31 = vadd.f32 %v3138_v15, %v1267_v29  ;;  %v1556_v32 = vpop.f32.mrb[94].mxu0  ;;  %v1269_v33 = vpop.f32.mrb[95].mxu1 }
 0x1d0   :  { %v1558_v34 = vpop.f32.mrb[95].mxu0 }
 0x1d1   :  { %v1670_v35 = vmax.f32 %v1554_v30, 0.0  ;;  %v1557_v36 = vadd.f32 %v1556_v32, %v1268_v31 }
 0x1d3   :  { %v2284_v37 = vpack.c.bf16 %v1670_v35, %v1670_v35  ;;  %v1671_v38 = vmax.f32 %v1557_v36, 0.0 }
 0x1d4   :  { %v1272_v39 = vpop.f32.mrb[96].mxu1 }
 0x1d5   :  { %1991 = vst.msk [vmem:[%s3522_s3 + $0xb8] sm:$0xf] %vm1944_vm0, %v2284_v37  ;;  %v2285_v40 = vpack.c.bf16 %v1671_v38, %v1671_v38  ;;  %v1273_v41 = vadd.f32 %v3138_v15, %v1272_v39  ;;  %v1561_v42 = vpop.f32.mrb[96].mxu0  ;;  %v1274_v43 = vpop.f32.mrb[97].mxu1 }
 0x1d6   :  { %v1563_v44 = vpop.f32.mrb[97].mxu0  ;;  %v1275_v45 = vpop.f32.mrb[98].mxu1 }
 0x1d7   :  { %1992 = vst.msk [vmem:[%s3522_s3 + $0xbc] sm:$0xf] %vm1944_vm0, %v2285_v40  ;;  %v1562_v46 = vadd.f32 %v1561_v42, %v1273_v41  ;;  %v1276_v47 = vadd.f32 %v3138_v15, %v1275_v45  ;;  %v1564_v48 = vpop.f32.mrb[98].mxu0  ;;  %v1277_v49 = vpop.f32.mrb[99].mxu1 }
 0x1d8   :  { %v1566_v50 = vpop.f32.mrb[99].mxu0 }
 0x1d9   :  { %v1672_v51 = vmax.f32 %v1562_v46, 0.0  ;;  %v1565_v52 = vadd.f32 %v1564_v48, %v1276_v47 }
 0x1db   :  { %v2286_v53 = vpack.c.bf16 %v1672_v51, %v1672_v51  ;;  %v1673_v54 = vmax.f32 %v1565_v52, 0.0 }
 0x1dc   :  { %v1280_v55 = vpop.f32.mrb[100].mxu1 }
 0x1dd   :  { %1993 = vst.msk [vmem:[%s3522_s3 + $0xc0] sm:$0xf] %vm1944_vm0, %v2286_v53  ;;  %v2287_v56 = vpack.c.bf16 %v1673_v54, %v1673_v54  ;;  %v1281_v57 = vadd.f32 %v3138_v15, %v1280_v55  ;;  %v1569_v58 = vpop.f32.mrb[100].mxu0  ;;  %v1282_v59 = vpop.f32.mrb[101].mxu1 }
 0x1de   :  { %v1571_v60 = vpop.f32.mrb[101].mxu0  ;;  %v1283_v61 = vpop.f32.mrb[102].mxu1 }
 0x1df   :  { %1994 = vst.msk [vmem:[%s3522_s3 + $0xc4] sm:$0xf] %vm1944_vm0, %v2287_v56  ;;  %v1570_v62 = vadd.f32 %v1569_v58, %v1281_v57  ;;  %v1284_v63 = vadd.f32 %v3138_v15, %v1283_v61  ;;  %v1572_v0 = vpop.f32.mrb[102].mxu0  ;;  %v1285_v1 = vpop.f32.mrb[103].mxu1 }
 0x1e0   :  { %v1574_v2 = vpop.f32.mrb[103].mxu0 }
 0x1e1   :  { %v1674_v3 = vmax.f32 %v1570_v62, 0.0  ;;  %v1573_v4 = vadd.f32 %v1572_v0, %v1284_v63 }
 0x1e3   :  { %v2288_v5 = vpack.c.bf16 %v1674_v3, %v1674_v3  ;;  %v1675_v6 = vmax.f32 %v1573_v4, 0.0 }
 0x1e4   :  { %v1288_v7 = vpop.f32.mrb[104].mxu1 }
 0x1e5   :  { %1995 = vst.msk [vmem:[%s3522_s3 + $0xc8] sm:$0xf] %vm1944_vm0, %v2288_v5  ;;  %v2289_v8 = vpack.c.bf16 %v1675_v6, %v1675_v6  ;;  %v1289_v9 = vadd.f32 %v3138_v15, %v1288_v7  ;;  %v1577_v10 = vpop.f32.mrb[104].mxu0  ;;  %v1290_v11 = vpop.f32.mrb[105].mxu1 }
 0x1e6   :  { %v1579_v12 = vpop.f32.mrb[105].mxu0  ;;  %v1291_v13 = vpop.f32.mrb[106].mxu1 }
 0x1e7   :  { %1996 = vst.msk [vmem:[%s3522_s3 + $0xcc] sm:$0xf] %vm1944_vm0, %v2289_v8  ;;  %v1578_v14 = vadd.f32 %v1577_v10, %v1289_v9  ;;  %v1292_v17 = vadd.f32 %v3458_v16, %v1291_v13  ;;  %v1580_v18 = vpop.f32.mrb[106].mxu0  ;;  %v1293_v19 = vpop.f32.mrb[107].mxu1 }
 0x1e8   :  { %v1582_v15 = vpop.f32.mrb[107].mxu0 }
 0x1e9   :  { %v1676_v20 = vmax.f32 %v1578_v14, 0.0  ;;  %v1581_v21 = vadd.f32 %v1580_v18, %v1292_v17 }
 0x1eb   :  { %v2290_v22 = vpack.c.bf16 %v1676_v20, %v1676_v20  ;;  %v1677_v23 = vmax.f32 %v1581_v21, 0.0 }
 0x1ec   :  { %v1296_v24 = vpop.f32.mrb[108].mxu1 }
 0x1ed   :  { %1997 = vst.msk [vmem:[%s3522_s3 + $0xd0] sm:$0xf] %vm1944_vm0, %v2290_v22  ;;  %v2291_v25 = vpack.c.bf16 %v1677_v23, %v1677_v23  ;;  %v1297_v26 = vadd.f32 %v3458_v16, %v1296_v24  ;;  %v1585_v27 = vpop.f32.mrb[108].mxu0  ;;  %v1298_v28 = vpop.f32.mrb[109].mxu1 }
 0x1ee   :  { %v1587_v29 = vpop.f32.mrb[109].mxu0  ;;  %v1299_v30 = vpop.f32.mrb[110].mxu1 }
 0x1ef   :  { %1998 = vst.msk [vmem:[%s3522_s3 + $0xd4] sm:$0xf] %vm1944_vm0, %v2291_v25  ;;  %v1586_v31 = vadd.f32 %v1585_v27, %v1297_v26  ;;  %v1300_v32 = vadd.f32 %v3458_v16, %v1299_v30  ;;  %v1588_v33 = vpop.f32.mrb[110].mxu0  ;;  %v1301_v34 = vpop.f32.mrb[111].mxu1 }
 0x1f0   :  { %v1590_v35 = vpop.f32.mrb[111].mxu0 }
 0x1f1   :  { %v1678_v36 = vmax.f32 %v1586_v31, 0.0  ;;  %v1589_v37 = vadd.f32 %v1588_v33, %v1300_v32 }
 0x1f3   :  { %v2292_v38 = vpack.c.bf16 %v1678_v36, %v1678_v36  ;;  %v1679_v39 = vmax.f32 %v1589_v37, 0.0 }
 0x1f4   :  { %v1304_v40 = vpop.f32.mrb[112].mxu1 }
 0x1f5   :  { %1999 = vst.msk [vmem:[%s3522_s3 + $0xd8] sm:$0xf] %vm1944_vm0, %v2292_v38  ;;  %v2293_v41 = vpack.c.bf16 %v1679_v39, %v1679_v39  ;;  %v1305_v42 = vadd.f32 %v3458_v16, %v1304_v40  ;;  %v1593_v43 = vpop.f32.mrb[112].mxu0  ;;  %v1306_v44 = vpop.f32.mrb[113].mxu1 }
 0x1f6   :  { %v1595_v45 = vpop.f32.mrb[113].mxu0  ;;  %v1307_v46 = vpop.f32.mrb[114].mxu1 }
 0x1f7   :  { %2000 = vst.msk [vmem:[%s3522_s3 + $0xdc] sm:$0xf] %vm1944_vm0, %v2293_v41  ;;  %v1594_v47 = vadd.f32 %v1593_v43, %v1305_v42  ;;  %v1308_v48 = vadd.f32 %v3458_v16, %v1307_v46  ;;  %v1596_v49 = vpop.f32.mrb[114].mxu0  ;;  %v1309_v50 = vpop.f32.mrb[115].mxu1 }
 0x1f8   :  { %v1598_v51 = vpop.f32.mrb[115].mxu0 }
 0x1f9   :  { %v1680_v52 = vmax.f32 %v1594_v47, 0.0  ;;  %v1597_v53 = vadd.f32 %v1596_v49, %v1308_v48 }
 0x1fb   :  { %v2294_v54 = vpack.c.bf16 %v1680_v52, %v1680_v52  ;;  %v1681_v55 = vmax.f32 %v1597_v53, 0.0 }
 0x1fc   :  { %v1312_v56 = vpop.f32.mrb[116].mxu1 }
 0x1fd   :  { %2001 = vst.msk [vmem:[%s3522_s3 + $0xe0] sm:$0xf] %vm1944_vm0, %v2294_v54  ;;  %v2295_v57 = vpack.c.bf16 %v1681_v55, %v1681_v55  ;;  %v1313_v58 = vadd.f32 %v3458_v16, %v1312_v56  ;;  %v1601_v59 = vpop.f32.mrb[116].mxu0  ;;  %v1314_v60 = vpop.f32.mrb[117].mxu1 }
 0x1fe   :  { %v1603_v61 = vpop.f32.mrb[117].mxu0  ;;  %v1315_v62 = vpop.f32.mrb[118].mxu1 }
 0x1ff   :  { %2002 = vst.msk [vmem:[%s3522_s3 + $0xe4] sm:$0xf] %vm1944_vm0, %v2295_v57  ;;  %v1602_v63 = vadd.f32 %v1601_v59, %v1313_v58  ;;  %v1316_v0 = vadd.f32 %v3458_v16, %v1315_v62  ;;  %v1604_v1 = vpop.f32.mrb[118].mxu0  ;;  %v1317_v2 = vpop.f32.mrb[119].mxu1 }
 0x200   :  { %v1606_v3 = vpop.f32.mrb[119].mxu0 }
 0x201   :  { %v1682_v4 = vmax.f32 %v1602_v63, 0.0  ;;  %v1605_v5 = vadd.f32 %v1604_v1, %v1316_v0 }
 0x203   :  { %v2296_v6 = vpack.c.bf16 %v1682_v4, %v1682_v4  ;;  %v1683_v7 = vmax.f32 %v1605_v5, 0.0 }
 0x204   :  { %v1320_v8 = vpop.f32.mrb[120].mxu1 }
 0x205   :  { %2003 = vst.msk [vmem:[%s3522_s3 + $0xe8] sm:$0xf] %vm1944_vm0, %v2296_v6  ;;  %v2297_v9 = vpack.c.bf16 %v1683_v7, %v1683_v7  ;;  %v1321_v10 = vadd.f32 %v3458_v16, %v1320_v8  ;;  %v1609_v11 = vpop.f32.mrb[120].mxu0  ;;  %v1322_v12 = vpop.f32.mrb[121].mxu1 }
 0x206   :  { %v1611_v13 = vpop.f32.mrb[121].mxu0  ;;  %v1323_v14 = vpop.f32.mrb[122].mxu1 }
 0x207   :  { %2004 = vst.msk [vmem:[%s3522_s3 + $0xec] sm:$0xf] %vm1944_vm0, %v2297_v9  ;;  %v1610_v17 = vadd.f32 %v1609_v11, %v1321_v10  ;;  %v1324_v18 = vadd.f32 %v3458_v16, %v1323_v14  ;;  %v1612_v19 = vpop.f32.mrb[122].mxu0  ;;  %v1325_v15 = vpop.f32.mrb[123].mxu1 }
 0x208   :  { %v1614_v20 = vpop.f32.mrb[123].mxu0 }
 0x209   :  { %v1684_v21 = vmax.f32 %v1610_v17, 0.0  ;;  %v1613_v22 = vadd.f32 %v1612_v19, %v1324_v18 }
 0x20b   :  { %v2298_v23 = vpack.c.bf16 %v1684_v21, %v1684_v21  ;;  %v1685_v24 = vmax.f32 %v1613_v22, 0.0 }
 0x20c   :  { %v1328_v25 = vpop.f32.mrb[124].mxu1 }
 0x20d   :  { %2005 = vst.msk [vmem:[%s3522_s3 + $0xf0] sm:$0xf] %vm1944_vm0, %v2298_v23  ;;  %v2299_v26 = vpack.c.bf16 %v1685_v24, %v1685_v24  ;;  %v1329_v27 = vadd.f32 %v3458_v16, %v1328_v25  ;;  %v1617_v28 = vpop.f32.mrb[124].mxu0  ;;  %v1330_v29 = vpop.f32.mrb[125].mxu1 }
 0x20e   :  { %v1619_v30 = vpop.f32.mrb[125].mxu0  ;;  %v1331_v31 = vpop.f32.mrb[126].mxu1 }
 0x20f   :  { %2006 = vst.msk [vmem:[%s3522_s3 + $0xf4] sm:$0xf] %vm1944_vm0, %v2299_v26  ;;  %v1618_v32 = vadd.f32 %v1617_v28, %v1329_v27  ;;  %v1332_v33 = vadd.f32 %v3458_v16, %v1331_v31  ;;  %v1620_v34 = vpop.f32.mrb[126].mxu0  ;;  %v1333_v35 = vpop.f32.mrb[127].mxu1 }
 0x210   :  { %v1622_v36 = vpop.f32.mrb[127].mxu0 }
 0x211   :  { %v1686_v37 = vmax.f32 %v1618_v32, 0.0  ;;  %v1621_v38 = vadd.f32 %v1620_v34, %v1332_v33 }
 0x213   :  { %v2300_v39 = vpack.c.bf16 %v1686_v37, %v1686_v37  ;;  %v1687_v40 = vmax.f32 %v1621_v38, 0.0 }
 0x215   :  { %2007 = vst.msk [vmem:[%s3522_s3 + $0xf8] sm:$0xf] %vm1944_vm0, %v2300_v39  ;;  %v2301_v41 = vpack.c.bf16 %v1687_v40, %v1687_v40 }
 0x217   :  { %2008 = vst.msk [vmem:[%s3522_s3 + $0xfc] sm:$0xf] %vm1944_vm0, %v2301_v41 }

// kernel: vae_forward.11
= control target key start
LH: loop header
LB: loop body
LE: loop exit
PB: predicated region body
PF: predicated region fallthrough
CT: control target
= control target key end

     0   :  { %vm744_vm0 = vcmask 519168   ;;  %s1367_s1 = inlined_call_operand.vmem [shape: bf16[512,64], index: 1, kind: input, shape index: {}]   ;;  %s1368_s0 = inlined_call_operand.vmem [shape: bf16[128,512], index: 0, kind: input, shape index: {}]   ;;  %s1369_s2 = inlined_call_operand.vmem [shape: f32[1,64], index: 2, kind: input, shape index: {}]   ;;  %s1370_s3 = inlined_call_operand.vmem [shape: bf16[128,64], index: 3, kind: output, shape index: {}]  }
   0x1   :  { %v990_v0 = vld [vmem:[%s1367_s1 + $0x40] sm:$0xff]   ;;  %v994_v4 = vld [vmem:[%s1367_s1 + $0x48] sm:$0xff]   ;;  %v998_v8 = vld [vmem:[%s1367_s1 + $0x50] sm:$0xff]  }
   0x2   :  { %v991_v1 = vld [vmem:[%s1367_s1 + $0xc0] sm:$0xff]   ;;  %862 = vmatprep.subr.bf16.mxu0 %v990_v0  ;;  %v995_v5 = vld [vmem:[%s1367_s1 + $0xc8] sm:$0xff]   ;;  %v999_v9 = vld [vmem:[%s1367_s1 + $0xd0] sm:$0xff]  }
   0x3   :  { %v992_v2 = vld [vmem:[%s1367_s1] sm:$0xff]   ;;  %926 = vmatprep.subr.bf16.mxu1 %v991_v1  ;;  %v996_v6 = vld [vmem:[%s1367_s1 + $0x8] sm:$0xff]   ;;  %v1000_v10 = vld [vmem:[%s1367_s1 + $0x10] sm:$0xff]  }
   0x4   :  { %v993_v3 = vld [vmem:[%s1367_s1 + $0x80] sm:$0xff]   ;;  %863 = vmatpush3.bf16.msra.mxu0 %v992_v2  ;;  %v997_v7 = vld [vmem:[%s1367_s1 + $0x88] sm:$0xff]   ;;  %v1001_v11 = vld [vmem:[%s1367_s1 + $0x90] sm:$0xff]  }
   0x5   :  { %927 = vmatpush3.bf16.msra.mxu1 %v993_v3  ;;  %864 = vmatprep.subr.bf16.mxu0 %v994_v4  ;;  %v1002_v12 = vld [vmem:[%s1367_s1 + $0x58] sm:$0xff]   ;;  %v1006_v16 = vld [vmem:[%s1367_s1 + $0x60] sm:$0xff]   ;;  %v1010_v20 = vld [vmem:[%s1367_s1 + $0x68] sm:$0xff]  }
   0x6   :  { %928 = vmatprep.subr.bf16.mxu1 %v995_v5  ;;  %v1003_v13 = vld [vmem:[%s1367_s1 + $0xd8] sm:$0xff]   ;;  %v1007_v17 = vld [vmem:[%s1367_s1 + $0xe0] sm:$0xff]   ;;  %v1011_v21 = vld [vmem:[%s1367_s1 + $0xe8] sm:$0xff]  }
   0x7   :  { %v1004_v14 = vld [vmem:[%s1367_s1 + $0x18] sm:$0xff]   ;;  %v1008_v18 = vld [vmem:[%s1367_s1 + $0x20] sm:$0xff]   ;;  %v1012_v22 = vld [vmem:[%s1367_s1 + $0x28] sm:$0xff]  }
   0x8   :  { %865 = vmatpush3.bf16.msra.mxu0 %v996_v6  ;;  %v1005_v15 = vld [vmem:[%s1367_s1 + $0x98] sm:$0xff]   ;;  %v1009_v19 = vld [vmem:[%s1367_s1 + $0xa0] sm:$0xff]   ;;  %v1013_v23 = vld [vmem:[%s1367_s1 + $0xa8] sm:$0xff]  }
   0x9   :  { %929 = vmatpush3.bf16.msra.mxu1 %v997_v7  ;;  %866 = vmatprep.subr.bf16.mxu0 %v998_v8  ;;  %v1014_v24 = vld [vmem:[%s1367_s1 + $0x70] sm:$0xff]   ;;  %v1018_v28 = vld [vmem:[%s1367_s1 + $0x78] sm:$0xff]   ;;  %v1285_v2 = vld [vmem:[%s1369_s2] ss:$0 sm:$0xff] }
   0xa   :  { %930 = vmatprep.subr.bf16.mxu1 %v999_v9  ;;  %v1015_v25 = vld [vmem:[%s1367_s1 + $0xf0] sm:$0xff]   ;;  %v1019_v29 = vld [vmem:[%s1367_s1 + $0xf8] sm:$0xff]  }
   0xb   :  { %v1016_v26 = vld [vmem:[%s1367_s1 + $0x30] sm:$0xff]   ;;  %v1020_v30 = vld [vmem:[%s1367_s1 + $0x38] sm:$0xff]  }
   0xc   :  { %867 = vmatpush3.bf16.msra.mxu0 %v1000_v10  ;;  %v1017_v27 = vld [vmem:[%s1367_s1 + $0xb0] sm:$0xff]   ;;  %v1021_v31 = vld [vmem:[%s1367_s1 + $0xb8] sm:$0xff]  }
   0xd   :  { %931 = vmatpush3.bf16.msra.mxu1 %v1001_v11  ;;  %868 = vmatprep.subr.bf16.mxu0 %v1002_v12  ;;  %v1022_v32 = vld [vmem:[%s1368_s0] ss:$16 sps:$4 sm:$0xff]   ;;  %v1024_v33 = vld [vmem:[%s1368_s0 + $0x4] ss:$16 sps:$4 sm:$0xff]   ;;  %v1025_v34 = vld [vmem:[%s1368_s0 + $0x8] ss:$16 sps:$4 sm:$0xff]  }
   0xe   :  { %932 = vmatprep.subr.bf16.mxu1 %v1003_v13  ;;  %v1027_v35 = vld [vmem:[%s1368_s0 + $0xc] ss:$16 sps:$4 sm:$0xff]   ;;  %502 = vmatprep.mubr.bf16.mxu0 %v1024_v33  ;;  %v1028_v36 = vld [vmem:[%s1368_s0 + $0x24] ss:$16 sps:$4 sm:$0xff]   ;;  %v1032_v38 = vld [vmem:[%s1368_s0 + $0x20] ss:$16 sps:$4 sm:$0xff]  }
   0xf   :  { %599 = vmatprep.mubr.bf16.mxu1 %v1027_v35  ;;  %v1030_v37 = vld [vmem:[%s1368_s0 + $0x2c] ss:$16 sps:$4 sm:$0xff]   ;;  %v1033_v39 = vld [vmem:[%s1368_s0 + $0x28] ss:$16 sps:$4 sm:$0xff]   ;;  %v1034_v40 = vld [vmem:[%s1368_s0 + $0x44] ss:$16 sps:$4 sm:$0xff]  }
  0x10   :  { %869 = vmatpush3.bf16.msra.mxu0 %v1004_v14  ;;  %v1036_v41 = vld [vmem:[%s1368_s0 + $0x4c] ss:$16 sps:$4 sm:$0xff]   ;;  %v1038_v42 = vld [vmem:[%s1368_s0 + $0x40] ss:$16 sps:$4 sm:$0xff]   ;;  %v1039_v43 = vld [vmem:[%s1368_s0 + $0x48] ss:$16 sps:$4 sm:$0xff]  }
  0x11   :  { %933 = vmatpush3.bf16.msra.mxu1 %v1005_v15  ;;  %870 = vmatprep.subr.bf16.mxu0 %v1006_v16  ;;  %v1040_v44 = vld [vmem:[%s1368_s0 + $0x64] ss:$16 sps:$4 sm:$0xff]   ;;  %v1042_v45 = vld [vmem:[%s1368_s0 + $0x6c] ss:$16 sps:$4 sm:$0xff]   ;;  %v1044_v46 = vld [vmem:[%s1368_s0 + $0x60] ss:$16 sps:$4 sm:$0xff]  }
  0x12   :  { %934 = vmatprep.subr.bf16.mxu1 %v1007_v17  ;;  %v1045_v47 = vld [vmem:[%s1368_s0 + $0x68] ss:$16 sps:$4 sm:$0xff]   ;;  %v1046_v48 = vld [vmem:[%s1368_s0 + $0x84] ss:$16 sps:$4 sm:$0xff]   ;;  %v1048_v49 = vld [vmem:[%s1368_s0 + $0x8c] ss:$16 sps:$4 sm:$0xff]  }
  0x13   :  { %v1050_v50 = vld [vmem:[%s1368_s0 + $0x80] ss:$16 sps:$4 sm:$0xff]   ;;  %v1051_v51 = vld [vmem:[%s1368_s0 + $0x88] ss:$16 sps:$4 sm:$0xff]   ;;  %v1052_v52 = vld [vmem:[%s1368_s0 + $0xa4] ss:$16 sps:$4 sm:$0xff]  }
  0x14   :  { %871 = vmatpush3.bf16.msra.mxu0 %v1008_v18  ;;  %v1054_v53 = vld [vmem:[%s1368_s0 + $0xac] ss:$16 sps:$4 sm:$0xff]   ;;  %v1056_v54 = vld [vmem:[%s1368_s0 + $0xa0] ss:$16 sps:$4 sm:$0xff]   ;;  %v1057_v55 = vld [vmem:[%s1368_s0 + $0xa8] ss:$16 sps:$4 sm:$0xff]  }
  0x15   :  { %935 = vmatpush3.bf16.msra.mxu1 %v1009_v19  ;;  %872 = vmatprep.subr.bf16.mxu0 %v1010_v20  ;;  %v1058_v56 = vld [vmem:[%s1368_s0 + $0xc4] ss:$16 sps:$4 sm:$0xff]   ;;  %v1060_v57 = vld [vmem:[%s1368_s0 + $0xcc] ss:$16 sps:$4 sm:$0xff]   ;;  %v1062_v58 = vld [vmem:[%s1368_s0 + $0xc0] ss:$16 sps:$4 sm:$0xff]  }
  0x16   :  { %936 = vmatprep.subr.bf16.mxu1 %v1011_v21  ;;  %v1063_v59 = vld [vmem:[%s1368_s0 + $0xc8] ss:$16 sps:$4 sm:$0xff]   ;;  %v1064_v60 = vld [vmem:[%s1368_s0 + $0xe4] ss:$16 sps:$4 sm:$0xff]   ;;  %v1066_v61 = vld [vmem:[%s1368_s0 + $0xec] ss:$16 sps:$4 sm:$0xff]  }
  0x17   :  { %v1068_v62 = vld [vmem:[%s1368_s0 + $0xe0] ss:$16 sps:$4 sm:$0xff]   ;;  %v1069_v63 = vld [vmem:[%s1368_s0 + $0xe8] ss:$16 sps:$4 sm:$0xff]  }
  0x18   :  { %873 = vmatpush3.bf16.msra.mxu0 %v1012_v22 }
  0x19   :  { %937 = vmatpush3.bf16.msra.mxu1 %v1013_v23  ;;  %874 = vmatprep.subr.bf16.mxu0 %v1014_v24 }
  0x1a   :  { %938 = vmatprep.subr.bf16.mxu1 %v1015_v25 }
  0x1c   :  { %875 = vmatpush3.bf16.msra.mxu0 %v1016_v26 }
  0x1d   :  { %939 = vmatpush3.bf16.msra.mxu1 %v1017_v27  ;;  %876 = vmatprep.subr.bf16.mxu0 %v1018_v28 }
  0x1e   :  { %940 = vmatprep.subr.bf16.mxu1 %v1019_v29 }
  0x20   :  { %877 = vmatpush3.bf16.msra.mxu0 %v1020_v30 }
  0x21   :  { %941 = vmatpush3.bf16.msra.mxu1 %v1021_v31 }
  0x23   :  { %503 = vmatmul.mubr.bf16.vlgmr.msra.gmra.mrb[0].mxu0 %v1022_v32 }
  0x24   :  { %600 = vmatmul.mubr.bf16.vlgmr.msra.gmra.mrb[0].mxu1 %v1025_v34  ;;  %510 = vmatprep.mubr.bf16.mxu0 %v1028_v36 }
  0x25   :  { %607 = vmatprep.mubr.bf16.mxu1 %v1030_v37 }
  0x2b   :  { %511 = vmatmul.mubr.bf16.gmra.mrb[4].mxu0 %v1032_v38 }
  0x2c   :  { %608 = vmatmul.mubr.bf16.gmra.mrb[4].mxu1 %v1033_v39  ;;  %518 = vmatprep.mubr.bf16.mxu0 %v1034_v40 }
  0x2d   :  { %615 = vmatprep.mubr.bf16.mxu1 %v1036_v41 }
  0x33   :  { %519 = vmatmul.mubr.bf16.gmra.mrb[8].mxu0 %v1038_v42 }
  0x34   :  { %616 = vmatmul.mubr.bf16.gmra.mrb[8].mxu1 %v1039_v43  ;;  %526 = vmatprep.mubr.bf16.mxu0 %v1040_v44 }
  0x35   :  { %623 = vmatprep.mubr.bf16.mxu1 %v1042_v45 }
  0x3b   :  { %527 = vmatmul.mubr.bf16.gmra.mrb[12].mxu0 %v1044_v46 }
  0x3c   :  { %624 = vmatmul.mubr.bf16.gmra.mrb[12].mxu1 %v1045_v47  ;;  %534 = vmatprep.mubr.bf16.mxu0 %v1046_v48 }
  0x3d   :  { %631 = vmatprep.mubr.bf16.mxu1 %v1048_v49 }
  0x43   :  { %535 = vmatmul.mubr.bf16.gmra.mrb[16].mxu0 %v1050_v50 }
  0x44   :  { %632 = vmatmul.mubr.bf16.gmra.mrb[16].mxu1 %v1051_v51  ;;  %542 = vmatprep.mubr.bf16.mxu0 %v1052_v52 }
  0x45   :  { %639 = vmatprep.mubr.bf16.mxu1 %v1054_v53 }
  0x4b   :  { %543 = vmatmul.mubr.bf16.gmra.mrb[20].mxu0 %v1056_v54 }
  0x4c   :  { %640 = vmatmul.mubr.bf16.gmra.mrb[20].mxu1 %v1057_v55  ;;  %550 = vmatprep.mubr.bf16.mxu0 %v1058_v56 }
  0x4d   :  { %647 = vmatprep.mubr.bf16.mxu1 %v1060_v57 }
  0x53   :  { %551 = vmatmul.mubr.bf16.gmra.mrb[24].mxu0 %v1062_v58 }
  0x54   :  { %648 = vmatmul.mubr.bf16.gmra.mrb[24].mxu1 %v1063_v59  ;;  %558 = vmatprep.mubr.bf16.mxu0 %v1064_v60 }
  0x55   :  { %655 = vmatprep.mubr.bf16.mxu1 %v1066_v61 }
  0x5b   :  { %559 = vmatmul.mubr.bf16.gmra.mrb[28].mxu0 %v1068_v62 }
  0x5c   :  { %656 = vmatmul.mubr.bf16.gmra.mrb[28].mxu1 %v1069_v63 }
  0xf6   :  { %v878_v0 = vpop.f32.mrb[0].mxu0 }
  0xf7   :  { %v942_v1 = vpop.f32.mrb[0].mxu1  ;;  %v879_v3 = vpop.f32.mrb[1].mxu0 }
  0xf8   :  { %v880_v4 = vadd.f32 %v879_v3, %v878_v0  ;;  %v943_v5 = vpop.f32.mrb[1].mxu1  ;;  %v881_v6 = vpop.f32.mrb[2].mxu0 }
  0xf9   :  { %v944_v7 = vadd.f32 %v943_v5, %v942_v1  ;;  %v945_v8 = vpop.f32.mrb[2].mxu1  ;;  %v882_v9 = vpop.f32.mrb[3].mxu0 }
  0xfa   :  { %v505_v10 = vadd.f32 %v880_v4, %v1285_v2  ;;  %v883_v11 = vadd.f32 %v882_v9, %v881_v6  ;;  %v946_v12 = vpop.f32.mrb[3].mxu1 }
  0xfb   :  { %v947_v13 = vadd.f32 %v946_v12, %v945_v8 }
  0xfc   :  { %v602_v14 = vadd.f32 %v944_v7, %v505_v10  ;;  %v508_v15 = vadd.f32 %v883_v11, %v1285_v2 }
  0xfe   :  { %v664_v16 = vmax.f32 %v602_v14, 0.0  ;;  %v605_v17 = vadd.f32 %v947_v13, %v508_v15  ;;  %v884_v18 = vpop.f32.mrb[4].mxu0 }
  0xff   :  { %v948_v19 = vpop.f32.mrb[4].mxu1  ;;  %v885_v20 = vpop.f32.mrb[5].mxu0 }
 0x100   :  { %v846_v21 = vpack.c.bf16 %v664_v16, %v664_v16  ;;  %v665_v22 = vmax.f32 %v605_v17, 0.0  ;;  %v886_v23 = vadd.f32 %v885_v20, %v884_v18  ;;  %v949_v24 = vpop.f32.mrb[5].mxu1  ;;  %v887_v25 = vpop.f32.mrb[6].mxu0 }
 0x101   :  { %v950_v26 = vadd.f32 %v949_v24, %v948_v19  ;;  %v951_v27 = vpop.f32.mrb[6].mxu1  ;;  %v888_v28 = vpop.f32.mrb[7].mxu0 }
 0x102   :  { %745 = vst.msk [vmem:[%s1370_s3] sm:$0xf] %vm744_vm0, %v846_v21  ;;  %v847_v29 = vpack.c.bf16 %v665_v22, %v665_v22  ;;  %v513_v30 = vadd.f32 %v886_v23, %v1285_v2  ;;  %v889_v31 = vadd.f32 %v888_v28, %v887_v25  ;;  %v952_v32 = vpop.f32.mrb[7].mxu1 }
 0x103   :  { %v953_v33 = vadd.f32 %v952_v32, %v951_v27 }
 0x104   :  { %746 = vst.msk [vmem:[%s1370_s3 + $0x4] sm:$0xf] %vm744_vm0, %v847_v29  ;;  %v610_v34 = vadd.f32 %v950_v26, %v513_v30  ;;  %v516_v35 = vadd.f32 %v889_v31, %v1285_v2 }
 0x106   :  { %v666_v36 = vmax.f32 %v610_v34, 0.0  ;;  %v613_v37 = vadd.f32 %v953_v33, %v516_v35  ;;  %v890_v38 = vpop.f32.mrb[8].mxu0 }
 0x107   :  { %v954_v39 = vpop.f32.mrb[8].mxu1  ;;  %v891_v40 = vpop.f32.mrb[9].mxu0 }
 0x108   :  { %v848_v41 = vpack.c.bf16 %v666_v36, %v666_v36  ;;  %v667_v42 = vmax.f32 %v613_v37, 0.0  ;;  %v892_v43 = vadd.f32 %v891_v40, %v890_v38  ;;  %v955_v44 = vpop.f32.mrb[9].mxu1  ;;  %v893_v45 = vpop.f32.mrb[10].mxu0 }
 0x109   :  { %v956_v46 = vadd.f32 %v955_v44, %v954_v39  ;;  %v957_v47 = vpop.f32.mrb[10].mxu1  ;;  %v894_v48 = vpop.f32.mrb[11].mxu0 }
 0x10a   :  { %747 = vst.msk [vmem:[%s1370_s3 + $0x8] sm:$0xf] %vm744_vm0, %v848_v41  ;;  %v849_v49 = vpack.c.bf16 %v667_v42, %v667_v42  ;;  %v521_v50 = vadd.f32 %v892_v43, %v1285_v2  ;;  %v895_v51 = vadd.f32 %v894_v48, %v893_v45  ;;  %v958_v52 = vpop.f32.mrb[11].mxu1 }
 0x10b   :  { %v959_v53 = vadd.f32 %v958_v52, %v957_v47 }
 0x10c   :  { %748 = vst.msk [vmem:[%s1370_s3 + $0xc] sm:$0xf] %vm744_vm0, %v849_v49  ;;  %v618_v54 = vadd.f32 %v956_v46, %v521_v50  ;;  %v524_v55 = vadd.f32 %v895_v51, %v1285_v2 }
 0x10e   :  { %v668_v56 = vmax.f32 %v618_v54, 0.0  ;;  %v621_v57 = vadd.f32 %v959_v53, %v524_v55  ;;  %v896_v58 = vpop.f32.mrb[12].mxu0 }
 0x10f   :  { %v960_v59 = vpop.f32.mrb[12].mxu1  ;;  %v897_v60 = vpop.f32.mrb[13].mxu0 }
 0x110   :  { %v850_v61 = vpack.c.bf16 %v668_v56, %v668_v56  ;;  %v669_v62 = vmax.f32 %v621_v57, 0.0  ;;  %v898_v63 = vadd.f32 %v897_v60, %v896_v58  ;;  %v961_v0 = vpop.f32.mrb[13].mxu1  ;;  %v899_v1 = vpop.f32.mrb[14].mxu0 }
 0x111   :  { %v962_v3 = vadd.f32 %v961_v0, %v960_v59  ;;  %v963_v4 = vpop.f32.mrb[14].mxu1  ;;  %v900_v5 = vpop.f32.mrb[15].mxu0 }
 0x112   :  { %749 = vst.msk [vmem:[%s1370_s3 + $0x10] sm:$0xf] %vm744_vm0, %v850_v61  ;;  %v851_v6 = vpack.c.bf16 %v669_v62, %v669_v62  ;;  %v529_v7 = vadd.f32 %v898_v63, %v1285_v2  ;;  %v901_v8 = vadd.f32 %v900_v5, %v899_v1  ;;  %v964_v9 = vpop.f32.mrb[15].mxu1 }
 0x113   :  { %v965_v10 = vadd.f32 %v964_v9, %v963_v4 }
 0x114   :  { %750 = vst.msk [vmem:[%s1370_s3 + $0x14] sm:$0xf] %vm744_vm0, %v851_v6  ;;  %v626_v11 = vadd.f32 %v962_v3, %v529_v7  ;;  %v532_v12 = vadd.f32 %v901_v8, %v1285_v2 }
 0x116   :  { %v670_v13 = vmax.f32 %v626_v11, 0.0  ;;  %v629_v14 = vadd.f32 %v965_v10, %v532_v12  ;;  %v902_v15 = vpop.f32.mrb[16].mxu0 }
 0x117   :  { %v966_v16 = vpop.f32.mrb[16].mxu1  ;;  %v903_v17 = vpop.f32.mrb[17].mxu0 }
 0x118   :  { %v852_v18 = vpack.c.bf16 %v670_v13, %v670_v13  ;;  %v671_v19 = vmax.f32 %v629_v14, 0.0  ;;  %v904_v20 = vadd.f32 %v903_v17, %v902_v15  ;;  %v967_v21 = vpop.f32.mrb[17].mxu1  ;;  %v905_v22 = vpop.f32.mrb[18].mxu0 }
 0x119   :  { %v968_v23 = vadd.f32 %v967_v21, %v966_v16  ;;  %v969_v24 = vpop.f32.mrb[18].mxu1  ;;  %v906_v25 = vpop.f32.mrb[19].mxu0 }
 0x11a   :  { %751 = vst.msk [vmem:[%s1370_s3 + $0x18] sm:$0xf] %vm744_vm0, %v852_v18  ;;  %v853_v26 = vpack.c.bf16 %v671_v19, %v671_v19  ;;  %v537_v27 = vadd.f32 %v904_v20, %v1285_v2  ;;  %v907_v28 = vadd.f32 %v906_v25, %v905_v22  ;;  %v970_v29 = vpop.f32.mrb[19].mxu1 }
 0x11b   :  { %v971_v30 = vadd.f32 %v970_v29, %v969_v24 }
 0x11c   :  { %752 = vst.msk [vmem:[%s1370_s3 + $0x1c] sm:$0xf] %vm744_vm0, %v853_v26  ;;  %v634_v31 = vadd.f32 %v968_v23, %v537_v27  ;;  %v540_v32 = vadd.f32 %v907_v28, %v1285_v2 }
 0x11e   :  { %v672_v33 = vmax.f32 %v634_v31, 0.0  ;;  %v637_v34 = vadd.f32 %v971_v30, %v540_v32  ;;  %v908_v35 = vpop.f32.mrb[20].mxu0 }
 0x11f   :  { %v972_v36 = vpop.f32.mrb[20].mxu1  ;;  %v909_v37 = vpop.f32.mrb[21].mxu0 }
 0x120   :  { %v854_v38 = vpack.c.bf16 %v672_v33, %v672_v33  ;;  %v673_v39 = vmax.f32 %v637_v34, 0.0  ;;  %v910_v40 = vadd.f32 %v909_v37, %v908_v35  ;;  %v973_v41 = vpop.f32.mrb[21].mxu1  ;;  %v911_v42 = vpop.f32.mrb[22].mxu0 }
 0x121   :  { %v974_v43 = vadd.f32 %v973_v41, %v972_v36  ;;  %v975_v44 = vpop.f32.mrb[22].mxu1  ;;  %v912_v45 = vpop.f32.mrb[23].mxu0 }
 0x122   :  { %753 = vst.msk [vmem:[%s1370_s3 + $0x20] sm:$0xf] %vm744_vm0, %v854_v38  ;;  %v855_v46 = vpack.c.bf16 %v673_v39, %v673_v39  ;;  %v545_v47 = vadd.f32 %v910_v40, %v1285_v2  ;;  %v913_v48 = vadd.f32 %v912_v45, %v911_v42  ;;  %v976_v49 = vpop.f32.mrb[23].mxu1 }
 0x123   :  { %v977_v50 = vadd.f32 %v976_v49, %v975_v44 }
 0x124   :  { %754 = vst.msk [vmem:[%s1370_s3 + $0x24] sm:$0xf] %vm744_vm0, %v855_v46  ;;  %v642_v51 = vadd.f32 %v974_v43, %v545_v47  ;;  %v548_v52 = vadd.f32 %v913_v48, %v1285_v2 }
 0x126   :  { %v674_v53 = vmax.f32 %v642_v51, 0.0  ;;  %v645_v54 = vadd.f32 %v977_v50, %v548_v52  ;;  %v914_v55 = vpop.f32.mrb[24].mxu0 }
 0x127   :  { %v978_v56 = vpop.f32.mrb[24].mxu1  ;;  %v915_v57 = vpop.f32.mrb[25].mxu0 }
 0x128   :  { %v856_v58 = vpack.c.bf16 %v674_v53, %v674_v53  ;;  %v675_v59 = vmax.f32 %v645_v54, 0.0  ;;  %v916_v60 = vadd.f32 %v915_v57, %v914_v55  ;;  %v979_v61 = vpop.f32.mrb[25].mxu1  ;;  %v917_v62 = vpop.f32.mrb[26].mxu0 }
 0x129   :  { %v980_v63 = vadd.f32 %v979_v61, %v978_v56  ;;  %v981_v0 = vpop.f32.mrb[26].mxu1  ;;  %v918_v1 = vpop.f32.mrb[27].mxu0 }
 0x12a   :  { %755 = vst.msk [vmem:[%s1370_s3 + $0x28] sm:$0xf] %vm744_vm0, %v856_v58  ;;  %v857_v3 = vpack.c.bf16 %v675_v59, %v675_v59  ;;  %v553_v4 = vadd.f32 %v916_v60, %v1285_v2  ;;  %v919_v5 = vadd.f32 %v918_v1, %v917_v62  ;;  %v982_v6 = vpop.f32.mrb[27].mxu1 }
 0x12b   :  { %v983_v7 = vadd.f32 %v982_v6, %v981_v0 }
 0x12c   :  { %756 = vst.msk [vmem:[%s1370_s3 + $0x2c] sm:$0xf] %vm744_vm0, %v857_v3  ;;  %v650_v8 = vadd.f32 %v980_v63, %v553_v4  ;;  %v556_v9 = vadd.f32 %v919_v5, %v1285_v2 }
 0x12e   :  { %v676_v10 = vmax.f32 %v650_v8, 0.0  ;;  %v653_v11 = vadd.f32 %v983_v7, %v556_v9  ;;  %v920_v12 = vpop.f32.mrb[28].mxu0 }
 0x12f   :  { %v984_v13 = vpop.f32.mrb[28].mxu1  ;;  %v921_v14 = vpop.f32.mrb[29].mxu0 }
 0x130   :  { %v858_v15 = vpack.c.bf16 %v676_v10, %v676_v10  ;;  %v677_v16 = vmax.f32 %v653_v11, 0.0  ;;  %v922_v17 = vadd.f32 %v921_v14, %v920_v12  ;;  %v985_v18 = vpop.f32.mrb[29].mxu1  ;;  %v923_v19 = vpop.f32.mrb[30].mxu0 }
 0x131   :  { %v986_v20 = vadd.f32 %v985_v18, %v984_v13  ;;  %v987_v21 = vpop.f32.mrb[30].mxu1  ;;  %v924_v22 = vpop.f32.mrb[31].mxu0 }
 0x132   :  { %757 = vst.msk [vmem:[%s1370_s3 + $0x30] sm:$0xf] %vm744_vm0, %v858_v15  ;;  %v859_v23 = vpack.c.bf16 %v677_v16, %v677_v16  ;;  %v561_v24 = vadd.f32 %v922_v17, %v1285_v2  ;;  %v925_v25 = vadd.f32 %v924_v22, %v923_v19  ;;  %v988_v26 = vpop.f32.mrb[31].mxu1 }
 0x133   :  { %v989_v27 = vadd.f32 %v988_v26, %v987_v21 }
 0x134   :  { %758 = vst.msk [vmem:[%s1370_s3 + $0x34] sm:$0xf] %vm744_vm0, %v859_v23  ;;  %v658_v28 = vadd.f32 %v986_v20, %v561_v24  ;;  %v564_v29 = vadd.f32 %v925_v25, %v1285_v2 }
 0x136   :  { %v678_v30 = vmax.f32 %v658_v28, 0.0  ;;  %v661_v31 = vadd.f32 %v989_v27, %v564_v29 }
 0x138   :  { %v860_v32 = vpack.c.bf16 %v678_v30, %v678_v30  ;;  %v679_v33 = vmax.f32 %v661_v31, 0.0 }
 0x13a   :  { %759 = vst.msk [vmem:[%s1370_s3 + $0x38] sm:$0xf] %vm744_vm0, %v860_v32  ;;  %v861_v34 = vpack.c.bf16 %v679_v33, %v679_v33 }
 0x13c   :  { %760 = vst.msk [vmem:[%s1370_s3 + $0x3c] sm:$0xf] %vm744_vm0, %v861_v34 }

// kernel: vae_forward.12
= control target key start
LH: loop header
LB: loop body
LE: loop exit
PB: predicated region body
PF: predicated region fallthrough
CT: control target
= control target key end

     0   :  { %vm846_vm0 = vcmask 519168   ;;  %s1399_s1 = inlined_call_operand.vmem [shape: bf16[1024,64], index: 1, kind: input, shape index: {}]   ;;  %s1400_s0 = inlined_call_operand.vmem [shape: bf16[32,1024], index: 0, kind: input, shape index: {}]   ;;  %s1401_s2 = inlined_call_operand.vmem [shape: f32[1,64], index: 2, kind: input, shape index: {}]   ;;  %s1402_s3 = inlined_call_operand.vmem [shape: bf16[32,64], index: 3, kind: output, shape index: {}]  }
   0x1   :  { %v1056_v0 = vld [vmem:[%s1399_s1 + $0x40] sm:$0xff]   ;;  %v1060_v4 = vld [vmem:[%s1399_s1 + $0x48] sm:$0xff]   ;;  %v1064_v8 = vld [vmem:[%s1399_s1 + $0x50] sm:$0xff]  }
   0x2   :  { %v1057_v1 = vld [vmem:[%s1399_s1 + $0xc0] sm:$0xff]   ;;  %944 = vmatprep.subr.bf16.mxu0 %v1056_v0  ;;  %v1061_v5 = vld [vmem:[%s1399_s1 + $0xc8] sm:$0xff]   ;;  %v1065_v9 = vld [vmem:[%s1399_s1 + $0xd0] sm:$0xff]  }
   0x3   :  { %v1058_v2 = vld [vmem:[%s1399_s1] sm:$0xff]   ;;  %972 = vmatprep.subr.bf16.mxu1 %v1057_v1  ;;  %v1062_v6 = vld [vmem:[%s1399_s1 + $0x8] sm:$0xff]   ;;  %v1066_v10 = vld [vmem:[%s1399_s1 + $0x10] sm:$0xff]  }
   0x4   :  { %v1059_v3 = vld [vmem:[%s1399_s1 + $0x80] sm:$0xff]   ;;  %945 = vmatpush3.bf16.msra.mxu0 %v1058_v2  ;;  %v1063_v7 = vld [vmem:[%s1399_s1 + $0x88] sm:$0xff]   ;;  %v1067_v11 = vld [vmem:[%s1399_s1 + $0x90] sm:$0xff]  }
   0x5   :  { %973 = vmatpush3.bf16.msra.mxu1 %v1059_v3  ;;  %946 = vmatprep.subr.bf16.mxu0 %v1060_v4  ;;  %v1068_v12 = vld [vmem:[%s1399_s1 + $0x58] sm:$0xff]   ;;  %v1072_v16 = vld [vmem:[%s1399_s1 + $0x60] sm:$0xff]   ;;  %v1076_v20 = vld [vmem:[%s1399_s1 + $0x68] sm:$0xff]  }
   0x6   :  { %974 = vmatprep.subr.bf16.mxu1 %v1061_v5  ;;  %v1069_v13 = vld [vmem:[%s1399_s1 + $0xd8] sm:$0xff]   ;;  %v1073_v17 = vld [vmem:[%s1399_s1 + $0xe0] sm:$0xff]   ;;  %v1077_v21 = vld [vmem:[%s1399_s1 + $0xe8] sm:$0xff]  }
   0x7   :  { %v1070_v14 = vld [vmem:[%s1399_s1 + $0x18] sm:$0xff]   ;;  %v1074_v18 = vld [vmem:[%s1399_s1 + $0x20] sm:$0xff]   ;;  %v1078_v22 = vld [vmem:[%s1399_s1 + $0x28] sm:$0xff]  }
   0x8   :  { %947 = vmatpush3.bf16.msra.mxu0 %v1062_v6  ;;  %v1071_v15 = vld [vmem:[%s1399_s1 + $0x98] sm:$0xff]   ;;  %v1075_v19 = vld [vmem:[%s1399_s1 + $0xa0] sm:$0xff]   ;;  %v1079_v23 = vld [vmem:[%s1399_s1 + $0xa8] sm:$0xff]  }
   0x9   :  { %975 = vmatpush3.bf16.msra.mxu1 %v1063_v7  ;;  %948 = vmatprep.subr.bf16.mxu0 %v1064_v8  ;;  %v1080_v24 = vld [vmem:[%s1399_s1 + $0x70] sm:$0xff]   ;;  %v1084_v28 = vld [vmem:[%s1399_s1 + $0x78] sm:$0xff]   ;;  %v15_v32 = vld [vmem:[%s1400_s0] sm:$0xff] }
   0xa   :  { %976 = vmatprep.subr.bf16.mxu1 %v1065_v9  ;;  %v1081_v25 = vld [vmem:[%s1399_s1 + $0xf0] sm:$0xff]   ;;  %v1085_v29 = vld [vmem:[%s1399_s1 + $0xf8] sm:$0xff]   ;;  %v19_v33 = vld [vmem:[%s1400_s0 + $0x20] sm:$0xff] }
   0xb   :  { %v1082_v26 = vld [vmem:[%s1399_s1 + $0x30] sm:$0xff]   ;;  %v1086_v30 = vld [vmem:[%s1399_s1 + $0x38] sm:$0xff]   ;;  %v16_v34 = vld [vmem:[%s1400_s0 + $0x8] sm:$0xff]  ;;  %v856_v35 = vcombine.low %v15_v32, %v19_v33  ;;  %v857_v36 = vcombine.high %v15_v32, %v19_v33 }
   0xc   :  { %949 = vmatpush3.bf16.msra.mxu0 %v1066_v10  ;;  %v1083_v27 = vld [vmem:[%s1399_s1 + $0xb0] sm:$0xff]   ;;  %v1087_v31 = vld [vmem:[%s1399_s1 + $0xb8] sm:$0xff]   ;;  %v20_v37 = vld [vmem:[%s1400_s0 + $0x28] sm:$0xff] }
   0xd   :  { %977 = vmatpush3.bf16.msra.mxu1 %v1067_v11  ;;  %950 = vmatprep.subr.bf16.mxu0 %v1068_v12  ;;  %v858_v38 = vcombine.low %v16_v34, %v20_v37  ;;  %v859_v39 = vcombine.high %v16_v34, %v20_v37  ;;  %v1088_v40 = vld [vmem:[%s1399_s1 + $0x140] sm:$0xff]   ;;  %v1092_v44 = vld [vmem:[%s1399_s1 + $0x148] sm:$0xff]   ;;  %v1096_v48 = vld [vmem:[%s1399_s1 + $0x150] sm:$0xff]  }
   0xe   :  { %978 = vmatprep.subr.bf16.mxu1 %v1069_v13  ;;  %662 = vmatprep.mubr.bf16.mxu0 %v857_v36  ;;  %v1089_v41 = vld [vmem:[%s1399_s1 + $0x1c0] sm:$0xff]   ;;  %v1093_v45 = vld [vmem:[%s1399_s1 + $0x1c8] sm:$0xff]   ;;  %v1097_v49 = vld [vmem:[%s1399_s1 + $0x1d0] sm:$0xff]  }
   0xf   :  { %711 = vmatprep.mubr.bf16.mxu1 %v859_v39  ;;  %v1090_v42 = vld [vmem:[%s1399_s1 + $0x100] sm:$0xff]   ;;  %v1094_v46 = vld [vmem:[%s1399_s1 + $0x108] sm:$0xff]   ;;  %v1098_v50 = vld [vmem:[%s1399_s1 + $0x110] sm:$0xff]  }
  0x10   :  { %951 = vmatpush3.bf16.msra.mxu0 %v1070_v14  ;;  %v1091_v43 = vld [vmem:[%s1399_s1 + $0x180] sm:$0xff]   ;;  %v1095_v47 = vld [vmem:[%s1399_s1 + $0x188] sm:$0xff]   ;;  %v1099_v51 = vld [vmem:[%s1399_s1 + $0x190] sm:$0xff]  }
  0x11   :  { %979 = vmatpush3.bf16.msra.mxu1 %v1071_v15  ;;  %952 = vmatprep.subr.bf16.mxu0 %v1072_v16  ;;  %v1100_v52 = vld [vmem:[%s1399_s1 + $0x158] sm:$0xff]   ;;  %v1104_v56 = vld [vmem:[%s1399_s1 + $0x160] sm:$0xff]   ;;  %v1108_v63 = vld [vmem:[%s1399_s1 + $0x168] sm:$0xff]  }
  0x12   :  { %980 = vmatprep.subr.bf16.mxu1 %v1073_v17  ;;  %v1101_v53 = vld [vmem:[%s1399_s1 + $0x1d8] sm:$0xff]   ;;  %v1105_v57 = vld [vmem:[%s1399_s1 + $0x1e0] sm:$0xff]   ;;  %v1109_v1 = vld [vmem:[%s1399_s1 + $0x1e8] sm:$0xff]  }
  0x13   :  { %v1102_v54 = vld [vmem:[%s1399_s1 + $0x118] sm:$0xff]   ;;  %v1106_v58 = vld [vmem:[%s1399_s1 + $0x120] sm:$0xff]   ;;  %v1110_v2 = vld [vmem:[%s1399_s1 + $0x128] sm:$0xff]  }
  0x14   :  { %953 = vmatpush3.bf16.msra.mxu0 %v1074_v18  ;;  %v1103_v55 = vld [vmem:[%s1399_s1 + $0x198] sm:$0xff]   ;;  %v1107_v59 = vld [vmem:[%s1399_s1 + $0x1a0] sm:$0xff]   ;;  %v1111_v3 = vld [vmem:[%s1399_s1 + $0x1a8] sm:$0xff]  }
  0x15   :  { %981 = vmatpush3.bf16.msra.mxu1 %v1075_v19  ;;  %954 = vmatprep.subr.bf16.mxu0 %v1076_v20  ;;  %v23_v60 = vld [vmem:[%s1400_s0 + $0x40] sm:$0xff]  ;;  %v24_v4 = vld [vmem:[%s1400_s0 + $0x48] sm:$0xff]  ;;  %v1112_v8 = vld [vmem:[%s1399_s1 + $0x170] sm:$0xff]  }
  0x16   :  { %982 = vmatprep.subr.bf16.mxu1 %v1077_v21  ;;  %v27_v61 = vld [vmem:[%s1400_s0 + $0x60] sm:$0xff]  ;;  %v28_v5 = vld [vmem:[%s1400_s0 + $0x68] sm:$0xff]  ;;  %v1113_v9 = vld [vmem:[%s1399_s1 + $0x1f0] sm:$0xff]  }
  0x17   :  { %v865_v62 = vcombine.high %v23_v60, %v27_v61  ;;  %v864_v0 = vcombine.low %v23_v60, %v27_v61  ;;  %v867_v6 = vcombine.high %v24_v4, %v28_v5  ;;  %v866_v7 = vcombine.low %v24_v4, %v28_v5  ;;  %v1114_v10 = vld [vmem:[%s1399_s1 + $0x130] sm:$0xff]   ;;  %v1116_v12 = vld [vmem:[%s1399_s1 + $0x178] sm:$0xff]   ;;  %v855_v34 = vld [vmem:[%s1401_s2] ss:$0 sm:$0xff] }
  0x18   :  { %955 = vmatpush3.bf16.msra.mxu0 %v1078_v22  ;;  %v1115_v11 = vld [vmem:[%s1399_s1 + $0x1b0] sm:$0xff]   ;;  %v1117_v13 = vld [vmem:[%s1399_s1 + $0x1f8] sm:$0xff]  }
  0x19   :  { %983 = vmatpush3.bf16.msra.mxu1 %v1079_v23  ;;  %956 = vmatprep.subr.bf16.mxu0 %v1080_v24  ;;  %v1118_v14 = vld [vmem:[%s1399_s1 + $0x138] sm:$0xff]   ;;  %v17_v16 = vld [vmem:[%s1400_s0 + $0x10] sm:$0xff] }
  0x1a   :  { %984 = vmatprep.subr.bf16.mxu1 %v1081_v25  ;;  %v1119_v15 = vld [vmem:[%s1399_s1 + $0x1b8] sm:$0xff]   ;;  %v21_v17 = vld [vmem:[%s1400_s0 + $0x30] sm:$0xff] }
  0x1b   :  { %v18_v18 = vld [vmem:[%s1400_s0 + $0x18] sm:$0xff]  ;;  %v860_v20 = vcombine.low %v17_v16, %v21_v17  ;;  %v861_v21 = vcombine.high %v17_v16, %v21_v17  ;;  %v25_v24 = vld [vmem:[%s1400_s0 + $0x50] sm:$0xff] }
  0x1c   :  { %957 = vmatpush3.bf16.msra.mxu0 %v1082_v26  ;;  %v22_v19 = vld [vmem:[%s1400_s0 + $0x38] sm:$0xff]  ;;  %v29_v25 = vld [vmem:[%s1400_s0 + $0x70] sm:$0xff] }
  0x1d   :  { %985 = vmatpush3.bf16.msra.mxu1 %v1083_v27  ;;  %958 = vmatprep.subr.bf16.mxu0 %v1084_v28  ;;  %v862_v22 = vcombine.low %v18_v18, %v22_v19  ;;  %v863_v23 = vcombine.high %v18_v18, %v22_v19  ;;  %v26_v26 = vld [vmem:[%s1400_s0 + $0x58] sm:$0xff]  ;;  %v869_v27 = vcombine.high %v25_v24, %v29_v25 }
  0x1e   :  { %986 = vmatprep.subr.bf16.mxu1 %v1085_v29  ;;  %v30_v28 = vld [vmem:[%s1400_s0 + $0x78] sm:$0xff] }
  0x1f   :  { %v871_v29 = vcombine.high %v26_v26, %v30_v28 }
  0x20   :  { %959 = vmatpush3.bf16.msra.mxu0 %v1086_v30  ;;  %v868_v30 = vcombine.low %v25_v24, %v29_v25 }
  0x21   :  { %987 = vmatpush3.bf16.msra.mxu1 %v1087_v31  ;;  %1000 = vmatprep.subr.bf16.mxu0 %v1088_v40  ;;  %v870_v31 = vcombine.low %v26_v26, %v30_v28 }
  0x22   :  { %1028 = vmatprep.subr.bf16.mxu1 %v1089_v41 }
  0x23   :  { %663 = vmatmul.mubr.bf16.vlgmr.msra.gmra.mrb[0].mxu0 %v856_v35 }
  0x24   :  { %712 = vmatmul.mubr.bf16.vlgmr.msra.gmra.mrb[0].mxu1 %v858_v38  ;;  %1001 = vmatpush3.bf16.msra.mxu0 %v1090_v42 }
  0x25   :  { %1029 = vmatpush3.bf16.msra.mxu1 %v1091_v43  ;;  %1002 = vmatprep.subr.bf16.mxu0 %v1092_v44 }
  0x26   :  { %1030 = vmatprep.subr.bf16.mxu1 %v1093_v45  ;;  %670 = vmatprep.mubr.bf16.mxu0 %v865_v62 }
  0x27   :  { %719 = vmatprep.mubr.bf16.mxu1 %v867_v6 }
  0x28   :  { %1003 = vmatpush3.bf16.msra.mxu0 %v1094_v46 }
  0x29   :  { %1031 = vmatpush3.bf16.msra.mxu1 %v1095_v47  ;;  %1004 = vmatprep.subr.bf16.mxu0 %v1096_v48 }
  0x2a   :  { %1032 = vmatprep.subr.bf16.mxu1 %v1097_v49 }
  0x2b   :  { %671 = vmatmul.mubr.bf16.gmra.mrb[4].mxu0 %v864_v0 }
  0x2c   :  { %1005 = vmatpush3.bf16.msra.mxu0 %v1098_v50  ;;  %720 = vmatmul.mubr.bf16.gmra.mrb[4].mxu1 %v866_v7 }
  0x2d   :  { %1033 = vmatpush3.bf16.msra.mxu1 %v1099_v51  ;;  %1006 = vmatprep.subr.bf16.mxu0 %v1100_v52 }
  0x2e   :  { %1034 = vmatprep.subr.bf16.mxu1 %v1101_v53  ;;  %760 = vmatprep.mubr.bf16.mxu0 %v861_v21 }
  0x2f   :  { %809 = vmatprep.mubr.bf16.mxu1 %v863_v23 }
  0x30   :  { %1007 = vmatpush3.bf16.msra.mxu0 %v1102_v54 }
  0x31   :  { %1035 = vmatpush3.bf16.msra.mxu1 %v1103_v55  ;;  %1008 = vmatprep.subr.bf16.mxu0 %v1104_v56 }
  0x32   :  { %1036 = vmatprep.subr.bf16.mxu1 %v1105_v57 }
  0x34   :  { %1009 = vmatpush3.bf16.msra.mxu0 %v1106_v58 }
  0x35   :  { %1037 = vmatpush3.bf16.msra.mxu1 %v1107_v59  ;;  %1010 = vmatprep.subr.bf16.mxu0 %v1108_v63 }
  0x36   :  { %1038 = vmatprep.subr.bf16.mxu1 %v1109_v1 }
  0x38   :  { %1011 = vmatpush3.bf16.msra.mxu0 %v1110_v2 }
  0x39   :  { %1039 = vmatpush3.bf16.msra.mxu1 %v1111_v3  ;;  %1012 = vmatprep.subr.bf16.mxu0 %v1112_v8 }
  0x3a   :  { %1040 = vmatprep.subr.bf16.mxu1 %v1113_v9 }
  0x3c   :  { %1013 = vmatpush3.bf16.msra.mxu0 %v1114_v10 }
  0x3d   :  { %1041 = vmatpush3.bf16.msra.mxu1 %v1115_v11  ;;  %1014 = vmatprep.subr.bf16.mxu0 %v1116_v12 }
  0x3e   :  { %1042 = vmatprep.subr.bf16.mxu1 %v1117_v13 }
  0x40   :  { %1015 = vmatpush3.bf16.msra.mxu0 %v1118_v14 }
  0x41   :  { %1043 = vmatpush3.bf16.msra.mxu1 %v1119_v15 }
  0x43   :  { %761 = vmatmul.mubr.bf16.vlgmr.msra.gmra.mrb[8].mxu0 %v860_v20 }
  0x44   :  { %810 = vmatmul.mubr.bf16.vlgmr.msra.gmra.mrb[8].mxu1 %v862_v22  ;;  %768 = vmatprep.mubr.bf16.mxu0 %v869_v27 }
  0x45   :  { %817 = vmatprep.mubr.bf16.mxu1 %v871_v29 }
  0x4b   :  { %769 = vmatmul.mubr.bf16.gmra.mrb[12].mxu0 %v868_v30 }
  0x4c   :  { %818 = vmatmul.mubr.bf16.gmra.mrb[12].mxu1 %v870_v31 }
  0xf6   :  { %v960_v32 = vpop.f32.mrb[0].mxu0 }
  0xf7   :  { %v988_v33 = vpop.f32.mrb[0].mxu1  ;;  %v961_v35 = vpop.f32.mrb[1].mxu0 }
  0xf8   :  { %v962_v36 = vadd.f32 %v961_v35, %v960_v32  ;;  %v989_v37 = vpop.f32.mrb[1].mxu1  ;;  %v963_v38 = vpop.f32.mrb[2].mxu0 }
  0xf9   :  { %v990_v39 = vadd.f32 %v989_v37, %v988_v33  ;;  %v991_v40 = vpop.f32.mrb[2].mxu1  ;;  %v964_v41 = vpop.f32.mrb[3].mxu0 }
  0xfa   :  { %v665_v42 = vadd.f32 %v962_v36, %v855_v34  ;;  %v965_v43 = vadd.f32 %v964_v41, %v963_v38  ;;  %v992_v44 = vpop.f32.mrb[3].mxu1 }
  0xfb   :  { %v993_v45 = vadd.f32 %v992_v44, %v991_v40 }
  0xfc   :  { %v714_v46 = vadd.f32 %v990_v39, %v665_v42  ;;  %v668_v47 = vadd.f32 %v965_v43, %v855_v34 }
  0xfe   :  { %v717_v48 = vadd.f32 %v993_v45, %v668_v47  ;;  %v966_v49 = vpop.f32.mrb[4].mxu0 }
  0xff   :  { %v967_v50 = vpop.f32.mrb[5].mxu0  ;;  %v994_v56 = vpop.f32.mrb[4].mxu1 }
 0x100   :  { %v968_v51 = vadd.f32 %v967_v50, %v966_v49  ;;  %v969_v52 = vpop.f32.mrb[6].mxu0  ;;  %v995_v57 = vpop.f32.mrb[5].mxu1 }
 0x101   :  { %v970_v53 = vpop.f32.mrb[7].mxu0  ;;  %v996_v59 = vadd.f32 %v995_v57, %v994_v56  ;;  %v997_v60 = vpop.f32.mrb[6].mxu1 }
 0x102   :  { %v971_v54 = vadd.f32 %v970_v53, %v969_v52  ;;  %v673_v55 = vadd.f32 %v968_v51, %v855_v34  ;;  %v998_v61 = vpop.f32.mrb[7].mxu1 }
 0x103   :  { %v999_v63 = vadd.f32 %v998_v61, %v997_v60 }
 0x104   :  { %v676_v58 = vadd.f32 %v971_v54, %v855_v34  ;;  %v722_v62 = vadd.f32 %v996_v59, %v673_v55 }
 0x106   :  { %v725_v0 = vadd.f32 %v999_v63, %v676_v58 }
 0x116   :  { %v1016_v1 = vpop.f32.mrb[8].mxu0 }
 0x117   :  { %v1044_v2 = vpop.f32.mrb[8].mxu1  ;;  %v1017_v3 = vpop.f32.mrb[9].mxu0 }
 0x118   :  { %v1045_v4 = vpop.f32.mrb[9].mxu1  ;;  %v1018_v5 = vadd.f32 %v1017_v3, %v1016_v1  ;;  %v1019_v7 = vpop.f32.mrb[10].mxu0 }
 0x119   :  { %v1046_v6 = vadd.f32 %v1045_v4, %v1044_v2  ;;  %v1047_v8 = vpop.f32.mrb[10].mxu1  ;;  %v1020_v9 = vpop.f32.mrb[11].mxu0 }
 0x11a   :  { %v1048_v10 = vpop.f32.mrb[11].mxu1  ;;  %v763_v11 = vadd.f32 %v1018_v5, %v714_v46  ;;  %v1021_v12 = vadd.f32 %v1020_v9, %v1019_v7 }
 0x11b   :  { %v1049_v13 = vadd.f32 %v1048_v10, %v1047_v8 }
 0x11c   :  { %v812_v14 = vadd.f32 %v1046_v6, %v763_v11  ;;  %v766_v15 = vadd.f32 %v1021_v12, %v717_v48 }
 0x11e   :  { %v826_v16 = vmax.f32 %v812_v14, 0.0  ;;  %v815_v17 = vadd.f32 %v1049_v13, %v766_v15  ;;  %v1022_v18 = vpop.f32.mrb[12].mxu0 }
 0x11f   :  { %v1050_v19 = vpop.f32.mrb[12].mxu1  ;;  %v1023_v20 = vpop.f32.mrb[13].mxu0 }
 0x120   :  { %v1051_v21 = vpop.f32.mrb[13].mxu1  ;;  %v940_v22 = vpack.c.bf16 %v826_v16, %v826_v16  ;;  %v827_v23 = vmax.f32 %v815_v17, 0.0  ;;  %v1024_v24 = vadd.f32 %v1023_v20, %v1022_v18  ;;  %v1025_v26 = vpop.f32.mrb[14].mxu0 }
 0x121   :  { %v1052_v25 = vadd.f32 %v1051_v21, %v1050_v19  ;;  %v1053_v27 = vpop.f32.mrb[14].mxu1  ;;  %v1026_v28 = vpop.f32.mrb[15].mxu0 }
 0x122   :  { %v1054_v29 = vpop.f32.mrb[15].mxu1  ;;  %847 = vst.msk [vmem:[%s1402_s3] sm:$0xf] %vm846_vm0, %v940_v22  ;;  %v941_v30 = vpack.c.bf16 %v827_v23, %v827_v23  ;;  %v771_v31 = vadd.f32 %v1024_v24, %v722_v62  ;;  %v1027_v32 = vadd.f32 %v1026_v28, %v1025_v26 }
 0x123   :  { %v1055_v33 = vadd.f32 %v1054_v29, %v1053_v27 }
 0x124   :  { %848 = vst.msk [vmem:[%s1402_s3 + $0x4] sm:$0xf] %vm846_vm0, %v941_v30  ;;  %v820_v34 = vadd.f32 %v1052_v25, %v771_v31  ;;  %v774_v35 = vadd.f32 %v1027_v32, %v725_v0 }
 0x126   :  { %v828_v36 = vmax.f32 %v820_v34, 0.0  ;;  %v823_v37 = vadd.f32 %v1055_v33, %v774_v35 }
 0x128   :  { %v942_v38 = vpack.c.bf16 %v828_v36, %v828_v36  ;;  %v829_v39 = vmax.f32 %v823_v37, 0.0 }
 0x12a   :  { %849 = vst.msk [vmem:[%s1402_s3 + $0x8] sm:$0xf] %vm846_vm0, %v942_v38  ;;  %v943_v40 = vpack.c.bf16 %v829_v39, %v829_v39 }
 0x12c   :  { %850 = vst.msk [vmem:[%s1402_s3 + $0xc] sm:$0xf] %vm846_vm0, %v943_v40 }

// kernel: vae_forward.14
= control target key start
LH: loop header
LB: loop body
LE: loop exit
PB: predicated region body
PF: predicated region fallthrough
CT: control target
= control target key end

     0   :  { %vm521_vm0 = vcmask 523264   ;;  %s1256_s1 = inlined_call_operand.vmem [shape: bf16[576,256], index: 1, kind: input, shape index: {}]   ;;  %s1257_s0 = inlined_call_operand.vmem [shape: bf16[32,576], index: 0, kind: input, shape index: {}]   ;;  %s1258_s2 = inlined_call_operand.vmem [shape: f32[1,256], index: 2, kind: input, shape index: {}]   ;;  %s1259_s3 = inlined_call_operand.vmem [shape: bf16[32,256], index: 3, kind: output, shape index: {}]  }
   0x1   :  { %v852_v0 = vld [vmem:[%s1256_s1 + $0x4] ss:$8 sps:$4 sm:$0xff]   ;;  %v856_v2 = vld [vmem:[%s1256_s1] ss:$8 sps:$4 sm:$0xff]   ;;  %v858_v4 = vld [vmem:[%s1256_s1 + $0x14] ss:$8 sps:$4 sm:$0xff]  }
   0x2   :  { %v854_v1 = vld [vmem:[%s1256_s1 + $0x104] ss:$8 sps:$4 sm:$0xff]   ;;  %528 = vmatprep.subr.bf16.mxu1 %v852_v0  ;;  %v857_v3 = vld [vmem:[%s1256_s1 + $0x100] ss:$8 sps:$4 sm:$0xff]   ;;  %v860_v5 = vld [vmem:[%s1256_s1 + $0x114] ss:$8 sps:$4 sm:$0xff]  }
   0x3   :  { %581 = vmatprep.subr.bf16.mxu0 %v854_v1  ;;  %529 = vmatpush1.bf16.msra.mxu1 %v856_v2  ;;  %v862_v6 = vld [vmem:[%s1256_s1 + $0x10] ss:$8 sps:$4 sm:$0xff]   ;;  %v864_v8 = vld [vmem:[%s1256_s1 + $0x24] ss:$8 sps:$4 sm:$0xff]   ;;  %v868_v10 = vld [vmem:[%s1256_s1 + $0x20] ss:$8 sps:$4 sm:$0xff]  }
   0x4   :  { %582 = vmatpush1.bf16.msra.mxu0 %v857_v3  ;;  %530 = vmatprep.subr.bf16.mxu1 %v858_v4  ;;  %v863_v7 = vld [vmem:[%s1256_s1 + $0x110] ss:$8 sps:$4 sm:$0xff]   ;;  %v866_v9 = vld [vmem:[%s1256_s1 + $0x124] ss:$8 sps:$4 sm:$0xff]   ;;  %v869_v11 = vld [vmem:[%s1256_s1 + $0x120] ss:$8 sps:$4 sm:$0xff]  }
   0x5   :  { %583 = vmatprep.subr.bf16.mxu0 %v860_v5  ;;  %v870_v12 = vld [vmem:[%s1256_s1 + $0x34] ss:$8 sps:$4 sm:$0xff]   ;;  %v874_v14 = vld [vmem:[%s1256_s1 + $0x30] ss:$8 sps:$4 sm:$0xff]   ;;  %v876_v16 = vld [vmem:[%s1256_s1 + $0x44] ss:$8 sps:$4 sm:$0xff]  }
   0x6   :  { %v872_v13 = vld [vmem:[%s1256_s1 + $0x134] ss:$8 sps:$4 sm:$0xff]   ;;  %v875_v15 = vld [vmem:[%s1256_s1 + $0x130] ss:$8 sps:$4 sm:$0xff]   ;;  %v878_v17 = vld [vmem:[%s1256_s1 + $0x144] ss:$8 sps:$4 sm:$0xff]  }
   0x7   :  { %531 = vmatpush1.bf16.msra.mxu1 %v862_v6  ;;  %v880_v18 = vld [vmem:[%s1256_s1 + $0x40] ss:$8 sps:$4 sm:$0xff]   ;;  %v882_v20 = vld [vmem:[%s1256_s1 + $0x54] ss:$8 sps:$4 sm:$0xff]   ;;  %v886_v22 = vld [vmem:[%s1256_s1 + $0x50] ss:$8 sps:$4 sm:$0xff]  }
   0x8   :  { %584 = vmatpush1.bf16.msra.mxu0 %v863_v7  ;;  %532 = vmatprep.subr.bf16.mxu1 %v864_v8  ;;  %v881_v19 = vld [vmem:[%s1256_s1 + $0x140] ss:$8 sps:$4 sm:$0xff]   ;;  %v884_v21 = vld [vmem:[%s1256_s1 + $0x154] ss:$8 sps:$4 sm:$0xff]   ;;  %v887_v23 = vld [vmem:[%s1256_s1 + $0x150] ss:$8 sps:$4 sm:$0xff]  }
   0x9   :  { %585 = vmatprep.subr.bf16.mxu0 %v866_v9  ;;  %v888_v24 = vld [vmem:[%s1256_s1 + $0x64] ss:$8 sps:$4 sm:$0xff]   ;;  %v892_v26 = vld [vmem:[%s1256_s1 + $0x60] ss:$8 sps:$4 sm:$0xff]   ;;  %v894_v28 = vld [vmem:[%s1256_s1 + $0x74] ss:$8 sps:$4 sm:$0xff]  }
   0xa   :  { %v890_v25 = vld [vmem:[%s1256_s1 + $0x164] ss:$8 sps:$4 sm:$0xff]   ;;  %v893_v27 = vld [vmem:[%s1256_s1 + $0x160] ss:$8 sps:$4 sm:$0xff]   ;;  %v896_v29 = vld [vmem:[%s1256_s1 + $0x174] ss:$8 sps:$4 sm:$0xff]  }
   0xb   :  { %533 = vmatpush1.bf16.msra.mxu1 %v868_v10  ;;  %v898_v30 = vld [vmem:[%s1256_s1 + $0x70] ss:$8 sps:$4 sm:$0xff]   ;;  %v900_v32 = vld [vmem:[%s1256_s1 + $0x84] ss:$8 sps:$4 sm:$0xff]   ;;  %v904_v34 = vld [vmem:[%s1256_s1 + $0x80] ss:$8 sps:$4 sm:$0xff]  }
   0xc   :  { %586 = vmatpush1.bf16.msra.mxu0 %v869_v11  ;;  %534 = vmatprep.subr.bf16.mxu1 %v870_v12  ;;  %v899_v31 = vld [vmem:[%s1256_s1 + $0x170] ss:$8 sps:$4 sm:$0xff]   ;;  %v902_v33 = vld [vmem:[%s1256_s1 + $0x184] ss:$8 sps:$4 sm:$0xff]   ;;  %v905_v35 = vld [vmem:[%s1256_s1 + $0x180] ss:$8 sps:$4 sm:$0xff]  }
   0xd   :  { %587 = vmatprep.subr.bf16.mxu0 %v872_v13  ;;  %v906_v36 = vld [vmem:[%s1256_s1 + $0x94] ss:$8 sps:$4 sm:$0xff]   ;;  %v910_v38 = vld [vmem:[%s1256_s1 + $0x90] ss:$8 sps:$4 sm:$0xff]   ;;  %v912_v40 = vld [vmem:[%s1256_s1 + $0xa4] ss:$8 sps:$4 sm:$0xff]  }
   0xe   :  { %v908_v37 = vld [vmem:[%s1256_s1 + $0x194] ss:$8 sps:$4 sm:$0xff]   ;;  %v911_v39 = vld [vmem:[%s1256_s1 + $0x190] ss:$8 sps:$4 sm:$0xff]   ;;  %v914_v41 = vld [vmem:[%s1256_s1 + $0x1a4] ss:$8 sps:$4 sm:$0xff]  }
   0xf   :  { %535 = vmatpush1.bf16.msra.mxu1 %v874_v14  ;;  %v916_v42 = vld [vmem:[%s1256_s1 + $0xa0] ss:$8 sps:$4 sm:$0xff]   ;;  %v918_v44 = vld [vmem:[%s1256_s1 + $0xb4] ss:$8 sps:$4 sm:$0xff]   ;;  %v922_v46 = vld [vmem:[%s1256_s1 + $0xb0] ss:$8 sps:$4 sm:$0xff]  }
  0x10   :  { %588 = vmatpush1.bf16.msra.mxu0 %v875_v15  ;;  %536 = vmatprep.subr.bf16.mxu1 %v876_v16  ;;  %v917_v43 = vld [vmem:[%s1256_s1 + $0x1a0] ss:$8 sps:$4 sm:$0xff]   ;;  %v920_v45 = vld [vmem:[%s1256_s1 + $0x1b4] ss:$8 sps:$4 sm:$0xff]   ;;  %v923_v47 = vld [vmem:[%s1256_s1 + $0x1b0] ss:$8 sps:$4 sm:$0xff]  }
  0x11   :  { %589 = vmatprep.subr.bf16.mxu0 %v878_v17  ;;  %v924_v48 = vld [vmem:[%s1256_s1 + $0xc4] ss:$8 sps:$4 sm:$0xff]   ;;  %v928_v52 = vld [vmem:[%s1256_s1 + $0xc0] ss:$8 sps:$4 sm:$0xff]   ;;  %v930_v54 = vld [vmem:[%s1256_s1 + $0xd4] ss:$8 sps:$4 sm:$0xff]  }
  0x12   :  { %v950_v49 = vld [vmem:[%s1257_s0 + $0x4] ss:$20 sps:$4 sm:$0xff]   ;;  %v953_v51 = vld [vmem:[%s1257_s0 + $0xc] ss:$20 sps:$4 sm:$0xff]   ;;  %v932_v55 = vld [vmem:[%s1256_s1 + $0x1d4] ss:$8 sps:$4 sm:$0xff]  }
  0x13   :  { %537 = vmatpush1.bf16.msra.mxu1 %v880_v18  ;;  %v926_v50 = vld [vmem:[%s1256_s1 + $0x1c4] ss:$8 sps:$4 sm:$0xff]   ;;  %560 = vmatprep.mubr.bf16.mxu1 %v950_v49  ;;  %v929_v53 = vld [vmem:[%s1256_s1 + $0x1c0] ss:$8 sps:$4 sm:$0xff]   ;;  %v934_v56 = vld [vmem:[%s1256_s1 + $0xd0] ss:$8 sps:$4 sm:$0xff]  }
  0x14   :  { %590 = vmatpush1.bf16.msra.mxu0 %v881_v19  ;;  %538 = vmatprep.subr.bf16.mxu1 %v882_v20  ;;  %v935_v57 = vld [vmem:[%s1256_s1 + $0x1d0] ss:$8 sps:$4 sm:$0xff]   ;;  %v936_v58 = vld [vmem:[%s1256_s1 + $0xe4] ss:$8 sps:$4 sm:$0xff]   ;;  %v940_v60 = vld [vmem:[%s1256_s1 + $0xe0] ss:$8 sps:$4 sm:$0xff]   ;;  %v101_v19 = vlaneseq }
  0x15   :  { %591 = vmatprep.subr.bf16.mxu0 %v884_v21  ;;  %613 = vmatprep.mubr.bf16.mxu0 %v953_v51  ;;  %v938_v59 = vld [vmem:[%s1256_s1 + $0x1e4] ss:$8 sps:$4 sm:$0xff]   ;;  %v941_v61 = vld [vmem:[%s1256_s1 + $0x1e0] ss:$8 sps:$4 sm:$0xff]   ;;  %v942_v62 = vld [vmem:[%s1256_s1 + $0xf4] ss:$8 sps:$4 sm:$0xff]  }
  0x16   :  { %v944_v63 = vld [vmem:[%s1256_s1 + $0x1f4] ss:$8 sps:$4 sm:$0xff]   ;;  %v946_v0 = vld [vmem:[%s1256_s1 + $0xf0] ss:$8 sps:$4 sm:$0xff]   ;;  %v956_v2 = vld [vmem:[%s1256_s1 + $0x204] ss:$8 sps:$4 sm:$0xff]  }
  0x17   :  { %539 = vmatpush1.bf16.msra.mxu1 %v886_v22  ;;  %v947_v1 = vld [vmem:[%s1256_s1 + $0x1f0] ss:$8 sps:$4 sm:$0xff]   ;;  %v948_v3 = vld [vmem:[%s1257_s0] ss:$20 sps:$4 sm:$0xff]   ;;  %v951_v4 = vld [vmem:[%s1257_s0 + $0x8] ss:$20 sps:$4 sm:$0xff]  }
  0x18   :  { %592 = vmatpush1.bf16.msra.mxu0 %v887_v23  ;;  %540 = vmatprep.subr.bf16.mxu1 %v888_v24  ;;  %v954_v5 = vld [vmem:[%s1256_s1 + $0x200] ss:$8 sps:$4 sm:$0xff]   ;;  %v959_v6 = vld [vmem:[%s1256_s1 + $0x214] ss:$8 sps:$4 sm:$0xff]   ;;  %v957_v9 = vld [vmem:[%s1256_s1 + $0x210] ss:$8 sps:$4 sm:$0xff]  }
  0x19   :  { %593 = vmatprep.subr.bf16.mxu0 %v890_v25  ;;  %v960_v7 = vld [vmem:[%s1257_s0 + $0x2c] ss:$20 sps:$4 sm:$0xff]   ;;  %v962_v8 = vld [vmem:[%s1257_s0 + $0x34] ss:$20 sps:$4 sm:$0xff]   ;;  %v965_v12 = vld [vmem:[%s1257_s0 + $0x30] ss:$20 sps:$4 sm:$0xff]  }
  0x1a   :  { %v968_v10 = vld [vmem:[%s1256_s1 + $0x224] ss:$8 sps:$4 sm:$0xff]   ;;  %v964_v11 = vld [vmem:[%s1257_s0 + $0x28] ss:$20 sps:$4 sm:$0xff]   ;;  %v969_v15 = vld [vmem:[%s1256_s1 + $0x230] ss:$8 sps:$4 sm:$0xff]  }
  0x1b   :  { %541 = vmatpush1.bf16.msra.mxu1 %v892_v26  ;;  %v966_v13 = vld [vmem:[%s1256_s1 + $0x220] ss:$8 sps:$4 sm:$0xff]   ;;  %v971_v14 = vld [vmem:[%s1256_s1 + $0x234] ss:$8 sps:$4 sm:$0xff]   ;;  %v974_v16 = vmov 0   ;;  %v102_v20 = vshrl.u32 %v101_v19, 7 }
  0x1c   :  { %594 = vmatpush1.bf16.msra.mxu0 %v893_v27  ;;  %542 = vmatprep.subr.bf16.mxu1 %v894_v28  ;;  %v972_v17 = vld [vmem:[%s1257_s0 + $0x10] ss:$20 sps:$4 sm:$0xff]   ;;  %v973_v18 = vld [vmem:[%s1257_s0 + $0x38] ss:$20 sps:$4 sm:$0xff]   ;;  %v99_v26 = vld [vmem:[%s1258_s2] sm:$0x3] }
  0x1d   :  { %595 = vmatprep.subr.bf16.mxu0 %v896_v29  ;;  %v103_v24 = vsub.s32 0, %v102_v20  ;;  %v107_v27 = vsub.s32 1, %v102_v20 }
  0x1f   :  { %543 = vmatpush1.bf16.msra.mxu1 %v898_v30  ;;  %v104_v28 = vrot.slane %v99_v26, %v103_v24  ;;  %v108_v29 = vrot.slane %v99_v26, %v107_v27 }
  0x20   :  { %596 = vmatpush1.bf16.msra.mxu0 %v899_v31  ;;  %544 = vmatprep.subr.bf16.mxu1 %v900_v32 }
  0x21   :  { %597 = vmatprep.subr.bf16.mxu0 %v902_v33 }
  0x23   :  { %545 = vmatpush1.bf16.msra.mxu1 %v904_v34 }
  0x24   :  { %598 = vmatpush1.bf16.msra.mxu0 %v905_v35  ;;  %546 = vmatprep.subr.bf16.mxu1 %v906_v36 }
  0x25   :  { %599 = vmatprep.subr.bf16.mxu0 %v908_v37 }
  0x27   :  { %547 = vmatpush1.bf16.msra.mxu1 %v910_v38 }
  0x28   :  { %600 = vmatpush1.bf16.msra.mxu0 %v911_v39  ;;  %548 = vmatprep.subr.bf16.mxu1 %v912_v40 }
  0x29   :  { %601 = vmatprep.subr.bf16.mxu0 %v914_v41 }
  0x2b   :  { %549 = vmatpush1.bf16.msra.mxu1 %v916_v42 }
  0x2c   :  { %602 = vmatpush1.bf16.msra.mxu0 %v917_v43  ;;  %550 = vmatprep.subr.bf16.mxu1 %v918_v44 }
  0x2d   :  { %603 = vmatprep.subr.bf16.mxu0 %v920_v45 }
  0x2f   :  { %551 = vmatpush1.bf16.msra.mxu1 %v922_v46 }
  0x30   :  { %604 = vmatpush1.bf16.msra.mxu0 %v923_v47  ;;  %552 = vmatprep.subr.bf16.mxu1 %v924_v48 }
  0x31   :  { %605 = vmatprep.subr.bf16.mxu0 %v926_v50 }
  0x33   :  { %553 = vmatpush1.bf16.msra.mxu1 %v928_v52 }
  0x34   :  { %606 = vmatpush1.bf16.msra.mxu0 %v929_v53  ;;  %554 = vmatprep.subr.bf16.mxu1 %v930_v54 }
  0x35   :  { %607 = vmatprep.subr.bf16.mxu0 %v932_v55 }
  0x37   :  { %555 = vmatpush1.bf16.msra.mxu1 %v934_v56 }
  0x38   :  { %608 = vmatpush1.bf16.msra.mxu0 %v935_v57  ;;  %556 = vmatprep.subr.bf16.mxu1 %v936_v58 }
  0x39   :  { %609 = vmatprep.subr.bf16.mxu0 %v938_v59 }
  0x3b   :  { %557 = vmatpush1.bf16.msra.mxu1 %v940_v60 }
  0x3c   :  { %610 = vmatpush1.bf16.msra.mxu0 %v941_v61  ;;  %558 = vmatprep.subr.bf16.mxu1 %v942_v62 }
  0x3d   :  { %611 = vmatprep.subr.bf16.mxu0 %v944_v63 }
  0x3f   :  { %559 = vmatpush1.bf16.msra.mxu1 %v946_v0 }
  0x40   :  { %612 = vmatpush1.bf16.msra.mxu0 %v947_v1  ;;  %819 = vmatprep.subr.bf16.mxu1 %v956_v2 }
  0x41   :  { %634 = vmatprep.subr.bf16.mxu0 %v956_v2 }
  0x42   :  { %561 = vmatmul.mubr.bf16.vlgmr.msra.gmra.mrb[0].mxu1 %v948_v3 }
  0x43   :  { %614 = vmatmul.mubr.bf16.vlgmr.msra.gmra.mrb[0].mxu0 %v951_v4  ;;  %823 = vmatpush1.bf16.msra.mxu1 %v954_v5 }
  0x44   :  { %635 = vmatpush1.bf16.msra.mxu0 %v954_v5  ;;  %820 = vmatprep.subr.bf16.mxu1 %v959_v6 }
  0x45   :  { %636 = vmatprep.subr.bf16.mxu0 %v959_v6  ;;  %570 = vmatprep.mubr.bf16.mxu1 %v960_v7 }
  0x46   :  { %623 = vmatprep.mubr.bf16.mxu0 %v962_v8 }
  0x47   :  { %824 = vmatpush1.bf16.msra.mxu1 %v957_v9 }
  0x48   :  { %637 = vmatpush1.bf16.msra.mxu0 %v957_v9  ;;  %821 = vmatprep.subr.bf16.mxu1 %v968_v10 }
  0x49   :  { %638 = vmatprep.subr.bf16.mxu0 %v968_v10 }
  0x4a   :  { %571 = vmatmul.mubr.bf16.gmra.mrb[4].mxu1 %v964_v11 }
  0x4b   :  { %624 = vmatmul.mubr.bf16.gmra.mrb[4].mxu0 %v965_v12  ;;  %825 = vmatpush1.bf16.msra.mxu1 %v966_v13 }
  0x4c   :  { %639 = vmatpush1.bf16.msra.mxu0 %v966_v13  ;;  %822 = vmatprep.subr.bf16.mxu1 %v971_v14 }
  0x4d   :  { %640 = vmatprep.subr.bf16.mxu0 %v971_v14  ;;  %666 = vmatprep.mubr.bf16.mxu0 %v974_v16 }
  0x4e   :  { %676 = vmatprep.mubr.bf16.mxu1 %v974_v16 }
  0x4f   :  { %826 = vmatpush1.bf16.msra.mxu1 %v969_v15 }
  0x50   :  { %641 = vmatpush1.bf16.msra.mxu0 %v969_v15 }
  0x52   :  { %810 = vmatmul.mubr.msk.bf16.vlgmr.msra.gmra.mrb[8].mxu1 %vm521_vm0, %v973_v18 }
  0x53   :  { %809 = vmatmul.mubr.msk.bf16.vlgmr.msra.gmra.mrb[0].mxu0 %vm521_vm0, %v972_v17 }
 0x115   :  { %v562_v21 = vpop.f32.mrb[0].mxu1 }
 0x116   :  { %v564_v22 = vpop.f32.mrb[1].mxu1  ;;  %v563_v46 = vadd.f32 %v562_v21, %v104_v28 }
 0x117   :  { %v566_v23 = vpop.f32.mrb[2].mxu1  ;;  %v565_v47 = vadd.f32 %v564_v22, %v108_v29 }
 0x118   :  { %v568_v25 = vpop.f32.mrb[3].mxu1  ;;  %v567_v50 = vadd.f32 %v566_v23, %v104_v28 }
 0x119   :  { %v569_v55 = vadd.f32 %v568_v25, %v108_v29 }
 0x11d   :  { %v572_v30 = vpop.f32.mrb[4].mxu1 }
 0x11e   :  { %v625_v31 = vpop.f32.mrb[4].mxu0  ;;  %v573_v32 = vadd.f32 %v572_v30, %v104_v28  ;;  %v574_v33 = vpop.f32.mrb[5].mxu1 }
 0x11f   :  { %v627_v34 = vpop.f32.mrb[5].mxu0  ;;  %v575_v35 = vadd.f32 %v574_v33, %v108_v29  ;;  %v576_v36 = vpop.f32.mrb[6].mxu1 }
 0x120   :  { %v629_v37 = vpop.f32.mrb[6].mxu0  ;;  %v626_v38 = vadd.f32 %v625_v31, %v573_v32  ;;  %v577_v39 = vadd.f32 %v576_v36, %v104_v28  ;;  %v578_v40 = vpop.f32.mrb[7].mxu1 }
 0x121   :  { %v631_v41 = vpop.f32.mrb[7].mxu0  ;;  %v628_v42 = vadd.f32 %v627_v34, %v575_v35  ;;  %v579_v43 = vadd.f32 %v578_v40, %v108_v29 }
 0x122   :  { %v630_v44 = vadd.f32 %v629_v37, %v577_v39 }
 0x123   :  { %v632_v45 = vadd.f32 %v631_v41, %v579_v43 }
 0x125   :  { %v678_v49 = vpop.f32.mrb[8].mxu1 }
 0x126   :  { %v668_v48 = vpop.f32.mrb[0].mxu0  ;;  %v679_v52 = vadd.f32 %v678_v49, %v626_v38  ;;  %v680_v54 = vpop.f32.mrb[9].mxu1 }
 0x127   :  { %v828_v51 = vadd.f32 %v668_v48, %v563_v46  ;;  %v670_v53 = vpop.f32.mrb[1].mxu0  ;;  %v681_v57 = vadd.f32 %v680_v54, %v628_v42  ;;  %v682_v59 = vpop.f32.mrb[10].mxu1 }
 0x128   :  { %v830_v56 = vadd.f32 %v670_v53, %v565_v47  ;;  %v672_v58 = vpop.f32.mrb[2].mxu0  ;;  %v691_v61 = vmax.f32 %v679_v52, 0.0  ;;  %v683_v63 = vadd.f32 %v682_v59, %v630_v44  ;;  %v684_v1 = vpop.f32.mrb[11].mxu1 }
 0x129   :  { %v687_v60 = vmax.f32 %v828_v51, 0.0  ;;  %v832_v62 = vadd.f32 %v672_v58, %v567_v50  ;;  %v674_v0 = vpop.f32.mrb[3].mxu0  ;;  %v692_v3 = vmax.f32 %v681_v57, 0.0  ;;  %v685_v5 = vadd.f32 %v684_v1, %v632_v45 }
 0x12a   :  { %v688_v2 = vmax.f32 %v830_v56, 0.0  ;;  %v834_v4 = vadd.f32 %v674_v0, %v569_v55  ;;  %v693_v7 = vmax.f32 %v683_v63, 0.0 }
 0x12b   :  { %v689_v6 = vmax.f32 %v832_v62, 0.0  ;;  %v817_v9 = vpack.c.bf16 %v692_v3, %v691_v61  ;;  %v694_v11 = vmax.f32 %v685_v5, 0.0 }
 0x12c   :  { %v815_v8 = vpack.c.bf16 %v688_v2, %v687_v60  ;;  %v690_v10 = vmax.f32 %v834_v4, 0.0 }
 0x12d   :  { %721 = vst [vmem:[%s1259_s3 + $0x10] sm:$0xff] %v817_v9  ;;  %v818_v13 = vpack.c.bf16 %v694_v11, %v693_v7 }
 0x12e   :  { %719 = vst [vmem:[%s1259_s3] sm:$0xff] %v815_v8  ;;  %v816_v12 = vpack.c.bf16 %v690_v10, %v689_v6 }
 0x12f   :  { %722 = vst [vmem:[%s1259_s3 + $0x18] sm:$0xff] %v818_v13 }
 0x130   :  { %720 = vst [vmem:[%s1259_s3 + $0x8] sm:$0xff] %v816_v12 }

// kernel: vae_forward.13
= control target key start
LH: loop header
LB: loop body
LE: loop exit
PB: predicated region body
PF: predicated region fallthrough
CT: control target
= control target key end

     0   :  { %20 = vsyncpa [#allocation3], 0  ;;  %v177_v7 = vlaneseq  ;;  %v3166_v8 = vmov 1966171168   ;;  %s4448_s0 = inlined_call_operand.vmem [shape: bf16[2,1024], index: 0, kind: input, shape index: {}]   ;;  %s4449_s1 = inlined_call_operand.vmem [shape: f32[2,128], index: 1, kind: input, shape index: {}]   ;;  %s4450_s2 = inlined_call_operand.vmem [shape: bf16[1024,256], index: 2, kind: input, shape index: {}]   ;;  %s4451_s3 = inlined_call_operand.vmem [shape: f32[1,256], index: 3, kind: input, shape index: {}]   ;;  %s4452_s4 = inlined_call_operand.vmem [shape: f32[256,128], index: 4, kind: input, shape index: {}]   ;;  %s4453_s5 = inlined_call_operand.vmem [shape: f32[1,128], index: 5, kind: input, shape index: {}]   ;;  %s4454_s6 = inlined_call_operand.vmem [shape: f32[256,128], index: 6, kind: input, shape index: {}]   ;;  %s4455_s7 = inlined_call_operand.vmem [shape: f32[1,128], index: 7, kind: input, shape index: {}]   ;;  %s4456_s8 = inlined_call_operand.vmem [shape: f32[128,256], index: 8, kind: input, shape index: {}]   ;;  %s4457_s9 = inlined_call_operand.vmem [shape: f32[1,256], index: 9, kind: input, shape index: {}]   ;;  %s4458_s10 = inlined_call_operand.vmem [shape: bf16[256,1024], index: 10, kind: input, shape index: {}]   ;;  %s4459_s11 = inlined_call_operand.vmem [shape: f32[1,1024], index: 11, kind: input, shape index: {}]   ;;  %s4460_s12 = inlined_call_operand.hbm [shape: f32[2,128], index: 12, kind: output, shape index: {0}]   ;;  %s4461_s13 = inlined_call_operand.hbm [shape: f32[2,128], index: 13, kind: output, shape index: {1}]   ;;  %s4462_s14 = inlined_call_operand.vmem [shape: bf16[2,1024], index: 14, kind: output, shape index: {2}]  }
   0x1   :  { %v2923_v0 = vld [vmem:[%s4450_s2 + $0x4] ss:$8 sps:$4 sm:$0xff]   ;;  %v2925_v1 = vld [vmem:[%s4450_s2] ss:$8 sps:$4 sm:$0xff]   ;;  %v2926_v2 = vld [vmem:[%s4450_s2 + $0x14] ss:$8 sps:$4 sm:$0xff]   ;;  %v190_v9 = vunpack.c.l.s4 %v3166_v8 }
   0x2   :  { %885 = vmatprep.subr.bf16.mxu0 %v2923_v0  ;;  %v2928_v3 = vld [vmem:[%s4450_s2 + $0x10] ss:$8 sps:$4 sm:$0xff]   ;;  %v2929_v4 = vld [vmem:[%s4450_s2 + $0x24] ss:$8 sps:$4 sm:$0xff]   ;;  %v2931_v5 = vld [vmem:[%s4450_s2 + $0x20] ss:$8 sps:$4 sm:$0xff]  }
   0x3   :  { %886 = vmatpush1.bf16.msra.mxu0 %v2925_v1  ;;  %v2932_v6 = vld [vmem:[%s4450_s2 + $0x34] ss:$8 sps:$4 sm:$0xff]   ;;  %v2934_v10 = vld [vmem:[%s4450_s2 + $0x30] ss:$8 sps:$4 sm:$0xff]   ;;  %v2935_v11 = vld [vmem:[%s4450_s2 + $0x44] ss:$8 sps:$4 sm:$0xff]   ;;  %v191_v13 = vunpack.c.0.s8 %v190_v9 }
   0x4   :  { %887 = vmatprep.subr.bf16.mxu0 %v2926_v2  ;;  %v3272_v12 = vshrl.u32 %v177_v7, 7  ;;  %v2937_v14 = vld [vmem:[%s4450_s2 + $0x40] ss:$8 sps:$4 sm:$0xff]   ;;  %v2938_v15 = vld [vmem:[%s4450_s2 + $0x54] ss:$8 sps:$4 sm:$0xff]  }
   0x5   :  { %v2940_v17 = vld [vmem:[%s4450_s2 + $0x50] ss:$8 sps:$4 sm:$0xff]   ;;  %v2941_v18 = vld [vmem:[%s4450_s2 + $0x64] ss:$8 sps:$4 sm:$0xff]   ;;  %v2943_v21 = vld [vmem:[%s4450_s2 + $0x60] ss:$8 sps:$4 sm:$0xff]  }
   0x6   :  { %v3281_v16 = vsub.s32 %v191_v13, %v3272_v12  ;;  %v3292_v19 = vld [vmem:[%s4448_s0] sm:$0xff]  ;;  %v2944_v22 = vld [vmem:[%s4450_s2 + $0x74] ss:$8 sps:$4 sm:$0xff]   ;;  %v2946_v25 = vld [vmem:[%s4450_s2 + $0x70] ss:$8 sps:$4 sm:$0xff]  }
   0x7   :  { %888 = vmatpush1.bf16.msra.mxu0 %v2928_v3  ;;  %v2947_v26 = vld [vmem:[%s4450_s2 + $0x84] ss:$8 sps:$4 sm:$0xff]   ;;  %v2949_v27 = vld [vmem:[%s4450_s2 + $0x80] ss:$8 sps:$4 sm:$0xff]   ;;  %v2950_v28 = vld [vmem:[%s4450_s2 + $0x94] ss:$8 sps:$4 sm:$0xff]  }
   0x8   :  { %889 = vmatprep.subr.bf16.mxu0 %v2929_v4  ;;  %v195_v20 = vrot.slane %v3292_v19, %v3281_v16  ;;  %v2952_v29 = vld [vmem:[%s4450_s2 + $0x90] ss:$8 sps:$4 sm:$0xff]   ;;  %v2953_v30 = vld [vmem:[%s4450_s2 + $0xa4] ss:$8 sps:$4 sm:$0xff]   ;;  %v2955_v31 = vld [vmem:[%s4450_s2 + $0xa0] ss:$8 sps:$4 sm:$0xff]  }
   0x9   :  { %v2956_v32 = vld [vmem:[%s4450_s2 + $0xb4] ss:$8 sps:$4 sm:$0xff]   ;;  %v2958_v33 = vld [vmem:[%s4450_s2 + $0xb0] ss:$8 sps:$4 sm:$0xff]   ;;  %v2959_v34 = vld [vmem:[%s4450_s2 + $0xc4] ss:$8 sps:$4 sm:$0xff]  }
   0xa   :  { %v203_v23 = vcombine.high %v195_v20, %v195_v20  ;;  %v2961_v35 = vld [vmem:[%s4450_s2 + $0xc0] ss:$8 sps:$4 sm:$0xff]   ;;  %v2962_v36 = vld [vmem:[%s4450_s2 + $0xd4] ss:$8 sps:$4 sm:$0xff]   ;;  %v2964_v37 = vld [vmem:[%s4450_s2 + $0xd0] ss:$8 sps:$4 sm:$0xff]   ;;  %v3358_v43 = vrot.slane %v195_v20, %v3281_v16 }
   0xb   :  { %890 = vmatpush1.bf16.msra.mxu0 %v2931_v5  ;;  %v2965_v38 = vld [vmem:[%s4450_s2 + $0xe4] ss:$8 sps:$4 sm:$0xff]   ;;  %v2967_v39 = vld [vmem:[%s4450_s2 + $0xe0] ss:$8 sps:$4 sm:$0xff]   ;;  %v2968_v40 = vld [vmem:[%s4450_s2 + $0xf4] ss:$8 sps:$4 sm:$0xff]  }
   0xc   :  { %891 = vmatprep.subr.bf16.mxu0 %v2932_v6  ;;  %v225_v24 = vrot.slane %v203_v23, %v3281_v16  ;;  %v2970_v41 = vld [vmem:[%s4450_s2 + $0xf0] ss:$8 sps:$4 sm:$0xff]   ;;  %v2974_v42 = vld [vmem:[%s4450_s2 + $0x104] ss:$8 sps:$4 sm:$0xff]   ;;  %v2972_v45 = vld [vmem:[%s4450_s2 + $0x100] ss:$8 sps:$4 sm:$0xff]  }
   0xd   :  { %v2977_v46 = vld [vmem:[%s4450_s2 + $0x114] ss:$8 sps:$4 sm:$0xff]   ;;  %v2975_v47 = vld [vmem:[%s4450_s2 + $0x110] ss:$8 sps:$4 sm:$0xff]   ;;  %v2980_v48 = vld [vmem:[%s4450_s2 + $0x124] ss:$8 sps:$4 sm:$0xff]  }
   0xe   :  { %917 = vmatprep.mubr.bf16.mxu0 %v225_v24  ;;  %v235_v44 = vcombine.high %v225_v24, %v225_v24  ;;  %v2978_v49 = vld [vmem:[%s4450_s2 + $0x120] ss:$8 sps:$4 sm:$0xff]   ;;  %v2983_v50 = vld [vmem:[%s4450_s2 + $0x134] ss:$8 sps:$4 sm:$0xff]   ;;  %v2981_v51 = vld [vmem:[%s4450_s2 + $0x130] ss:$8 sps:$4 sm:$0xff]  }
   0xf   :  { %892 = vmatpush1.bf16.msra.mxu0 %v2934_v10  ;;  %v2986_v52 = vld [vmem:[%s4450_s2 + $0x144] ss:$8 sps:$4 sm:$0xff]  }
  0x10   :  { %893 = vmatprep.subr.bf16.mxu0 %v2935_v11 }
  0x13   :  { %894 = vmatpush1.bf16.msra.mxu0 %v2937_v14 }
  0x14   :  { %895 = vmatprep.subr.bf16.mxu0 %v2938_v15 }
  0x17   :  { %896 = vmatpush1.bf16.msra.mxu0 %v2940_v17 }
  0x18   :  { %897 = vmatprep.subr.bf16.mxu0 %v2941_v18 }
  0x1b   :  { %898 = vmatpush1.bf16.msra.mxu0 %v2943_v21 }
  0x1c   :  { %899 = vmatprep.subr.bf16.mxu0 %v2944_v22 }
  0x1f   :  { %900 = vmatpush1.bf16.msra.mxu0 %v2946_v25 }
  0x20   :  { %901 = vmatprep.subr.bf16.mxu0 %v2947_v26 }
  0x23   :  { %902 = vmatpush1.bf16.msra.mxu0 %v2949_v27 }
  0x24   :  { %903 = vmatprep.subr.bf16.mxu0 %v2950_v28 }
  0x27   :  { %904 = vmatpush1.bf16.msra.mxu0 %v2952_v29 }
  0x28   :  { %905 = vmatprep.subr.bf16.mxu0 %v2953_v30 }
  0x2b   :  { %906 = vmatpush1.bf16.msra.mxu0 %v2955_v31 }
  0x2c   :  { %907 = vmatprep.subr.bf16.mxu0 %v2956_v32 }
  0x2f   :  { %908 = vmatpush1.bf16.msra.mxu0 %v2958_v33 }
  0x30   :  { %909 = vmatprep.subr.bf16.mxu0 %v2959_v34 }
  0x33   :  { %910 = vmatpush1.bf16.msra.mxu0 %v2961_v35 }
  0x34   :  { %911 = vmatprep.subr.bf16.mxu0 %v2962_v36 }
  0x37   :  { %912 = vmatpush1.bf16.msra.mxu0 %v2964_v37 }
  0x38   :  { %913 = vmatprep.subr.bf16.mxu0 %v2965_v38 }
  0x3b   :  { %914 = vmatpush1.bf16.msra.mxu0 %v2967_v39 }
  0x3c   :  { %915 = vmatprep.subr.bf16.mxu0 %v2968_v40 }
  0x3f   :  { %916 = vmatpush1.bf16.msra.mxu0 %v2970_v41 }
  0x40   :  { %926 = vmatprep.subr.bf16.mxu0 %v2974_v42 }
  0x42   :  { %918 = vmatmul.mubr.bf16.vlgmr.msra.gmra.mrb[0].mxu0 %v3358_v43 }
  0x43   :  { %927 = vmatpush1.bf16.msra.mxu0 %v2972_v45  ;;  %958 = vmatprep.mubr.bf16.mxu0 %v235_v44 }
  0x44   :  { %928 = vmatprep.subr.bf16.mxu0 %v2977_v46 }
  0x47   :  { %929 = vmatpush1.bf16.msra.mxu0 %v2975_v47 }
  0x48   :  { %930 = vmatprep.subr.bf16.mxu0 %v2980_v48 }
  0x4b   :  { %931 = vmatpush1.bf16.msra.mxu0 %v2978_v49 }
  0x4c   :  { %932 = vmatprep.subr.bf16.mxu0 %v2983_v50 }
  0x4d   :  { %21 = vsyncpa [#allocation5], 0  ;;  %v2984_v53 = vld [vmem:[%s4450_s2 + $0x140] ss:$8 sps:$4 sm:$0xff]   ;;  %v2989_v54 = vld [vmem:[%s4450_s2 + $0x154] ss:$8 sps:$4 sm:$0xff]   ;;  %v188_v7 = vcombine.high %v3292_v19, %v3292_v19  ;;  %v233_v18 = vcombine.high %v3358_v43, %v3358_v43 }
  0x4e   :  { %v2987_v55 = vld [vmem:[%s4450_s2 + $0x150] ss:$8 sps:$4 sm:$0xff]   ;;  %v2992_v56 = vld [vmem:[%s4450_s2 + $0x164] ss:$8 sps:$4 sm:$0xff]   ;;  %v2990_v57 = vld [vmem:[%s4450_s2 + $0x160] ss:$8 sps:$4 sm:$0xff]  }
  0x4f   :  { %933 = vmatpush1.bf16.msra.mxu0 %v2981_v51  ;;  %v2995_v58 = vld [vmem:[%s4450_s2 + $0x174] ss:$8 sps:$4 sm:$0xff]   ;;  %v2993_v59 = vld [vmem:[%s4450_s2 + $0x170] ss:$8 sps:$4 sm:$0xff]   ;;  %v2998_v60 = vld [vmem:[%s4450_s2 + $0x184] ss:$8 sps:$4 sm:$0xff]   ;;  %v3451_v11 = vrot.slane %v188_v7, %v3281_v16 }
  0x50   :  { %934 = vmatprep.subr.bf16.mxu0 %v2986_v52  ;;  %v2996_v61 = vld [vmem:[%s4450_s2 + $0x180] ss:$8 sps:$4 sm:$0xff]   ;;  %v3001_v62 = vld [vmem:[%s4450_s2 + $0x194] ss:$8 sps:$4 sm:$0xff]   ;;  %v2999_v63 = vld [vmem:[%s4450_s2 + $0x190] ss:$8 sps:$4 sm:$0xff]  }
  0x51   :  { %v3004_v0 = vld [vmem:[%s4450_s2 + $0x1a4] ss:$8 sps:$4 sm:$0xff]   ;;  %v3002_v1 = vld [vmem:[%s4450_s2 + $0x1a0] ss:$8 sps:$4 sm:$0xff]   ;;  %v3007_v2 = vld [vmem:[%s4450_s2 + $0x1b4] ss:$8 sps:$4 sm:$0xff]   ;;  %v204_v15 = vcombine.high %v3451_v11, %v3451_v11 }
  0x52   :  { %v3005_v3 = vld [vmem:[%s4450_s2 + $0x1b0] ss:$8 sps:$4 sm:$0xff]   ;;  %v3010_v4 = vld [vmem:[%s4450_s2 + $0x1c4] ss:$8 sps:$4 sm:$0xff]   ;;  %v3008_v5 = vld [vmem:[%s4450_s2 + $0x1c0] ss:$8 sps:$4 sm:$0xff]  }
  0x53   :  { %935 = vmatpush1.bf16.msra.mxu0 %v2984_v53  ;;  %v3013_v6 = vld [vmem:[%s4450_s2 + $0x1d4] ss:$8 sps:$4 sm:$0xff]   ;;  %v3011_v8 = vld [vmem:[%s4450_s2 + $0x1d0] ss:$8 sps:$4 sm:$0xff]   ;;  %v3016_v9 = vld [vmem:[%s4450_s2 + $0x1e4] ss:$8 sps:$4 sm:$0xff]   ;;  %v3470_v20 = vrot.slane %v204_v15, %v3281_v16 }
  0x54   :  { %936 = vmatprep.subr.bf16.mxu0 %v2989_v54  ;;  %v3014_v10 = vld [vmem:[%s4450_s2 + $0x1e0] ss:$8 sps:$4 sm:$0xff]   ;;  %v3019_v13 = vld [vmem:[%s4450_s2 + $0x1f4] ss:$8 sps:$4 sm:$0xff]   ;;  %v3017_v14 = vld [vmem:[%s4450_s2 + $0x1f0] ss:$8 sps:$4 sm:$0xff]  }
  0x55   :  { %v3022_v17 = vld [vmem:[%s4450_s2 + $0x204] ss:$8 sps:$4 sm:$0xff]   ;;  %v3020_v19 = vld [vmem:[%s4450_s2 + $0x200] ss:$8 sps:$4 sm:$0xff]   ;;  %v3025_v21 = vld [vmem:[%s4450_s2 + $0x214] ss:$8 sps:$4 sm:$0xff]  }
  0x56   :  { %v3023_v22 = vld [vmem:[%s4450_s2 + $0x210] ss:$8 sps:$4 sm:$0xff]   ;;  %v3028_v23 = vld [vmem:[%s4450_s2 + $0x224] ss:$8 sps:$4 sm:$0xff]   ;;  %v3026_v38 = vld [vmem:[%s4450_s2 + $0x220] ss:$8 sps:$4 sm:$0xff]  }
  0x57   :  { %937 = vmatpush1.bf16.msra.mxu0 %v2987_v55  ;;  %v1067_v24 = vld [vmem:[%s4452_s4 + $0x80] sm:$0xff]  ;;  %v1068_v25 = vld [vmem:[%s4452_s4 + $0x88] sm:$0xff]  ;;  %v1069_v29 = vld [vmem:[%s4452_s4 + $0x90] sm:$0xff]  ;;  %s3169_s30 = smov [#allocation4]  }
  0x58   :  { %938 = vmatprep.subr.bf16.mxu0 %v2992_v56  ;;  %v1051_v26 = vld [vmem:[%s4452_s4] sm:$0xff]  ;;  %v2809_v27 = vpack.c.bf16 %v1068_v25, %v1067_v24  ;;  %v1052_v28 = vld [vmem:[%s4452_s4 + $0x8] sm:$0xff]  ;;  %v1070_v30 = vld [vmem:[%s4452_s4 + $0x98] sm:$0xff]  ;;  %s2461_s15 = sshll.u32 %s3169_s30, 4  ;;  %s2462_s15 = int_to_ptr.vmem [resolvable:$true] %s2461_s15 }
  0x59   :  { %v2811_v31 = vpack.c.bf16 %v1052_v28, %v1051_v26  ;;  %v2813_v32 = vpack.c.bf16 %v1070_v30, %v1069_v29  ;;  %v1053_v33 = vld [vmem:[%s4452_s4 + $0x10] sm:$0xff]  ;;  %v1054_v34 = vld [vmem:[%s4452_s4 + $0x18] sm:$0xff]  ;;  %v1071_v35 = vld [vmem:[%s4452_s4 + $0xa0] sm:$0xff] }
  0x5a   :  { %2810 = vmatprep.subr.bf16.mxu1 %v2809_v27  ;;  %v1072_v36 = vld [vmem:[%s4452_s4 + $0xa8] sm:$0xff]  ;;  %v2815_v37 = vpack.c.bf16 %v1054_v34, %v1053_v33  ;;  %v1055_v40 = vld [vmem:[%s4452_s4 + $0x20] sm:$0xff]  ;;  %v3031_v42 = vld [vmem:[%s4450_s2 + $0x234] ss:$8 sps:$4 sm:$0xff]   ;;  %v3652_v34 = vrot.slane %v3451_v11, %v3281_v16 }
  0x5b   :  { %939 = vmatpush1.bf16.msra.mxu0 %v2990_v57  ;;  %2812 = vmatpush3.bf16.msra.mxu1 %v2811_v31  ;;  %v2817_v39 = vpack.c.bf16 %v1072_v36, %v1071_v35  ;;  %v1056_v41 = vld [vmem:[%s4452_s4 + $0x28] sm:$0xff]  ;;  %v1073_v43 = vld [vmem:[%s4452_s4 + $0xb0] sm:$0xff]  ;;  %v1074_v44 = vld [vmem:[%s4452_s4 + $0xb8] sm:$0xff]  ;;  %v236_v36 = vcombine.high %v3470_v20, %v3470_v20 }
  0x5c   :  { %940 = vmatprep.subr.bf16.mxu0 %v2995_v58  ;;  %2814 = vmatprep.subr.bf16.mxu1 %v2813_v32  ;;  %v2819_v45 = vpack.c.bf16 %v1056_v41, %v1055_v40  ;;  %v3029_v46 = vld [vmem:[%s4450_s2 + $0x230] ss:$8 sps:$4 sm:$0xff]   ;;  %v2821_v47 = vpack.c.bf16 %v1074_v44, %v1073_v43  ;;  %v3034_v50 = vld [vmem:[%s4450_s2 + $0x244] ss:$8 sps:$4 sm:$0xff]   ;;  %v3032_v54 = vld [vmem:[%s4450_s2 + $0x240] ss:$8 sps:$4 sm:$0xff]  }
  0x5d   :  { %v1057_v48 = vld [vmem:[%s4452_s4 + $0x30] sm:$0xff]  ;;  %v1058_v49 = vld [vmem:[%s4452_s4 + $0x38] sm:$0xff]  ;;  %v1075_v51 = vld [vmem:[%s4452_s4 + $0xc0] sm:$0xff] }
  0x5e   :  { %v1076_v52 = vld [vmem:[%s4452_s4 + $0xc8] sm:$0xff]  ;;  %v2823_v53 = vpack.c.bf16 %v1058_v49, %v1057_v48  ;;  %v1059_v56 = vld [vmem:[%s4452_s4 + $0x40] sm:$0xff]  ;;  %v3037_v58 = vld [vmem:[%s4450_s2 + $0x254] ss:$8 sps:$4 sm:$0xff]  }
  0x5f   :  { %941 = vmatpush1.bf16.msra.mxu0 %v2993_v59  ;;  %2816 = vmatpush3.bf16.msra.mxu1 %v2815_v37  ;;  %v2825_v55 = vpack.c.bf16 %v1076_v52, %v1075_v51  ;;  %v1060_v57 = vld [vmem:[%s4452_s4 + $0x48] sm:$0xff]  ;;  %v1077_v59 = vld [vmem:[%s4452_s4 + $0xd0] sm:$0xff] }
  0x60   :  { %942 = vmatprep.subr.bf16.mxu0 %v2998_v60  ;;  %2818 = vmatprep.subr.bf16.mxu1 %v2817_v39  ;;  %v1078_v60 = vld [vmem:[%s4452_s4 + $0xd8] sm:$0xff]  ;;  %v3046_v15 = vld [vmem:[%s4450_s2 + $0x284] ss:$8 sps:$4 sm:$0xff]   ;;  %v3056_v26 = vld [vmem:[%s4450_s2 + $0x2c0] ss:$8 sps:$4 sm:$0xff]  }
  0x61   :  { %v3053_v24 = vld [vmem:[%s4450_s2 + $0x2b0] ss:$8 sps:$4 sm:$0xff]   ;;  %v3058_v25 = vld [vmem:[%s4450_s2 + $0x2c4] ss:$8 sps:$4 sm:$0xff]   ;;  %v3061_v27 = vld [vmem:[%s4450_s2 + $0x2d4] ss:$8 sps:$4 sm:$0xff]  }
  0x62   :  { %v3059_v28 = vld [vmem:[%s4450_s2 + $0x2d0] ss:$8 sps:$4 sm:$0xff]   ;;  %v3064_v29 = vld [vmem:[%s4450_s2 + $0x2e4] ss:$8 sps:$4 sm:$0xff]   ;;  %v3062_v30 = vld [vmem:[%s4450_s2 + $0x2e0] ss:$8 sps:$4 sm:$0xff]  }
  0x63   :  { %943 = vmatpush1.bf16.msra.mxu0 %v2996_v61  ;;  %2820 = vmatpush3.bf16.msra.mxu1 %v2819_v45  ;;  %v2827_v61 = vpack.c.bf16 %v1060_v57, %v1059_v56  ;;  %v3067_v31 = vld [vmem:[%s4450_s2 + $0x2f4] ss:$8 sps:$4 sm:$0xff]   ;;  %v3065_v32 = vld [vmem:[%s4450_s2 + $0x2f0] ss:$8 sps:$4 sm:$0xff]   ;;  %v3070_v33 = vld [vmem:[%s4450_s2 + $0x304] ss:$8 sps:$4 sm:$0xff]  }
  0x64   :  { %944 = vmatprep.subr.bf16.mxu0 %v3001_v62  ;;  %2822 = vmatprep.subr.bf16.mxu1 %v2821_v47  ;;  %v3035_v62 = vld [vmem:[%s4450_s2 + $0x250] ss:$8 sps:$4 sm:$0xff]   ;;  %v3068_v35 = vld [vmem:[%s4450_s2 + $0x300] ss:$8 sps:$4 sm:$0xff]   ;;  %v3073_v37 = vld [vmem:[%s4450_s2 + $0x314] ss:$8 sps:$4 sm:$0xff]  }
  0x65   :  { %v3071_v11 = vld [vmem:[%s4450_s2 + $0x310] ss:$8 sps:$4 sm:$0xff]   ;;  %v3079_v39 = vld [vmem:[%s4450_s2 + $0x334] ss:$8 sps:$4 sm:$0xff]   ;;  %v3082_v41 = vld [vmem:[%s4450_s2 + $0x344] ss:$8 sps:$4 sm:$0xff]  }
  0x66   :  { %v3077_v40 = vld [vmem:[%s4450_s2 + $0x330] ss:$8 sps:$4 sm:$0xff]   ;;  %v3085_v43 = vld [vmem:[%s4450_s2 + $0x354] ss:$8 sps:$4 sm:$0xff]   ;;  %v3088_v45 = vld [vmem:[%s4450_s2 + $0x364] ss:$8 sps:$4 sm:$0xff]  }
  0x67   :  { %945 = vmatpush1.bf16.msra.mxu0 %v2999_v63  ;;  %2824 = vmatpush3.bf16.msra.mxu1 %v2823_v53  ;;  %v2829_v63 = vpack.c.bf16 %v1078_v60, %v1077_v59  ;;  %v3083_v44 = vld [vmem:[%s4450_s2 + $0x350] ss:$8 sps:$4 sm:$0xff]   ;;  %v3091_v47 = vld [vmem:[%s4450_s2 + $0x374] ss:$8 sps:$4 sm:$0xff]   ;;  %v3094_v49 = vld [vmem:[%s4450_s2 + $0x384] ss:$8 sps:$4 sm:$0xff]  }
  0x68   :  { %946 = vmatprep.subr.bf16.mxu0 %v3004_v0  ;;  %2826 = vmatprep.subr.bf16.mxu1 %v2825_v55  ;;  %v1061_v0 = vld [vmem:[%s4452_s4 + $0x50] sm:$0xff]  ;;  %v3100_v53 = vld [vmem:[%s4450_s2 + $0x3a4] ss:$8 sps:$4 sm:$0xff]  }
  0x69   :  { %v3089_v48 = vld [vmem:[%s4450_s2 + $0x370] ss:$8 sps:$4 sm:$0xff]   ;;  %v3097_v51 = vld [vmem:[%s4450_s2 + $0x394] ss:$8 sps:$4 sm:$0xff]   ;;  %v3106_v57 = vld [vmem:[%s4450_s2 + $0x3c4] ss:$8 sps:$4 sm:$0xff]  }
  0x6a   :  { %v3095_v52 = vld [vmem:[%s4450_s2 + $0x390] ss:$8 sps:$4 sm:$0xff]   ;;  %v3103_v55 = vld [vmem:[%s4450_s2 + $0x3b4] ss:$8 sps:$4 sm:$0xff]  }
  0x6b   :  { %947 = vmatpush1.bf16.msra.mxu0 %v3002_v1  ;;  %v1062_v1 = vld [vmem:[%s4452_s4 + $0x58] sm:$0xff]  ;;  %2828 = vmatpush3.bf16.msra.mxu1 %v2827_v61  ;;  %v3112_v61 = vld [vmem:[%s4450_s2 + $0x3e4] ss:$8 sps:$4 sm:$0xff]  }
  0x6c   :  { %948 = vmatprep.subr.bf16.mxu0 %v3007_v2  ;;  %v3040_v2 = vld [vmem:[%s4450_s2 + $0x264] ss:$8 sps:$4 sm:$0xff]   ;;  %2830 = vmatprep.subr.bf16.mxu1 %v2829_v63  ;;  %v3101_v56 = vld [vmem:[%s4450_s2 + $0x3b0] ss:$8 sps:$4 sm:$0xff]   ;;  %v3109_v59 = vld [vmem:[%s4450_s2 + $0x3d4] ss:$8 sps:$4 sm:$0xff]  }
  0x6d   :  { %v3107_v60 = vld [vmem:[%s4450_s2 + $0x3d0] ss:$8 sps:$4 sm:$0xff]   ;;  %v3115_v63 = vld [vmem:[%s4450_s2 + $0x3f4] ss:$8 sps:$4 sm:$0xff]  }
  0x6f   :  { %949 = vmatpush1.bf16.msra.mxu0 %v3005_v3  ;;  %v1079_v3 = vld [vmem:[%s4452_s4 + $0xe0] sm:$0xff] }
  0x70   :  { %950 = vmatprep.subr.bf16.mxu0 %v3010_v4  ;;  %v1080_v4 = vld [vmem:[%s4452_s4 + $0xe8] sm:$0xff] }
  0x71   :  { %v2833_v7 = vpack.c.bf16 %v1080_v4, %v1079_v3  ;;  %v1082_v3 = vld [vmem:[%s4452_s4 + $0xf8] sm:$0xff] }
  0x73   :  { %951 = vmatpush1.bf16.msra.mxu0 %v3008_v5  ;;  %v2831_v5 = vpack.c.bf16 %v1062_v1, %v1061_v0  ;;  %v3113_v0 = vld [vmem:[%s4450_s2 + $0x3f0] ss:$8 sps:$4 sm:$0xff]   ;;  %v234_v1 = vcombine.high %v3652_v34, %v3652_v34 }
  0x74   :  { %952 = vmatprep.subr.bf16.mxu0 %v3013_v6  ;;  %v3038_v6 = vld [vmem:[%s4450_s2 + $0x260] ss:$8 sps:$4 sm:$0xff]  }
  0x75   :  { %2832 = vmatpush3.bf16.msra.mxu1 %v2831_v5  ;;  %v1065_v5 = vld [vmem:[%s4452_s4 + $0x70] sm:$0xff] }
  0x76   :  { %2834 = vmatprep.subr.bf16.mxu1 %v2833_v7 }
  0x77   :  { %953 = vmatpush1.bf16.msra.mxu0 %v3011_v8  ;;  %v1063_v8 = vld [vmem:[%s4452_s4 + $0x60] sm:$0xff] }
  0x78   :  { %954 = vmatprep.subr.bf16.mxu0 %v3016_v9  ;;  %v1064_v9 = vld [vmem:[%s4452_s4 + $0x68] sm:$0xff] }
  0x7b   :  { %955 = vmatpush1.bf16.msra.mxu0 %v3014_v10  ;;  %v3043_v10 = vld [vmem:[%s4450_s2 + $0x274] ss:$8 sps:$4 sm:$0xff]  }
  0x7c   :  { %956 = vmatprep.subr.bf16.mxu0 %v3019_v13  ;;  %v2835_v13 = vpack.c.bf16 %v1064_v9, %v1063_v8  ;;  %v1176_v8 = vld [vmem:[%s4454_s6 + $0x80] sm:$0xff]  ;;  %v1177_v9 = vld [vmem:[%s4454_s6 + $0x88] sm:$0xff] }
  0x7e   :  { %2836 = vmatpush3.bf16.msra.mxu1 %v2835_v13  ;;  %v3771_v13 = vsub.s32 0, %v3272_v12 }
  0x7f   :  { %957 = vmatpush1.bf16.msra.mxu0 %v3017_v14  ;;  %v3041_v14 = vld [vmem:[%s4450_s2 + $0x270] ss:$8 sps:$4 sm:$0xff]  }
  0x80   :  { %967 = vmatprep.subr.bf16.mxu0 %v3022_v17  ;;  %v3044_v17 = vld [vmem:[%s4450_s2 + $0x280] ss:$8 sps:$4 sm:$0xff]  }
  0x82   :  { %959 = vmatmul.mubr.bf16.vlgmr.msra.gmra.mrb[0].mxu0 %v233_v18  ;;  %v3049_v18 = vld [vmem:[%s4450_s2 + $0x294] ss:$8 sps:$4 sm:$0xff]  }
  0x83   :  { %968 = vmatpush1.bf16.msra.mxu0 %v3020_v19  ;;  %999 = vmatprep.mubr.bf16.mxu0 %v3470_v20  ;;  %v3047_v19 = vld [vmem:[%s4450_s2 + $0x290] ss:$8 sps:$4 sm:$0xff]   ;;  %v3074_v20 = vld [vmem:[%s4450_s2 + $0x320] ss:$8 sps:$4 sm:$0xff]  }
  0x84   :  { %969 = vmatprep.subr.bf16.mxu0 %v3025_v21  ;;  %v3052_v21 = vld [vmem:[%s4450_s2 + $0x2a4] ss:$8 sps:$4 sm:$0xff]  }
  0x87   :  { %970 = vmatpush1.bf16.msra.mxu0 %v3023_v22  ;;  %v3050_v22 = vld [vmem:[%s4450_s2 + $0x2a0] ss:$8 sps:$4 sm:$0xff]  }
  0x88   :  { %971 = vmatprep.subr.bf16.mxu0 %v3028_v23  ;;  %v3055_v23 = vld [vmem:[%s4450_s2 + $0x2b4] ss:$8 sps:$4 sm:$0xff]  }
  0x8b   :  { %972 = vmatpush1.bf16.msra.mxu0 %v3026_v38  ;;  %v3076_v38 = vld [vmem:[%s4450_s2 + $0x324] ss:$8 sps:$4 sm:$0xff]  }
  0x8c   :  { %973 = vmatprep.subr.bf16.mxu0 %v3031_v42  ;;  %v3080_v42 = vld [vmem:[%s4450_s2 + $0x340] ss:$8 sps:$4 sm:$0xff]  }
  0x8f   :  { %974 = vmatpush1.bf16.msra.mxu0 %v3029_v46  ;;  %v3086_v46 = vld [vmem:[%s4450_s2 + $0x360] ss:$8 sps:$4 sm:$0xff]  }
  0x90   :  { %975 = vmatprep.subr.bf16.mxu0 %v3034_v50  ;;  %v3092_v50 = vld [vmem:[%s4450_s2 + $0x380] ss:$8 sps:$4 sm:$0xff]  }
  0x93   :  { %976 = vmatpush1.bf16.msra.mxu0 %v3032_v54  ;;  %v3098_v54 = vld [vmem:[%s4450_s2 + $0x3a0] ss:$8 sps:$4 sm:$0xff]  }
  0x94   :  { %977 = vmatprep.subr.bf16.mxu0 %v3037_v58  ;;  %v3104_v58 = vld [vmem:[%s4450_s2 + $0x3c0] ss:$8 sps:$4 sm:$0xff]  }
  0x97   :  { %978 = vmatpush1.bf16.msra.mxu0 %v3035_v62  ;;  %v3110_v62 = vld [vmem:[%s4450_s2 + $0x3e0] ss:$8 sps:$4 sm:$0xff]  }
  0x98   :  { %979 = vmatprep.subr.bf16.mxu0 %v3040_v2  ;;  %v1081_v2 = vld [vmem:[%s4452_s4 + $0xf0] sm:$0xff] }
  0x99   :  { %v2837_v4 = vpack.c.bf16 %v1082_v3, %v1081_v2 }
  0x9b   :  { %980 = vmatpush1.bf16.msra.mxu0 %v3038_v6  ;;  %v1066_v6 = vld [vmem:[%s4452_s4 + $0x78] sm:$0xff]  ;;  %2838 = vmatprep.subr.bf16.mxu1 %v2837_v4  ;;  %v1174_v4 = vld [vmem:[%s4454_s6 + $0x70] sm:$0xff] }
  0x9c   :  { %981 = vmatprep.subr.bf16.mxu0 %v3043_v10  ;;  %v2839_v7 = vpack.c.bf16 %v1066_v6, %v1065_v5  ;;  %v2841_v10 = vpack.c.bf16 %v1177_v9, %v1176_v8  ;;  %v1175_v5 = vld [vmem:[%s4454_s6 + $0x78] sm:$0xff]  ;;  %v1275_v9 = vld [vmem:[%s4456_s8] sm:$0xff] }
  0x9d   :  { %v2871_v6 = vpack.c.bf16 %v1175_v5, %v1174_v4  ;;  %v1278_v8 = vld [vmem:[%s4456_s8 + $0x18] sm:$0xff] }
  0x9e   :  { %2840 = vmatpush3.bf16.msra.mxu1 %v2839_v7  ;;  %v1276_v7 = vld [vmem:[%s4456_s8 + $0x8] sm:$0xff]  ;;  %v1405_v4 = vld [vmem:[%s4458_s10 + $0x58] sm:$0xff] }
  0x9f   :  { %982 = vmatpush1.bf16.msra.mxu0 %v3041_v14  ;;  %2842 = vmatprep.subr.bf16.mxu1 %v2841_v10  ;;  %v175_v14 = vld [vmem:[%s4451_s3] sm:$0x3]  ;;  %v2873_v10 = vpack.c.bf16 %v1278_v8, %v1276_v7  ;;  %v1409_v5 = vld [vmem:[%s4458_s10 + $0x78] sm:$0xff] }
  0xa0   :  { %983 = vmatprep.subr.bf16.mxu0 %v3046_v15  ;;  %v3777_v15 = vsub.s32 1, %v3272_v12  ;;  %v2622_v7 = vcombine.high %v1405_v4, %v1409_v5  ;;  %v1413_v8 = vld [vmem:[%s4458_s10 + $0x98] sm:$0xff] }
  0xa3   :  { %984 = vmatpush1.bf16.msra.mxu0 %v3044_v17  ;;  %v180_v17 = vrot.slane %v175_v14, %v3771_v13 }
  0xa4   :  { %985 = vmatprep.subr.bf16.mxu0 %v3049_v18  ;;  %v184_v18 = vrot.slane %v175_v14, %v3777_v15  ;;  %v1277_v14 = vld [vmem:[%s4456_s8 + $0x10] sm:$0xff] }
  0xa7   :  { %986 = vmatpush1.bf16.msra.mxu0 %v3047_v19 }
  0xa8   :  { %987 = vmatprep.subr.bf16.mxu0 %v3052_v21 }
  0xab   :  { %988 = vmatpush1.bf16.msra.mxu0 %v3050_v22 }
  0xac   :  { %989 = vmatprep.subr.bf16.mxu0 %v3055_v23  ;;  %v1160_v23 = vld [vmem:[%s4454_s6] sm:$0xff] }
  0xaf   :  { %990 = vmatpush1.bf16.msra.mxu0 %v3053_v24  ;;  %v1161_v24 = vld [vmem:[%s4454_s6 + $0x8] sm:$0xff] }
  0xb0   :  { %991 = vmatprep.subr.bf16.mxu0 %v3058_v25 }
  0xb3   :  { %992 = vmatpush1.bf16.msra.mxu0 %v3056_v26 }
  0xb4   :  { %993 = vmatprep.subr.bf16.mxu0 %v3061_v27  ;;  %v1178_v27 = vld [vmem:[%s4454_s6 + $0x90] sm:$0xff] }
  0xb7   :  { %994 = vmatpush1.bf16.msra.mxu0 %v3059_v28  ;;  %v1179_v28 = vld [vmem:[%s4454_s6 + $0x98] sm:$0xff] }
  0xb8   :  { %995 = vmatprep.subr.bf16.mxu0 %v3064_v29 }
  0xbb   :  { %996 = vmatpush1.bf16.msra.mxu0 %v3062_v30 }
  0xbc   :  { %997 = vmatprep.subr.bf16.mxu0 %v3067_v31  ;;  %v2843_v31 = vpack.c.bf16 %v1161_v24, %v1160_v23  ;;  %v1281_v23 = vld [vmem:[%s4456_s8 + $0x30] sm:$0xff] }
  0xbf   :  { %998 = vmatpush1.bf16.msra.mxu0 %v3065_v32 }
  0xc0   :  { %1008 = vmatprep.subr.bf16.mxu0 %v3070_v33  ;;  %v2845_v33 = vpack.c.bf16 %v1179_v28, %v1178_v27  ;;  %v1283_v28 = vld [vmem:[%s4456_s8 + $0x40] sm:$0xff] }
  0xc2   :  { %1000 = vmatmul.mubr.bf16.vlgmr.msra.gmra.mrb[0].mxu0 %v3652_v34  ;;  %v1162_v34 = vld [vmem:[%s4454_s6 + $0x10] sm:$0xff] }
  0xc3   :  { %1009 = vmatpush1.bf16.msra.mxu0 %v3068_v35  ;;  %1040 = vmatprep.mubr.bf16.mxu0 %v236_v36  ;;  %v1163_v35 = vld [vmem:[%s4454_s6 + $0x18] sm:$0xff]  ;;  %v1180_v36 = vld [vmem:[%s4454_s6 + $0xa0] sm:$0xff] }
  0xc4   :  { %1010 = vmatprep.subr.bf16.mxu0 %v3073_v37  ;;  %v1181_v37 = vld [vmem:[%s4454_s6 + $0xa8] sm:$0xff] }
  0xc7   :  { %1011 = vmatpush1.bf16.msra.mxu0 %v3071_v11  ;;  %v2847_v11 = vpack.c.bf16 %v1163_v35, %v1162_v34  ;;  %v1287_v34 = vld [vmem:[%s4456_s8 + $0x60] sm:$0xff]  ;;  %v1289_v35 = vld [vmem:[%s4456_s8 + $0x70] sm:$0xff] }
  0xc8   :  { %1012 = vmatprep.subr.bf16.mxu0 %v3076_v38  ;;  %v2849_v38 = vpack.c.bf16 %v1181_v37, %v1180_v36  ;;  %v2887_v36 = vpack.c.bf16 %v1289_v35, %v1287_v34  ;;  %v1292_v37 = vld [vmem:[%s4456_s8 + $0x88] sm:$0xff]  ;;  %v1453_v34 = vld [vmem:[%s4458_s10 + $0x1d8] sm:$0xff] }
  0xc9   :  { %v1457_v35 = vld [vmem:[%s4458_s10 + $0x1f8] sm:$0xff] }
  0xcb   :  { %1013 = vmatpush1.bf16.msra.mxu0 %v3074_v20  ;;  %v1164_v20 = vld [vmem:[%s4454_s6 + $0x20] sm:$0xff] }
  0xcc   :  { %1014 = vmatprep.subr.bf16.mxu0 %v3079_v39  ;;  %v1165_v39 = vld [vmem:[%s4454_s6 + $0x28] sm:$0xff] }
  0xcf   :  { %1015 = vmatpush1.bf16.msra.mxu0 %v3077_v40  ;;  %v1182_v40 = vld [vmem:[%s4454_s6 + $0xb0] sm:$0xff] }
  0xd0   :  { %1016 = vmatprep.subr.bf16.mxu0 %v3082_v41  ;;  %v1183_v41 = vld [vmem:[%s4454_s6 + $0xb8] sm:$0xff] }
  0xd3   :  { %1017 = vmatpush1.bf16.msra.mxu0 %v3080_v42  ;;  %v2851_v42 = vpack.c.bf16 %v1165_v39, %v1164_v20  ;;  %v1291_v20 = vld [vmem:[%s4456_s8 + $0x80] sm:$0xff]  ;;  %v1293_v39 = vld [vmem:[%s4456_s8 + $0x90] sm:$0xff] }
  0xd4   :  { %1018 = vmatprep.subr.bf16.mxu0 %v3085_v43  ;;  %v2853_v43 = vpack.c.bf16 %v1183_v41, %v1182_v40  ;;  %v2891_v40 = vpack.c.bf16 %v1293_v39, %v1291_v20  ;;  %v1296_v41 = vld [vmem:[%s4456_s8 + $0xa8] sm:$0xff] }
  0xd7   :  { %1019 = vmatpush1.bf16.msra.mxu0 %v3083_v44  ;;  %v1166_v44 = vld [vmem:[%s4454_s6 + $0x30] sm:$0xff] }
  0xd8   :  { %1020 = vmatprep.subr.bf16.mxu0 %v3088_v45  ;;  %v1167_v45 = vld [vmem:[%s4454_s6 + $0x38] sm:$0xff] }
  0xdb   :  { %1021 = vmatpush1.bf16.msra.mxu0 %v3086_v46  ;;  %v1184_v46 = vld [vmem:[%s4454_s6 + $0xc0] sm:$0xff] }
  0xdc   :  { %1022 = vmatprep.subr.bf16.mxu0 %v3091_v47  ;;  %v1185_v47 = vld [vmem:[%s4454_s6 + $0xc8] sm:$0xff] }
  0xdf   :  { %1023 = vmatpush1.bf16.msra.mxu0 %v3089_v48  ;;  %v2855_v48 = vpack.c.bf16 %v1167_v45, %v1166_v44  ;;  %v1297_v45 = vld [vmem:[%s4456_s8 + $0xb0] sm:$0xff] }
  0xe0   :  { %1024 = vmatprep.subr.bf16.mxu0 %v3094_v49  ;;  %v2857_v49 = vpack.c.bf16 %v1185_v47, %v1184_v46  ;;  %v1300_v46 = vld [vmem:[%s4456_s8 + $0xc8] sm:$0xff]  ;;  %v1302_v47 = vld [vmem:[%s4456_s8 + $0xd8] sm:$0xff] }
  0xe3   :  { %1025 = vmatpush1.bf16.msra.mxu0 %v3092_v50  ;;  %v1168_v50 = vld [vmem:[%s4454_s6 + $0x40] sm:$0xff] }
  0xe4   :  { %1026 = vmatprep.subr.bf16.mxu0 %v3097_v51  ;;  %v1169_v51 = vld [vmem:[%s4454_s6 + $0x48] sm:$0xff] }
  0xe7   :  { %1027 = vmatpush1.bf16.msra.mxu0 %v3095_v52  ;;  %v1186_v52 = vld [vmem:[%s4454_s6 + $0xd0] sm:$0xff] }
  0xe8   :  { %1028 = vmatprep.subr.bf16.mxu0 %v3100_v53  ;;  %v1187_v53 = vld [vmem:[%s4454_s6 + $0xd8] sm:$0xff] }
  0xeb   :  { %1029 = vmatpush1.bf16.msra.mxu0 %v3098_v54  ;;  %v2859_v54 = vpack.c.bf16 %v1169_v51, %v1168_v50  ;;  %v2897_v50 = vpack.c.bf16 %v1302_v47, %v1300_v46  ;;  %v1299_v51 = vld [vmem:[%s4456_s8 + $0xc0] sm:$0xff] }
  0xec   :  { %1030 = vmatprep.subr.bf16.mxu0 %v3103_v55  ;;  %v2861_v55 = vpack.c.bf16 %v1187_v53, %v1186_v52  ;;  %v1301_v52 = vld [vmem:[%s4456_s8 + $0xd0] sm:$0xff]  ;;  %v1304_v53 = vld [vmem:[%s4456_s8 + $0xe8] sm:$0xff] }
  0xef   :  { %1031 = vmatpush1.bf16.msra.mxu0 %v3101_v56  ;;  %v1170_v56 = vld [vmem:[%s4454_s6 + $0x50] sm:$0xff] }
  0xf0   :  { %1032 = vmatprep.subr.bf16.mxu0 %v3106_v57  ;;  %v1171_v57 = vld [vmem:[%s4454_s6 + $0x58] sm:$0xff] }
  0xf3   :  { %1033 = vmatpush1.bf16.msra.mxu0 %v3104_v58  ;;  %v1188_v58 = vld [vmem:[%s4454_s6 + $0xe0] sm:$0xff] }
  0xf4   :  { %1034 = vmatprep.subr.bf16.mxu0 %v3109_v59  ;;  %v1189_v59 = vld [vmem:[%s4454_s6 + $0xe8] sm:$0xff] }
  0xf7   :  { %1035 = vmatpush1.bf16.msra.mxu0 %v3107_v60  ;;  %v2863_v60 = vpack.c.bf16 %v1171_v57, %v1170_v56  ;;  %v1303_v57 = vld [vmem:[%s4456_s8 + $0xe0] sm:$0xff] }
  0xf8   :  { %1036 = vmatprep.subr.bf16.mxu0 %v3112_v61  ;;  %v2865_v61 = vpack.c.bf16 %v1189_v59, %v1188_v58  ;;  %v1305_v58 = vld [vmem:[%s4456_s8 + $0xf0] sm:$0xff] }
  0xf9   :  { %v2903_v59 = vpack.c.bf16 %v1305_v58, %v1303_v57  ;;  %v1505_v57 = vld [vmem:[%s4458_s10 + $0x378] sm:$0xff] }
  0xfb   :  { %1037 = vmatpush1.bf16.msra.mxu0 %v3110_v62  ;;  %v1172_v62 = vld [vmem:[%s4454_s6 + $0x60] sm:$0xff] }
  0xfc   :  { %1038 = vmatprep.subr.bf16.mxu0 %v3115_v63  ;;  %v1173_v63 = vld [vmem:[%s4454_s6 + $0x68] sm:$0xff] }
  0xfd   :  { %v2867_v2 = vpack.c.bf16 %v1173_v63, %v1172_v62 }
  0xff   :  { %1039 = vmatpush1.bf16.msra.mxu0 %v3113_v0  ;;  %v1190_v0 = vld [vmem:[%s4454_s6 + $0xf0] sm:$0xff] }
 0x102   :  { %1041 = vmatmul.mubr.bf16.vlgmr.msra.gmra.mrb[0].mxu0 %v234_v1  ;;  %v1191_v1 = vld [vmem:[%s4454_s6 + $0xf8] sm:$0xff] }
 0x103   :  { %v2869_v3 = vpack.c.bf16 %v1191_v1, %v1190_v0  ;;  %v1397_v0 = vld [vmem:[%s4458_s10 + $0x18] sm:$0xff] }
 0x104   :  { %v1401_v1 = vld [vmem:[%s4458_s10 + $0x38] sm:$0xff] }
 0x1d5   :  { %v1042_v19 = vpop.f32.mrb[0].mxu0 }
 0x1d6   :  { %v3781_v21 = vadd.f32 %v1042_v19, %v180_v17  ;;  %v1044_v22 = vpop.f32.mrb[1].mxu0  ;;  %v1280_v17 = vld [vmem:[%s4456_s8 + $0x28] sm:$0xff]  ;;  %v2875_v19 = vpack.c.bf16 %v1277_v14, %v1275_v9  ;;  %v1417_v9 = vld [vmem:[%s4458_s10 + $0xb8] sm:$0xff] }
 0x1d7   :  { %v2906_v25 = vadd.f32 %v1044_v22, %v184_v18  ;;  %v1046_v26 = vpop.f32.mrb[2].mxu0  ;;  %v1282_v18 = vld [vmem:[%s4456_s8 + $0x38] sm:$0xff]  ;;  %v1279_v22 = vld [vmem:[%s4456_s8 + $0x20] sm:$0xff]  ;;  %v2630_v14 = vcombine.high %v1413_v8, %v1417_v9 }
 0x1d8   :  { %v1047_v29 = vpop.f32.mrb[3].mxu0  ;;  %v1049_v32 = vmax.f32 %v3781_v21, 0.0  ;;  %v2877_v21 = vpack.c.bf16 %v1282_v18, %v1280_v17  ;;  %v2879_v24 = vpack.c.bf16 %v1281_v23, %v1279_v22  ;;  %v1286_v26 = vld [vmem:[%s4456_s8 + $0x58] sm:$0xff] }
 0x1d9   :  { %v1050_v30 = vmax.f32 %v2906_v25, 0.0  ;;  %v1284_v25 = vld [vmem:[%s4456_s8 + $0x48] sm:$0xff]  ;;  %v1285_v29 = vld [vmem:[%s4456_s8 + $0x50] sm:$0xff]  ;;  %v1421_v17 = vld [vmem:[%s4458_s10 + $0xd8] sm:$0xff] }
 0x1da   :  { %v2881_v27 = vpack.c.bf16 %v1286_v26, %v1284_v25  ;;  %v1425_v18 = vld [vmem:[%s4458_s10 + $0xf8] sm:$0xff] }
 0x1db   :  { %1154 = vmatprep.mubr.f32.mxu1 %v1050_v30  ;;  %v1429_v22 = vld [vmem:[%s4458_s10 + $0x118] sm:$0xff] }
 0x1dc   :  { %1155 = vmatmul.mubr.f32.vlgmr.msra.gmra.mrb[0].mxu1 %v1049_v32  ;;  %v1433_v23 = vld [vmem:[%s4458_s10 + $0x138] sm:$0xff] }
 0x1dd   :  { %2844 = vmatpush3.bf16.msra.mxu1 %v2843_v31  ;;  %1263 = vmatprep.mubr.f32.mxu1 %v1050_v30  ;;  %v2883_v30 = vpack.c.bf16 %v1285_v29, %v1283_v28  ;;  %v1288_v31 = vld [vmem:[%s4456_s8 + $0x68] sm:$0xff]  ;;  %v2646_v25 = vcombine.high %v1429_v22, %v1433_v23  ;;  %v1437_v26 = vld [vmem:[%s4458_s10 + $0x158] sm:$0xff] }
 0x1de   :  { %2846 = vmatprep.subr.bf16.mxu1 %v2845_v33 }
 0x1e1   :  { %2848 = vmatpush3.bf16.msra.mxu1 %v2847_v11  ;;  %v1294_v11 = vld [vmem:[%s4456_s8 + $0x98] sm:$0xff] }
 0x1e2   :  { %2850 = vmatprep.subr.bf16.mxu1 %v2849_v38  ;;  %v2889_v38 = vpack.c.bf16 %v1294_v11, %v1292_v37  ;;  %v2670_v37 = vcombine.high %v1453_v34, %v1457_v35  ;;  %v1461_v11 = vld [vmem:[%s4458_s10 + $0x218] sm:$0xff] }
 0x1e5   :  { %2852 = vmatpush3.bf16.msra.mxu1 %v2851_v42  ;;  %v1298_v42 = vld [vmem:[%s4456_s8 + $0xb8] sm:$0xff] }
 0x1e6   :  { %2854 = vmatprep.subr.bf16.mxu1 %v2853_v43  ;;  %v1295_v43 = vld [vmem:[%s4456_s8 + $0xa0] sm:$0xff]  ;;  %v2893_v44 = vpack.c.bf16 %v1298_v42, %v1296_v41  ;;  %v1473_v41 = vld [vmem:[%s4458_s10 + $0x278] sm:$0xff] }
 0x1e9   :  { %2856 = vmatpush3.bf16.msra.mxu1 %v2855_v48  ;;  %v3167_v48 = vmov 0.0  }
 0x1ea   :  { %2858 = vmatprep.subr.bf16.mxu1 %v2857_v49  ;;  %v2895_v49 = vpack.c.bf16 %v1297_v45, %v1295_v43  ;;  %v1481_v45 = vld [vmem:[%s4458_s10 + $0x2b8] sm:$0xff] }
 0x1ed   :  { %2860 = vmatpush3.bf16.msra.mxu1 %v2859_v54  ;;  %v1306_v54 = vld [vmem:[%s4456_s8 + $0xf8] sm:$0xff] }
 0x1ee   :  { %2862 = vmatprep.subr.bf16.mxu1 %v2861_v55  ;;  %v2899_v55 = vpack.c.bf16 %v1301_v52, %v1299_v51  ;;  %v2901_v56 = vpack.c.bf16 %v1306_v54, %v1304_v53  ;;  %v1493_v52 = vld [vmem:[%s4458_s10 + $0x318] sm:$0xff] }
 0x1ef   :  { %v1497_v53 = vld [vmem:[%s4458_s10 + $0x338] sm:$0xff] }
 0x1f0   :  { %v2709_v54 = vcombine.low %v1493_v52, %v1497_v53 }
 0x1f1   :  { %2864 = vmatpush3.bf16.msra.mxu1 %v2863_v60  ;;  %v3973_v60 = vld [vmem:[%s4458_s10] sm:$0xff] }
 0x1f2   :  { %2866 = vmatprep.subr.bf16.mxu1 %v2865_v61  ;;  %v3978_v61 = vld [vmem:[%s4458_s10 + $0x20] sm:$0xff] }
 0x1f3   :  { %v2607_v62 = vcombine.low %v3973_v60, %v3978_v61  ;;  %v2608_v63 = vcombine.high %v3973_v60, %v3978_v61  ;;  %v1426_v60 = vld [vmem:[%s4458_s10 + $0x100] sm:$0xff] }
 0x1f4   :  { %v1430_v61 = vld [vmem:[%s4458_s10 + $0x120] sm:$0xff] }
 0x1f5   :  { %2868 = vmatpush3.bf16.msra.mxu1 %v2867_v2  ;;  %v2613_v2 = vcombine.low %v1397_v0, %v1401_v1 }
 0x1f6   :  { %2870 = vmatprep.subr.bf16.mxu1 %v2869_v3  ;;  %v2614_v3 = vcombine.high %v1397_v0, %v1401_v1  ;;  %v2605_v0 = vld [vmem:[%s4453_s5] ss:$0 sm:$0xff] }
 0x1f8   :  { %2327 = vmatprep.subr.bf16.mxu0 %v2614_v3 }
 0x1f9   :  { %2872 = vmatpush3.bf16.msra.mxu1 %v2871_v6  ;;  %2328 = vmatpush1.bf16.msra.mxu0 %v2613_v2  ;;  %v2621_v6 = vcombine.low %v1405_v4, %v1409_v5  ;;  %v2606_v5 = vld [vmem:[%s4455_s7] ss:$0 sm:$0xff] }
 0x1fa   :  { %2874 = vmatprep.subr.bf16.mxu1 %v2873_v10  ;;  %2329 = vmatprep.subr.bf16.mxu0 %v2622_v7  ;;  %v2629_v10 = vcombine.low %v1413_v8, %v1417_v9 }
 0x1fc   :  { %1264 = vmatmul.mubr.f32.vlgmr.msra.gmra.mrb[2].mxu1 %v1049_v32  ;;  %v1290_v32 = vld [vmem:[%s4456_s8 + $0x78] sm:$0xff] }
 0x1fd   :  { %2876 = vmatpush1.bf16.msra.mxu1 %v2875_v19  ;;  %v2885_v33 = vpack.c.bf16 %v1290_v32, %v1288_v31  ;;  %1383 = vmatprep.mubr.f32.mxu1 %v3167_v48  ;;  %v2637_v19 = vcombine.low %v1421_v17, %v1425_v18  ;;  %v1449_v31 = vld [vmem:[%s4458_s10 + $0x1b8] sm:$0xff] }
 0x1fe   :  { %2878 = vmatprep.subr.bf16.mxu1 %v2877_v21  ;;  %2330 = vmatpush1.bf16.msra.mxu0 %v2621_v6  ;;  %v2638_v21 = vcombine.high %v1421_v17, %v1425_v18  ;;  %v1485_v48 = vld [vmem:[%s4458_s10 + $0x2d8] sm:$0xff]  ;;  %v1402_v18 = vld [vmem:[%s4458_s10 + $0x40] sm:$0xff] }
 0x1ff   :  { %2331 = vmatprep.subr.bf16.mxu0 %v2630_v14  ;;  %v1272_v14 = vld [vmem:[%s4449_s1] sm:$0x3] }
 0x201   :  { %2880 = vmatpush1.bf16.msra.mxu1 %v2879_v24  ;;  %v2645_v24 = vcombine.low %v1429_v22, %v1433_v23 }
 0x202   :  { %2882 = vmatprep.subr.bf16.mxu1 %v2881_v27  ;;  %2332 = vmatpush1.bf16.msra.mxu0 %v2629_v10  ;;  %v1441_v27 = vld [vmem:[%s4458_s10 + $0x178] sm:$0xff] }
 0x203   :  { %2333 = vmatprep.subr.bf16.mxu0 %v2638_v21  ;;  %v2653_v28 = vcombine.low %v1437_v26, %v1441_v27  ;;  %v2654_v29 = vcombine.high %v1437_v26, %v1441_v27 }
 0x205   :  { %2884 = vmatpush1.bf16.msra.mxu1 %v2883_v30  ;;  %v1445_v30 = vld [vmem:[%s4458_s10 + $0x198] sm:$0xff] }
 0x206   :  { %2886 = vmatprep.subr.bf16.mxu1 %v2885_v33  ;;  %2334 = vmatpush1.bf16.msra.mxu0 %v2637_v19  ;;  %v2661_v32 = vcombine.low %v1445_v30, %v1449_v31  ;;  %v2662_v33 = vcombine.high %v1445_v30, %v1449_v31  ;;  %v1406_v19 = vld [vmem:[%s4458_s10 + $0x60] sm:$0xff] }
 0x207   :  { %2335 = vmatprep.subr.bf16.mxu0 %v2646_v25  ;;  %v2616_v23 = vcombine.high %v1402_v18, %v1406_v19  ;;  %v1414_v25 = vld [vmem:[%s4458_s10 + $0xa0] sm:$0xff]  ;;  %v2615_v26 = vcombine.low %v1402_v18, %v1406_v19 }
 0x209   :  { %2888 = vmatpush1.bf16.msra.mxu1 %v2887_v36  ;;  %v2669_v36 = vcombine.low %v1453_v34, %v1457_v35  ;;  %v1438_v34 = vld [vmem:[%s4458_s10 + $0x160] sm:$0xff]  ;;  %v2639_v35 = vcombine.low %v1426_v60, %v1430_v61 }
 0x20a   :  { %2890 = vmatprep.subr.bf16.mxu1 %v2889_v38  ;;  %2336 = vmatpush1.bf16.msra.mxu0 %v2645_v24  ;;  %v1465_v38 = vld [vmem:[%s4458_s10 + $0x238] sm:$0xff]  ;;  %v1410_v24 = vld [vmem:[%s4458_s10 + $0x80] sm:$0xff] }
 0x20b   :  { %2337 = vmatprep.subr.bf16.mxu0 %v2654_v29  ;;  %v2677_v20 = vcombine.low %v1461_v11, %v1465_v38  ;;  %v2678_v39 = vcombine.high %v1461_v11, %v1465_v38  ;;  %v2624_v27 = vcombine.high %v1410_v24, %v1414_v25  ;;  %v1422_v29 = vld [vmem:[%s4458_s10 + $0xe0] sm:$0xff]  ;;  %v2623_v30 = vcombine.low %v1410_v24, %v1414_v25  ;;  %v1517_v24 = vld [vmem:[%s4458_s10 + $0x3d8] sm:$0xff] }
 0x20c   :  { %v1446_v11 = vld [vmem:[%s4458_s10 + $0x1a0] sm:$0xff]  ;;  %v1521_v25 = vld [vmem:[%s4458_s10 + $0x3f8] sm:$0xff] }
 0x20d   :  { %2892 = vmatpush1.bf16.msra.mxu1 %v2891_v40  ;;  %v1469_v40 = vld [vmem:[%s4458_s10 + $0x258] sm:$0xff] }
 0x20e   :  { %2894 = vmatprep.subr.bf16.mxu1 %v2893_v44  ;;  %2338 = vmatpush1.bf16.msra.mxu0 %v2653_v28  ;;  %v2685_v42 = vcombine.low %v1469_v40, %v1473_v41  ;;  %v2686_v43 = vcombine.high %v1469_v40, %v1473_v41  ;;  %v1477_v44 = vld [vmem:[%s4458_s10 + $0x298] sm:$0xff]  ;;  %v1418_v28 = vld [vmem:[%s4458_s10 + $0xc0] sm:$0xff] }
 0x20f   :  { %2339 = vmatprep.subr.bf16.mxu0 %v2662_v33  ;;  %v2693_v46 = vcombine.low %v1477_v44, %v1481_v45  ;;  %v2694_v47 = vcombine.high %v1477_v44, %v1481_v45  ;;  %v2632_v31 = vcombine.high %v1418_v28, %v1422_v29  ;;  %v1434_v33 = vld [vmem:[%s4458_s10 + $0x140] sm:$0xff] }
 0x210   :  { %v2647_v38 = vcombine.low %v1434_v33, %v1438_v34  ;;  %v1454_v40 = vld [vmem:[%s4458_s10 + $0x1e0] sm:$0xff] }
 0x211   :  { %2896 = vmatpush1.bf16.msra.mxu1 %v2895_v49  ;;  %v1489_v49 = vld [vmem:[%s4458_s10 + $0x2f8] sm:$0xff]  ;;  %v1462_v44 = vld [vmem:[%s4458_s10 + $0x220] sm:$0xff] }
 0x212   :  { %2898 = vmatprep.subr.bf16.mxu1 %v2897_v50  ;;  %2340 = vmatpush1.bf16.msra.mxu0 %v2661_v32  ;;  %v2701_v50 = vcombine.low %v1485_v48, %v1489_v49  ;;  %v2702_v51 = vcombine.high %v1485_v48, %v1489_v49  ;;  %v2640_v32 = vcombine.high %v1426_v60, %v1430_v61  ;;  %v1470_v48 = vld [vmem:[%s4458_s10 + $0x260] sm:$0xff] }
 0x213   :  { %2341 = vmatprep.subr.bf16.mxu0 %v2670_v37  ;;  %v1442_v37 = vld [vmem:[%s4458_s10 + $0x180] sm:$0xff] }
 0x214   :  { %v2655_v41 = vcombine.low %v1442_v37, %v1446_v11  ;;  %v1307_v61 = vld [vmem:[%s4457_s9] sm:$0x3] }
 0x215   :  { %2900 = vmatpush1.bf16.msra.mxu1 %v2899_v55  ;;  %v2710_v55 = vcombine.high %v1493_v52, %v1497_v53  ;;  %v1478_v52 = vld [vmem:[%s4458_s10 + $0x2a0] sm:$0xff] }
 0x216   :  { %2902 = vmatprep.subr.bf16.mxu1 %v2901_v56  ;;  %2342 = vmatpush1.bf16.msra.mxu0 %v2669_v36  ;;  %v1501_v56 = vld [vmem:[%s4458_s10 + $0x358] sm:$0xff]  ;;  %v2648_v36 = vcombine.high %v1434_v33, %v1438_v34 }
 0x217   :  { %2343 = vmatprep.subr.bf16.mxu0 %v2678_v39  ;;  %v2717_v58 = vcombine.low %v1501_v56, %v1505_v57  ;;  %v1450_v39 = vld [vmem:[%s4458_s10 + $0x1c0] sm:$0xff] }
 0x218   :  { %v2663_v45 = vcombine.low %v1450_v39, %v1454_v40 }
 0x219   :  { %2904 = vmatpush1.bf16.msra.mxu1 %v2903_v59  ;;  %v2718_v59 = vcombine.high %v1501_v56, %v1505_v57  ;;  %v1486_v56 = vld [vmem:[%s4458_s10 + $0x2e0] sm:$0xff] }
 0x21a   :  { %2204 = vmatprep.subr.bf16.mxu1 %v2608_v63  ;;  %2344 = vmatpush1.bf16.msra.mxu0 %v2677_v20  ;;  %v2656_v20 = vcombine.high %v1442_v37, %v1446_v11 }
 0x21b   :  { %2345 = vmatprep.subr.bf16.mxu0 %v2686_v43  ;;  %v1458_v43 = vld [vmem:[%s4458_s10 + $0x200] sm:$0xff] }
 0x21c   :  { %v2671_v49 = vcombine.low %v1458_v43, %v1462_v44 }
 0x21e   :  { %2346 = vmatpush1.bf16.msra.mxu0 %v2685_v42  ;;  %v2664_v42 = vcombine.high %v1450_v39, %v1454_v40 }
 0x21f   :  { %2347 = vmatprep.subr.bf16.mxu0 %v2694_v47  ;;  %v1466_v47 = vld [vmem:[%s4458_s10 + $0x240] sm:$0xff] }
 0x220   :  { %v2679_v53 = vcombine.low %v1466_v47, %v1470_v48 }
 0x222   :  { %2348 = vmatpush1.bf16.msra.mxu0 %v2693_v46  ;;  %v2672_v46 = vcombine.high %v1458_v43, %v1462_v44  ;;  %v1415_v43 = vld [vmem:[%s4458_s10 + $0xa8] sm:$0xff] }
 0x223   :  { %2349 = vmatprep.subr.bf16.mxu0 %v2702_v51  ;;  %v1474_v51 = vld [vmem:[%s4458_s10 + $0x280] sm:$0xff] }
 0x224   :  { %v2687_v57 = vcombine.low %v1474_v51, %v1478_v52 }
 0x226   :  { %2350 = vmatpush1.bf16.msra.mxu0 %v2701_v50  ;;  %v2680_v50 = vcombine.high %v1466_v47, %v1470_v48  ;;  %v1423_v47 = vld [vmem:[%s4458_s10 + $0xe8] sm:$0xff] }
 0x227   :  { %2351 = vmatprep.subr.bf16.mxu0 %v2710_v55  ;;  %v1482_v55 = vld [vmem:[%s4458_s10 + $0x2c0] sm:$0xff] }
 0x22a   :  { %2352 = vmatpush1.bf16.msra.mxu0 %v2709_v54  ;;  %v2688_v54 = vcombine.high %v1474_v51, %v1478_v52  ;;  %v1431_v51 = vld [vmem:[%s4458_s10 + $0x128] sm:$0xff] }
 0x22b   :  { %2353 = vmatprep.subr.bf16.mxu0 %v2718_v59  ;;  %v1490_v59 = vld [vmem:[%s4458_s10 + $0x300] sm:$0xff] }
 0x22e   :  { %2354 = vmatpush1.bf16.msra.mxu0 %v2717_v58  ;;  %v2696_v58 = vcombine.high %v1482_v55, %v1486_v56 }
 0x2af   :  { %v2771_v63 = vpop.f32.mrb[0].mxu1 }
 0x2b0   :  { %v2772_v1 = vpop.f32.mrb[1].mxu1 }
 0x2b1   :  { %v2773_v2 = vadd.f32 %v2772_v1, %v2771_v63  ;;  %v1494_v63 = vld [vmem:[%s4458_s10 + $0x320] sm:$0xff] }
 0x2b2   :  { %v2704_v1 = vcombine.high %v1490_v59, %v1494_v63 }
 0x2b3   :  { %v1157_v3 = vadd.f32 %v2773_v2, %v2605_v0  ;;  %v2695_v0 = vcombine.low %v1482_v55, %v1486_v56  ;;  %v1498_v2 = vld [vmem:[%s4458_s10 + $0x340] sm:$0xff]  ;;  %v1439_v55 = vld [vmem:[%s4458_s10 + $0x168] sm:$0xff] }
 0x2b5   :  { %2368 = vst [vmem:[#allocation2] sm:$0x3] %v1157_v3 }
 0x2cf   :  { %v2806_v4 = vpop.f32.mrb[2].mxu1 }
 0x2d0   :  { %v2807_v6 = vpop.f32.mrb[3].mxu1 }
 0x2d1   :  { %v2808_v7 = vadd.f32 %v2807_v6, %v2806_v4  ;;  %v2703_v4 = vcombine.low %v1490_v59, %v1494_v63  ;;  %v1447_v59 = vld [vmem:[%s4458_s10 + $0x1a8] sm:$0xff] }
 0x2d3   :  { %v1266_v8 = vadd.f32 %v2808_v7, %v2606_v5  ;;  %v1506_v7 = vld [vmem:[%s4458_s10 + $0x380] sm:$0xff] }
 0x2d5   :  { %v1269_v9 = vmul.f32 0.5, %v1266_v8  ;;  %2369 = vst [vmem:[#allocation4] sm:$0x3] %v1266_v8  ;;  %v1510_v8 = vld [vmem:[%s4458_s10 + $0x3a0] sm:$0xff] }
 0x2d7   :  { %v1270_v10 = vmul.f32 1.442695, %v1269_v9  ;;  %v2720_v9 = vcombine.high %v1506_v7, %v1510_v8 }
 0x2d9   :  { %3116 = vpow2.f32 %v1270_v10  ;;  %v1509_v10 = vld [vmem:[%s4458_s10 + $0x398] sm:$0xff] }
 0x2e3   :  { %v3117_v17 = vpop.eup %3116 }
 0x2e4   :  { %v1273_v21 = vmul.f32 %v3117_v17, %v1272_v14  ;;  %v1513_v14 = vld [vmem:[%s4458_s10 + $0x3b8] sm:$0xff]  ;;  %v2719_v17 = vcombine.low %v1506_v7, %v1510_v8 }
 0x2e5   :  { %v2726_v18 = vcombine.high %v1509_v10, %v1513_v14  ;;  %v2725_v19 = vcombine.low %v1509_v10, %v1513_v14  ;;  %v1471_v10 = vld [vmem:[%s4458_s10 + $0x268] sm:$0xff] }
 0x2e6   :  { %v1274_v22 = vadd.f32 %v1273_v21, %v1157_v3  ;;  %v1502_v3 = vld [vmem:[%s4458_s10 + $0x360] sm:$0xff] }
 0x2e7   :  { %v2712_v5 = vcombine.high %v1498_v2, %v1502_v3  ;;  %v2711_v6 = vcombine.low %v1498_v2, %v1502_v3  ;;  %2355 = vmatprep.subr.bf16.mxu0 %v2726_v18  ;;  %v1514_v21 = vld [vmem:[%s4458_s10 + $0x3c0] sm:$0xff]  ;;  %v1455_v2 = vld [vmem:[%s4458_s10 + $0x1e8] sm:$0xff] }
 0x2e8   :  { %1384 = vmatmul.mubr.f32.vlgmr.msra.gmra.mrb[4].mxu1 %v1274_v22  ;;  %v1518_v22 = vld [vmem:[%s4458_s10 + $0x3e0] sm:$0xff]  ;;  %2356 = vmatpush1.bf16.msra.mxu0 %v2725_v19  ;;  %v1475_v18 = vld [vmem:[%s4458_s10 + $0x288] sm:$0xff] }
 0x2e9   :  { %2205 = vmatpush1.bf16.msra.mxu1 %v2607_v62  ;;  %v2631_v62 = vcombine.low %v1418_v28, %v1422_v29  ;;  %v2733_v28 = vcombine.low %v1517_v24, %v1521_v25  ;;  %v1395_v29 = vld [vmem:[%s4458_s10 + $0x8] sm:$0xff] }
 0x2ea   :  { %2206 = vmatprep.subr.bf16.mxu1 %v2616_v23  ;;  %v2728_v23 = vcombine.high %v1514_v21, %v1518_v22  ;;  %v1479_v19 = vld [vmem:[%s4458_s10 + $0x2a8] sm:$0xff] }
 0x2ed   :  { %2207 = vmatpush1.bf16.msra.mxu1 %v2615_v26  ;;  %v2727_v26 = vcombine.low %v1514_v21, %v1518_v22  ;;  %v2690_v22 = vcombine.high %v1475_v18, %v1479_v19 }
 0x2ee   :  { %2208 = vmatprep.subr.bf16.mxu1 %v2624_v27  ;;  %v2734_v27 = vcombine.high %v1517_v24, %v1521_v25  ;;  %v1487_v24 = vld [vmem:[%s4458_s10 + $0x2e8] sm:$0xff]  ;;  %v2689_v25 = vcombine.low %v1475_v18, %v1479_v19  ;;  %v1468_v19 = vld [vmem:[%s4458_s10 + $0x250] sm:$0xff] }
 0x2f0   :  { %2357 = vmatprep.subr.bf16.mxu0 %v2734_v27  ;;  %v1491_v27 = vld [vmem:[%s4458_s10 + $0x308] sm:$0xff] }
 0x2f1   :  { %2209 = vmatpush1.bf16.msra.mxu1 %v2623_v30  ;;  %v1399_v30 = vld [vmem:[%s4458_s10 + $0x28] sm:$0xff]  ;;  %2358 = vmatpush1.bf16.msra.mxu0 %v2733_v28 }
 0x2f2   :  { %2210 = vmatprep.subr.bf16.mxu1 %v2632_v31  ;;  %v2610_v31 = vcombine.high %v1395_v29, %v1399_v30  ;;  %v2609_v60 = vcombine.low %v1395_v29, %v1399_v30  ;;  %v1495_v28 = vld [vmem:[%s4458_s10 + $0x328] sm:$0xff] }
 0x2f3   :  { %v2706_v30 = vcombine.high %v1491_v27, %v1495_v28 }
 0x2f5   :  { %2211 = vmatpush1.bf16.msra.mxu1 %v2631_v62  ;;  %v1312_v62 = vrot.slane %v1307_v61, %v3771_v13 }
 0x2f6   :  { %2212 = vmatprep.subr.bf16.mxu1 %v2640_v32  ;;  %v1316_v32 = vrot.slane %v1307_v61, %v3777_v15  ;;  %v2705_v61 = vcombine.low %v1491_v27, %v1495_v28  ;;  %v1484_v28 = vld [vmem:[%s4458_s10 + $0x2d0] sm:$0xff] }
 0x2f9   :  { %2213 = vmatpush1.bf16.msra.mxu1 %v2639_v35 }
 0x2fa   :  { %2214 = vmatprep.subr.bf16.mxu1 %v2648_v36 }
 0x2fd   :  { %2215 = vmatpush1.bf16.msra.mxu1 %v2647_v38  ;;  %v1403_v38 = vld [vmem:[%s4458_s10 + $0x48] sm:$0xff] }
 0x2fe   :  { %2216 = vmatprep.subr.bf16.mxu1 %v2656_v20  ;;  %v1407_v20 = vld [vmem:[%s4458_s10 + $0x68] sm:$0xff] }
 0x2ff   :  { %v2617_v44 = vcombine.low %v1403_v38, %v1407_v20 }
 0x301   :  { %2217 = vmatpush1.bf16.msra.mxu1 %v2655_v41  ;;  %v2618_v41 = vcombine.high %v1403_v38, %v1407_v20  ;;  %v1396_v20 = vld [vmem:[%s4458_s10 + $0x10] sm:$0xff] }
 0x302   :  { %2218 = vmatprep.subr.bf16.mxu1 %v2664_v42  ;;  %v1411_v42 = vld [vmem:[%s4458_s10 + $0x88] sm:$0xff] }
 0x303   :  { %v2625_v48 = vcombine.low %v1411_v42, %v1415_v43 }
 0x305   :  { %2219 = vmatpush1.bf16.msra.mxu1 %v2663_v45  ;;  %v2626_v45 = vcombine.high %v1411_v42, %v1415_v43 }
 0x306   :  { %2220 = vmatprep.subr.bf16.mxu1 %v2672_v46  ;;  %v1419_v46 = vld [vmem:[%s4458_s10 + $0xc8] sm:$0xff] }
 0x307   :  { %v2633_v52 = vcombine.low %v1419_v46, %v1423_v47 }
 0x309   :  { %2221 = vmatpush1.bf16.msra.mxu1 %v2671_v49  ;;  %v2634_v49 = vcombine.high %v1419_v46, %v1423_v47 }
 0x30a   :  { %2222 = vmatprep.subr.bf16.mxu1 %v2680_v50  ;;  %v1427_v50 = vld [vmem:[%s4458_s10 + $0x108] sm:$0xff] }
 0x30b   :  { %v2641_v56 = vcombine.low %v1427_v50, %v1431_v51 }
 0x30d   :  { %2223 = vmatpush1.bf16.msra.mxu1 %v2679_v53  ;;  %v2642_v53 = vcombine.high %v1427_v50, %v1431_v51 }
 0x30e   :  { %2224 = vmatprep.subr.bf16.mxu1 %v2688_v54  ;;  %v1435_v54 = vld [vmem:[%s4458_s10 + $0x148] sm:$0xff] }
 0x30f   :  { %v2649_v63 = vcombine.low %v1435_v54, %v1439_v55 }
 0x311   :  { %2225 = vmatpush1.bf16.msra.mxu1 %v2687_v57  ;;  %v2650_v57 = vcombine.high %v1435_v54, %v1439_v55 }
 0x312   :  { %2226 = vmatprep.subr.bf16.mxu1 %v2696_v58  ;;  %v1443_v58 = vld [vmem:[%s4458_s10 + $0x188] sm:$0xff] }
 0x313   :  { %v2657_v3 = vcombine.low %v1443_v58, %v1447_v59 }
 0x315   :  { %2227 = vmatpush1.bf16.msra.mxu1 %v2695_v0  ;;  %v2658_v0 = vcombine.high %v1443_v58, %v1447_v59  ;;  %v1436_v59 = vld [vmem:[%s4458_s10 + $0x150] sm:$0xff] }
 0x316   :  { %2228 = vmatprep.subr.bf16.mxu1 %v2704_v1  ;;  %v1451_v1 = vld [vmem:[%s4458_s10 + $0x1c8] sm:$0xff] }
 0x317   :  { %v2665_v7 = vcombine.low %v1451_v1, %v1455_v2 }
 0x319   :  { %2229 = vmatpush1.bf16.msra.mxu1 %v2703_v4  ;;  %v2666_v4 = vcombine.high %v1451_v1, %v1455_v2  ;;  %v1444_v2 = vld [vmem:[%s4458_s10 + $0x190] sm:$0xff] }
 0x31a   :  { %2230 = vmatprep.subr.bf16.mxu1 %v2712_v5  ;;  %v1459_v5 = vld [vmem:[%s4458_s10 + $0x208] sm:$0xff] }
 0x31d   :  { %2231 = vmatpush1.bf16.msra.mxu1 %v2711_v6  ;;  %v1463_v6 = vld [vmem:[%s4458_s10 + $0x228] sm:$0xff] }
 0x31e   :  { %2232 = vmatprep.subr.bf16.mxu1 %v2720_v9  ;;  %v2674_v8 = vcombine.high %v1459_v5, %v1463_v6  ;;  %v1467_v9 = vld [vmem:[%s4458_s10 + $0x248] sm:$0xff]  ;;  %v2673_v14 = vcombine.low %v1459_v5, %v1463_v6  ;;  %v1452_v6 = vld [vmem:[%s4458_s10 + $0x1d0] sm:$0xff] }
 0x31f   :  { %v2681_v21 = vcombine.low %v1467_v9, %v1471_v10 }
 0x321   :  { %2233 = vmatpush1.bf16.msra.mxu1 %v2719_v17  ;;  %v2682_v17 = vcombine.high %v1467_v9, %v1471_v10  ;;  %v1460_v10 = vld [vmem:[%s4458_s10 + $0x210] sm:$0xff] }
 0x322   :  { %2234 = vmatprep.subr.bf16.mxu1 %v2728_v23  ;;  %v1483_v23 = vld [vmem:[%s4458_s10 + $0x2c8] sm:$0xff] }
 0x323   :  { %v2697_v29 = vcombine.low %v1483_v23, %v1487_v24 }
 0x325   :  { %2235 = vmatpush1.bf16.msra.mxu1 %v2727_v26  ;;  %v2698_v26 = vcombine.high %v1483_v23, %v1487_v24  ;;  %v1476_v24 = vld [vmem:[%s4458_s10 + $0x290] sm:$0xff] }
 0x326   :  { %2245 = vmatprep.subr.bf16.mxu1 %v2610_v31  ;;  %v1499_v31 = vld [vmem:[%s4458_s10 + $0x348] sm:$0xff] }
 0x3bb   :  { %v1385_v33 = vpop.f32.mrb[4].mxu1 }
 0x3bc   :  { %v1386_v34 = vadd.f32 %v1385_v33, %v1312_v62  ;;  %v1387_v35 = vpop.f32.mrb[5].mxu1  ;;  %v1511_v33 = vld [vmem:[%s4458_s10 + $0x3a8] sm:$0xff] }
 0x3bd   :  { %v1388_v36 = vadd.f32 %v1387_v35, %v1316_v32  ;;  %v1507_v32 = vld [vmem:[%s4458_s10 + $0x388] sm:$0xff] }
 0x3be   :  { %v1390_v37 = vmax.f32 %v1386_v34, 0.0  ;;  %v2722_v35 = vcombine.high %v1507_v32, %v1511_v33 }
 0x3bf   :  { %v1391_v11 = vmax.f32 %v1388_v36, 0.0  ;;  %v1515_v36 = vld [vmem:[%s4458_s10 + $0x3c8] sm:$0xff] }
 0x3c0   :  { %v4201_v40 = vpack.c.bf16 %v1390_v37, %v1390_v37  ;;  %v1519_v37 = vld [vmem:[%s4458_s10 + $0x3e8] sm:$0xff] }
 0x3c1   :  { %v4199_v39 = vpack.c.bf16 %v1391_v11, %v1391_v11  ;;  %v2721_v11 = vcombine.low %v1507_v32, %v1511_v33  ;;  %v2730_v38 = vcombine.high %v1515_v36, %v1519_v37  ;;  %v2729_v42 = vcombine.low %v1515_v36, %v1519_v37  ;;  %v1500_v33 = vld [vmem:[%s4458_s10 + $0x350] sm:$0xff] }
 0x3c2   :  { %v1508_v37 = vld [vmem:[%s4458_s10 + $0x390] sm:$0xff] }
 0x3c3   :  { %2236 = vmatprep.mubr.bf16.mxu1 %v4199_v39  ;;  %2359 = vmatprep.mubr.bf16.mxu0 %v4199_v39 }
 0x3c4   :  { %2237 = vmatmul.mubr.bf16.vlgmr.msra.gmra.mrb[8].mxu1 %v4201_v40  ;;  %2360 = vmatmul.mubr.bf16.vlgmr.msra.gmra.mrb[4].mxu0 %v4201_v40 }
 0x3c5   :  { %2246 = vmatpush1.bf16.msra.mxu1 %v2609_v60  ;;  %2277 = vmatprep.mubr.bf16.mxu1 %v4199_v39  ;;  %v1503_v60 = vld [vmem:[%s4458_s10 + $0x368] sm:$0xff] }
 0x3c6   :  { %2247 = vmatprep.subr.bf16.mxu1 %v2618_v41  ;;  %v2714_v62 = vcombine.high %v1499_v31, %v1503_v60  ;;  %v2713_v34 = vcombine.low %v1499_v31, %v1503_v60  ;;  %v1400_v41 = vld [vmem:[%s4458_s10 + $0x30] sm:$0xff] }
 0x3c7   :  { %v2612_v43 = vcombine.high %v1396_v20, %v1400_v41  ;;  %v2611_v46 = vcombine.low %v1396_v20, %v1400_v41  ;;  %v1492_v60 = vld [vmem:[%s4458_s10 + $0x310] sm:$0xff] }
 0x3c8   :  { %v1516_v41 = vld [vmem:[%s4458_s10 + $0x3d0] sm:$0xff] }
 0x3c9   :  { %2248 = vmatpush1.bf16.msra.mxu1 %v2617_v44  ;;  %v1404_v44 = vld [vmem:[%s4458_s10 + $0x50] sm:$0xff] }
 0x3ca   :  { %2249 = vmatprep.subr.bf16.mxu1 %v2626_v45  ;;  %v1408_v45 = vld [vmem:[%s4458_s10 + $0x70] sm:$0xff] }
 0x3cb   :  { %v2620_v47 = vcombine.high %v1404_v44, %v1408_v45  ;;  %v2619_v50 = vcombine.low %v1404_v44, %v1408_v45 }
 0x3cd   :  { %2250 = vmatpush1.bf16.msra.mxu1 %v2625_v48  ;;  %v1412_v48 = vld [vmem:[%s4458_s10 + $0x90] sm:$0xff] }
 0x3ce   :  { %2251 = vmatprep.subr.bf16.mxu1 %v2634_v49  ;;  %v1416_v49 = vld [vmem:[%s4458_s10 + $0xb0] sm:$0xff] }
 0x3cf   :  { %v2628_v51 = vcombine.high %v1412_v48, %v1416_v49  ;;  %v2627_v54 = vcombine.low %v1412_v48, %v1416_v49  ;;  %v1554_v48 = vsub.s32 7, %v3272_v12 }
 0x3d1   :  { %2252 = vmatpush1.bf16.msra.mxu1 %v2633_v52  ;;  %v1420_v52 = vld [vmem:[%s4458_s10 + $0xd0] sm:$0xff] }
 0x3d2   :  { %2253 = vmatprep.subr.bf16.mxu1 %v2642_v53  ;;  %v1424_v53 = vld [vmem:[%s4458_s10 + $0xf0] sm:$0xff] }
 0x3d3   :  { %v2636_v55 = vcombine.high %v1420_v52, %v1424_v53 }
 0x3d5   :  { %2254 = vmatpush1.bf16.msra.mxu1 %v2641_v56  ;;  %v1428_v56 = vld [vmem:[%s4458_s10 + $0x110] sm:$0xff] }
 0x3d6   :  { %2255 = vmatprep.subr.bf16.mxu1 %v2650_v57  ;;  %v2635_v57 = vcombine.low %v1420_v52, %v1424_v53 }
 0x3d9   :  { %2256 = vmatpush1.bf16.msra.mxu1 %v2649_v63  ;;  %v1440_v63 = vld [vmem:[%s4458_s10 + $0x170] sm:$0xff] }
 0x3da   :  { %2257 = vmatprep.subr.bf16.mxu1 %v2658_v0  ;;  %v2652_v1 = vcombine.high %v1436_v59, %v1440_v63 }
 0x3dd   :  { %2258 = vmatpush1.bf16.msra.mxu1 %v2657_v3  ;;  %v1448_v3 = vld [vmem:[%s4458_s10 + $0x1b0] sm:$0xff] }
 0x3de   :  { %2259 = vmatprep.subr.bf16.mxu1 %v2666_v4  ;;  %v2651_v4 = vcombine.low %v1436_v59, %v1440_v63  ;;  %v2660_v5 = vcombine.high %v1444_v2, %v1448_v3 }
 0x3e1   :  { %2260 = vmatpush1.bf16.msra.mxu1 %v2665_v7  ;;  %v1456_v7 = vld [vmem:[%s4458_s10 + $0x1f0] sm:$0xff] }
 0x3e2   :  { %2261 = vmatprep.subr.bf16.mxu1 %v2674_v8  ;;  %v2659_v8 = vcombine.low %v1444_v2, %v1448_v3  ;;  %v2668_v9 = vcombine.high %v1452_v6, %v1456_v7 }
 0x3e5   :  { %2262 = vmatpush1.bf16.msra.mxu1 %v2673_v14  ;;  %v1464_v14 = vld [vmem:[%s4458_s10 + $0x230] sm:$0xff] }
 0x3e6   :  { %2263 = vmatprep.subr.bf16.mxu1 %v2682_v17  ;;  %v2667_v17 = vcombine.low %v1452_v6, %v1456_v7  ;;  %v2676_v18 = vcombine.high %v1460_v10, %v1464_v14 }
 0x3e9   :  { %2264 = vmatpush1.bf16.msra.mxu1 %v2681_v21  ;;  %v1472_v21 = vld [vmem:[%s4458_s10 + $0x270] sm:$0xff] }
 0x3ea   :  { %2265 = vmatprep.subr.bf16.mxu1 %v2690_v22  ;;  %v2675_v22 = vcombine.low %v1460_v10, %v1464_v14  ;;  %v2684_v23 = vcombine.high %v1468_v19, %v1472_v21 }
 0x3ed   :  { %2266 = vmatpush1.bf16.msra.mxu1 %v2689_v25  ;;  %v1480_v25 = vld [vmem:[%s4458_s10 + $0x2b0] sm:$0xff] }
 0x3ee   :  { %2267 = vmatprep.subr.bf16.mxu1 %v2698_v26  ;;  %v2683_v26 = vcombine.low %v1468_v19, %v1472_v21  ;;  %v2692_v27 = vcombine.high %v1476_v24, %v1480_v25 }
 0x3f1   :  { %2268 = vmatpush1.bf16.msra.mxu1 %v2697_v29  ;;  %v1488_v29 = vld [vmem:[%s4458_s10 + $0x2f0] sm:$0xff] }
 0x3f2   :  { %2269 = vmatprep.subr.bf16.mxu1 %v2706_v30  ;;  %v2691_v30 = vcombine.low %v1476_v24, %v1480_v25  ;;  %v2700_v31 = vcombine.high %v1484_v28, %v1488_v29 }
 0x3f5   :  { %2270 = vmatpush1.bf16.msra.mxu1 %v2705_v61  ;;  %v1496_v61 = vld [vmem:[%s4458_s10 + $0x330] sm:$0xff] }
 0x3f6   :  { %2271 = vmatprep.subr.bf16.mxu1 %v2714_v62  ;;  %v2699_v62 = vcombine.low %v1484_v28, %v1488_v29  ;;  %v2708_v32 = vcombine.high %v1492_v60, %v1496_v61 }
 0x3f9   :  { %2272 = vmatpush1.bf16.msra.mxu1 %v2713_v34  ;;  %v1504_v34 = vld [vmem:[%s4458_s10 + $0x370] sm:$0xff] }
 0x3fa   :  { %2273 = vmatprep.subr.bf16.mxu1 %v2722_v35  ;;  %v2707_v35 = vcombine.low %v1492_v60, %v1496_v61  ;;  %v2716_v36 = vcombine.high %v1500_v33, %v1504_v34 }
 0x3fd   :  { %2274 = vmatpush1.bf16.msra.mxu1 %v2721_v11  ;;  %v1512_v11 = vld [vmem:[%s4458_s10 + $0x3b0] sm:$0xff] }
 0x3fe   :  { %2275 = vmatprep.subr.bf16.mxu1 %v2730_v38  ;;  %v2715_v38 = vcombine.low %v1500_v33, %v1504_v34  ;;  %v2724_v20 = vcombine.high %v1508_v37, %v1512_v11 }
 0x401   :  { %2276 = vmatpush1.bf16.msra.mxu1 %v2729_v42  ;;  %v1520_v42 = vld [vmem:[%s4458_s10 + $0x3f0] sm:$0xff] }
 0x402   :  { %2286 = vmatprep.subr.bf16.mxu1 %v2612_v43  ;;  %v2723_v43 = vcombine.low %v1508_v37, %v1512_v11  ;;  %v2732_v44 = vcombine.high %v1516_v41, %v1520_v42  ;;  %v2731_v45 = vcombine.low %v1516_v41, %v1520_v42 }
 0x404   :  { %2278 = vmatmul.mubr.bf16.vlgmr.msra.gmra.mrb[12].mxu1 %v4201_v40 }
 0x405   :  { %2287 = vmatpush1.bf16.msra.mxu1 %v2611_v46  ;;  %2318 = vmatprep.mubr.bf16.mxu1 %v4199_v39  ;;  %v1432_v39 = vld [vmem:[%s4458_s10 + $0x130] sm:$0xff]  ;;  %v1550_v46 = vsub.s32 6, %v3272_v12  ;;  %s3168_s10 = smov [#allocation2]  }
 0x406   :  { %2288 = vmatprep.subr.bf16.mxu1 %v2620_v47  ;;  %v2644_v58 = vcombine.high %v1428_v56, %v1432_v39  ;;  %v2643_v0 = vcombine.low %v1428_v56, %v1432_v39  ;;  %v4395_v47 = vld [vmem:[%s4459_s11] sm:$0xff]  ;;  %s2451_s11 = sshll.u32 %s3168_s10, 4  ;;  %s2452_s11 = int_to_ptr.vmem [resolvable:$true] %s2451_s11 }
 0x407   :  { %v1527_v49 = vrot.slane %v4395_v47, %v3771_v13  ;;  %v1555_v52 = vrot.slane %v4395_v47, %v1554_v48  ;;  %s3118_s16 = scalar_lea.vmem %s2452_s11, 32  ;;  %p3123_p1 = scmp.lt.s32.totalorder %s2452_s11, %s2452_s11 }
 0x408   :  { %p3119_p0 = scmp.ne.s32.totalorder %s2452_s11, %s3118_s16  ;;  %p3124_p2 = scmp.lt.s32.totalorder %s3118_s16, %s3118_s16 }
 0x409   :  { %2289 = vmatpush1.bf16.msra.mxu1 %v2619_v50  ;;  %v1551_v50 = vrot.slane %v4395_v47, %v1550_v46 }
 0x40a   :  { %2290 = vmatprep.subr.bf16.mxu1 %v2628_v51  ;;  %v1531_v51 = vrot.slane %v4395_v47, %v3777_v15  ;;  %p3125_p3 = por %p3124_p2, %p3123_p1 }
 0x40c   :  { %p3126_p4 = pnand %p3125_p3, %p3119_p0 }
 0x40d   :  { %2291 = vmatpush1.bf16.msra.mxu1 %v2627_v54 }
 0x40e   :  { %2292 = vmatprep.subr.bf16.mxu1 %v2636_v55 }
 0x411   :  { %2293 = vmatpush1.bf16.msra.mxu1 %v2635_v57 }
 0x412   :  { %2294 = vmatprep.subr.bf16.mxu1 %v2644_v58 }
 0x415   :  { %2295 = vmatpush1.bf16.msra.mxu1 %v2643_v0 }
 0x416   :  { %2296 = vmatprep.subr.bf16.mxu1 %v2652_v1 }
 0x419   :  { %2297 = vmatpush1.bf16.msra.mxu1 %v2651_v4 }
 0x41a   :  { %2298 = vmatprep.subr.bf16.mxu1 %v2660_v5 }
 0x41d   :  { %2299 = vmatpush1.bf16.msra.mxu1 %v2659_v8 }
 0x41e   :  { %2300 = vmatprep.subr.bf16.mxu1 %v2668_v9 }
 0x421   :  { %2301 = vmatpush1.bf16.msra.mxu1 %v2667_v17 }
 0x422   :  { %2302 = vmatprep.subr.bf16.mxu1 %v2676_v18 }
 0x425   :  { %2303 = vmatpush1.bf16.msra.mxu1 %v2675_v22 }
 0x426   :  { %2304 = vmatprep.subr.bf16.mxu1 %v2684_v23 }
 0x429   :  { %2305 = vmatpush1.bf16.msra.mxu1 %v2683_v26 }
 0x42a   :  { %2306 = vmatprep.subr.bf16.mxu1 %v2692_v27 }
 0x42d   :  { %2307 = vmatpush1.bf16.msra.mxu1 %v2691_v30 }
 0x42e   :  { %2308 = vmatprep.subr.bf16.mxu1 %v2700_v31 }
 0x431   :  { %2309 = vmatpush1.bf16.msra.mxu1 %v2699_v62 }
 0x432   :  { %2310 = vmatprep.subr.bf16.mxu1 %v2708_v32 }
 0x435   :  { %2311 = vmatpush1.bf16.msra.mxu1 %v2707_v35 }
 0x436   :  { %2312 = vmatprep.subr.bf16.mxu1 %v2716_v36 }
 0x439   :  { %2313 = vmatpush1.bf16.msra.mxu1 %v2715_v38 }
 0x43a   :  { %2314 = vmatprep.subr.bf16.mxu1 %v2724_v20 }
 0x43d   :  { %2315 = vmatpush1.bf16.msra.mxu1 %v2723_v43 }
 0x43e   :  { %2316 = vmatprep.subr.bf16.mxu1 %v2732_v44 }
 0x441   :  { %2317 = vmatpush1.bf16.msra.mxu1 %v2731_v45 }
 0x444   :  { %2319 = vmatmul.mubr.bf16.vlgmr.msra.gmra.mrb[16].mxu1 %v4201_v40 }
 0x497   :  { %v2238_v40 = vpop.f32.mrb[8].mxu1  ;;  %v2361_v53 = vpop.f32.mrb[4].mxu0 }
 0x498   :  { %v2239_v54 = vadd.f32 %v2238_v40, %v1527_v49  ;;  %v2362_v55 = vadd.f32 %v2361_v53, %v1551_v50  ;;  %v2240_v56 = vpop.f32.mrb[9].mxu1  ;;  %v2363_v39 = vpop.f32.mrb[5].mxu0 }
 0x499   :  { %v2241_v57 = vadd.f32 %v2240_v56, %v1531_v51  ;;  %v2364_v58 = vadd.f32 %v2363_v39, %v1555_v52  ;;  %v2242_v59 = vpop.f32.mrb[10].mxu1  ;;  %v2365_v63 = vpop.f32.mrb[6].mxu0 }
 0x49a   :  { %v2370_v0 = vmax.f32 %v2239_v54, 0.0  ;;  %v2376_v1 = vmax.f32 %v2362_v55, 0.0  ;;  %v2243_v13 = vpop.f32.mrb[11].mxu1  ;;  %v2366_v2 = vpop.f32.mrb[7].mxu0 }
 0x49b   :  { %v2371_v3 = vmax.f32 %v2241_v57, 0.0  ;;  %v2377_v4 = vmax.f32 %v2364_v58, 0.0 }
 0x49d   :  { %v2735_v5 = vpack.c.bf16 %v2371_v3, %v2370_v0  ;;  %v4404_v15 = vpack.c.bf16 %v2377_v4, %v2376_v1 }
 0x49e   :  { %3129 = shalt.err (!%p3126_p4)
}
 0x49f   :  { %s3130_s5 = scalar_lea.hbm %s4460_s12, 32 }
 0x4a0   :  { %p3131_p5 = scmp.ne.s32.totalorder %s4460_s12, %s3130_s5  ;;  %p3134_p6 = scmp.lt.u32.totalorder %s3130_s5, %s4460_s12 }
 0x4a2   :  { %p3136_p7 = pnand %p3134_p6, %p3131_p5 }
 0x4a4   :  { %3139 = shalt.err (!%p3136_p7)
}
 0x4a5   :  { %2454 = dma.vmem_to_hbm [thread:$0]  %s2452_s11, 32, %s4460_s12, [#allocation3]  }
 0x4a6   :  { %s3140_s8 = scalar_lea.vmem %s2462_s15, 32  ;;  %p3145_p9 = scmp.lt.s32.totalorder %s2462_s15, %s2462_s15 }
 0x4a7   :  { %p3141_p8 = scmp.ne.s32.totalorder %s2462_s15, %s3140_s8  ;;  %p3146_p10 = scmp.lt.s32.totalorder %s3140_s8, %s3140_s8 }
 0x4a9   :  { %p3147_p11 = por %p3146_p10, %p3145_p9 }
 0x4ab   :  { %p3148_p12 = pnand %p3147_p11, %p3141_p8 }
 0x4ad   :  { %3151 = shalt.err (!%p3148_p12)
}
 0x4ae   :  { %s3152_s22 = scalar_lea.hbm %s4461_s13, 32 }
 0x4af   :  { %p3153_p13 = scmp.ne.s32.totalorder %s4461_s13, %s3152_s22  ;;  %p3156_p0 = scmp.lt.u32.totalorder %s3152_s22, %s4461_s13 }
 0x4b1   :  { %p3158_p1 = pnand %p3156_p0, %p3153_p13 }
 0x4b3   :  { %3161 = shalt.err (!%p3158_p1)
}
 0x4b4   :  { %2464 = dma.vmem_to_hbm [thread:$0]  %s2462_s15, 32, %s4461_s13, [#allocation5]   ;;  %v1534_v6 = vsub.s32 2, %v3272_v12  ;;  %v1538_v7 = vsub.s32 3, %v3272_v12  ;;  %v2404_v25 = vrot.slane %v2735_v5, %v3281_v16  ;;  %v1542_v28 = vsub.s32 4, %v3272_v12 }
 0x4b5   :  { %v1546_v29 = vsub.s32 5, %v3272_v12  ;;  %v2425_v11 = vrot.slane %v4404_v15, %v3281_v16 }
 0x4b6   :  { %v1535_v8 = vrot.slane %v4395_v47, %v1534_v6  ;;  %v1539_v9 = vrot.slane %v4395_v47, %v1538_v7  ;;  %v1543_v30 = vrot.slane %v4395_v47, %v1542_v28 }
 0x4b7   :  { %v1547_v31 = vrot.slane %v4395_v47, %v1546_v29 }
 0x4d7   :  { %v2279_v10 = vpop.f32.mrb[12].mxu1 }
 0x4d8   :  { %v2280_v14 = vadd.f32 %v2279_v10, %v1535_v8  ;;  %v2281_v17 = vpop.f32.mrb[13].mxu1 }
 0x4d9   :  { %v2282_v18 = vadd.f32 %v2281_v17, %v1539_v9  ;;  %v2283_v19 = vpop.f32.mrb[14].mxu1 }
 0x4da   :  { %v2372_v21 = vmax.f32 %v2280_v14, 0.0  ;;  %v2284_v22 = vpop.f32.mrb[15].mxu1 }
 0x4db   :  { %v2373_v23 = vmax.f32 %v2282_v18, 0.0 }
 0x4dd   :  { %v2736_v24 = vpack.c.bf16 %v2373_v23, %v2372_v21 }
 0x4df   :  { %v2411_v26 = vrot.slane %v2736_v24, %v3281_v16 }
 0x4e1   :  { %v2426_v27 = vcombine.low %v2404_v25, %v2411_v26 }
 0x4e3   :  { %v2434_v12 = vrot.slane %v2426_v27, %v3281_v16 }
 0x517   :  { %v2320_v60 = vpop.f32.mrb[16].mxu1 }
 0x518   :  { %v2321_v61 = vadd.f32 %v2320_v60, %v1543_v30  ;;  %v2322_v62 = vpop.f32.mrb[17].mxu1 }
 0x519   :  { %v2323_v32 = vadd.f32 %v2322_v62, %v1547_v31  ;;  %v2324_v33 = vpop.f32.mrb[18].mxu1 }
 0x51a   :  { %v2374_v34 = vmax.f32 %v2321_v61, 0.0  ;;  %v2325_v35 = vpop.f32.mrb[19].mxu1 }
 0x51b   :  { %v2375_v36 = vmax.f32 %v2323_v32, 0.0 }
 0x51d   :  { %v2737_v37 = vpack.c.bf16 %v2375_v36, %v2374_v34 }
 0x51f   :  { %v2418_v38 = vrot.slane %v2737_v37, %v3281_v16 }
 0x521   :  { %v2427_v20 = vcombine.low %v2418_v38, %v2425_v11 }
 0x523   :  { %v2441_v41 = vrot.slane %v2427_v20, %v3281_v16 }
 0x525   :  { %v2442_v42 = vcombine.low %v2434_v12, %v2441_v41 }
 0x527   :  { %2444 = vst [vmem:[%s4462_s14] sm:$0xff] %v2442_v42 }
 0x528   :  { %3162 = dma.done.wait [#allocation3], 32  }
 0x529   :  { %3163 = vsyncadd [#allocation3], 4294967264 }
 0x52a   :  { %3164 = dma.done.wait [#allocation5], 32  }
 0x52b   :  { %3165 = vsyncadd [#allocation5], 4294967264 }
 0x52c   :  { %2475 = vsyncpa [#allocation3], 1 }
 0x52d   :  { %2476 = vsyncpa [#allocation5], 1 }

// kernel: vae_forward.15
= control target key start
LH: loop header
LB: loop body
LE: loop exit
PB: predicated region body
PF: predicated region fallthrough
CT: control target
= control target key end

     0   :  { %vm558_vm0 = vcmask 523264   ;;  %s1733_s1 = inlined_call_operand.vmem [shape: bf16[576,128], index: 1, kind: input, shape index: {}]   ;;  %s1734_s0 = inlined_call_operand.vmem [shape: bf16[128,576], index: 0, kind: input, shape index: {}]   ;;  %s1735_s2 = inlined_call_operand.vmem [shape: f32[1,128], index: 2, kind: input, shape index: {}]   ;;  %s1736_s3 = inlined_call_operand.vmem [shape: bf16[128,128], index: 3, kind: output, shape index: {}]  }
   0x1   :  { %v1310_v0 = vld [vmem:[%s1733_s1 + $0x40] sm:$0xff]   ;;  %v1314_v4 = vld [vmem:[%s1733_s1 + $0x48] sm:$0xff]   ;;  %v1318_v8 = vld [vmem:[%s1733_s1 + $0x50] sm:$0xff]  }
   0x2   :  { %v1311_v1 = vld [vmem:[%s1733_s1 + $0xc0] sm:$0xff]   ;;  %1138 = vmatprep.subr.bf16.mxu0 %v1310_v0  ;;  %v1315_v5 = vld [vmem:[%s1733_s1 + $0xc8] sm:$0xff]   ;;  %v1319_v9 = vld [vmem:[%s1733_s1 + $0xd0] sm:$0xff]  }
   0x3   :  { %v1312_v2 = vld [vmem:[%s1733_s1] sm:$0xff]   ;;  %1202 = vmatprep.subr.bf16.mxu1 %v1311_v1  ;;  %v1316_v6 = vld [vmem:[%s1733_s1 + $0x8] sm:$0xff]   ;;  %v1320_v10 = vld [vmem:[%s1733_s1 + $0x10] sm:$0xff]  }
   0x4   :  { %v1313_v3 = vld [vmem:[%s1733_s1 + $0x80] sm:$0xff]   ;;  %1139 = vmatpush3.bf16.msra.mxu0 %v1312_v2  ;;  %v1317_v7 = vld [vmem:[%s1733_s1 + $0x88] sm:$0xff]   ;;  %v1321_v11 = vld [vmem:[%s1733_s1 + $0x90] sm:$0xff]  }
   0x5   :  { %1203 = vmatpush3.bf16.msra.mxu1 %v1313_v3  ;;  %1140 = vmatprep.subr.bf16.mxu0 %v1314_v4  ;;  %v1322_v12 = vld [vmem:[%s1733_s1 + $0x58] sm:$0xff]   ;;  %v1326_v16 = vld [vmem:[%s1733_s1 + $0x60] sm:$0xff]   ;;  %v1330_v20 = vld [vmem:[%s1733_s1 + $0x68] sm:$0xff]  }
   0x6   :  { %1204 = vmatprep.subr.bf16.mxu1 %v1315_v5  ;;  %v1323_v13 = vld [vmem:[%s1733_s1 + $0xd8] sm:$0xff]   ;;  %v1327_v17 = vld [vmem:[%s1733_s1 + $0xe0] sm:$0xff]   ;;  %v1331_v21 = vld [vmem:[%s1733_s1 + $0xe8] sm:$0xff]  }
   0x7   :  { %v1324_v14 = vld [vmem:[%s1733_s1 + $0x18] sm:$0xff]   ;;  %v1328_v18 = vld [vmem:[%s1733_s1 + $0x20] sm:$0xff]   ;;  %v1332_v22 = vld [vmem:[%s1733_s1 + $0x28] sm:$0xff]  }
   0x8   :  { %1141 = vmatpush3.bf16.msra.mxu0 %v1316_v6  ;;  %v1325_v15 = vld [vmem:[%s1733_s1 + $0x98] sm:$0xff]   ;;  %v1329_v19 = vld [vmem:[%s1733_s1 + $0xa0] sm:$0xff]   ;;  %v1333_v23 = vld [vmem:[%s1733_s1 + $0xa8] sm:$0xff]  }
   0x9   :  { %1205 = vmatpush3.bf16.msra.mxu1 %v1317_v7  ;;  %1142 = vmatprep.subr.bf16.mxu0 %v1318_v8  ;;  %v1334_v24 = vld [vmem:[%s1733_s1 + $0x70] sm:$0xff]   ;;  %v1338_v28 = vld [vmem:[%s1733_s1 + $0x78] sm:$0xff]   ;;  %v1347_v35 = vld [vmem:[%s1734_s0 + $0xc] ss:$20 sps:$4 sm:$0xff]  }
   0xa   :  { %1206 = vmatprep.subr.bf16.mxu1 %v1319_v9  ;;  %v1335_v25 = vld [vmem:[%s1733_s1 + $0xf0] sm:$0xff]   ;;  %v1339_v29 = vld [vmem:[%s1733_s1 + $0xf8] sm:$0xff]   ;;  %v1348_v36 = vld [vmem:[%s1733_s1 + $0x100] sm:$0xff]   ;;  %712 = vmatprep.mubr.bf16.mxu1 %v1347_v35 }
   0xb   :  { %v1336_v26 = vld [vmem:[%s1733_s1 + $0x30] sm:$0xff]   ;;  %v1340_v30 = vld [vmem:[%s1733_s1 + $0x38] sm:$0xff]   ;;  %v1349_v37 = vld [vmem:[%s1734_s0 + $0x2c] ss:$20 sps:$4 sm:$0xff]  }
   0xc   :  { %1143 = vmatpush3.bf16.msra.mxu0 %v1320_v10  ;;  %v1337_v27 = vld [vmem:[%s1733_s1 + $0xb0] sm:$0xff]   ;;  %v1341_v31 = vld [vmem:[%s1733_s1 + $0xb8] sm:$0xff]   ;;  %v1361_v42 = vld [vmem:[%s1733_s1 + $0x108] sm:$0xff]  }
   0xd   :  { %1207 = vmatpush3.bf16.msra.mxu1 %v1321_v11  ;;  %1144 = vmatprep.subr.bf16.mxu0 %v1322_v12  ;;  %v1342_v32 = vld [vmem:[%s1734_s0] ss:$20 sps:$4 sm:$0xff]   ;;  %v1344_v33 = vld [vmem:[%s1734_s0 + $0x4] ss:$20 sps:$4 sm:$0xff]   ;;  %v1345_v34 = vld [vmem:[%s1734_s0 + $0x8] ss:$20 sps:$4 sm:$0xff]  }
   0xe   :  { %1208 = vmatprep.subr.bf16.mxu1 %v1323_v13  ;;  %615 = vmatprep.mubr.bf16.mxu0 %v1344_v33  ;;  %v1351_v38 = vld [vmem:[%s1734_s0 + $0x34] ss:$20 sps:$4 sm:$0xff]   ;;  %v1354_v40 = vld [vmem:[%s1734_s0 + $0x30] ss:$20 sps:$4 sm:$0xff]   ;;  %v1360_v45 = vld [vmem:[%s1734_s0 + $0x58] ss:$20 sps:$4 sm:$0xff]  }
   0xf   :  { %v1353_v39 = vld [vmem:[%s1734_s0 + $0x28] ss:$20 sps:$4 sm:$0xff]   ;;  %v1359_v44 = vld [vmem:[%s1734_s0 + $0x50] ss:$20 sps:$4 sm:$0xff]   ;;  %v1366_v50 = vld [vmem:[%s1734_s0 + $0x78] ss:$20 sps:$4 sm:$0xff]  }
  0x10   :  { %1145 = vmatpush3.bf16.msra.mxu0 %v1324_v14  ;;  %v1355_v41 = vld [vmem:[%s1734_s0 + $0x54] ss:$20 sps:$4 sm:$0xff]   ;;  %v1357_v43 = vld [vmem:[%s1734_s0 + $0x5c] ss:$20 sps:$4 sm:$0xff]   ;;  %v1364_v48 = vld [vmem:[%s1734_s0 + $0x84] ss:$20 sps:$4 sm:$0xff]  }
  0x11   :  { %1209 = vmatpush3.bf16.msra.mxu1 %v1325_v15  ;;  %1146 = vmatprep.subr.bf16.mxu0 %v1326_v16  ;;  %v1374_v46 = vld [vmem:[%s1733_s1 + $0x110] sm:$0xff]   ;;  %v1387_v49 = vld [vmem:[%s1733_s1 + $0x118] sm:$0xff]   ;;  %v1370_v53 = vld [vmem:[%s1734_s0 + $0xac] ss:$20 sps:$4 sm:$0xff]  }
  0x12   :  { %1210 = vmatprep.subr.bf16.mxu1 %v1327_v17  ;;  %v1362_v47 = vld [vmem:[%s1734_s0 + $0x7c] ss:$20 sps:$4 sm:$0xff]   ;;  %v1367_v51 = vld [vmem:[%s1734_s0 + $0x80] ss:$20 sps:$4 sm:$0xff]   ;;  %v1368_v52 = vld [vmem:[%s1734_s0 + $0xa4] ss:$20 sps:$4 sm:$0xff]  }
  0x13   :  { %v1372_v54 = vld [vmem:[%s1734_s0 + $0xa0] ss:$20 sps:$4 sm:$0xff]   ;;  %v1373_v55 = vld [vmem:[%s1734_s0 + $0xa8] ss:$20 sps:$4 sm:$0xff]   ;;  %v1380_v59 = vld [vmem:[%s1734_s0 + $0xd0] ss:$20 sps:$4 sm:$0xff]  }
  0x14   :  { %1147 = vmatpush3.bf16.msra.mxu0 %v1328_v18  ;;  %v1375_v56 = vld [vmem:[%s1734_s0 + $0xcc] ss:$20 sps:$4 sm:$0xff]   ;;  %v1377_v57 = vld [vmem:[%s1734_s0 + $0xd4] ss:$20 sps:$4 sm:$0xff]   ;;  %v1383_v61 = vld [vmem:[%s1734_s0 + $0xfc] ss:$20 sps:$4 sm:$0xff]  }
  0x15   :  { %1211 = vmatpush3.bf16.msra.mxu1 %v1329_v19  ;;  %1148 = vmatprep.subr.bf16.mxu0 %v1330_v20  ;;  %v1379_v58 = vld [vmem:[%s1734_s0 + $0xc8] ss:$20 sps:$4 sm:$0xff]   ;;  %v1385_v62 = vld [vmem:[%s1734_s0 + $0xf0] ss:$20 sps:$4 sm:$0xff]   ;;  %v1386_v63 = vld [vmem:[%s1734_s0 + $0xf8] ss:$20 sps:$4 sm:$0xff]  }
  0x16   :  { %1212 = vmatprep.subr.bf16.mxu1 %v1331_v21  ;;  %v1381_v60 = vld [vmem:[%s1734_s0 + $0xf4] ss:$20 sps:$4 sm:$0xff]   ;;  %v1388_v0 = vld [vmem:[%s1734_s0 + $0x11c] ss:$20 sps:$4 sm:$0xff]   ;;  %v1390_v1 = vld [vmem:[%s1734_s0 + $0x124] ss:$20 sps:$4 sm:$0xff]  }
  0x17   :  { %v1392_v2 = vld [vmem:[%s1734_s0 + $0x118] ss:$20 sps:$4 sm:$0xff]   ;;  %v1393_v3 = vld [vmem:[%s1734_s0 + $0x120] ss:$20 sps:$4 sm:$0xff]   ;;  %v1394_v4 = vld [vmem:[%s1734_s0 + $0x10] ss:$20 sps:$4 sm:$0xff]  }
  0x18   :  { %1149 = vmatpush3.bf16.msra.mxu0 %v1332_v22  ;;  %v1395_v5 = vld [vmem:[%s1734_s0 + $0xb0] ss:$20 sps:$4 sm:$0xff]   ;;  %v1396_v6 = vld [vmem:[%s1734_s0 + $0x38] ss:$20 sps:$4 sm:$0xff]   ;;  %v1398_v8 = vld [vmem:[%s1734_s0 + $0x60] ss:$20 sps:$4 sm:$0xff]  }
  0x19   :  { %1213 = vmatpush3.bf16.msra.mxu1 %v1333_v23  ;;  %1150 = vmatprep.subr.bf16.mxu0 %v1334_v24  ;;  %v1397_v7 = vld [vmem:[%s1734_s0 + $0xd8] ss:$20 sps:$4 sm:$0xff]   ;;  %v1399_v9 = vld [vmem:[%s1734_s0 + $0x100] ss:$20 sps:$4 sm:$0xff]   ;;  %v1400_v10 = vld [vmem:[%s1734_s0 + $0x88] ss:$20 sps:$4 sm:$0xff]  }
  0x1a   :  { %1214 = vmatprep.subr.bf16.mxu1 %v1335_v25  ;;  %v1401_v11 = vld [vmem:[%s1734_s0 + $0x128] ss:$20 sps:$4 sm:$0xff]   ;;  %v1661_v14 = vld [vmem:[%s1735_s2] ss:$0 sm:$0xff] }
  0x1c   :  { %1151 = vmatpush3.bf16.msra.mxu0 %v1336_v26 }
  0x1d   :  { %1215 = vmatpush3.bf16.msra.mxu1 %v1337_v27  ;;  %1152 = vmatprep.subr.bf16.mxu0 %v1338_v28 }
  0x1e   :  { %1216 = vmatprep.subr.bf16.mxu1 %v1339_v29 }
  0x20   :  { %1153 = vmatpush3.bf16.msra.mxu0 %v1340_v30 }
  0x21   :  { %1217 = vmatpush3.bf16.msra.mxu1 %v1341_v31  ;;  %1278 = vmatprep.subr.bf16.mxu0 %v1348_v36 }
  0x22   :  { %1302 = vmatprep.subr.bf16.mxu1 %v1348_v36 }
  0x23   :  { %616 = vmatmul.mubr.bf16.vlgmr.msra.gmra.mrb[0].mxu0 %v1342_v32 }
  0x24   :  { %713 = vmatmul.mubr.bf16.vlgmr.msra.gmra.mrb[0].mxu1 %v1345_v34  ;;  %1279 = vmatpush3.bf16.msra.mxu0 %v1348_v36 }
  0x25   :  { %1306 = vmatpush3.bf16.msra.mxu1 %v1348_v36  ;;  %623 = vmatprep.mubr.bf16.mxu0 %v1349_v37 }
  0x26   :  { %720 = vmatprep.mubr.bf16.mxu1 %v1351_v38  ;;  %1280 = vmatprep.subr.bf16.mxu0 %v1361_v42 }
  0x27   :  { %1303 = vmatprep.subr.bf16.mxu1 %v1361_v42 }
  0x28   :  { %1281 = vmatpush3.bf16.msra.mxu0 %v1361_v42 }
  0x29   :  { %1307 = vmatpush3.bf16.msra.mxu1 %v1361_v42  ;;  %1282 = vmatprep.subr.bf16.mxu0 %v1374_v46 }
  0x2a   :  { %1304 = vmatprep.subr.bf16.mxu1 %v1374_v46 }
  0x2b   :  { %624 = vmatmul.mubr.bf16.gmra.mrb[4].mxu0 %v1353_v39 }
  0x2c   :  { %721 = vmatmul.mubr.bf16.gmra.mrb[4].mxu1 %v1354_v40  ;;  %631 = vmatprep.mubr.bf16.mxu0 %v1355_v41 }
  0x2d   :  { %728 = vmatprep.mubr.bf16.mxu1 %v1357_v43  ;;  %1283 = vmatpush3.bf16.msra.mxu0 %v1374_v46 }
  0x2e   :  { %1308 = vmatpush3.bf16.msra.mxu1 %v1374_v46  ;;  %1284 = vmatprep.subr.bf16.mxu0 %v1387_v49 }
  0x2f   :  { %1305 = vmatprep.subr.bf16.mxu1 %v1387_v49 }
  0x31   :  { %1285 = vmatpush3.bf16.msra.mxu0 %v1387_v49 }
  0x32   :  { %1309 = vmatpush3.bf16.msra.mxu1 %v1387_v49 }
  0x33   :  { %632 = vmatmul.mubr.bf16.gmra.mrb[8].mxu0 %v1359_v44 }
  0x34   :  { %729 = vmatmul.mubr.bf16.gmra.mrb[8].mxu1 %v1360_v45  ;;  %639 = vmatprep.mubr.bf16.mxu0 %v1362_v47 }
  0x35   :  { %736 = vmatprep.mubr.bf16.mxu1 %v1364_v48 }
  0x3b   :  { %640 = vmatmul.mubr.bf16.gmra.mrb[12].mxu0 %v1366_v50 }
  0x3c   :  { %737 = vmatmul.mubr.bf16.gmra.mrb[12].mxu1 %v1367_v51  ;;  %647 = vmatprep.mubr.bf16.mxu0 %v1368_v52 }
  0x3d   :  { %744 = vmatprep.mubr.bf16.mxu1 %v1370_v53 }
  0x43   :  { %648 = vmatmul.mubr.bf16.gmra.mrb[16].mxu0 %v1372_v54 }
  0x44   :  { %745 = vmatmul.mubr.bf16.gmra.mrb[16].mxu1 %v1373_v55  ;;  %655 = vmatprep.mubr.bf16.mxu0 %v1375_v56 }
  0x45   :  { %752 = vmatprep.mubr.bf16.mxu1 %v1377_v57 }
  0x4b   :  { %656 = vmatmul.mubr.bf16.gmra.mrb[20].mxu0 %v1379_v58 }
  0x4c   :  { %753 = vmatmul.mubr.bf16.gmra.mrb[20].mxu1 %v1380_v59  ;;  %663 = vmatprep.mubr.bf16.mxu0 %v1381_v60 }
  0x4d   :  { %760 = vmatprep.mubr.bf16.mxu1 %v1383_v61 }
  0x53   :  { %664 = vmatmul.mubr.bf16.gmra.mrb[24].mxu0 %v1385_v62 }
  0x54   :  { %761 = vmatmul.mubr.bf16.gmra.mrb[24].mxu1 %v1386_v63  ;;  %671 = vmatprep.mubr.bf16.mxu0 %v1388_v0 }
  0x55   :  { %768 = vmatprep.mubr.bf16.mxu1 %v1390_v1 }
  0x5b   :  { %672 = vmatmul.mubr.bf16.gmra.mrb[28].mxu0 %v1392_v2 }
  0x5c   :  { %769 = vmatmul.mubr.bf16.gmra.mrb[28].mxu1 %v1393_v3  ;;  %1286 = vmatprep.mubr.msk.bf16.mxu0 %vm558_vm0, %v1394_v4 }
  0x5d   :  { %1294 = vmatprep.mubr.msk.bf16.mxu1 %vm558_vm0, %v1395_v5 }
  0x63   :  { %1287 = vmatmul.mubr.msk.bf16.vlgmr.msra.gmra.mrb[32].mxu0 %vm558_vm0, %v1396_v6 }
  0x64   :  { %1295 = vmatmul.mubr.msk.bf16.vlgmr.msra.gmra.mrb[32].mxu1 %vm558_vm0, %v1397_v7  ;;  %1290 = vmatprep.mubr.msk.bf16.mxu0 %vm558_vm0, %v1398_v8 }
  0x65   :  { %1298 = vmatprep.mubr.msk.bf16.mxu1 %vm558_vm0, %v1399_v9 }
  0x6b   :  { %1291 = vmatmul.mubr.msk.bf16.gmra.mrb[36].mxu0 %vm558_vm0, %v1400_v10 }
  0x6c   :  { %1299 = vmatmul.mubr.msk.bf16.gmra.mrb[36].mxu1 %vm558_vm0, %v1401_v11 }
  0xf6   :  { %v1154_v12 = vpop.f32.mrb[0].mxu0 }
  0xf7   :  { %v1218_v13 = vpop.f32.mrb[0].mxu1  ;;  %v1155_v15 = vpop.f32.mrb[1].mxu0 }
  0xf8   :  { %v1156_v16 = vadd.f32 %v1155_v15, %v1154_v12  ;;  %v1219_v17 = vpop.f32.mrb[1].mxu1  ;;  %v1157_v18 = vpop.f32.mrb[2].mxu0 }
  0xf9   :  { %v1220_v19 = vadd.f32 %v1219_v17, %v1218_v13  ;;  %v1221_v20 = vpop.f32.mrb[2].mxu1  ;;  %v1158_v21 = vpop.f32.mrb[3].mxu0 }
  0xfa   :  { %v618_v22 = vadd.f32 %v1156_v16, %v1661_v14  ;;  %v1159_v23 = vadd.f32 %v1158_v21, %v1157_v18  ;;  %v1222_v24 = vpop.f32.mrb[3].mxu1 }
  0xfb   :  { %v1223_v25 = vadd.f32 %v1222_v24, %v1221_v20 }
  0xfc   :  { %v621_v26 = vadd.f32 %v1159_v23, %v1661_v14  ;;  %v1665_v27 = vadd.f32 %v1220_v19, %v618_v22 }
  0xfe   :  { %v1160_v28 = vpop.f32.mrb[4].mxu0  ;;  %v1667_v29 = vadd.f32 %v1223_v25, %v621_v26 }
  0xff   :  { %v1224_v30 = vpop.f32.mrb[4].mxu1  ;;  %v1161_v31 = vpop.f32.mrb[5].mxu0 }
 0x100   :  { %v1162_v32 = vadd.f32 %v1161_v31, %v1160_v28  ;;  %v1225_v33 = vpop.f32.mrb[5].mxu1  ;;  %v1163_v34 = vpop.f32.mrb[6].mxu0 }
 0x101   :  { %v1226_v35 = vadd.f32 %v1225_v33, %v1224_v30  ;;  %v1227_v36 = vpop.f32.mrb[6].mxu1  ;;  %v1164_v37 = vpop.f32.mrb[7].mxu0 }
 0x102   :  { %v626_v38 = vadd.f32 %v1162_v32, %v1661_v14  ;;  %v1165_v39 = vadd.f32 %v1164_v37, %v1163_v34  ;;  %v1228_v40 = vpop.f32.mrb[7].mxu1 }
 0x103   :  { %v1229_v41 = vadd.f32 %v1228_v40, %v1227_v36 }
 0x104   :  { %v629_v42 = vadd.f32 %v1165_v39, %v1661_v14  ;;  %v1671_v43 = vadd.f32 %v1226_v35, %v626_v38 }
 0x106   :  { %v1166_v44 = vpop.f32.mrb[8].mxu0  ;;  %v1673_v45 = vadd.f32 %v1229_v41, %v629_v42 }
 0x107   :  { %v1230_v46 = vpop.f32.mrb[8].mxu1  ;;  %v1167_v47 = vpop.f32.mrb[9].mxu0 }
 0x108   :  { %v1168_v48 = vadd.f32 %v1167_v47, %v1166_v44  ;;  %v1231_v49 = vpop.f32.mrb[9].mxu1  ;;  %v1169_v50 = vpop.f32.mrb[10].mxu0 }
 0x109   :  { %v1232_v51 = vadd.f32 %v1231_v49, %v1230_v46  ;;  %v1233_v52 = vpop.f32.mrb[10].mxu1  ;;  %v1170_v53 = vpop.f32.mrb[11].mxu0 }
 0x10a   :  { %v634_v54 = vadd.f32 %v1168_v48, %v1661_v14  ;;  %v1171_v55 = vadd.f32 %v1170_v53, %v1169_v50  ;;  %v1234_v56 = vpop.f32.mrb[11].mxu1 }
 0x10b   :  { %v1235_v57 = vadd.f32 %v1234_v56, %v1233_v52 }
 0x10c   :  { %v637_v58 = vadd.f32 %v1171_v55, %v1661_v14  ;;  %v1677_v59 = vadd.f32 %v1232_v51, %v634_v54 }
 0x10e   :  { %v1172_v60 = vpop.f32.mrb[12].mxu0  ;;  %v1679_v61 = vadd.f32 %v1235_v57, %v637_v58 }
 0x10f   :  { %v1236_v62 = vpop.f32.mrb[12].mxu1  ;;  %v1173_v63 = vpop.f32.mrb[13].mxu0 }
 0x110   :  { %v1174_v0 = vadd.f32 %v1173_v63, %v1172_v60  ;;  %v1237_v1 = vpop.f32.mrb[13].mxu1  ;;  %v1175_v2 = vpop.f32.mrb[14].mxu0 }
 0x111   :  { %v1238_v3 = vadd.f32 %v1237_v1, %v1236_v62  ;;  %v1239_v4 = vpop.f32.mrb[14].mxu1  ;;  %v1176_v5 = vpop.f32.mrb[15].mxu0 }
 0x112   :  { %v642_v6 = vadd.f32 %v1174_v0, %v1661_v14  ;;  %v1177_v7 = vadd.f32 %v1176_v5, %v1175_v2  ;;  %v1240_v8 = vpop.f32.mrb[15].mxu1 }
 0x113   :  { %v1241_v9 = vadd.f32 %v1240_v8, %v1239_v4 }
 0x114   :  { %v645_v10 = vadd.f32 %v1177_v7, %v1661_v14  ;;  %v1683_v11 = vadd.f32 %v1238_v3, %v642_v6 }
 0x116   :  { %v1178_v12 = vpop.f32.mrb[16].mxu0  ;;  %v1685_v13 = vadd.f32 %v1241_v9, %v645_v10 }
 0x117   :  { %v1242_v15 = vpop.f32.mrb[16].mxu1  ;;  %v1179_v16 = vpop.f32.mrb[17].mxu0 }
 0x118   :  { %v1180_v17 = vadd.f32 %v1179_v16, %v1178_v12  ;;  %v1243_v18 = vpop.f32.mrb[17].mxu1  ;;  %v1181_v19 = vpop.f32.mrb[18].mxu0 }
 0x119   :  { %v1244_v20 = vadd.f32 %v1243_v18, %v1242_v15  ;;  %v1245_v21 = vpop.f32.mrb[18].mxu1  ;;  %v1182_v22 = vpop.f32.mrb[19].mxu0 }
 0x11a   :  { %v650_v23 = vadd.f32 %v1180_v17, %v1661_v14  ;;  %v1183_v24 = vadd.f32 %v1182_v22, %v1181_v19  ;;  %v1246_v25 = vpop.f32.mrb[19].mxu1 }
 0x11b   :  { %v1247_v26 = vadd.f32 %v1246_v25, %v1245_v21 }
 0x11c   :  { %v653_v28 = vadd.f32 %v1183_v24, %v1661_v14  ;;  %v747_v30 = vadd.f32 %v1244_v20, %v650_v23 }
 0x11e   :  { %v1184_v31 = vpop.f32.mrb[20].mxu0  ;;  %v1689_v32 = vadd.f32 %v1247_v26, %v653_v28 }
 0x11f   :  { %v1248_v33 = vpop.f32.mrb[20].mxu1  ;;  %v1185_v34 = vpop.f32.mrb[21].mxu0 }
 0x120   :  { %v1186_v35 = vadd.f32 %v1185_v34, %v1184_v31  ;;  %v1249_v36 = vpop.f32.mrb[21].mxu1  ;;  %v1187_v37 = vpop.f32.mrb[22].mxu0 }
 0x121   :  { %v1250_v38 = vadd.f32 %v1249_v36, %v1248_v33  ;;  %v1251_v39 = vpop.f32.mrb[22].mxu1  ;;  %v1188_v40 = vpop.f32.mrb[23].mxu0 }
 0x122   :  { %v658_v41 = vadd.f32 %v1186_v35, %v1661_v14  ;;  %v1189_v42 = vadd.f32 %v1188_v40, %v1187_v37  ;;  %v1252_v44 = vpop.f32.mrb[23].mxu1 }
 0x123   :  { %v1253_v46 = vadd.f32 %v1252_v44, %v1251_v39 }
 0x124   :  { %v661_v47 = vadd.f32 %v1189_v42, %v1661_v14  ;;  %v755_v48 = vadd.f32 %v1250_v38, %v658_v41 }
 0x126   :  { %v1190_v49 = vpop.f32.mrb[24].mxu0  ;;  %v758_v50 = vadd.f32 %v1253_v46, %v661_v47 }
 0x127   :  { %v1254_v51 = vpop.f32.mrb[24].mxu1  ;;  %v1191_v52 = vpop.f32.mrb[25].mxu0 }
 0x128   :  { %v1192_v53 = vadd.f32 %v1191_v52, %v1190_v49  ;;  %v1255_v54 = vpop.f32.mrb[25].mxu1  ;;  %v1193_v55 = vpop.f32.mrb[26].mxu0 }
 0x129   :  { %v1256_v56 = vadd.f32 %v1255_v54, %v1254_v51  ;;  %v1257_v57 = vpop.f32.mrb[26].mxu1  ;;  %v1194_v58 = vpop.f32.mrb[27].mxu0 }
 0x12a   :  { %v666_v60 = vadd.f32 %v1192_v53, %v1661_v14  ;;  %v1195_v62 = vadd.f32 %v1194_v58, %v1193_v55  ;;  %v1258_v63 = vpop.f32.mrb[27].mxu1 }
 0x12b   :  { %v1259_v0 = vadd.f32 %v1258_v63, %v1257_v57 }
 0x12c   :  { %v669_v1 = vadd.f32 %v1195_v62, %v1661_v14  ;;  %v763_v2 = vadd.f32 %v1256_v56, %v666_v60 }
 0x12e   :  { %v1196_v3 = vpop.f32.mrb[28].mxu0  ;;  %v1695_v4 = vadd.f32 %v1259_v0, %v669_v1 }
 0x12f   :  { %v1260_v5 = vpop.f32.mrb[28].mxu1  ;;  %v1197_v6 = vpop.f32.mrb[29].mxu0 }
 0x130   :  { %v1198_v7 = vadd.f32 %v1197_v6, %v1196_v3  ;;  %v1261_v8 = vpop.f32.mrb[29].mxu1  ;;  %v1199_v9 = vpop.f32.mrb[30].mxu0 }
 0x131   :  { %v1262_v10 = vadd.f32 %v1261_v8, %v1260_v5  ;;  %v1263_v12 = vpop.f32.mrb[30].mxu1  ;;  %v1200_v15 = vpop.f32.mrb[31].mxu0 }
 0x132   :  { %v674_v16 = vadd.f32 %v1198_v7, %v1661_v14  ;;  %v1201_v17 = vadd.f32 %v1200_v15, %v1199_v9  ;;  %v1264_v18 = vpop.f32.mrb[31].mxu1 }
 0x133   :  { %v1265_v19 = vadd.f32 %v1264_v18, %v1263_v12 }
 0x134   :  { %v677_v20 = vadd.f32 %v1201_v17, %v1661_v14  ;;  %v771_v21 = vadd.f32 %v1262_v10, %v674_v16 }
 0x136   :  { %v1288_v22 = vpop.f32.mrb[32].mxu0  ;;  %v774_v23 = vadd.f32 %v1265_v19, %v677_v20 }
 0x137   :  { %v820_v24 = vadd.f32 %v1288_v22, %v1671_v43  ;;  %v1296_v25 = vpop.f32.mrb[32].mxu1  ;;  %v811_v26 = vpop.f32.mrb[33].mxu0 }
 0x138   :  { %v852_v28 = vadd.f32 %v1296_v25, %v755_v48  ;;  %v812_v31 = vadd.f32 %v811_v26, %v1665_v27  ;;  %v843_v33 = vpop.f32.mrb[33].mxu1  ;;  %v1289_v34 = vpop.f32.mrb[34].mxu0 }
 0x139   :  { %v844_v35 = vadd.f32 %v843_v33, %v747_v30  ;;  %v823_v36 = vadd.f32 %v1289_v34, %v1673_v45  ;;  %v1297_v37 = vpop.f32.mrb[34].mxu1  ;;  %v814_v38 = vpop.f32.mrb[35].mxu0  ;;  %v876_v41 = vmax.f32 %v820_v24, 0.0 }
 0x13a   :  { %v855_v39 = vadd.f32 %v1297_v37, %v758_v50  ;;  %v815_v14 = vadd.f32 %v814_v38, %v1667_v29  ;;  %v846_v40 = vpop.f32.mrb[35].mxu1  ;;  %v884_v44 = vmax.f32 %v852_v28, 0.0  ;;  %v874_v46 = vmax.f32 %v812_v31, 0.0 }
 0x13b   :  { %v877_v42 = vmax.f32 %v823_v36, 0.0  ;;  %v847_v43 = vadd.f32 %v846_v40, %v1689_v32  ;;  %v882_v27 = vmax.f32 %v844_v35, 0.0 }
 0x13c   :  { %v885_v47 = vmax.f32 %v855_v39, 0.0  ;;  %v875_v48 = vmax.f32 %v815_v14, 0.0 }
 0x13d   :  { %v1099_v49 = vpack.c.bf16 %v877_v42, %v876_v41  ;;  %v883_v51 = vmax.f32 %v847_v43, 0.0 }
 0x13e   :  { %v1119_v30 = vpack.c.bf16 %v885_v47, %v884_v44  ;;  %v1094_v52 = vpack.c.bf16 %v875_v48, %v874_v46  ;;  %v1292_v45 = vpop.f32.mrb[36].mxu0 }
 0x13f   :  { %1131 = vst [vmem:[%s1736_s3 + $0x8] sm:$0xff] %v1099_v49   ;;  %v1114_v29 = vpack.c.bf16 %v883_v51, %v882_v27  ;;  %v836_v50 = vadd.f32 %v1292_v45, %v1683_v11  ;;  %v1300_v53 = vpop.f32.mrb[36].mxu1  ;;  %v827_v54 = vpop.f32.mrb[37].mxu0 }
 0x140   :  { %1135 = vst [vmem:[%s1736_s3 + $0x28] sm:$0xff] %v1119_v30   ;;  %1095 = vst [vmem:[%s1736_s3] sm:$0xff] %v1094_v52   ;;  %v868_v32 = vadd.f32 %v1300_v53, %v771_v21  ;;  %v828_v55 = vadd.f32 %v827_v54, %v1677_v59  ;;  %v859_v56 = vpop.f32.mrb[37].mxu1  ;;  %v1293_v57 = vpop.f32.mrb[38].mxu0 }
 0x141   :  { %1134 = vst [vmem:[%s1736_s3 + $0x20] sm:$0xff] %v1114_v29   ;;  %v860_v11 = vadd.f32 %v859_v56, %v763_v2  ;;  %v839_v58 = vadd.f32 %v1293_v57, %v1685_v13  ;;  %v1301_v60 = vpop.f32.mrb[38].mxu1  ;;  %v830_v62 = vpop.f32.mrb[39].mxu0  ;;  %v880_v3 = vmax.f32 %v836_v50, 0.0 }
 0x142   :  { %v871_v63 = vadd.f32 %v1301_v60, %v774_v23  ;;  %v831_v0 = vadd.f32 %v830_v62, %v1679_v61  ;;  %v862_v1 = vpop.f32.mrb[39].mxu1  ;;  %v888_v59 = vmax.f32 %v868_v32, 0.0  ;;  %v878_v7 = vmax.f32 %v828_v55, 0.0 }
 0x143   :  { %v881_v5 = vmax.f32 %v839_v58, 0.0  ;;  %v863_v6 = vadd.f32 %v862_v1, %v1695_v4  ;;  %v886_v10 = vmax.f32 %v860_v11, 0.0 }
 0x144   :  { %v889_v8 = vmax.f32 %v871_v63, 0.0  ;;  %v879_v9 = vmax.f32 %v831_v0, 0.0 }
 0x145   :  { %v1109_v12 = vpack.c.bf16 %v881_v5, %v880_v3  ;;  %v887_v15 = vmax.f32 %v863_v6, 0.0 }
 0x146   :  { %v1129_v2 = vpack.c.bf16 %v889_v8, %v888_v59  ;;  %v1104_v16 = vpack.c.bf16 %v879_v9, %v878_v7 }
 0x147   :  { %1133 = vst [vmem:[%s1736_s3 + $0x18] sm:$0xff] %v1109_v12   ;;  %v1124_v13 = vpack.c.bf16 %v887_v15, %v886_v10 }
 0x148   :  { %1137 = vst [vmem:[%s1736_s3 + $0x38] sm:$0xff] %v1129_v2   ;;  %1132 = vst [vmem:[%s1736_s3 + $0x10] sm:$0xff] %v1104_v16  }
 0x149   :  { %1136 = vst [vmem:[%s1736_s3 + $0x30] sm:$0xff] %v1124_v13  }

// kernel: vae_forward.16
= control target key start
LH: loop header
LB: loop body
LE: loop exit
PB: predicated region body
PF: predicated region fallthrough
CT: control target
= control target key end

     0   :  { %v2584_v0 = vmov 0   ;;  %vm774_vm0 = vcmask 261120   ;;  %s3302_s1 = inlined_call_operand.vmem [shape: bf16[288,128], index: 1, kind: input, shape index: {}]   ;;  %s3303_s0 = inlined_call_operand.vmem [shape: bf16[512,288], index: 0, kind: input, shape index: {}]   ;;  %s3304_s2 = inlined_call_operand.vmem [shape: f32[1,128], index: 2, kind: input, shape index: {}]   ;;  %s3305_s3 = inlined_call_operand.vmem [shape: bf16[512,128], index: 3, kind: output, shape index: {}]  }
   0x1   :  { %871 = vmatprep.subr.bf16.mxu0 %v2584_v0  ;;  %2405 = vmatprep.subr.bf16.mxu1 %v2584_v0  ;;  %v2438_v1 = vld [vmem:[%s3302_s1] sm:$0xff]   ;;  %v2439_v2 = vld [vmem:[%s3302_s1 + $0x8] sm:$0xff]   ;;  %v2440_v3 = vld [vmem:[%s3302_s1 + $0x10] sm:$0xff]  }
   0x2   :  { %872 = vmatpush1.bf16.msra.mxu0 %v2438_v1  ;;  %2421 = vmatpush1.bf16.msra.mxu1 %v2438_v1  ;;  %v2441_v4 = vld [vmem:[%s3302_s1 + $0x18] sm:$0xff]   ;;  %v2442_v5 = vld [vmem:[%s3302_s1 + $0x20] sm:$0xff]   ;;  %v2443_v7 = vld [vmem:[%s3302_s1 + $0x28] sm:$0xff]  }
   0x3   :  { %873 = vmatprep.subr.bf16.mxu0 %v2584_v0  ;;  %2406 = vmatprep.subr.bf16.mxu1 %v2584_v0  ;;  %v2456_v6 = vld [vmem:[%s3303_s0 + $0x4] ss:$12 sps:$4 sm:$0xff]   ;;  %v2445_v10 = vld [vmem:[%s3302_s1 + $0x38] sm:$0xff]   ;;  %v2447_v12 = vld [vmem:[%s3302_s1 + $0x48] sm:$0xff]  }
   0x4   :  { %v2459_v8 = vld [vmem:[%s3303_s0 + $0x244] ss:$12 sps:$4 sm:$0xff]   ;;  %903 = vmatprep.mubr.bf16.mxu0 %v2456_v6  ;;  %v2449_v14 = vld [vmem:[%s3302_s1 + $0x58] sm:$0xff]   ;;  %v2451_v16 = vld [vmem:[%s3302_s1 + $0x68] sm:$0xff]  }
   0x5   :  { %1095 = vmatprep.mubr.bf16.mxu1 %v2459_v8  ;;  %v2444_v9 = vld [vmem:[%s3302_s1 + $0x30] sm:$0xff]   ;;  %v2446_v11 = vld [vmem:[%s3302_s1 + $0x40] sm:$0xff]   ;;  %v2453_v18 = vld [vmem:[%s3302_s1 + $0x78] sm:$0xff]  }
   0x6   :  { %874 = vmatpush1.bf16.msra.mxu0 %v2439_v2  ;;  %2422 = vmatpush1.bf16.msra.mxu1 %v2439_v2  ;;  %v2448_v13 = vld [vmem:[%s3302_s1 + $0x50] sm:$0xff]   ;;  %v2450_v15 = vld [vmem:[%s3302_s1 + $0x60] sm:$0xff]   ;;  %v2461_v22 = vld [vmem:[%s3303_s0 + $0x1c] ss:$12 sps:$4 sm:$0xff]  }
   0x7   :  { %875 = vmatprep.subr.bf16.mxu0 %v2584_v0  ;;  %2407 = vmatprep.subr.bf16.mxu1 %v2584_v0  ;;  %v2452_v17 = vld [vmem:[%s3302_s1 + $0x70] sm:$0xff]   ;;  %v2460_v19 = vld [vmem:[%s3302_s1 + $0x80] sm:$0xff]   ;;  %v2463_v23 = vld [vmem:[%s3303_s0 + $0x25c] ss:$12 sps:$4 sm:$0xff]  }
   0x8   :  { %v2454_v20 = vld [vmem:[%s3303_s0] ss:$12 sps:$4 sm:$0xff]   ;;  %v2465_v25 = vld [vmem:[%s3303_s0 + $0x18] ss:$12 sps:$4 sm:$0xff]   ;;  %v2471_v29 = vld [vmem:[%s3303_s0 + $0x30] ss:$12 sps:$4 sm:$0xff]  }
   0x9   :  { %v2457_v21 = vld [vmem:[%s3303_s0 + $0x240] ss:$12 sps:$4 sm:$0xff]   ;;  %v2466_v26 = vld [vmem:[%s3303_s0 + $0x258] ss:$12 sps:$4 sm:$0xff]   ;;  %v2472_v30 = vld [vmem:[%s3303_s0 + $0x270] ss:$12 sps:$4 sm:$0xff]  }
   0xa   :  { %876 = vmatpush1.bf16.msra.mxu0 %v2440_v3  ;;  %2423 = vmatpush1.bf16.msra.mxu1 %v2440_v3  ;;  %v2485_v24 = vld [vmem:[%s3302_s1 + $0x88] sm:$0xff]   ;;  %v2467_v27 = vld [vmem:[%s3303_s0 + $0x34] ss:$12 sps:$4 sm:$0xff]   ;;  %v2479_v35 = vld [vmem:[%s3303_s0 + $0x64] ss:$12 sps:$4 sm:$0xff]  }
   0xb   :  { %877 = vmatprep.subr.bf16.mxu0 %v2584_v0  ;;  %2408 = vmatprep.subr.bf16.mxu1 %v2584_v0  ;;  %v2469_v28 = vld [vmem:[%s3303_s0 + $0x274] ss:$12 sps:$4 sm:$0xff]   ;;  %v2473_v31 = vld [vmem:[%s3303_s0 + $0x4c] ss:$12 sps:$4 sm:$0xff]   ;;  %v2481_v36 = vld [vmem:[%s3303_s0 + $0x2a4] ss:$12 sps:$4 sm:$0xff]  }
   0xc   :  { %v2475_v32 = vld [vmem:[%s3303_s0 + $0x28c] ss:$12 sps:$4 sm:$0xff]   ;;  %v2477_v33 = vld [vmem:[%s3303_s0 + $0x48] ss:$12 sps:$4 sm:$0xff]   ;;  %v2496_v45 = vld [vmem:[%s3303_s0 + $0x90] ss:$12 sps:$4 sm:$0xff]  }
   0xd   :  { %v2478_v34 = vld [vmem:[%s3303_s0 + $0x288] ss:$12 sps:$4 sm:$0xff]   ;;  %v2483_v37 = vld [vmem:[%s3303_s0 + $0x60] ss:$12 sps:$4 sm:$0xff]   ;;  %v2490_v41 = vld [vmem:[%s3303_s0 + $0x78] ss:$12 sps:$4 sm:$0xff]  }
   0xe   :  { %878 = vmatpush1.bf16.msra.mxu0 %v2441_v4  ;;  %2424 = vmatpush1.bf16.msra.mxu1 %v2441_v4  ;;  %v2484_v38 = vld [vmem:[%s3303_s0 + $0x2a0] ss:$12 sps:$4 sm:$0xff]   ;;  %v2486_v39 = vld [vmem:[%s3303_s0 + $0x7c] ss:$12 sps:$4 sm:$0xff]   ;;  %v2491_v42 = vld [vmem:[%s3303_s0 + $0x2b8] ss:$12 sps:$4 sm:$0xff]  }
   0xf   :  { %879 = vmatprep.subr.bf16.mxu0 %v2584_v0  ;;  %2409 = vmatprep.subr.bf16.mxu1 %v2584_v0  ;;  %v2488_v40 = vld [vmem:[%s3303_s0 + $0x2bc] ss:$12 sps:$4 sm:$0xff]   ;;  %v2492_v43 = vld [vmem:[%s3303_s0 + $0x94] ss:$12 sps:$4 sm:$0xff]   ;;  %v2498_v47 = vld [vmem:[%s3303_s0 + $0xac] ss:$12 sps:$4 sm:$0xff]  }
  0x10   :  { %v2494_v44 = vld [vmem:[%s3303_s0 + $0x2d4] ss:$12 sps:$4 sm:$0xff]   ;;  %v2497_v46 = vld [vmem:[%s3303_s0 + $0x2d0] ss:$12 sps:$4 sm:$0xff]   ;;  %v2500_v48 = vld [vmem:[%s3303_s0 + $0x2ec] ss:$12 sps:$4 sm:$0xff]  }
  0x11   :  { %v2502_v49 = vld [vmem:[%s3303_s0 + $0xa8] ss:$12 sps:$4 sm:$0xff]   ;;  %v2504_v51 = vld [vmem:[%s3303_s0 + $0xc4] ss:$12 sps:$4 sm:$0xff]   ;;  %v2507_v53 = vld [vmem:[%s3303_s0 + $0xc0] ss:$12 sps:$4 sm:$0xff]  }
  0x12   :  { %880 = vmatpush1.bf16.msra.mxu0 %v2442_v5  ;;  %2425 = vmatpush1.bf16.msra.mxu1 %v2442_v5  ;;  %v2503_v50 = vld [vmem:[%s3303_s0 + $0x2e8] ss:$12 sps:$4 sm:$0xff]   ;;  %v2508_v54 = vld [vmem:[%s3303_s0 + $0x20] ss:$12 sps:$4 sm:$0xff]   ;;  %v2511_v56 = vld [vmem:[%s3303_s0 + $0x38] ss:$12 sps:$4 sm:$0xff]  }
  0x13   :  { %881 = vmatprep.subr.bf16.mxu0 %v2584_v0  ;;  %2410 = vmatprep.subr.bf16.mxu1 %v2584_v0  ;;  %v2506_v52 = vld [vmem:[%s3303_s0 + $0x8] ss:$12 sps:$4 sm:$0xff]   ;;  %v2512_v57 = vld [vmem:[%s3303_s0 + $0xd8] ss:$12 sps:$4 sm:$0xff]   ;;  %v2513_v58 = vld [vmem:[%s3303_s0 + $0x50] ss:$12 sps:$4 sm:$0xff]  }
  0x14   :  { %v2509_v55 = vld [vmem:[%s3303_s0 + $0xdc] ss:$12 sps:$4 sm:$0xff]   ;;  %v2514_v59 = vld [vmem:[%s3303_s0 + $0xf4] ss:$12 sps:$4 sm:$0xff]   ;;  %v2519_v63 = vld [vmem:[%s3303_s0 + $0x10c] ss:$12 sps:$4 sm:$0xff]  }
  0x15   :  { %v2516_v60 = vld [vmem:[%s3303_s0 + $0x68] ss:$12 sps:$4 sm:$0xff]   ;;  %v2517_v61 = vld [vmem:[%s3303_s0 + $0xf0] ss:$12 sps:$4 sm:$0xff]   ;;  %v2518_v62 = vld [vmem:[%s3303_s0 + $0x80] ss:$12 sps:$4 sm:$0xff]  }
  0x16   :  { %882 = vmatpush1.bf16.msra.mxu0 %v2443_v7  ;;  %2426 = vmatpush1.bf16.msra.mxu1 %v2443_v7  ;;  %v2522_v1 = vld [vmem:[%s3303_s0 + $0x108] ss:$12 sps:$4 sm:$0xff]   ;;  %v2523_v2 = vld [vmem:[%s3303_s0 + $0xb0] ss:$12 sps:$4 sm:$0xff]   ;;  %v2527_v5 = vld [vmem:[%s3303_s0 + $0x120] ss:$12 sps:$4 sm:$0xff]  }
  0x17   :  { %883 = vmatprep.subr.bf16.mxu0 %v2584_v0  ;;  %2411 = vmatprep.subr.bf16.mxu1 %v2584_v0  ;;  %v2524_v3 = vld [vmem:[%s3303_s0 + $0x124] ss:$12 sps:$4 sm:$0xff]   ;;  %v2526_v4 = vld [vmem:[%s3303_s0 + $0xc8] ss:$12 sps:$4 sm:$0xff]   ;;  %v2528_v6 = vld [vmem:[%s3303_s0 + $0xe0] ss:$12 sps:$4 sm:$0xff]  }
  0x18   :  { %v2529_v7 = vld [vmem:[%s3303_s0 + $0x13c] ss:$12 sps:$4 sm:$0xff]   ;;  %v2531_v8 = vld [vmem:[%s3303_s0 + $0xf8] ss:$12 sps:$4 sm:$0xff]  }
  0x1a   :  { %884 = vmatpush1.bf16.msra.mxu0 %v2444_v9  ;;  %2427 = vmatpush1.bf16.msra.mxu1 %v2444_v9  ;;  %v2532_v9 = vld [vmem:[%s3303_s0 + $0x138] ss:$12 sps:$4 sm:$0xff]  }
  0x1b   :  { %885 = vmatprep.subr.bf16.mxu0 %v2584_v0  ;;  %2412 = vmatprep.subr.bf16.mxu1 %v2584_v0 }
  0x1e   :  { %886 = vmatpush1.bf16.msra.mxu0 %v2445_v10  ;;  %2428 = vmatpush1.bf16.msra.mxu1 %v2445_v10  ;;  %v2533_v10 = vld [vmem:[%s3303_s0 + $0x110] ss:$12 sps:$4 sm:$0xff]  }
  0x1f   :  { %887 = vmatprep.subr.bf16.mxu0 %v2584_v0  ;;  %2413 = vmatprep.subr.bf16.mxu1 %v2584_v0 }
  0x22   :  { %888 = vmatpush1.bf16.msra.mxu0 %v2446_v11  ;;  %2429 = vmatpush1.bf16.msra.mxu1 %v2446_v11  ;;  %v2534_v11 = vld [vmem:[%s3303_s0 + $0x154] ss:$12 sps:$4 sm:$0xff]  }
  0x23   :  { %889 = vmatprep.subr.bf16.mxu0 %v2584_v0  ;;  %2414 = vmatprep.subr.bf16.mxu1 %v2584_v0 }
  0x26   :  { %890 = vmatpush1.bf16.msra.mxu0 %v2447_v12  ;;  %2430 = vmatpush1.bf16.msra.mxu1 %v2447_v12  ;;  %v2536_v12 = vld [vmem:[%s3303_s0 + $0x128] ss:$12 sps:$4 sm:$0xff]  }
  0x27   :  { %891 = vmatprep.subr.bf16.mxu0 %v2584_v0  ;;  %2415 = vmatprep.subr.bf16.mxu1 %v2584_v0 }
  0x2a   :  { %892 = vmatpush1.bf16.msra.mxu0 %v2448_v13  ;;  %2431 = vmatpush1.bf16.msra.mxu1 %v2448_v13  ;;  %v2537_v13 = vld [vmem:[%s3303_s0 + $0x150] ss:$12 sps:$4 sm:$0xff]  }
  0x2b   :  { %893 = vmatprep.subr.bf16.mxu0 %v2584_v0  ;;  %2416 = vmatprep.subr.bf16.mxu1 %v2584_v0 }
  0x2e   :  { %894 = vmatpush1.bf16.msra.mxu0 %v2449_v14  ;;  %2432 = vmatpush1.bf16.msra.mxu1 %v2449_v14  ;;  %v2538_v14 = vld [vmem:[%s3303_s0 + $0x140] ss:$12 sps:$4 sm:$0xff]  }
  0x2f   :  { %895 = vmatprep.subr.bf16.mxu0 %v2584_v0  ;;  %2417 = vmatprep.subr.bf16.mxu1 %v2584_v0 }
  0x32   :  { %896 = vmatpush1.bf16.msra.mxu0 %v2450_v15  ;;  %2433 = vmatpush1.bf16.msra.mxu1 %v2450_v15  ;;  %v2539_v15 = vld [vmem:[%s3303_s0 + $0x16c] ss:$12 sps:$4 sm:$0xff]  }
  0x33   :  { %897 = vmatprep.subr.bf16.mxu0 %v2584_v0  ;;  %2418 = vmatprep.subr.bf16.mxu1 %v2584_v0 }
  0x36   :  { %898 = vmatpush1.bf16.msra.mxu0 %v2451_v16  ;;  %2434 = vmatpush1.bf16.msra.mxu1 %v2451_v16  ;;  %v2541_v16 = vld [vmem:[%s3303_s0 + $0x158] ss:$12 sps:$4 sm:$0xff]  }
  0x37   :  { %899 = vmatprep.subr.bf16.mxu0 %v2584_v0  ;;  %2419 = vmatprep.subr.bf16.mxu1 %v2584_v0 }
  0x3a   :  { %900 = vmatpush1.bf16.msra.mxu0 %v2452_v17  ;;  %2435 = vmatpush1.bf16.msra.mxu1 %v2452_v17  ;;  %v2542_v17 = vld [vmem:[%s3303_s0 + $0x168] ss:$12 sps:$4 sm:$0xff]  }
  0x3b   :  { %901 = vmatprep.subr.bf16.mxu0 %v2584_v0  ;;  %2420 = vmatprep.subr.bf16.mxu1 %v2584_v0  ;;  %v2521_v0 = vld [vmem:[%s3303_s0 + $0x98] ss:$12 sps:$4 sm:$0xff]  }
  0x3e   :  { %902 = vmatpush1.bf16.msra.mxu0 %v2453_v18  ;;  %2436 = vmatpush1.bf16.msra.mxu1 %v2453_v18  ;;  %v2543_v18 = vld [vmem:[%s3303_s0 + $0x170] ss:$12 sps:$4 sm:$0xff]  }
  0x3f   :  { %2337 = vmatprep.subr.bf16.mxu1 %v2460_v19 }
  0x41   :  { %904 = vmatmul.mubr.bf16.vlgmr.msra.gmra.mrb[0].mxu0 %v2454_v20  ;;  %1096 = vmatmul.mubr.bf16.vlgmr.msra.gmra.mrb[0].mxu1 %v2457_v21  ;;  %v2546_v20 = vld [vmem:[%s3303_s0 + $0x188] ss:$12 sps:$4 sm:$0xff]   ;;  %v2547_v21 = vld [vmem:[%s3303_s0 + $0x180] ss:$12 sps:$4 sm:$0xff]  }
  0x42   :  { %2338 = vmatpush3.bf16.msra.mxu1 %v2460_v19  ;;  %911 = vmatprep.mubr.bf16.mxu0 %v2461_v22  ;;  %v2544_v19 = vld [vmem:[%s3303_s0 + $0x184] ss:$12 sps:$4 sm:$0xff]   ;;  %v2548_v22 = vld [vmem:[%s3303_s0 + $0x1a0] ss:$12 sps:$4 sm:$0xff]  }
  0x43   :  { %1103 = vmatprep.mubr.bf16.mxu1 %v2463_v23  ;;  %2339 = vmatprep.subr.bf16.mxu1 %v2485_v24  ;;  %v2549_v23 = vld [vmem:[%s3303_s0 + $0x19c] ss:$12 sps:$4 sm:$0xff]  }
  0x46   :  { %2340 = vmatpush3.bf16.msra.mxu1 %v2485_v24  ;;  %v2551_v24 = vld [vmem:[%s3303_s0 + $0x1b8] ss:$12 sps:$4 sm:$0xff]  }
  0x49   :  { %912 = vmatmul.mubr.bf16.gmra.mrb[4].mxu0 %v2465_v25  ;;  %1104 = vmatmul.mubr.bf16.gmra.mrb[4].mxu1 %v2466_v26  ;;  %v2552_v25 = vld [vmem:[%s3303_s0 + $0x198] ss:$12 sps:$4 sm:$0xff]   ;;  %v2553_v26 = vld [vmem:[%s3303_s0 + $0x1d0] ss:$12 sps:$4 sm:$0xff]  }
  0x4a   :  { %919 = vmatprep.mubr.bf16.mxu0 %v2467_v27  ;;  %1111 = vmatprep.mubr.bf16.mxu1 %v2469_v28  ;;  %v2554_v27 = vld [vmem:[%s3303_s0 + $0x1b4] ss:$12 sps:$4 sm:$0xff]  }
  0x4b   :  { %v2556_v28 = vld [vmem:[%s3303_s0 + $0x1e8] ss:$12 sps:$4 sm:$0xff]  }
  0x51   :  { %920 = vmatmul.mubr.bf16.gmra.mrb[8].mxu0 %v2471_v29  ;;  %1112 = vmatmul.mubr.bf16.gmra.mrb[8].mxu1 %v2472_v30  ;;  %v2557_v29 = vld [vmem:[%s3303_s0 + $0x1b0] ss:$12 sps:$4 sm:$0xff]   ;;  %v2558_v30 = vld [vmem:[%s3303_s0 + $0x200] ss:$12 sps:$4 sm:$0xff]  }
  0x52   :  { %927 = vmatprep.mubr.bf16.mxu0 %v2473_v31  ;;  %1119 = vmatprep.mubr.bf16.mxu1 %v2475_v32  ;;  %v2559_v31 = vld [vmem:[%s3303_s0 + $0x1cc] ss:$12 sps:$4 sm:$0xff]  }
  0x53   :  { %v2561_v32 = vld [vmem:[%s3303_s0 + $0x218] ss:$12 sps:$4 sm:$0xff]  }
  0x59   :  { %928 = vmatmul.mubr.bf16.gmra.mrb[12].mxu0 %v2477_v33  ;;  %1120 = vmatmul.mubr.bf16.gmra.mrb[12].mxu1 %v2478_v34  ;;  %v2562_v33 = vld [vmem:[%s3303_s0 + $0x1c8] ss:$12 sps:$4 sm:$0xff]   ;;  %v2563_v34 = vld [vmem:[%s3303_s0 + $0x230] ss:$12 sps:$4 sm:$0xff]  }
  0x5a   :  { %935 = vmatprep.mubr.bf16.mxu0 %v2479_v35  ;;  %1127 = vmatprep.mubr.bf16.mxu1 %v2481_v36  ;;  %v2564_v35 = vld [vmem:[%s3303_s0 + $0x1e4] ss:$12 sps:$4 sm:$0xff]   ;;  %v2566_v36 = vld [vmem:[%s3303_s0 + $0x248] ss:$12 sps:$4 sm:$0xff]  }
  0x61   :  { %936 = vmatmul.mubr.bf16.gmra.mrb[16].mxu0 %v2483_v37  ;;  %1128 = vmatmul.mubr.bf16.gmra.mrb[16].mxu1 %v2484_v38  ;;  %v2567_v37 = vld [vmem:[%s3303_s0 + $0x1e0] ss:$12 sps:$4 sm:$0xff]  }
  0x62   :  { %943 = vmatprep.mubr.bf16.mxu0 %v2486_v39  ;;  %1135 = vmatprep.mubr.bf16.mxu1 %v2488_v40  ;;  %v2568_v38 = vld [vmem:[%s3303_s0 + $0x260] ss:$12 sps:$4 sm:$0xff]   ;;  %v2569_v39 = vld [vmem:[%s3303_s0 + $0x1fc] ss:$12 sps:$4 sm:$0xff]   ;;  %v2571_v40 = vld [vmem:[%s3303_s0 + $0x278] ss:$12 sps:$4 sm:$0xff]  }
  0x69   :  { %944 = vmatmul.mubr.bf16.gmra.mrb[20].mxu0 %v2490_v41  ;;  %1136 = vmatmul.mubr.bf16.gmra.mrb[20].mxu1 %v2491_v42  ;;  %v2572_v41 = vld [vmem:[%s3303_s0 + $0x1f8] ss:$12 sps:$4 sm:$0xff]   ;;  %v2573_v42 = vld [vmem:[%s3303_s0 + $0x290] ss:$12 sps:$4 sm:$0xff]  }
  0x6a   :  { %951 = vmatprep.mubr.bf16.mxu0 %v2492_v43  ;;  %1143 = vmatprep.mubr.bf16.mxu1 %v2494_v44  ;;  %v2574_v43 = vld [vmem:[%s3303_s0 + $0x214] ss:$12 sps:$4 sm:$0xff]  }
  0x6b   :  { %v2576_v44 = vld [vmem:[%s3303_s0 + $0x2a8] ss:$12 sps:$4 sm:$0xff]  }
  0x71   :  { %952 = vmatmul.mubr.bf16.gmra.mrb[24].mxu0 %v2496_v45  ;;  %1144 = vmatmul.mubr.bf16.gmra.mrb[24].mxu1 %v2497_v46  ;;  %v2577_v45 = vld [vmem:[%s3303_s0 + $0x210] ss:$12 sps:$4 sm:$0xff]   ;;  %v2578_v46 = vld [vmem:[%s3303_s0 + $0x2c0] ss:$12 sps:$4 sm:$0xff]  }
  0x72   :  { %959 = vmatprep.mubr.bf16.mxu0 %v2498_v47  ;;  %1151 = vmatprep.mubr.bf16.mxu1 %v2500_v48  ;;  %v2579_v47 = vld [vmem:[%s3303_s0 + $0x22c] ss:$12 sps:$4 sm:$0xff]  }
  0x73   :  { %v2581_v48 = vld [vmem:[%s3303_s0 + $0x2d8] ss:$12 sps:$4 sm:$0xff]  }
  0x79   :  { %960 = vmatmul.mubr.bf16.gmra.mrb[28].mxu0 %v2502_v49  ;;  %1152 = vmatmul.mubr.bf16.gmra.mrb[28].mxu1 %v2503_v50  ;;  %v2582_v49 = vld [vmem:[%s3303_s0 + $0x228] ss:$12 sps:$4 sm:$0xff]   ;;  %v2583_v50 = vld [vmem:[%s3303_s0 + $0x2f0] ss:$12 sps:$4 sm:$0xff]  }
  0x7a   :  { %967 = vmatprep.mubr.bf16.mxu0 %v2504_v51  ;;  %2341 = vmatprep.mubr.msk.bf16.mxu1 %vm774_vm0, %v2506_v52 }
  0x81   :  { %968 = vmatmul.mubr.bf16.gmra.mrb[32].mxu0 %v2507_v53  ;;  %2342 = vmatmul.mubr.msk.bf16.vlgmr.msra.gmra.mrb[32].mxu1 %vm774_vm0, %v2508_v54 }
  0x82   :  { %975 = vmatprep.mubr.bf16.mxu0 %v2509_v55  ;;  %2345 = vmatprep.mubr.msk.bf16.mxu1 %vm774_vm0, %v2511_v56 }
  0x89   :  { %976 = vmatmul.mubr.bf16.gmra.mrb[36].mxu0 %v2512_v57  ;;  %2346 = vmatmul.mubr.msk.bf16.gmra.mrb[36].mxu1 %vm774_vm0, %v2513_v58 }
  0x8a   :  { %983 = vmatprep.mubr.bf16.mxu0 %v2514_v59  ;;  %2349 = vmatprep.mubr.msk.bf16.mxu1 %vm774_vm0, %v2516_v60 }
  0x91   :  { %984 = vmatmul.mubr.bf16.gmra.mrb[40].mxu0 %v2517_v61  ;;  %2350 = vmatmul.mubr.msk.bf16.gmra.mrb[40].mxu1 %vm774_vm0, %v2518_v62 }
  0x92   :  { %991 = vmatprep.mubr.bf16.mxu0 %v2519_v63  ;;  %2353 = vmatprep.mubr.msk.bf16.mxu1 %vm774_vm0, %v2521_v0 }
  0x99   :  { %992 = vmatmul.mubr.bf16.gmra.mrb[44].mxu0 %v2522_v1  ;;  %2354 = vmatmul.mubr.msk.bf16.gmra.mrb[44].mxu1 %vm774_vm0, %v2523_v2 }
  0x9a   :  { %999 = vmatprep.mubr.bf16.mxu0 %v2524_v3  ;;  %2357 = vmatprep.mubr.msk.bf16.mxu1 %vm774_vm0, %v2526_v4 }
  0xa1   :  { %1000 = vmatmul.mubr.bf16.gmra.mrb[48].mxu0 %v2527_v5  ;;  %2358 = vmatmul.mubr.msk.bf16.gmra.mrb[48].mxu1 %vm774_vm0, %v2528_v6 }
  0xa2   :  { %1007 = vmatprep.mubr.bf16.mxu0 %v2529_v7  ;;  %2361 = vmatprep.mubr.msk.bf16.mxu1 %vm774_vm0, %v2531_v8 }
  0xa9   :  { %1008 = vmatmul.mubr.bf16.gmra.mrb[52].mxu0 %v2532_v9  ;;  %2362 = vmatmul.mubr.msk.bf16.gmra.mrb[52].mxu1 %vm774_vm0, %v2533_v10 }
  0xaa   :  { %1015 = vmatprep.mubr.bf16.mxu0 %v2534_v11  ;;  %2365 = vmatprep.mubr.msk.bf16.mxu1 %vm774_vm0, %v2536_v12 }
  0xb1   :  { %1016 = vmatmul.mubr.bf16.gmra.mrb[56].mxu0 %v2537_v13  ;;  %2366 = vmatmul.mubr.msk.bf16.gmra.mrb[56].mxu1 %vm774_vm0, %v2538_v14 }
  0xb2   :  { %1023 = vmatprep.mubr.bf16.mxu0 %v2539_v15  ;;  %2369 = vmatprep.mubr.msk.bf16.mxu1 %vm774_vm0, %v2541_v16 }
  0xb9   :  { %1024 = vmatmul.mubr.bf16.gmra.mrb[60].mxu0 %v2542_v17  ;;  %2370 = vmatmul.mubr.msk.bf16.gmra.mrb[60].mxu1 %vm774_vm0, %v2543_v18 }
  0xba   :  { %1031 = vmatprep.mubr.bf16.mxu0 %v2544_v19  ;;  %2373 = vmatprep.mubr.msk.bf16.mxu1 %vm774_vm0, %v2546_v20 }
  0xc1   :  { %1032 = vmatmul.mubr.bf16.gmra.mrb[64].mxu0 %v2547_v21  ;;  %2374 = vmatmul.mubr.msk.bf16.gmra.mrb[64].mxu1 %vm774_vm0, %v2548_v22 }
  0xc2   :  { %1039 = vmatprep.mubr.bf16.mxu0 %v2549_v23  ;;  %2377 = vmatprep.mubr.msk.bf16.mxu1 %vm774_vm0, %v2551_v24 }
  0xc9   :  { %1040 = vmatmul.mubr.bf16.gmra.mrb[68].mxu0 %v2552_v25  ;;  %2378 = vmatmul.mubr.msk.bf16.gmra.mrb[68].mxu1 %vm774_vm0, %v2553_v26 }
  0xca   :  { %1047 = vmatprep.mubr.bf16.mxu0 %v2554_v27  ;;  %2381 = vmatprep.mubr.msk.bf16.mxu1 %vm774_vm0, %v2556_v28 }
  0xd1   :  { %1048 = vmatmul.mubr.bf16.gmra.mrb[72].mxu0 %v2557_v29  ;;  %2382 = vmatmul.mubr.msk.bf16.gmra.mrb[72].mxu1 %vm774_vm0, %v2558_v30 }
  0xd2   :  { %1055 = vmatprep.mubr.bf16.mxu0 %v2559_v31  ;;  %2385 = vmatprep.mubr.msk.bf16.mxu1 %vm774_vm0, %v2561_v32 }
  0xd9   :  { %1056 = vmatmul.mubr.bf16.gmra.mrb[76].mxu0 %v2562_v33  ;;  %2386 = vmatmul.mubr.msk.bf16.gmra.mrb[76].mxu1 %vm774_vm0, %v2563_v34 }
  0xda   :  { %1063 = vmatprep.mubr.bf16.mxu0 %v2564_v35  ;;  %2389 = vmatprep.mubr.msk.bf16.mxu1 %vm774_vm0, %v2566_v36 }
  0xe1   :  { %1064 = vmatmul.mubr.bf16.gmra.mrb[80].mxu0 %v2567_v37  ;;  %2390 = vmatmul.mubr.msk.bf16.gmra.mrb[80].mxu1 %vm774_vm0, %v2568_v38 }
  0xe2   :  { %1071 = vmatprep.mubr.bf16.mxu0 %v2569_v39  ;;  %2393 = vmatprep.mubr.msk.bf16.mxu1 %vm774_vm0, %v2571_v40 }
  0xe9   :  { %1072 = vmatmul.mubr.bf16.gmra.mrb[84].mxu0 %v2572_v41  ;;  %2394 = vmatmul.mubr.msk.bf16.gmra.mrb[84].mxu1 %vm774_vm0, %v2573_v42 }
  0xea   :  { %1079 = vmatprep.mubr.bf16.mxu0 %v2574_v43  ;;  %2397 = vmatprep.mubr.msk.bf16.mxu1 %vm774_vm0, %v2576_v44 }
  0xf1   :  { %1080 = vmatmul.mubr.bf16.gmra.mrb[88].mxu0 %v2577_v45  ;;  %2398 = vmatmul.mubr.msk.bf16.gmra.mrb[88].mxu1 %vm774_vm0, %v2578_v46 }
  0xf2   :  { %1087 = vmatprep.mubr.bf16.mxu0 %v2579_v47  ;;  %2401 = vmatprep.mubr.msk.bf16.mxu1 %vm774_vm0, %v2581_v48 }
  0xf9   :  { %1088 = vmatmul.mubr.bf16.gmra.mrb[92].mxu0 %v2582_v49  ;;  %2402 = vmatmul.mubr.msk.bf16.gmra.mrb[92].mxu1 %vm774_vm0, %v2583_v50 }
 0x114   :  { %v3011_v51 = vpop.f32.mrb[0].mxu0  ;;  %v3013_v52 = vpop.f32.mrb[0].mxu1 }
 0x115   :  { %v907_v53 = vpop.f32.mrb[1].mxu0  ;;  %v1099_v54 = vpop.f32.mrb[1].mxu1 }
 0x116   :  { %v3015_v55 = vpop.f32.mrb[2].mxu0  ;;  %v3017_v56 = vpop.f32.mrb[2].mxu1  ;;  %v3074_v53 = vld [vmem:[%s3304_s2] ss:$0 sm:$0xff] }
 0x117   :  { %v910_v57 = vpop.f32.mrb[3].mxu0  ;;  %v1102_v58 = vpop.f32.mrb[3].mxu1 }
 0x118   :  { %v906_v57 = vadd.f32 %v3074_v53, %v3011_v51 }
 0x11c   :  { %v913_v59 = vpop.f32.mrb[4].mxu0  ;;  %v3019_v60 = vpop.f32.mrb[4].mxu1 }
 0x11d   :  { %v915_v61 = vpop.f32.mrb[5].mxu0  ;;  %v1107_v62 = vpop.f32.mrb[5].mxu1  ;;  %v914_v54 = vadd.f32 %v3074_v53, %v913_v59 }
 0x11e   :  { %v916_v63 = vpop.f32.mrb[6].mxu0  ;;  %v3021_v0 = vpop.f32.mrb[6].mxu1 }
 0x11f   :  { %v918_v1 = vpop.f32.mrb[7].mxu0  ;;  %v1110_v2 = vpop.f32.mrb[7].mxu1  ;;  %v917_v62 = vadd.f32 %v3074_v53, %v916_v63 }
 0x124   :  { %v3023_v3 = vpop.f32.mrb[8].mxu0  ;;  %v3025_v4 = vpop.f32.mrb[8].mxu1 }
 0x125   :  { %v923_v5 = vpop.f32.mrb[9].mxu0  ;;  %v1115_v6 = vpop.f32.mrb[9].mxu1 }
 0x126   :  { %v3027_v7 = vpop.f32.mrb[10].mxu0  ;;  %v3029_v8 = vpop.f32.mrb[10].mxu1  ;;  %v909_v6 = vadd.f32 %v3074_v53, %v3015_v55 }
 0x127   :  { %v926_v9 = vpop.f32.mrb[11].mxu0  ;;  %v1118_v10 = vpop.f32.mrb[11].mxu1 }
 0x12c   :  { %v3031_v11 = vpop.f32.mrb[12].mxu0  ;;  %v3033_v12 = vpop.f32.mrb[12].mxu1 }
 0x12d   :  { %v931_v13 = vpop.f32.mrb[13].mxu0  ;;  %v1123_v14 = vpop.f32.mrb[13].mxu1  ;;  %v930_v63 = vadd.f32 %v3074_v53, %v3031_v11  ;;  %v925_v11 = vadd.f32 %v3074_v53, %v3027_v7 }
 0x12e   :  { %v3035_v15 = vpop.f32.mrb[14].mxu0  ;;  %v3037_v16 = vpop.f32.mrb[14].mxu1 }
 0x12f   :  { %v934_v17 = vpop.f32.mrb[15].mxu0  ;;  %v1126_v18 = vpop.f32.mrb[15].mxu1 }
 0x134   :  { %v3039_v19 = vpop.f32.mrb[16].mxu0  ;;  %v3041_v20 = vpop.f32.mrb[16].mxu1 }
 0x135   :  { %v939_v21 = vpop.f32.mrb[17].mxu0  ;;  %v1131_v22 = vpop.f32.mrb[17].mxu1 }
 0x136   :  { %v3043_v23 = vpop.f32.mrb[18].mxu0  ;;  %v3045_v24 = vpop.f32.mrb[18].mxu1 }
 0x137   :  { %v942_v25 = vpop.f32.mrb[19].mxu0  ;;  %v1134_v26 = vpop.f32.mrb[19].mxu1 }
 0x13c   :  { %v3047_v27 = vpop.f32.mrb[20].mxu0  ;;  %v3049_v28 = vpop.f32.mrb[20].mxu1 }
 0x13d   :  { %v947_v29 = vpop.f32.mrb[21].mxu0  ;;  %v1139_v30 = vpop.f32.mrb[21].mxu1 }
 0x13e   :  { %v3051_v31 = vpop.f32.mrb[22].mxu0  ;;  %v3053_v32 = vpop.f32.mrb[22].mxu1  ;;  %v922_v29 = vadd.f32 %v3074_v53, %v3023_v3 }
 0x13f   :  { %v950_v33 = vpop.f32.mrb[23].mxu0  ;;  %v1142_v34 = vpop.f32.mrb[23].mxu1 }
 0x140   :  { %v933_v34 = vadd.f32 %v3074_v53, %v3035_v15 }
 0x144   :  { %v3055_v35 = vpop.f32.mrb[24].mxu0  ;;  %v3057_v36 = vpop.f32.mrb[24].mxu1 }
 0x145   :  { %v955_v37 = vpop.f32.mrb[25].mxu0  ;;  %v1147_v38 = vpop.f32.mrb[25].mxu1 }
 0x146   :  { %v3059_v39 = vpop.f32.mrb[26].mxu0  ;;  %v3061_v40 = vpop.f32.mrb[26].mxu1 }
 0x147   :  { %v958_v41 = vpop.f32.mrb[27].mxu0  ;;  %v1150_v42 = vpop.f32.mrb[27].mxu1 }
 0x14c   :  { %v3063_v43 = vpop.f32.mrb[28].mxu0  ;;  %v3065_v44 = vpop.f32.mrb[28].mxu1 }
 0x14d   :  { %v963_v45 = vpop.f32.mrb[29].mxu0  ;;  %v1155_v46 = vpop.f32.mrb[29].mxu1 }
 0x14e   :  { %v3067_v47 = vpop.f32.mrb[30].mxu0  ;;  %v3069_v48 = vpop.f32.mrb[30].mxu1 }
 0x14f   :  { %v966_v49 = vpop.f32.mrb[31].mxu0  ;;  %v1158_v50 = vpop.f32.mrb[31].mxu1 }
 0x154   :  { %v3079_v58 = vpop.f32.mrb[32].mxu0  ;;  %v2343_v61 = vpop.f32.mrb[32].mxu1 }
 0x155   :  { %v1203_v1 = vadd.f32 %v2343_v61, %v914_v54  ;;  %v971_v2 = vpop.f32.mrb[33].mxu0  ;;  %v1194_v5 = vpop.f32.mrb[33].mxu1 }
 0x156   :  { %v1195_v9 = vadd.f32 %v1194_v5, %v906_v57  ;;  %v3084_v10 = vpop.f32.mrb[34].mxu0  ;;  %v2344_v13 = vpop.f32.mrb[34].mxu1  ;;  %v938_v2 = vadd.f32 %v3074_v53, %v3039_v19 }
 0x157   :  { %v1206_v14 = vadd.f32 %v2344_v13, %v917_v62  ;;  %v974_v59 = vpop.f32.mrb[35].mxu0  ;;  %v1197_v17 = vpop.f32.mrb[35].mxu1  ;;  %v1451_v51 = vmax.f32 %v1203_v1, 0.0  ;;  %v946_v1 = vadd.f32 %v3074_v53, %v3047_v27  ;;  %v949_v13 = vadd.f32 %v3074_v53, %v3051_v31 }
 0x158   :  { %v1198_v18 = vadd.f32 %v1197_v17, %v909_v6  ;;  %v1449_v22 = vmax.f32 %v1195_v9, 0.0  ;;  %v941_v27 = vadd.f32 %v3074_v53, %v3043_v23 }
 0x159   :  { %v1452_v21 = vmax.f32 %v1206_v14, 0.0 }
 0x15a   :  { %v1450_v25 = vmax.f32 %v1198_v18, 0.0 }
 0x15b   :  { %v2120_v26 = vpack.c.bf16 %v1452_v21, %v1451_v51 }
 0x15c   :  { %v2115_v55 = vpack.c.bf16 %v1450_v25, %v1449_v22  ;;  %v3090_v30 = vpop.f32.mrb[36].mxu0  ;;  %v2347_v33 = vpop.f32.mrb[36].mxu1 }
 0x15d   :  { %2272 = vst [vmem:[%s3305_s3 + $0x8] sm:$0xff] %v2120_v26   ;;  %v1219_v37 = vadd.f32 %v2347_v33, %v930_v63  ;;  %v979_v38 = vpop.f32.mrb[37].mxu0  ;;  %v1210_v41 = vpop.f32.mrb[37].mxu1  ;;  %v962_v33 = vadd.f32 %v3074_v53, %v3063_v43  ;;  %v957_v43 = vadd.f32 %v3074_v53, %v3059_v39  ;;  %v970_v39 = vadd.f32 %v3074_v53, %v3079_v58 }
 0x15e   :  { %2116 = vst [vmem:[%s3305_s3] sm:$0xff] %v2115_v55   ;;  %v1211_v3 = vadd.f32 %v1210_v41, %v922_v29  ;;  %v3102_v42 = vpop.f32.mrb[38].mxu0  ;;  %v2348_v45 = vpop.f32.mrb[38].mxu1 }
 0x15f   :  { %v1222_v46 = vadd.f32 %v2348_v45, %v933_v34  ;;  %v982_v15 = vpop.f32.mrb[39].mxu0  ;;  %v1213_v49 = vpop.f32.mrb[39].mxu1  ;;  %v1455_v54 = vmax.f32 %v1219_v37, 0.0  ;;  %v954_v34 = vadd.f32 %v3074_v53, %v3055_v35 }
 0x160   :  { %v1214_v50 = vadd.f32 %v1213_v49, %v925_v11  ;;  %v1453_v61 = vmax.f32 %v1211_v3, 0.0  ;;  %v965_v11 = vadd.f32 %v3074_v53, %v3067_v47 }
 0x161   :  { %v1456_v57 = vmax.f32 %v1222_v46, 0.0 }
 0x162   :  { %v1454_v62 = vmax.f32 %v1214_v50, 0.0 }
 0x163   :  { %v2130_v7 = vpack.c.bf16 %v1456_v57, %v1455_v54 }
 0x164   :  { %v2125_v5 = vpack.c.bf16 %v1454_v62, %v1453_v61  ;;  %v3108_v6 = vpop.f32.mrb[40].mxu0  ;;  %v2351_v9 = vpop.f32.mrb[40].mxu1 }
 0x165   :  { %2274 = vst [vmem:[%s3305_s3 + $0x18] sm:$0xff] %v2130_v7   ;;  %v1235_v14 = vadd.f32 %v2351_v9, %v946_v1  ;;  %v987_v59 = vpop.f32.mrb[41].mxu0  ;;  %v1226_v17 = vpop.f32.mrb[41].mxu1 }
 0x166   :  { %2273 = vst [vmem:[%s3305_s3 + $0x10] sm:$0xff] %v2125_v5   ;;  %v1227_v19 = vadd.f32 %v1226_v17, %v938_v2  ;;  %v3120_v18 = vpop.f32.mrb[42].mxu0  ;;  %v2352_v51 = vpop.f32.mrb[42].mxu1  ;;  %v978_v2 = vadd.f32 %v3074_v53, %v3090_v30  ;;  %v981_v59 = vadd.f32 %v3074_v53, %v3102_v42  ;;  %v973_v30 = vadd.f32 %v3074_v53, %v3084_v10 }
 0x167   :  { %v1238_v21 = vadd.f32 %v2352_v51, %v949_v13  ;;  %v990_v31 = vpop.f32.mrb[43].mxu0  ;;  %v1229_v22 = vpop.f32.mrb[43].mxu1  ;;  %v1459_v63 = vmax.f32 %v1235_v14, 0.0  ;;  %v986_v10 = vadd.f32 %v3074_v53, %v3108_v6 }
 0x168   :  { %v1230_v25 = vadd.f32 %v1229_v22, %v941_v27  ;;  %v1457_v29 = vmax.f32 %v1227_v19, 0.0 }
 0x169   :  { %v1460_v26 = vmax.f32 %v1238_v21, 0.0 }
 0x16a   :  { %v1458_v55 = vmax.f32 %v1230_v25, 0.0 }
 0x16b   :  { %v2140_v23 = vpack.c.bf16 %v1460_v26, %v1459_v63 }
 0x16c   :  { %v2135_v37 = vpack.c.bf16 %v1458_v55, %v1457_v29  ;;  %v993_v38 = vpop.f32.mrb[44].mxu0  ;;  %v2355_v41 = vpop.f32.mrb[44].mxu1 }
 0x16d   :  { %2276 = vst [vmem:[%s3305_s3 + $0x28] sm:$0xff] %v2140_v23   ;;  %v1251_v3 = vadd.f32 %v2355_v41, %v962_v33  ;;  %v995_v45 = vpop.f32.mrb[45].mxu0  ;;  %v1242_v46 = vpop.f32.mrb[45].mxu1  ;;  %v994_v33 = vadd.f32 %v3074_v53, %v993_v38 }
 0x16e   :  { %2275 = vst [vmem:[%s3305_s3 + $0x20] sm:$0xff] %v2135_v37   ;;  %v1243_v35 = vadd.f32 %v1242_v46, %v954_v34  ;;  %v996_v15 = vpop.f32.mrb[46].mxu0  ;;  %v2356_v49 = vpop.f32.mrb[46].mxu1 }
 0x16f   :  { %v1254_v50 = vadd.f32 %v2356_v49, %v965_v11  ;;  %v998_v54 = vpop.f32.mrb[47].mxu0  ;;  %v1245_v47 = vpop.f32.mrb[47].mxu1  ;;  %v1463_v61 = vmax.f32 %v1251_v3, 0.0  ;;  %v997_v11 = vadd.f32 %v3074_v53, %v996_v15 }
 0x170   :  { %v1246_v57 = vadd.f32 %v1245_v47, %v957_v43  ;;  %v1461_v1 = vmax.f32 %v1243_v35, 0.0  ;;  %v989_v43 = vadd.f32 %v3074_v53, %v3120_v18 }
 0x171   :  { %v1464_v62 = vmax.f32 %v1254_v50, 0.0 }
 0x172   :  { %v1462_v7 = vmax.f32 %v1246_v57, 0.0 }
 0x173   :  { %v2150_v5 = vpack.c.bf16 %v1464_v62, %v1463_v61 }
 0x174   :  { %v2145_v9 = vpack.c.bf16 %v1462_v7, %v1461_v1  ;;  %v1001_v13 = vpop.f32.mrb[48].mxu0  ;;  %v2359_v14 = vpop.f32.mrb[48].mxu1 }
 0x175   :  { %2278 = vst [vmem:[%s3305_s3 + $0x38] sm:$0xff] %v2150_v5   ;;  %v1267_v17 = vadd.f32 %v2359_v14, %v978_v2  ;;  %v1003_v27 = vpop.f32.mrb[49].mxu0  ;;  %v1258_v19 = vpop.f32.mrb[49].mxu1  ;;  %v1002_v18 = vadd.f32 %v3074_v53, %v1001_v13 }
 0x176   :  { %2277 = vst [vmem:[%s3305_s3 + $0x30] sm:$0xff] %v2145_v9   ;;  %v1259_v58 = vadd.f32 %v1258_v19, %v970_v39  ;;  %v1004_v51 = vpop.f32.mrb[50].mxu0  ;;  %v2360_v21 = vpop.f32.mrb[50].mxu1 }
 0x177   :  { %v1270_v31 = vadd.f32 %v2360_v21, %v981_v59  ;;  %v1006_v22 = vpop.f32.mrb[51].mxu0  ;;  %v1261_v42 = vpop.f32.mrb[51].mxu1  ;;  %v1467_v63 = vmax.f32 %v1267_v17, 0.0  ;;  %v1005_v27 = vadd.f32 %v3074_v53, %v1004_v51 }
 0x178   :  { %v1262_v25 = vadd.f32 %v1261_v42, %v973_v30  ;;  %v1465_v29 = vmax.f32 %v1259_v58, 0.0 }
 0x179   :  { %v1468_v26 = vmax.f32 %v1270_v31, 0.0 }
 0x17a   :  { %v1466_v55 = vmax.f32 %v1262_v25, 0.0 }
 0x17b   :  { %v2160_v23 = vpack.c.bf16 %v1468_v26, %v1467_v63 }
 0x17c   :  { %v2155_v34 = vpack.c.bf16 %v1466_v55, %v1465_v29  ;;  %v1009_v37 = vpop.f32.mrb[52].mxu0  ;;  %v2363_v41 = vpop.f32.mrb[52].mxu1 }
 0x17d   :  { %2280 = vst [vmem:[%s3305_s3 + $0x48] sm:$0xff] %v2160_v23   ;;  %v1283_v3 = vadd.f32 %v2363_v41, %v994_v33  ;;  %v1011_v45 = vpop.f32.mrb[53].mxu0  ;;  %v1274_v46 = vpop.f32.mrb[53].mxu1  ;;  %v1010_v1 = vadd.f32 %v3074_v53, %v1009_v37 }
 0x17e   :  { %2279 = vst [vmem:[%s3305_s3 + $0x40] sm:$0xff] %v2155_v34   ;;  %v1275_v6 = vadd.f32 %v1274_v46, %v986_v10  ;;  %v1012_v38 = vpop.f32.mrb[54].mxu0  ;;  %v2364_v35 = vpop.f32.mrb[54].mxu1 }
 0x17f   :  { %v1286_v49 = vadd.f32 %v2364_v35, %v997_v11  ;;  %v1014_v50 = vpop.f32.mrb[55].mxu0  ;;  %v1277_v15 = vpop.f32.mrb[55].mxu1  ;;  %v1471_v47 = vmax.f32 %v1283_v3, 0.0  ;;  %v1013_v9 = vadd.f32 %v3074_v53, %v1012_v38 }
 0x180   :  { %v1278_v54 = vadd.f32 %v1277_v15, %v989_v43  ;;  %v1469_v61 = vmax.f32 %v1275_v6, 0.0 }
 0x181   :  { %v1472_v57 = vmax.f32 %v1286_v49, 0.0 }
 0x182   :  { %v1470_v62 = vmax.f32 %v1278_v54, 0.0 }
 0x183   :  { %v2170_v7 = vpack.c.bf16 %v1472_v57, %v1471_v47 }
 0x184   :  { %v2165_v2 = vpack.c.bf16 %v1470_v62, %v1469_v61  ;;  %v1017_v5 = vpop.f32.mrb[56].mxu0  ;;  %v2367_v39 = vpop.f32.mrb[56].mxu1 }
 0x185   :  { %2282 = vst [vmem:[%s3305_s3 + $0x58] sm:$0xff] %v2170_v7   ;;  %v1299_v14 = vadd.f32 %v2367_v39, %v1010_v1  ;;  %v1019_v59 = vpop.f32.mrb[57].mxu0  ;;  %v1290_v17 = vpop.f32.mrb[57].mxu1  ;;  %v1018_v55 = vadd.f32 %v3074_v53, %v1017_v5 }
 0x186   :  { %2281 = vst [vmem:[%s3305_s3 + $0x50] sm:$0xff] %v2165_v2   ;;  %v1291_v19 = vadd.f32 %v1290_v17, %v1002_v18  ;;  %v1020_v13 = vpop.f32.mrb[58].mxu0  ;;  %v2368_v30 = vpop.f32.mrb[58].mxu1 }
 0x187   :  { %v1302_v58 = vadd.f32 %v2368_v30, %v1013_v9  ;;  %v1022_v21 = vpop.f32.mrb[59].mxu0  ;;  %v1293_v31 = vpop.f32.mrb[59].mxu1  ;;  %v1475_v42 = vmax.f32 %v1299_v14, 0.0  ;;  %v1021_v41 = vadd.f32 %v3074_v53, %v1020_v13 }
 0x188   :  { %v1294_v22 = vadd.f32 %v1293_v31, %v1005_v27  ;;  %v1473_v63 = vmax.f32 %v1291_v19, 0.0 }
 0x189   :  { %v1476_v25 = vmax.f32 %v1302_v58, 0.0 }
 0x18a   :  { %v1474_v26 = vmax.f32 %v1294_v22, 0.0 }
 0x18b   :  { %v2180_v29 = vpack.c.bf16 %v1476_v25, %v1475_v42 }
 0x18c   :  { %v2175_v33 = vpack.c.bf16 %v1474_v26, %v1473_v63  ;;  %v1025_v51 = vpop.f32.mrb[60].mxu0  ;;  %v2371_v23 = vpop.f32.mrb[60].mxu1 }
 0x18d   :  { %2284 = vst [vmem:[%s3305_s3 + $0x68] sm:$0xff] %v2180_v29   ;;  %v1026_v10 = vadd.f32 %v3074_v53, %v1025_v51  ;;  %v1027_v34 = vpop.f32.mrb[61].mxu0  ;;  %v1306_v37 = vpop.f32.mrb[61].mxu1 }
 0x18e   :  { %2283 = vst [vmem:[%s3305_s3 + $0x60] sm:$0xff] %v2175_v33   ;;  %v1307_v11 = vadd.f32 %v1306_v37, %v1018_v55  ;;  %v1028_v3 = vpop.f32.mrb[62].mxu0  ;;  %v2372_v45 = vpop.f32.mrb[62].mxu1 }
 0x18f   :  { %v1315_v46 = vadd.f32 %v2371_v23, %v1026_v10  ;;  %v1029_v43 = vadd.f32 %v3074_v53, %v1028_v3  ;;  %v1030_v6 = vpop.f32.mrb[63].mxu0  ;;  %v1309_v38 = vpop.f32.mrb[63].mxu1 }
 0x190   :  { %v1310_v35 = vadd.f32 %v1309_v38, %v1021_v41  ;;  %v1477_v50 = vmax.f32 %v1307_v11, 0.0 }
 0x191   :  { %v1318_v49 = vadd.f32 %v2372_v45, %v1029_v43  ;;  %v1479_v54 = vmax.f32 %v1315_v46, 0.0 }
 0x192   :  { %v1478_v15 = vmax.f32 %v1310_v35, 0.0 }
 0x193   :  { %v1480_v47 = vmax.f32 %v1318_v49, 0.0 }
 0x194   :  { %v2185_v57 = vpack.c.bf16 %v1478_v15, %v1477_v50  ;;  %v1033_v61 = vpop.f32.mrb[64].mxu0  ;;  %v2375_v62 = vpop.f32.mrb[64].mxu1 }
 0x195   :  { %v2190_v1 = vpack.c.bf16 %v1480_v47, %v1479_v54  ;;  %v1034_v7 = vadd.f32 %v3074_v53, %v1033_v61  ;;  %v1035_v18 = vpop.f32.mrb[65].mxu0  ;;  %v1322_v2 = vpop.f32.mrb[65].mxu1 }
 0x196   :  { %2285 = vst [vmem:[%s3305_s3 + $0x70] sm:$0xff] %v2185_v57   ;;  %v1036_v5 = vpop.f32.mrb[66].mxu0  ;;  %v2376_v39 = vpop.f32.mrb[66].mxu1 }
 0x197   :  { %2286 = vst [vmem:[%s3305_s3 + $0x78] sm:$0xff] %v2190_v1   ;;  %v1323_v9 = vadd.f32 %v1322_v2, %v1034_v7  ;;  %v1037_v14 = vadd.f32 %v3074_v53, %v1036_v5  ;;  %v1038_v59 = vpop.f32.mrb[67].mxu0  ;;  %v1325_v17 = vpop.f32.mrb[67].mxu1 }
 0x199   :  { %v1326_v27 = vadd.f32 %v1325_v17, %v1037_v14  ;;  %v1481_v19 = vmax.f32 %v1323_v9, 0.0  ;;  %v1106_v17 = vadd.f32 %v3074_v53, %v3019_v60 }
 0x19b   :  { %v1482_v13 = vmax.f32 %v1326_v27, 0.0 }
 0x19c   :  { %v1041_v30 = vpop.f32.mrb[68].mxu0  ;;  %v2379_v58 = vpop.f32.mrb[68].mxu1 }
 0x19d   :  { %v2195_v21 = vpack.c.bf16 %v1482_v13, %v1481_v19  ;;  %v1042_v31 = vadd.f32 %v3074_v53, %v1041_v30  ;;  %v1043_v22 = vpop.f32.mrb[69].mxu0  ;;  %v1338_v42 = vpop.f32.mrb[69].mxu1  ;;  %v1098_v13 = vadd.f32 %v3074_v53, %v3013_v52 }
 0x19e   :  { %v1044_v25 = vpop.f32.mrb[70].mxu0  ;;  %v2380_v63 = vpop.f32.mrb[70].mxu1 }
 0x19f   :  { %2287 = vst [vmem:[%s3305_s3 + $0x80] sm:$0xff] %v2195_v21   ;;  %v1331_v26 = vadd.f32 %v2375_v62, %v1042_v31  ;;  %v1045_v29 = vadd.f32 %v3074_v53, %v1044_v25  ;;  %v1046_v55 = vpop.f32.mrb[71].mxu0  ;;  %v1341_v33 = vpop.f32.mrb[71].mxu1  ;;  %v1109_v31 = vadd.f32 %v3074_v53, %v3021_v0 }
 0x1a1   :  { %v1334_v51 = vadd.f32 %v2376_v39, %v1045_v29  ;;  %v1483_v23 = vmax.f32 %v1331_v26, 0.0 }
 0x1a3   :  { %v1484_v10 = vmax.f32 %v1334_v51, 0.0 }
 0x1a4   :  { %v1049_v34 = vpop.f32.mrb[72].mxu0  ;;  %v3195_v37 = vpop.f32.mrb[72].mxu1 }
 0x1a5   :  { %v2200_v41 = vpack.c.bf16 %v1484_v10, %v1483_v23  ;;  %v1050_v11 = vadd.f32 %v3074_v53, %v1049_v34  ;;  %v1051_v3 = vpop.f32.mrb[73].mxu0  ;;  %v1354_v45 = vpop.f32.mrb[73].mxu1 }
 0x1a6   :  { %v1052_v46 = vpop.f32.mrb[74].mxu0  ;;  %v3198_v43 = vpop.f32.mrb[74].mxu1 }
 0x1a7   :  { %2288 = vst [vmem:[%s3305_s3 + $0x88] sm:$0xff] %v2200_v41   ;;  %v1339_v6 = vadd.f32 %v1338_v42, %v1050_v11  ;;  %v1053_v38 = vadd.f32 %v3074_v53, %v1052_v46  ;;  %v1054_v35 = vpop.f32.mrb[75].mxu0  ;;  %v1357_v49 = vpop.f32.mrb[75].mxu1 }
 0x1a9   :  { %v1342_v50 = vadd.f32 %v1341_v33, %v1053_v38  ;;  %v1485_v15 = vmax.f32 %v1339_v6, 0.0 }
 0x1ab   :  { %v1486_v54 = vmax.f32 %v1342_v50, 0.0 }
 0x1ac   :  { %v1057_v47 = vpop.f32.mrb[76].mxu0  ;;  %v3204_v57 = vpop.f32.mrb[76].mxu1 }
 0x1ad   :  { %v2205_v61 = vpack.c.bf16 %v1486_v54, %v1485_v15  ;;  %v1058_v62 = vadd.f32 %v3074_v53, %v1057_v47  ;;  %v1059_v1 = vpop.f32.mrb[77].mxu0  ;;  %v3207_v7 = vpop.f32.mrb[77].mxu1  ;;  %v1125_v47 = vadd.f32 %v3074_v53, %v3037_v16 }
 0x1ae   :  { %v1060_v18 = vpop.f32.mrb[78].mxu0  ;;  %v3209_v2 = vpop.f32.mrb[78].mxu1 }
 0x1af   :  { %2289 = vst [vmem:[%s3305_s3 + $0x90] sm:$0xff] %v2205_v61   ;;  %v1347_v5 = vadd.f32 %v2379_v58, %v1058_v62  ;;  %v1061_v39 = vadd.f32 %v3074_v53, %v1060_v18  ;;  %v1062_v9 = vpop.f32.mrb[79].mxu0  ;;  %v3215_v14 = vpop.f32.mrb[79].mxu1  ;;  %v1117_v18 = vadd.f32 %v3074_v53, %v3029_v8 }
 0x1b1   :  { %v1350_v59 = vadd.f32 %v2380_v63, %v1061_v39  ;;  %v1487_v27 = vmax.f32 %v1347_v5, 0.0  ;;  %v1101_v63 = vadd.f32 %v3074_v53, %v3017_v56  ;;  %v1122_v56 = vadd.f32 %v3074_v53, %v3033_v12 }
 0x1b3   :  { %v1488_v19 = vmax.f32 %v1350_v59, 0.0 }
 0x1b4   :  { %v1065_v30 = vpop.f32.mrb[80].mxu0  ;;  %v2391_v21 = vpop.f32.mrb[80].mxu1 }
 0x1b5   :  { %v2210_v58 = vpack.c.bf16 %v1488_v19, %v1487_v27  ;;  %v1066_v22 = vadd.f32 %v3074_v53, %v1065_v30  ;;  %v1395_v42 = vadd.f32 %v2391_v21, %v1106_v17  ;;  %v1067_v25 = vpop.f32.mrb[81].mxu0  ;;  %v1386_v26 = vpop.f32.mrb[81].mxu1 }
 0x1b6   :  { %v1387_v60 = vadd.f32 %v1386_v26, %v1098_v13  ;;  %v1068_v29 = vpop.f32.mrb[82].mxu0  ;;  %v2392_v55 = vpop.f32.mrb[82].mxu1 }
 0x1b7   :  { %2290 = vst [vmem:[%s3305_s3 + $0x98] sm:$0xff] %v2210_v58   ;;  %v1355_v52 = vadd.f32 %v1354_v45, %v1066_v22  ;;  %v1069_v33 = vadd.f32 %v3074_v53, %v1068_v29  ;;  %v1398_v0 = vadd.f32 %v2392_v55, %v1109_v31  ;;  %v1070_v51 = vpop.f32.mrb[83].mxu0  ;;  %v1389_v23 = vpop.f32.mrb[83].mxu1  ;;  %v1499_v34 = vmax.f32 %v1395_v42, 0.0 }
 0x1b8   :  { %v1390_v10 = vadd.f32 %v1389_v23, %v1101_v63  ;;  %v1497_v3 = vmax.f32 %v1387_v60, 0.0  ;;  %v1114_v45 = vadd.f32 %v3074_v53, %v3025_v4  ;;  %v1138_v58 = vadd.f32 %v3074_v53, %v3049_v28 }
 0x1b9   :  { %v1358_v41 = vadd.f32 %v1357_v49, %v1069_v33  ;;  %v1500_v11 = vmax.f32 %v1398_v0, 0.0  ;;  %v1489_v6 = vmax.f32 %v1355_v52, 0.0  ;;  %v1141_v29 = vadd.f32 %v3074_v53, %v3053_v32 }
 0x1ba   :  { %v1498_v46 = vmax.f32 %v1390_v10, 0.0  ;;  %v1133_v0 = vadd.f32 %v3074_v53, %v3045_v24 }
 0x1bb   :  { %v1490_v38 = vmax.f32 %v1358_v41, 0.0  ;;  %v2240_v35 = vpack.c.bf16 %v1500_v11, %v1499_v34 }
 0x1bc   :  { %v2235_v50 = vpack.c.bf16 %v1498_v46, %v1497_v3  ;;  %v1073_v15 = vpop.f32.mrb[84].mxu0  ;;  %v2395_v54 = vpop.f32.mrb[84].mxu1 }
 0x1bd   :  { %v2215_v61 = vpack.c.bf16 %v1490_v38, %v1489_v6  ;;  %2296 = vst [vmem:[%s3305_s3 + $0xc8] sm:$0xff] %v2240_v35   ;;  %v1074_v49 = vadd.f32 %v3074_v53, %v1073_v15  ;;  %v1411_v12 = vadd.f32 %v2395_v54, %v1122_v56  ;;  %v1075_v62 = vpop.f32.mrb[85].mxu0  ;;  %v1402_v1 = vpop.f32.mrb[85].mxu1  ;;  %v1154_v35 = vadd.f32 %v3074_v53, %v3065_v44 }
 0x1be   :  { %2295 = vst [vmem:[%s3305_s3 + $0xc0] sm:$0xff] %v2235_v50   ;;  %v1403_v4 = vadd.f32 %v1402_v1, %v1114_v45  ;;  %v1076_v5 = vpop.f32.mrb[86].mxu0  ;;  %v2396_v16 = vpop.f32.mrb[86].mxu1 }
 0x1bf   :  { %2291 = vst [vmem:[%s3305_s3 + $0xa0] sm:$0xff] %v2215_v61   ;;  %v1363_v39 = vadd.f32 %v3195_v37, %v1074_v49  ;;  %v1077_v9 = vadd.f32 %v3074_v53, %v1076_v5  ;;  %v1414_v59 = vadd.f32 %v2396_v16, %v1125_v47  ;;  %v1078_v17 = vpop.f32.mrb[87].mxu0  ;;  %v1405_v27 = vpop.f32.mrb[87].mxu1  ;;  %v1503_v8 = vmax.f32 %v1411_v12, 0.0 }
 0x1c0   :  { %v1406_v19 = vadd.f32 %v1405_v27, %v1117_v18  ;;  %v1501_v21 = vmax.f32 %v1403_v4, 0.0  ;;  %v1130_v37 = vadd.f32 %v3074_v53, %v3041_v20  ;;  %v1157_v49 = vadd.f32 %v3074_v53, %v3069_v48 }
 0x1c1   :  { %v1366_v13 = vadd.f32 %v3198_v43, %v1077_v9  ;;  %v1504_v30 = vmax.f32 %v1414_v59, 0.0  ;;  %v1491_v22 = vmax.f32 %v1363_v39, 0.0  ;;  %v1149_v18 = vadd.f32 %v3074_v53, %v3061_v40 }
 0x1c2   :  { %v1502_v31 = vmax.f32 %v1406_v19, 0.0 }
 0x1c3   :  { %v1492_v42 = vmax.f32 %v1366_v13, 0.0  ;;  %v2250_v25 = vpack.c.bf16 %v1504_v30, %v1503_v8 }
 0x1c4   :  { %v2245_v26 = vpack.c.bf16 %v1502_v31, %v1501_v21  ;;  %v1081_v63 = vpop.f32.mrb[88].mxu0  ;;  %v2399_v60 = vpop.f32.mrb[88].mxu1 }
 0x1c5   :  { %v2220_v55 = vpack.c.bf16 %v1492_v42, %v1491_v22  ;;  %2298 = vst [vmem:[%s3305_s3 + $0xd8] sm:$0xff] %v2250_v25   ;;  %v1082_v43 = vadd.f32 %v3074_v53, %v1081_v63  ;;  %v1427_v28 = vadd.f32 %v2399_v60, %v1138_v58  ;;  %v1083_v52 = vpop.f32.mrb[89].mxu0  ;;  %v1418_v33 = vpop.f32.mrb[89].mxu1 }
 0x1c6   :  { %2297 = vst [vmem:[%s3305_s3 + $0xd0] sm:$0xff] %v2245_v26   ;;  %v1419_v20 = vadd.f32 %v1418_v33, %v1130_v37  ;;  %v1084_v51 = vpop.f32.mrb[90].mxu0  ;;  %v2400_v32 = vpop.f32.mrb[90].mxu1 }
 0x1c7   :  { %2292 = vst [vmem:[%s3305_s3 + $0xa8] sm:$0xff] %v2220_v55   ;;  %v1371_v23 = vadd.f32 %v3207_v7, %v1082_v43  ;;  %v1085_v10 = vadd.f32 %v3074_v53, %v1084_v51  ;;  %v1430_v34 = vadd.f32 %v2400_v32, %v1141_v29  ;;  %v1086_v41 = vpop.f32.mrb[91].mxu0  ;;  %v1421_v11 = vpop.f32.mrb[91].mxu1  ;;  %v1507_v24 = vmax.f32 %v1427_v28, 0.0 }
 0x1c8   :  { %v1422_v3 = vadd.f32 %v1421_v11, %v1133_v0  ;;  %v1505_v6 = vmax.f32 %v1419_v20, 0.0  ;;  %v1146_v7 = vadd.f32 %v3074_v53, %v3057_v36 }
 0x1c9   :  { %v1374_v46 = vadd.f32 %v3215_v14, %v1085_v10  ;;  %v1508_v56 = vmax.f32 %v1430_v34, 0.0  ;;  %v1493_v45 = vmax.f32 %v1371_v23, 0.0 }
 0x1ca   :  { %v1506_v38 = vmax.f32 %v1422_v3, 0.0 }
 0x1cb   :  { %v1494_v50 = vmax.f32 %v1374_v46, 0.0  ;;  %v2260_v15 = vpack.c.bf16 %v1508_v56, %v1507_v24 }
 0x1cc   :  { %v2255_v54 = vpack.c.bf16 %v1506_v38, %v1505_v6  ;;  %v1089_v47 = vpop.f32.mrb[92].mxu0  ;;  %v2403_v61 = vpop.f32.mrb[92].mxu1 }
 0x1cd   :  { %v2225_v12 = vpack.c.bf16 %v1494_v50, %v1493_v45  ;;  %2300 = vst [vmem:[%s3305_s3 + $0xe8] sm:$0xff] %v2260_v15   ;;  %v1090_v14 = vadd.f32 %v3074_v53, %v1089_v47  ;;  %v1443_v44 = vadd.f32 %v2403_v61, %v1154_v35  ;;  %v1091_v62 = vpop.f32.mrb[93].mxu0  ;;  %v1434_v1 = vpop.f32.mrb[93].mxu1 }
 0x1ce   :  { %2299 = vst [vmem:[%s3305_s3 + $0xe0] sm:$0xff] %v2255_v54   ;;  %v1435_v36 = vadd.f32 %v1434_v1, %v1146_v7  ;;  %v1092_v4 = vpop.f32.mrb[94].mxu0  ;;  %v2404_v48 = vpop.f32.mrb[94].mxu1 }
 0x1cf   :  { %2293 = vst [vmem:[%s3305_s3 + $0xb0] sm:$0xff] %v2225_v12   ;;  %v1379_v5 = vadd.f32 %v3204_v57, %v1090_v14  ;;  %v1093_v16 = vadd.f32 %v3074_v53, %v1092_v4  ;;  %v1446_v39 = vadd.f32 %v2404_v48, %v1157_v49  ;;  %v1094_v9 = vpop.f32.mrb[95].mxu0  ;;  %v1437_v59 = vpop.f32.mrb[95].mxu1  ;;  %v1511_v40 = vmax.f32 %v1443_v44, 0.0 }
 0x1d0   :  { %v1438_v17 = vadd.f32 %v1437_v59, %v1149_v18  ;;  %v1509_v8 = vmax.f32 %v1435_v36, 0.0 }
 0x1d1   :  { %v1382_v27 = vadd.f32 %v3209_v2, %v1093_v16  ;;  %v1512_v19 = vmax.f32 %v1446_v39, 0.0  ;;  %v1495_v30 = vmax.f32 %v1379_v5, 0.0 }
 0x1d2   :  { %v1510_v13 = vmax.f32 %v1438_v17, 0.0 }
 0x1d3   :  { %v1496_v21 = vmax.f32 %v1382_v27, 0.0  ;;  %v2270_v31 = vpack.c.bf16 %v1512_v19, %v1511_v40 }
 0x1d4   :  { %v2265_v58 = vpack.c.bf16 %v1510_v13, %v1509_v8 }
 0x1d5   :  { %v2230_v22 = vpack.c.bf16 %v1496_v21, %v1495_v30  ;;  %2302 = vst [vmem:[%s3305_s3 + $0xf8] sm:$0xff] %v2270_v31  }
 0x1d6   :  { %2301 = vst [vmem:[%s3305_s3 + $0xf0] sm:$0xff] %v2265_v58  }
 0x1d7   :  { %2294 = vst [vmem:[%s3305_s3 + $0xb8] sm:$0xff] %v2230_v22  }

// kernel: vae_forward.17
= control target key start
LH: loop header
LB: loop body
LE: loop exit
PB: predicated region body
PF: predicated region fallthrough
CT: control target
= control target key end

     0   :  { %s3843_s12 = smov 0   ;;  %s4898_s0 = inlined_call_operand.vmem [shape: bf16[2048,288], index: 0, kind: input, shape index: {}]   ;;  %s4899_s1 = inlined_call_operand.vmem [shape: bf16[288,4], index: 1, kind: input, shape index: {}]   ;;  %s4900_s2 = inlined_call_operand.vmem [shape: f32[1,4], index: 2, kind: input, shape index: {}]   ;;  %s4901_s3 = inlined_call_operand.vmem [shape: f32[2048,4], index: 3, kind: output, shape index: {}]  }
   0x1 LB: > { %s3013_s13 = sadd.s32 4294967295, %s3820_s12   ;;  %p3017_p0 = scmp.ge.s32.totalorder %s3820_s12, 1  ;;  %s3820_s12 = sphi %s3843_s12, %s13_s12  }
   0x2   : > { %p139_p1 = scmp.lt.s32.totalorder %s3820_s12, 3 }
   0x4   : > { %p140_p2 = pnand %p3017_p0, %p139_p1 }
   0x6   : > { %143 = sbr.rel (%p140_p2) target bundleno = 673 (0x2a1), region = 32 }
   0xd   : > { %v3539_v0 = vld [vmem:[%s4899_s1] sm:$0xff]   ;;  %v3822_v1 = vmov 0   ;;  %s3018_s16 = sshll.u32 %s3013_s13, 7  ;;  %v3540_v2 = vld [vmem:[%s4899_s1 + $0x8] sm:$0xff]   ;;  %v3541_v3 = vld [vmem:[%s4899_s1 + $0x10] sm:$0xff]   ;;  %vm1545_vm0 = vcmask 261120  }
   0xe   : > { %1738 = vmatprep.subr.bf16.mxu0 %v3822_v1  ;;  %3497 = vmatprep.subr.bf16.mxu1 %v3822_v1  ;;  %p165_p3 = scmp.lt.s32.totalorder %s3018_s16, 255  ;;  %v3542_v4 = vld [vmem:[%s4899_s1 + $0x18] sm:$0xff]   ;;  %v3543_v5 = vld [vmem:[%s4899_s1 + $0x20] sm:$0xff]   ;;  %v3544_v7 = vld [vmem:[%s4899_s1 + $0x28] sm:$0xff]   ;;  %vm2828_vm1 = vcmask 31744  }
   0xf   : > { %1739 = vmatpush1.bf16.msra.mxu0 %v3539_v0  ;;  %3513 = vmatpush1.bf16.msra.mxu1 %v3539_v0  ;;  %v3545_v9 = vld [vmem:[%s4899_s1 + $0x30] sm:$0xff]   ;;  %v3546_v10 = vld [vmem:[%s4899_s1 + $0x38] sm:$0xff]   ;;  %v3547_v11 = vld [vmem:[%s4899_s1 + $0x40] sm:$0xff]  }
  0x10   : > { %1740 = vmatprep.subr.bf16.mxu0 %v3822_v1  ;;  %3498 = vmatprep.subr.bf16.mxu1 %v3822_v1  ;;  %s4935_s16 = smov (!%p165_p3, %s3018_s16), 255  ;;  %v3548_v12 = vld [vmem:[%s4899_s1 + $0x48] sm:$0xff]   ;;  %v3549_v13 = vld [vmem:[%s4899_s1 + $0x50] sm:$0xff]   ;;  %v3550_v14 = vld [vmem:[%s4899_s1 + $0x58] sm:$0xff]  }
  0x11   : > { %s3529_s23 = smul.u32 12, %s4935_s16  ;;  %v3551_v15 = vld [vmem:[%s4899_s1 + $0x60] sm:$0xff]   ;;  %v3552_v16 = vld [vmem:[%s4899_s1 + $0x68] sm:$0xff]   ;;  %v3553_v17 = vld [vmem:[%s4899_s1 + $0x70] sm:$0xff]   ;;  %s3021_s6 = sshll.u32 %s4935_s16, 3 }
  0x12   : > { %v3554_v18 = vld [vmem:[%s4899_s1 + $0x78] sm:$0xff]   ;;  %v3561_v19 = vld [vmem:[%s4899_s1 + $0x80] sm:$0xff]   ;;  %v3610_v24 = vld [vmem:[%s4899_s1 + $0x88] sm:$0xff]   ;;  %s4317_s9 = scalar_lea.vmem %s4901_s3, %s3021_s6 }
  0x13   : > { %1741 = vmatpush1.bf16.msra.mxu0 %v3540_v2  ;;  %3514 = vmatpush1.bf16.msra.mxu1 %v3540_v2  ;;  %s3880_s28 = scalar_lea.vmem %s4898_s0, %s3529_s23 }
  0x14   : > { %1742 = vmatprep.subr.bf16.mxu0 %v3822_v1  ;;  %3499 = vmatprep.subr.bf16.mxu1 %v3822_v1  ;;  %v3557_v6 = vld [vmem:[%s3880_s28 + $0x4] ss:$12 sps:$4 sm:$0xff]   ;;  %v3555_v20 = vld [vmem:[%s3880_s28] ss:$12 sps:$4 sm:$0xff]   ;;  %v3562_v22 = vld [vmem:[%s3880_s28 + $0x1c] ss:$12 sps:$4 sm:$0xff]  }
  0x15   : > { %v3560_v8 = vld [vmem:[%s3880_s28 + $0x484] ss:$12 sps:$4 sm:$0xff]   ;;  %1770 = vmatprep.mubr.bf16.mxu0 %v3557_v6  ;;  %v3558_v21 = vld [vmem:[%s3880_s28 + $0x480] ss:$12 sps:$4 sm:$0xff]   ;;  %v3564_v23 = vld [vmem:[%s3880_s28 + $0x49c] ss:$12 sps:$4 sm:$0xff]  }
  0x16   : > { %2154 = vmatprep.mubr.bf16.mxu1 %v3560_v8  ;;  %v3566_v25 = vld [vmem:[%s3880_s28 + $0x18] ss:$12 sps:$4 sm:$0xff]   ;;  %v3568_v27 = vld [vmem:[%s3880_s28 + $0x34] ss:$12 sps:$4 sm:$0xff]   ;;  %v3572_v29 = vld [vmem:[%s3880_s28 + $0x30] ss:$12 sps:$4 sm:$0xff]  }
  0x17   : > { %1743 = vmatpush1.bf16.msra.mxu0 %v3541_v3  ;;  %3515 = vmatpush1.bf16.msra.mxu1 %v3541_v3  ;;  %v3567_v26 = vld [vmem:[%s3880_s28 + $0x498] ss:$12 sps:$4 sm:$0xff]   ;;  %v3570_v28 = vld [vmem:[%s3880_s28 + $0x4b4] ss:$12 sps:$4 sm:$0xff]   ;;  %v3573_v30 = vld [vmem:[%s3880_s28 + $0x4b0] ss:$12 sps:$4 sm:$0xff]  }
  0x18   : > { %1744 = vmatprep.subr.bf16.mxu0 %v3822_v1  ;;  %3500 = vmatprep.subr.bf16.mxu1 %v3822_v1  ;;  %v3574_v31 = vld [vmem:[%s3880_s28 + $0x4c] ss:$12 sps:$4 sm:$0xff]   ;;  %v3578_v33 = vld [vmem:[%s3880_s28 + $0x48] ss:$12 sps:$4 sm:$0xff]   ;;  %v3580_v35 = vld [vmem:[%s3880_s28 + $0x64] ss:$12 sps:$4 sm:$0xff]  }
  0x19   : > { %v3576_v32 = vld [vmem:[%s3880_s28 + $0x4cc] ss:$12 sps:$4 sm:$0xff]   ;;  %v3579_v34 = vld [vmem:[%s3880_s28 + $0x4c8] ss:$12 sps:$4 sm:$0xff]   ;;  %v3582_v36 = vld [vmem:[%s3880_s28 + $0x4e4] ss:$12 sps:$4 sm:$0xff]  }
  0x1a   : > { %v3584_v37 = vld [vmem:[%s3880_s28 + $0x60] ss:$12 sps:$4 sm:$0xff]   ;;  %v3586_v39 = vld [vmem:[%s3880_s28 + $0x7c] ss:$12 sps:$4 sm:$0xff]   ;;  %v3590_v41 = vld [vmem:[%s3880_s28 + $0x78] ss:$12 sps:$4 sm:$0xff]  }
  0x1b   : > { %1745 = vmatpush1.bf16.msra.mxu0 %v3542_v4  ;;  %3516 = vmatpush1.bf16.msra.mxu1 %v3542_v4  ;;  %v3585_v38 = vld [vmem:[%s3880_s28 + $0x4e0] ss:$12 sps:$4 sm:$0xff]   ;;  %v3588_v40 = vld [vmem:[%s3880_s28 + $0x4fc] ss:$12 sps:$4 sm:$0xff]   ;;  %v3591_v42 = vld [vmem:[%s3880_s28 + $0x4f8] ss:$12 sps:$4 sm:$0xff]  }
  0x1c   : > { %1746 = vmatprep.subr.bf16.mxu0 %v3822_v1  ;;  %3501 = vmatprep.subr.bf16.mxu1 %v3822_v1  ;;  %v3592_v43 = vld [vmem:[%s3880_s28 + $0x94] ss:$12 sps:$4 sm:$0xff]   ;;  %v3596_v45 = vld [vmem:[%s3880_s28 + $0x90] ss:$12 sps:$4 sm:$0xff]   ;;  %v3598_v47 = vld [vmem:[%s3880_s28 + $0xac] ss:$12 sps:$4 sm:$0xff]  }
  0x1d   : > { %v3594_v44 = vld [vmem:[%s3880_s28 + $0x514] ss:$12 sps:$4 sm:$0xff]   ;;  %v3597_v46 = vld [vmem:[%s3880_s28 + $0x510] ss:$12 sps:$4 sm:$0xff]   ;;  %v3600_v48 = vld [vmem:[%s3880_s28 + $0x52c] ss:$12 sps:$4 sm:$0xff]  }
  0x1e   : > { %v3602_v49 = vld [vmem:[%s3880_s28 + $0xa8] ss:$12 sps:$4 sm:$0xff]   ;;  %v3604_v51 = vld [vmem:[%s3880_s28 + $0xc4] ss:$12 sps:$4 sm:$0xff]   ;;  %v3608_v53 = vld [vmem:[%s3880_s28 + $0xc0] ss:$12 sps:$4 sm:$0xff]  }
  0x1f   : > { %1747 = vmatpush1.bf16.msra.mxu0 %v3543_v5  ;;  %3517 = vmatpush1.bf16.msra.mxu1 %v3543_v5  ;;  %v3603_v50 = vld [vmem:[%s3880_s28 + $0x528] ss:$12 sps:$4 sm:$0xff]   ;;  %v3606_v52 = vld [vmem:[%s3880_s28 + $0x544] ss:$12 sps:$4 sm:$0xff]   ;;  %v3609_v54 = vld [vmem:[%s3880_s28 + $0x540] ss:$12 sps:$4 sm:$0xff]  }
  0x20   : > { %1748 = vmatprep.subr.bf16.mxu0 %v3822_v1  ;;  %3502 = vmatprep.subr.bf16.mxu1 %v3822_v1  ;;  %v3611_v55 = vld [vmem:[%s3880_s28 + $0xdc] ss:$12 sps:$4 sm:$0xff]   ;;  %v3615_v57 = vld [vmem:[%s3880_s28 + $0xd8] ss:$12 sps:$4 sm:$0xff]   ;;  %v3617_v59 = vld [vmem:[%s3880_s28 + $0xf4] ss:$12 sps:$4 sm:$0xff]  }
  0x21   : > { %v3613_v56 = vld [vmem:[%s3880_s28 + $0x55c] ss:$12 sps:$4 sm:$0xff]   ;;  %v3616_v58 = vld [vmem:[%s3880_s28 + $0x558] ss:$12 sps:$4 sm:$0xff]   ;;  %v3619_v60 = vld [vmem:[%s3880_s28 + $0x574] ss:$12 sps:$4 sm:$0xff]  }
  0x22   : > { %v3621_v61 = vld [vmem:[%s3880_s28 + $0xf0] ss:$12 sps:$4 sm:$0xff]   ;;  %v3623_v63 = vld [vmem:[%s3880_s28 + $0x10c] ss:$12 sps:$4 sm:$0xff]   ;;  %v3628_v2 = vld [vmem:[%s3880_s28 + $0x588] ss:$12 sps:$4 sm:$0xff]  }
  0x23   : > { %1749 = vmatpush1.bf16.msra.mxu0 %v3544_v7  ;;  %3518 = vmatpush1.bf16.msra.mxu1 %v3544_v7  ;;  %v3622_v62 = vld [vmem:[%s3880_s28 + $0x570] ss:$12 sps:$4 sm:$0xff]   ;;  %v3625_v0 = vld [vmem:[%s3880_s28 + $0x58c] ss:$12 sps:$4 sm:$0xff]  }
  0x24   : > { %1750 = vmatprep.subr.bf16.mxu0 %v3822_v1  ;;  %3503 = vmatprep.subr.bf16.mxu1 %v3822_v1  ;;  %v3629_v3 = vld [vmem:[%s3880_s28 + $0x124] ss:$12 sps:$4 sm:$0xff]   ;;  %v3633_v5 = vld [vmem:[%s3880_s28 + $0x120] ss:$12 sps:$4 sm:$0xff]   ;;  %v3635_v7 = vld [vmem:[%s3880_s28 + $0x13c] ss:$12 sps:$4 sm:$0xff]  }
  0x25   : > { %v3631_v4 = vld [vmem:[%s3880_s28 + $0x5a4] ss:$12 sps:$4 sm:$0xff]   ;;  %v3634_v6 = vld [vmem:[%s3880_s28 + $0x5a0] ss:$12 sps:$4 sm:$0xff]   ;;  %v3637_v8 = vld [vmem:[%s3880_s28 + $0x5bc] ss:$12 sps:$4 sm:$0xff]  }
  0x27   : > { %1751 = vmatpush1.bf16.msra.mxu0 %v3545_v9  ;;  %3519 = vmatpush1.bf16.msra.mxu1 %v3545_v9  ;;  %v3639_v9 = vld [vmem:[%s3880_s28 + $0x138] ss:$12 sps:$4 sm:$0xff]  }
  0x28   : > { %1752 = vmatprep.subr.bf16.mxu0 %v3822_v1  ;;  %3504 = vmatprep.subr.bf16.mxu1 %v3822_v1 }
  0x2b   : > { %1753 = vmatpush1.bf16.msra.mxu0 %v3546_v10  ;;  %3520 = vmatpush1.bf16.msra.mxu1 %v3546_v10  ;;  %v3640_v10 = vld [vmem:[%s3880_s28 + $0x5b8] ss:$12 sps:$4 sm:$0xff]  }
  0x2c   : > { %1754 = vmatprep.subr.bf16.mxu0 %v3822_v1  ;;  %3505 = vmatprep.subr.bf16.mxu1 %v3822_v1 }
  0x2f   : > { %1755 = vmatpush1.bf16.msra.mxu0 %v3547_v11  ;;  %3521 = vmatpush1.bf16.msra.mxu1 %v3547_v11  ;;  %v3641_v11 = vld [vmem:[%s3880_s28 + $0x154] ss:$12 sps:$4 sm:$0xff]  }
  0x30   : > { %1756 = vmatprep.subr.bf16.mxu0 %v3822_v1  ;;  %3506 = vmatprep.subr.bf16.mxu1 %v3822_v1 }
  0x33   : > { %1757 = vmatpush1.bf16.msra.mxu0 %v3548_v12  ;;  %3522 = vmatpush1.bf16.msra.mxu1 %v3548_v12  ;;  %v3643_v12 = vld [vmem:[%s3880_s28 + $0x5d4] ss:$12 sps:$4 sm:$0xff]  }
  0x34   : > { %1758 = vmatprep.subr.bf16.mxu0 %v3822_v1  ;;  %3507 = vmatprep.subr.bf16.mxu1 %v3822_v1 }
  0x37   : > { %1759 = vmatpush1.bf16.msra.mxu0 %v3549_v13  ;;  %3523 = vmatpush1.bf16.msra.mxu1 %v3549_v13  ;;  %v3645_v13 = vld [vmem:[%s3880_s28 + $0x150] ss:$12 sps:$4 sm:$0xff]  }
  0x38   : > { %1760 = vmatprep.subr.bf16.mxu0 %v3822_v1  ;;  %3508 = vmatprep.subr.bf16.mxu1 %v3822_v1 }
  0x3b   : > { %1761 = vmatpush1.bf16.msra.mxu0 %v3550_v14  ;;  %3524 = vmatpush1.bf16.msra.mxu1 %v3550_v14  ;;  %v3646_v14 = vld [vmem:[%s3880_s28 + $0x5d0] ss:$12 sps:$4 sm:$0xff]  }
  0x3c   : > { %1762 = vmatprep.subr.bf16.mxu0 %v3822_v1  ;;  %3509 = vmatprep.subr.bf16.mxu1 %v3822_v1 }
  0x3f   : > { %1763 = vmatpush1.bf16.msra.mxu0 %v3551_v15  ;;  %3525 = vmatpush1.bf16.msra.mxu1 %v3551_v15  ;;  %v3647_v15 = vld [vmem:[%s3880_s28 + $0x16c] ss:$12 sps:$4 sm:$0xff]  }
  0x40   : > { %1764 = vmatprep.subr.bf16.mxu0 %v3822_v1  ;;  %3510 = vmatprep.subr.bf16.mxu1 %v3822_v1 }
  0x43   : > { %1765 = vmatpush1.bf16.msra.mxu0 %v3552_v16  ;;  %3526 = vmatpush1.bf16.msra.mxu1 %v3552_v16  ;;  %v3649_v16 = vld [vmem:[%s3880_s28 + $0x5ec] ss:$12 sps:$4 sm:$0xff]  }
  0x44   : > { %1766 = vmatprep.subr.bf16.mxu0 %v3822_v1  ;;  %3511 = vmatprep.subr.bf16.mxu1 %v3822_v1 }
  0x47   : > { %1767 = vmatpush1.bf16.msra.mxu0 %v3553_v17  ;;  %3527 = vmatpush1.bf16.msra.mxu1 %v3553_v17  ;;  %v3651_v17 = vld [vmem:[%s3880_s28 + $0x168] ss:$12 sps:$4 sm:$0xff]  }
  0x48   : > { %1768 = vmatprep.subr.bf16.mxu0 %v3822_v1  ;;  %3512 = vmatprep.subr.bf16.mxu1 %v3822_v1  ;;  %v3627_v1 = vld [vmem:[%s3880_s28 + $0x108] ss:$12 sps:$4 sm:$0xff]  }
  0x4b   : > { %1769 = vmatpush1.bf16.msra.mxu0 %v3554_v18  ;;  %3528 = vmatpush1.bf16.msra.mxu1 %v3554_v18  ;;  %v3652_v18 = vld [vmem:[%s3880_s28 + $0x5e8] ss:$12 sps:$4 sm:$0xff]  }
  0x4c   : > { %3365 = vmatprep.subr.bf16.mxu1 %v3561_v19 }
  0x4e   : > { %1771 = vmatmul.mubr.bf16.vlgmr.msra.gmra.mrb[0].mxu0 %v3555_v20  ;;  %2155 = vmatmul.mubr.bf16.vlgmr.msra.gmra.mrb[0].mxu1 %v3558_v21  ;;  %v3655_v20 = vld [vmem:[%s3880_s28 + $0x8] ss:$12 sps:$4 sm:$0xff]   ;;  %v3656_v21 = vld [vmem:[%s3880_s28 + $0x180] ss:$12 sps:$4 sm:$0xff]  }
  0x4f   : > { %3366 = vmatpush3.bf16.msra.mxu1 %v3561_v19  ;;  %1778 = vmatprep.mubr.bf16.mxu0 %v3562_v22  ;;  %v3653_v19 = vld [vmem:[%s3880_s28 + $0x184] ss:$12 sps:$4 sm:$0xff]   ;;  %v3657_v22 = vld [vmem:[%s3880_s28 + $0x20] ss:$12 sps:$4 sm:$0xff]  }
  0x50   : > { %2162 = vmatprep.mubr.bf16.mxu1 %v3564_v23  ;;  %3367 = vmatprep.subr.bf16.mxu1 %v3610_v24  ;;  %v3658_v23 = vld [vmem:[%s3880_s28 + $0x19c] ss:$12 sps:$4 sm:$0xff]  }
  0x53   : > { %3368 = vmatpush3.bf16.msra.mxu1 %v3610_v24  ;;  %v3660_v24 = vld [vmem:[%s3880_s28 + $0x38] ss:$12 sps:$4 sm:$0xff]  }
  0x56   : > { %1779 = vmatmul.mubr.bf16.gmra.mrb[4].mxu0 %v3566_v25  ;;  %2163 = vmatmul.mubr.bf16.gmra.mrb[4].mxu1 %v3567_v26  ;;  %v3661_v25 = vld [vmem:[%s3880_s28 + $0x198] ss:$12 sps:$4 sm:$0xff]   ;;  %v3662_v26 = vld [vmem:[%s3880_s28 + $0x50] ss:$12 sps:$4 sm:$0xff]  }
  0x57   : > { %1786 = vmatprep.mubr.bf16.mxu0 %v3568_v27  ;;  %2170 = vmatprep.mubr.bf16.mxu1 %v3570_v28  ;;  %v3663_v27 = vld [vmem:[%s3880_s28 + $0x1b4] ss:$12 sps:$4 sm:$0xff]  }
  0x58   : > { %v3665_v28 = vld [vmem:[%s3880_s28 + $0x68] ss:$12 sps:$4 sm:$0xff]  }
  0x5e   : > { %1787 = vmatmul.mubr.bf16.gmra.mrb[8].mxu0 %v3572_v29  ;;  %2171 = vmatmul.mubr.bf16.gmra.mrb[8].mxu1 %v3573_v30  ;;  %v3666_v29 = vld [vmem:[%s3880_s28 + $0x1b0] ss:$12 sps:$4 sm:$0xff]   ;;  %v3667_v30 = vld [vmem:[%s3880_s28 + $0x80] ss:$12 sps:$4 sm:$0xff]  }
  0x5f   : > { %1794 = vmatprep.mubr.bf16.mxu0 %v3574_v31  ;;  %2178 = vmatprep.mubr.bf16.mxu1 %v3576_v32  ;;  %v3668_v31 = vld [vmem:[%s3880_s28 + $0x1cc] ss:$12 sps:$4 sm:$0xff]  }
  0x60   : > { %v3670_v32 = vld [vmem:[%s3880_s28 + $0x98] ss:$12 sps:$4 sm:$0xff]  }
  0x66   : > { %1795 = vmatmul.mubr.bf16.gmra.mrb[12].mxu0 %v3578_v33  ;;  %2179 = vmatmul.mubr.bf16.gmra.mrb[12].mxu1 %v3579_v34  ;;  %v3671_v33 = vld [vmem:[%s3880_s28 + $0x1c8] ss:$12 sps:$4 sm:$0xff]   ;;  %v3672_v34 = vld [vmem:[%s3880_s28 + $0xb0] ss:$12 sps:$4 sm:$0xff]  }
  0x67   : > { %1802 = vmatprep.mubr.bf16.mxu0 %v3580_v35  ;;  %2186 = vmatprep.mubr.bf16.mxu1 %v3582_v36  ;;  %v3673_v35 = vld [vmem:[%s3880_s28 + $0x1e4] ss:$12 sps:$4 sm:$0xff]   ;;  %v3675_v36 = vld [vmem:[%s3880_s28 + $0xc8] ss:$12 sps:$4 sm:$0xff]  }
  0x6e   : > { %1803 = vmatmul.mubr.bf16.gmra.mrb[16].mxu0 %v3584_v37  ;;  %2187 = vmatmul.mubr.bf16.gmra.mrb[16].mxu1 %v3585_v38  ;;  %v3676_v37 = vld [vmem:[%s3880_s28 + $0x1e0] ss:$12 sps:$4 sm:$0xff]  }
  0x6f   : > { %1810 = vmatprep.mubr.bf16.mxu0 %v3586_v39  ;;  %2194 = vmatprep.mubr.bf16.mxu1 %v3588_v40  ;;  %v3677_v38 = vld [vmem:[%s3880_s28 + $0xe0] ss:$12 sps:$4 sm:$0xff]   ;;  %v3678_v39 = vld [vmem:[%s3880_s28 + $0x1fc] ss:$12 sps:$4 sm:$0xff]   ;;  %v3680_v40 = vld [vmem:[%s3880_s28 + $0xf8] ss:$12 sps:$4 sm:$0xff]  }
  0x76   : > { %1811 = vmatmul.mubr.bf16.gmra.mrb[20].mxu0 %v3590_v41  ;;  %2195 = vmatmul.mubr.bf16.gmra.mrb[20].mxu1 %v3591_v42  ;;  %v3681_v41 = vld [vmem:[%s3880_s28 + $0x1f8] ss:$12 sps:$4 sm:$0xff]   ;;  %v3682_v42 = vld [vmem:[%s3880_s28 + $0x110] ss:$12 sps:$4 sm:$0xff]  }
  0x77   : > { %1818 = vmatprep.mubr.bf16.mxu0 %v3592_v43  ;;  %2202 = vmatprep.mubr.bf16.mxu1 %v3594_v44  ;;  %v3683_v43 = vld [vmem:[%s3880_s28 + $0x214] ss:$12 sps:$4 sm:$0xff]  }
  0x78   : > { %v3685_v44 = vld [vmem:[%s3880_s28 + $0x128] ss:$12 sps:$4 sm:$0xff]  }
  0x7e   : > { %1819 = vmatmul.mubr.bf16.gmra.mrb[24].mxu0 %v3596_v45  ;;  %2203 = vmatmul.mubr.bf16.gmra.mrb[24].mxu1 %v3597_v46  ;;  %v3686_v45 = vld [vmem:[%s3880_s28 + $0x210] ss:$12 sps:$4 sm:$0xff]   ;;  %v3687_v46 = vld [vmem:[%s3880_s28 + $0x140] ss:$12 sps:$4 sm:$0xff]  }
  0x7f   : > { %1826 = vmatprep.mubr.bf16.mxu0 %v3598_v47  ;;  %2210 = vmatprep.mubr.bf16.mxu1 %v3600_v48  ;;  %v3688_v47 = vld [vmem:[%s3880_s28 + $0x22c] ss:$12 sps:$4 sm:$0xff]  }
  0x80   : > { %v3690_v48 = vld [vmem:[%s3880_s28 + $0x158] ss:$12 sps:$4 sm:$0xff]  }
  0x86   : > { %1827 = vmatmul.mubr.bf16.gmra.mrb[28].mxu0 %v3602_v49  ;;  %2211 = vmatmul.mubr.bf16.gmra.mrb[28].mxu1 %v3603_v50  ;;  %v3691_v49 = vld [vmem:[%s3880_s28 + $0x228] ss:$12 sps:$4 sm:$0xff]   ;;  %v3692_v50 = vld [vmem:[%s3880_s28 + $0x170] ss:$12 sps:$4 sm:$0xff]  }
  0x87   : > { %1834 = vmatprep.mubr.bf16.mxu0 %v3604_v51  ;;  %2218 = vmatprep.mubr.bf16.mxu1 %v3606_v52  ;;  %v3693_v51 = vld [vmem:[%s3880_s28 + $0x244] ss:$12 sps:$4 sm:$0xff]   ;;  %v3695_v52 = vld [vmem:[%s3880_s28 + $0x188] ss:$12 sps:$4 sm:$0xff]  }
  0x8e   : > { %1835 = vmatmul.mubr.bf16.gmra.mrb[32].mxu0 %v3608_v53  ;;  %2219 = vmatmul.mubr.bf16.gmra.mrb[32].mxu1 %v3609_v54  ;;  %v3696_v53 = vld [vmem:[%s3880_s28 + $0x240] ss:$12 sps:$4 sm:$0xff]  }
  0x8f   : > { %1842 = vmatprep.mubr.bf16.mxu0 %v3611_v55  ;;  %2226 = vmatprep.mubr.bf16.mxu1 %v3613_v56  ;;  %v3697_v54 = vld [vmem:[%s3880_s28 + $0x1a0] ss:$12 sps:$4 sm:$0xff]   ;;  %v3698_v55 = vld [vmem:[%s3880_s28 + $0x25c] ss:$12 sps:$4 sm:$0xff]   ;;  %v3700_v56 = vld [vmem:[%s3880_s28 + $0x1b8] ss:$12 sps:$4 sm:$0xff]  }
  0x96   : > { %1843 = vmatmul.mubr.bf16.gmra.mrb[36].mxu0 %v3615_v57  ;;  %2227 = vmatmul.mubr.bf16.gmra.mrb[36].mxu1 %v3616_v58  ;;  %v3701_v57 = vld [vmem:[%s3880_s28 + $0x258] ss:$12 sps:$4 sm:$0xff]   ;;  %v3702_v58 = vld [vmem:[%s3880_s28 + $0x1d0] ss:$12 sps:$4 sm:$0xff]  }
  0x97   : > { %1850 = vmatprep.mubr.bf16.mxu0 %v3617_v59  ;;  %2234 = vmatprep.mubr.bf16.mxu1 %v3619_v60  ;;  %v3703_v59 = vld [vmem:[%s3880_s28 + $0x274] ss:$12 sps:$4 sm:$0xff]  }
  0x98   : > { %v3705_v60 = vld [vmem:[%s3880_s28 + $0x1e8] ss:$12 sps:$4 sm:$0xff]  }
  0x9e   : > { %1851 = vmatmul.mubr.bf16.gmra.mrb[40].mxu0 %v3621_v61  ;;  %2235 = vmatmul.mubr.bf16.gmra.mrb[40].mxu1 %v3622_v62  ;;  %v3706_v61 = vld [vmem:[%s3880_s28 + $0x270] ss:$12 sps:$4 sm:$0xff]   ;;  %v3707_v62 = vld [vmem:[%s3880_s28 + $0x200] ss:$12 sps:$4 sm:$0xff]  }
  0x9f   : > { %1858 = vmatprep.mubr.bf16.mxu0 %v3623_v63  ;;  %2242 = vmatprep.mubr.bf16.mxu1 %v3625_v0  ;;  %v3708_v63 = vld [vmem:[%s3880_s28 + $0x28c] ss:$12 sps:$4 sm:$0xff]  }
  0xa0   : > { %v3710_v0 = vld [vmem:[%s3880_s28 + $0x218] ss:$12 sps:$4 sm:$0xff]  }
  0xa6   : > { %1859 = vmatmul.mubr.bf16.gmra.mrb[44].mxu0 %v3627_v1  ;;  %2243 = vmatmul.mubr.bf16.gmra.mrb[44].mxu1 %v3628_v2 }
  0xa7   : > { %1866 = vmatprep.mubr.bf16.mxu0 %v3629_v3  ;;  %2250 = vmatprep.mubr.bf16.mxu1 %v3631_v4 }
  0xae   : > { %1867 = vmatmul.mubr.bf16.gmra.mrb[48].mxu0 %v3633_v5  ;;  %2251 = vmatmul.mubr.bf16.gmra.mrb[48].mxu1 %v3634_v6  ;;  %v3711_v5 = vld [vmem:[%s3880_s28 + $0x288] ss:$12 sps:$4 sm:$0xff]   ;;  %v3712_v6 = vld [vmem:[%s3880_s28 + $0x230] ss:$12 sps:$4 sm:$0xff]  }
  0xaf   : > { %1874 = vmatprep.mubr.bf16.mxu0 %v3635_v7  ;;  %2258 = vmatprep.mubr.bf16.mxu1 %v3637_v8 }
  0xb6   : > { %1875 = vmatmul.mubr.bf16.gmra.mrb[52].mxu0 %v3639_v9  ;;  %2259 = vmatmul.mubr.bf16.gmra.mrb[52].mxu1 %v3640_v10  ;;  %v3713_v9 = vld [vmem:[%s3880_s28 + $0x2a4] ss:$12 sps:$4 sm:$0xff]   ;;  %v3715_v10 = vld [vmem:[%s3880_s28 + $0x248] ss:$12 sps:$4 sm:$0xff]  }
  0xb7   : > { %1882 = vmatprep.mubr.bf16.mxu0 %v3641_v11  ;;  %2266 = vmatprep.mubr.bf16.mxu1 %v3643_v12 }
  0xbe   : > { %1883 = vmatmul.mubr.bf16.gmra.mrb[56].mxu0 %v3645_v13  ;;  %2267 = vmatmul.mubr.bf16.gmra.mrb[56].mxu1 %v3646_v14 }
  0xbf   : > { %1890 = vmatprep.mubr.bf16.mxu0 %v3647_v15  ;;  %2274 = vmatprep.mubr.bf16.mxu1 %v3649_v16 }
  0xc6   : > { %1891 = vmatmul.mubr.bf16.gmra.mrb[60].mxu0 %v3651_v17  ;;  %2275 = vmatmul.mubr.bf16.gmra.mrb[60].mxu1 %v3652_v18  ;;  %v3716_v17 = vld [vmem:[%s3880_s28 + $0x2a0] ss:$12 sps:$4 sm:$0xff]  }
  0xc7   : > { %1898 = vmatprep.mubr.bf16.mxu0 %v3653_v19  ;;  %3369 = vmatprep.mubr.msk.bf16.mxu1 %vm1545_vm0, %v3655_v20  ;;  %v3717_v18 = vld [vmem:[%s3880_s28 + $0x260] ss:$12 sps:$4 sm:$0xff]  }
  0xce   : > { %1899 = vmatmul.mubr.bf16.gmra.mrb[64].mxu0 %v3656_v21  ;;  %3370 = vmatmul.mubr.msk.bf16.vlgmr.msra.gmra.mrb[64].mxu1 %vm1545_vm0, %v3657_v22  ;;  %v3718_v21 = vld [vmem:[%s3880_s28 + $0x2bc] ss:$12 sps:$4 sm:$0xff]   ;;  %v3720_v22 = vld [vmem:[%s3880_s28 + $0x278] ss:$12 sps:$4 sm:$0xff]  }
  0xcf   : > { %1906 = vmatprep.mubr.bf16.mxu0 %v3658_v23  ;;  %3373 = vmatprep.mubr.msk.bf16.mxu1 %vm1545_vm0, %v3660_v24 }
  0xd6   : > { %1907 = vmatmul.mubr.bf16.gmra.mrb[68].mxu0 %v3661_v25  ;;  %3374 = vmatmul.mubr.msk.bf16.gmra.mrb[68].mxu1 %vm1545_vm0, %v3662_v26 }
  0xd7   : > { %1914 = vmatprep.mubr.bf16.mxu0 %v3663_v27  ;;  %3377 = vmatprep.mubr.msk.bf16.mxu1 %vm1545_vm0, %v3665_v28 }
  0xde   : > { %1915 = vmatmul.mubr.bf16.gmra.mrb[72].mxu0 %v3666_v29  ;;  %3378 = vmatmul.mubr.msk.bf16.gmra.mrb[72].mxu1 %vm1545_vm0, %v3667_v30  ;;  %v3721_v29 = vld [vmem:[%s3880_s28 + $0x2b8] ss:$12 sps:$4 sm:$0xff]   ;;  %v3722_v30 = vld [vmem:[%s3880_s28 + $0x290] ss:$12 sps:$4 sm:$0xff]  }
  0xdf   : > { %1922 = vmatprep.mubr.bf16.mxu0 %v3668_v31  ;;  %3381 = vmatprep.mubr.msk.bf16.mxu1 %vm1545_vm0, %v3670_v32 }
  0xe6   : > { %1923 = vmatmul.mubr.bf16.gmra.mrb[76].mxu0 %v3671_v33  ;;  %3382 = vmatmul.mubr.msk.bf16.gmra.mrb[76].mxu1 %vm1545_vm0, %v3672_v34  ;;  %v3723_v33 = vld [vmem:[%s3880_s28 + $0x2d4] ss:$12 sps:$4 sm:$0xff]  }
  0xe7   : > { %1930 = vmatprep.mubr.bf16.mxu0 %v3673_v35  ;;  %3385 = vmatprep.mubr.msk.bf16.mxu1 %vm1545_vm0, %v3675_v36  ;;  %v3725_v34 = vld [vmem:[%s3880_s28 + $0x2a8] ss:$12 sps:$4 sm:$0xff]  }
  0xee   : > { %1931 = vmatmul.mubr.bf16.gmra.mrb[80].mxu0 %v3676_v37  ;;  %3386 = vmatmul.mubr.msk.bf16.gmra.mrb[80].mxu1 %vm1545_vm0, %v3677_v38 }
  0xef   : > { %1938 = vmatprep.mubr.bf16.mxu0 %v3678_v39  ;;  %3389 = vmatprep.mubr.msk.bf16.mxu1 %vm1545_vm0, %v3680_v40 }
  0xf6   : > { %1939 = vmatmul.mubr.bf16.gmra.mrb[84].mxu0 %v3681_v41  ;;  %3390 = vmatmul.mubr.msk.bf16.gmra.mrb[84].mxu1 %vm1545_vm0, %v3682_v42  ;;  %v3726_v41 = vld [vmem:[%s3880_s28 + $0x2d0] ss:$12 sps:$4 sm:$0xff]   ;;  %v3727_v42 = vld [vmem:[%s3880_s28 + $0x2c0] ss:$12 sps:$4 sm:$0xff]  }
  0xf7   : > { %1946 = vmatprep.mubr.bf16.mxu0 %v3683_v43  ;;  %3393 = vmatprep.mubr.msk.bf16.mxu1 %vm1545_vm0, %v3685_v44 }
  0xfe   : > { %1947 = vmatmul.mubr.bf16.gmra.mrb[88].mxu0 %v3686_v45  ;;  %3394 = vmatmul.mubr.msk.bf16.gmra.mrb[88].mxu1 %vm1545_vm0, %v3687_v46  ;;  %v3728_v45 = vld [vmem:[%s3880_s28 + $0x2ec] ss:$12 sps:$4 sm:$0xff]  }
  0xff   : > { %1954 = vmatprep.mubr.bf16.mxu0 %v3688_v47  ;;  %3397 = vmatprep.mubr.msk.bf16.mxu1 %vm1545_vm0, %v3690_v48  ;;  %v3730_v46 = vld [vmem:[%s3880_s28 + $0x2d8] ss:$12 sps:$4 sm:$0xff]  }
 0x106   : > { %1955 = vmatmul.mubr.bf16.gmra.mrb[92].mxu0 %v3691_v49  ;;  %3398 = vmatmul.mubr.msk.bf16.gmra.mrb[92].mxu1 %vm1545_vm0, %v3692_v50 }
 0x107   : > { %1962 = vmatprep.mubr.bf16.mxu0 %v3693_v51  ;;  %3401 = vmatprep.mubr.msk.bf16.mxu1 %vm1545_vm0, %v3695_v52 }
 0x10e   : > { %1963 = vmatmul.mubr.bf16.gmra.mrb[96].mxu0 %v3696_v53  ;;  %3402 = vmatmul.mubr.msk.bf16.gmra.mrb[96].mxu1 %vm1545_vm0, %v3697_v54  ;;  %v3731_v53 = vld [vmem:[%s3880_s28 + $0x2e8] ss:$12 sps:$4 sm:$0xff]   ;;  %v3732_v54 = vld [vmem:[%s3880_s28 + $0x2f0] ss:$12 sps:$4 sm:$0xff]  }
 0x10f   : > { %1970 = vmatprep.mubr.bf16.mxu0 %v3698_v55  ;;  %3405 = vmatprep.mubr.msk.bf16.mxu1 %vm1545_vm0, %v3700_v56 }
 0x116   : > { %1971 = vmatmul.mubr.bf16.gmra.mrb[100].mxu0 %v3701_v57  ;;  %3406 = vmatmul.mubr.msk.bf16.gmra.mrb[100].mxu1 %vm1545_vm0, %v3702_v58  ;;  %v3733_v57 = vld [vmem:[%s3880_s28 + $0x304] ss:$12 sps:$4 sm:$0xff]   ;;  %v3735_v58 = vld [vmem:[%s3880_s28 + $0x308] ss:$12 sps:$4 sm:$0xff]  }
 0x117   : > { %1978 = vmatprep.mubr.bf16.mxu0 %v3703_v59  ;;  %3409 = vmatprep.mubr.msk.bf16.mxu1 %vm1545_vm0, %v3705_v60 }
 0x11e   : > { %1979 = vmatmul.mubr.bf16.gmra.mrb[104].mxu0 %v3706_v61  ;;  %3410 = vmatmul.mubr.msk.bf16.gmra.mrb[104].mxu1 %vm1545_vm0, %v3707_v62 }
 0x11f   : > { %1986 = vmatprep.mubr.bf16.mxu0 %v3708_v63  ;;  %3413 = vmatprep.mubr.msk.bf16.mxu1 %vm1545_vm0, %v3710_v0 }
 0x121   : > { %v4078_v1 = vpop.f32.mrb[0].mxu0  ;;  %v4080_v2 = vpop.f32.mrb[0].mxu1 }
 0x122   : > { %v1774_v3 = vpop.f32.mrb[1].mxu0  ;;  %v2158_v4 = vpop.f32.mrb[1].mxu1 }
 0x123   : > { %v4084_v7 = vpop.f32.mrb[2].mxu0  ;;  %v4086_v8 = vpop.f32.mrb[2].mxu1  ;;  %v3736_v3 = vld [vmem:[%s3880_s28 + $0x300] ss:$12 sps:$4 sm:$0xff]  }
 0x124   : > { %v1777_v11 = vpop.f32.mrb[3].mxu0  ;;  %v2161_v12 = vpop.f32.mrb[3].mxu1  ;;  %v3737_v4 = vld [vmem:[%s3880_s28 + $0x320] ss:$12 sps:$4 sm:$0xff]  }
 0x126   : > { %1987 = vmatmul.mubr.bf16.gmra.mrb[108].mxu0 %v3711_v5  ;;  %3414 = vmatmul.mubr.msk.bf16.gmra.mrb[108].mxu1 %vm1545_vm0, %v3712_v6 }
 0x127   : > { %1994 = vmatprep.mubr.bf16.mxu0 %v3713_v9  ;;  %3417 = vmatprep.mubr.msk.bf16.mxu1 %vm1545_vm0, %v3715_v10  ;;  %v3738_v9 = vld [vmem:[%s3880_s28 + $0x31c] ss:$12 sps:$4 sm:$0xff]   ;;  %v3740_v10 = vld [vmem:[%s3880_s28 + $0x338] ss:$12 sps:$4 sm:$0xff]  }
 0x129   : > { %v4092_v13 = vpop.f32.mrb[4].mxu0  ;;  %v4094_v14 = vpop.f32.mrb[4].mxu1 }
 0x12a   : > { %v1782_v15 = vpop.f32.mrb[5].mxu0  ;;  %v2166_v16 = vpop.f32.mrb[5].mxu1 }
 0x12b   : > { %v4098_v19 = vpop.f32.mrb[6].mxu0  ;;  %v4100_v20 = vpop.f32.mrb[6].mxu1 }
 0x12c   : > { %v1785_v23 = vpop.f32.mrb[7].mxu0  ;;  %v2169_v24 = vpop.f32.mrb[7].mxu1 }
 0x12e   : > { %1995 = vmatmul.mubr.bf16.gmra.mrb[112].mxu0 %v3716_v17  ;;  %3418 = vmatmul.mubr.msk.bf16.gmra.mrb[112].mxu1 %vm1545_vm0, %v3717_v18 }
 0x12f   : > { %2002 = vmatprep.mubr.bf16.mxu0 %v3718_v21  ;;  %3421 = vmatprep.mubr.msk.bf16.mxu1 %vm1545_vm0, %v3720_v22  ;;  %v3741_v21 = vld [vmem:[%s3880_s28 + $0x318] ss:$12 sps:$4 sm:$0xff]   ;;  %v3742_v22 = vld [vmem:[%s3880_s28 + $0x350] ss:$12 sps:$4 sm:$0xff]  }
 0x131   : > { %v4106_v25 = vpop.f32.mrb[8].mxu0  ;;  %v4108_v26 = vpop.f32.mrb[8].mxu1 }
 0x132   : > { %v1790_v27 = vpop.f32.mrb[9].mxu0  ;;  %v2174_v28 = vpop.f32.mrb[9].mxu1 }
 0x133   : > { %v4112_v31 = vpop.f32.mrb[10].mxu0  ;;  %v4114_v32 = vpop.f32.mrb[10].mxu1  ;;  %v3743_v27 = vld [vmem:[%s3880_s28 + $0x334] ss:$12 sps:$4 sm:$0xff]  }
 0x134   : > { %v1793_v35 = vpop.f32.mrb[11].mxu0  ;;  %v2177_v36 = vpop.f32.mrb[11].mxu1  ;;  %v3745_v28 = vld [vmem:[%s3880_s28 + $0x368] ss:$12 sps:$4 sm:$0xff]  }
 0x136   : > { %2003 = vmatmul.mubr.bf16.gmra.mrb[116].mxu0 %v3721_v29  ;;  %3422 = vmatmul.mubr.msk.bf16.gmra.mrb[116].mxu1 %vm1545_vm0, %v3722_v30 }
 0x137   : > { %2010 = vmatprep.mubr.bf16.mxu0 %v3723_v33  ;;  %3425 = vmatprep.mubr.msk.bf16.mxu1 %vm1545_vm0, %v3725_v34 }
 0x139   : > { %v4120_v37 = vpop.f32.mrb[12].mxu0  ;;  %v4122_v38 = vpop.f32.mrb[12].mxu1 }
 0x13a   : > { %v1798_v39 = vpop.f32.mrb[13].mxu0  ;;  %v2182_v40 = vpop.f32.mrb[13].mxu1 }
 0x13b   : > { %v4126_v43 = vpop.f32.mrb[14].mxu0  ;;  %v4128_v44 = vpop.f32.mrb[14].mxu1  ;;  %v3746_v39 = vld [vmem:[%s3880_s28 + $0x330] ss:$12 sps:$4 sm:$0xff]   ;;  %v3747_v40 = vld [vmem:[%s3880_s28 + $0x380] ss:$12 sps:$4 sm:$0xff]  }
 0x13c   : > { %v1801_v47 = vpop.f32.mrb[15].mxu0  ;;  %v2185_v48 = vpop.f32.mrb[15].mxu1 }
 0x13e   : > { %2011 = vmatmul.mubr.bf16.gmra.mrb[120].mxu0 %v3726_v41  ;;  %3426 = vmatmul.mubr.msk.bf16.gmra.mrb[120].mxu1 %vm1545_vm0, %v3727_v42 }
 0x13f   : > { %2018 = vmatprep.mubr.bf16.mxu0 %v3728_v45  ;;  %3429 = vmatprep.mubr.msk.bf16.mxu1 %vm1545_vm0, %v3730_v46  ;;  %v3748_v45 = vld [vmem:[%s3880_s28 + $0x34c] ss:$12 sps:$4 sm:$0xff]  }
 0x140   : > { %v3750_v46 = vld [vmem:[%s3880_s28 + $0x398] ss:$12 sps:$4 sm:$0xff]  }
 0x141   : > { %v4134_v49 = vpop.f32.mrb[16].mxu0  ;;  %v4136_v50 = vpop.f32.mrb[16].mxu1 }
 0x142   : > { %v1806_v51 = vpop.f32.mrb[17].mxu0  ;;  %v2190_v52 = vpop.f32.mrb[17].mxu1 }
 0x143   : > { %v4140_v55 = vpop.f32.mrb[18].mxu0  ;;  %v4142_v56 = vpop.f32.mrb[18].mxu1 }
 0x144   : > { %v1809_v59 = vpop.f32.mrb[19].mxu0  ;;  %v2193_v60 = vpop.f32.mrb[19].mxu1 }
 0x146   : > { %2019 = vmatmul.mubr.bf16.gmra.mrb[124].mxu0 %v3731_v53  ;;  %3430 = vmatmul.mubr.msk.bf16.gmra.mrb[124].mxu1 %vm1545_vm0, %v3732_v54 }
 0x147   : > { %2026 = vmatprep.mubr.bf16.mxu0 %v3733_v57  ;;  %3433 = vmatprep.mubr.msk.bf16.mxu1 %vm1545_vm0, %v3735_v58  ;;  %v3751_v57 = vld [vmem:[%s3880_s28 + $0x348] ss:$12 sps:$4 sm:$0xff]   ;;  %v3752_v58 = vld [vmem:[%s3880_s28 + $0x3b0] ss:$12 sps:$4 sm:$0xff]  }
 0x149   : > { %v4148_v61 = vpop.f32.mrb[20].mxu0  ;;  %v4150_v62 = vpop.f32.mrb[20].mxu1 }
 0x14a   : > { %v1814_v63 = vpop.f32.mrb[21].mxu0  ;;  %v2198_v0 = vpop.f32.mrb[21].mxu1 }
 0x14b   : > { %v4154_v5 = vpop.f32.mrb[22].mxu0  ;;  %v4156_v6 = vpop.f32.mrb[22].mxu1  ;;  %v3753_v63 = vld [vmem:[%s3880_s28 + $0x364] ss:$12 sps:$4 sm:$0xff]   ;;  %v3755_v0 = vld [vmem:[%s3880_s28 + $0x3c8] ss:$12 sps:$4 sm:$0xff]  }
 0x14c   : > { %v1817_v11 = vpop.f32.mrb[23].mxu0  ;;  %v2201_v12 = vpop.f32.mrb[23].mxu1 }
 0x14e   : > { %2027 = vmatmul.mubr.bf16.gmra.mrb[128].mxu0 %v3736_v3  ;;  %3434 = vmatmul.mubr.msk.bf16.gmra.mrb[128].mxu1 %vm1545_vm0, %v3737_v4 }
 0x14f   : > { %2034 = vmatprep.mubr.bf16.mxu0 %v3738_v9  ;;  %3437 = vmatprep.mubr.msk.bf16.mxu1 %vm1545_vm0, %v3740_v10 }
 0x151   : > { %v4162_v15 = vpop.f32.mrb[24].mxu0  ;;  %v4164_v16 = vpop.f32.mrb[24].mxu1 }
 0x152   : > { %v1822_v17 = vpop.f32.mrb[25].mxu0  ;;  %v2206_v18 = vpop.f32.mrb[25].mxu1 }
 0x153   : > { %v4168_v23 = vpop.f32.mrb[26].mxu0  ;;  %v4170_v24 = vpop.f32.mrb[26].mxu1  ;;  %v3756_v17 = vld [vmem:[%s3880_s28 + $0x360] ss:$12 sps:$4 sm:$0xff]  }
 0x154   : > { %v1825_v29 = vpop.f32.mrb[27].mxu0  ;;  %v2209_v30 = vpop.f32.mrb[27].mxu1  ;;  %v3757_v18 = vld [vmem:[%s3880_s28 + $0x3e0] ss:$12 sps:$4 sm:$0xff]  }
 0x156   : > { %2035 = vmatmul.mubr.bf16.gmra.mrb[132].mxu0 %v3741_v21  ;;  %3438 = vmatmul.mubr.msk.bf16.gmra.mrb[132].mxu1 %vm1545_vm0, %v3742_v22 }
 0x157   : > { %2042 = vmatprep.mubr.bf16.mxu0 %v3743_v27  ;;  %3441 = vmatprep.mubr.msk.bf16.mxu1 %vm1545_vm0, %v3745_v28  ;;  %v3758_v27 = vld [vmem:[%s3880_s28 + $0x37c] ss:$12 sps:$4 sm:$0xff]   ;;  %v3760_v28 = vld [vmem:[%s3880_s28 + $0x3f8] ss:$12 sps:$4 sm:$0xff]  }
 0x159   : > { %v4176_v33 = vpop.f32.mrb[28].mxu0  ;;  %v4178_v34 = vpop.f32.mrb[28].mxu1 }
 0x15a   : > { %v1830_v35 = vpop.f32.mrb[29].mxu0  ;;  %v2214_v36 = vpop.f32.mrb[29].mxu1 }
 0x15b   : > { %v4182_v41 = vpop.f32.mrb[30].mxu0  ;;  %v4184_v42 = vpop.f32.mrb[30].mxu1 }
 0x15c   : > { %v1833_v47 = vpop.f32.mrb[31].mxu0  ;;  %v2217_v48 = vpop.f32.mrb[31].mxu1 }
 0x15e   : > { %2043 = vmatmul.mubr.bf16.gmra.mrb[136].mxu0 %v3746_v39  ;;  %3442 = vmatmul.mubr.msk.bf16.gmra.mrb[136].mxu1 %vm1545_vm0, %v3747_v40 }
 0x15f   : > { %2050 = vmatprep.mubr.bf16.mxu0 %v3748_v45  ;;  %3445 = vmatprep.mubr.msk.bf16.mxu1 %vm1545_vm0, %v3750_v46  ;;  %v3761_v45 = vld [vmem:[%s3880_s28 + $0x378] ss:$12 sps:$4 sm:$0xff]   ;;  %v3762_v46 = vld [vmem:[%s3880_s28 + $0x410] ss:$12 sps:$4 sm:$0xff]  }
 0x161   : > { %v4190_v51 = vpop.f32.mrb[32].mxu0  ;;  %v4192_v52 = vpop.f32.mrb[32].mxu1 }
 0x162   : > { %4902 = vst [vmem:[#allocation2_spill] sm:$0xff] %v4192_v52  ;;  %v1838_v53 = vpop.f32.mrb[33].mxu0  ;;  %v2222_v54 = vpop.f32.mrb[33].mxu1  ;;  %v3795_v52 = vld [vmem:[%s3880_s28 + $0x548] ss:$12 sps:$4 sm:$0xff]  }
 0x163   : > { %v4196_v59 = vpop.f32.mrb[34].mxu0  ;;  %v4198_v60 = vpop.f32.mrb[34].mxu1  ;;  %v3763_v53 = vld [vmem:[%s3880_s28 + $0x394] ss:$12 sps:$4 sm:$0xff]  }
 0x164   : > { %4903 = vst [vmem:[#allocation3_spill] sm:$0xff] %v4198_v60  ;;  %v1841_v3 = vpop.f32.mrb[35].mxu0  ;;  %v2225_v4 = vpop.f32.mrb[35].mxu1  ;;  %v3765_v54 = vld [vmem:[%s3880_s28 + $0x428] ss:$12 sps:$4 sm:$0xff]  }
 0x166   : > { %2051 = vmatmul.mubr.bf16.gmra.mrb[140].mxu0 %v3751_v57  ;;  %3446 = vmatmul.mubr.msk.bf16.gmra.mrb[140].mxu1 %vm1545_vm0, %v3752_v58 }
 0x167   : > { %2058 = vmatprep.mubr.bf16.mxu0 %v3753_v63  ;;  %3449 = vmatprep.mubr.msk.bf16.mxu1 %vm1545_vm0, %v3755_v0 }
 0x169   : > { %v4204_v9 = vpop.f32.mrb[36].mxu0  ;;  %v4206_v10 = vpop.f32.mrb[36].mxu1 }
 0x16a   : > { %4904 = vst [vmem:[#allocation4_spill] sm:$0xff] %v4206_v10  ;;  %v1846_v11 = vpop.f32.mrb[37].mxu0  ;;  %v2230_v12 = vpop.f32.mrb[37].mxu1 }
 0x16b   : > { %v4210_v21 = vpop.f32.mrb[38].mxu0  ;;  %v4212_v22 = vpop.f32.mrb[38].mxu1  ;;  %v3766_v11 = vld [vmem:[%s3880_s28 + $0x390] ss:$12 sps:$4 sm:$0xff]   ;;  %v3767_v12 = vld [vmem:[%s3880_s28 + $0x440] ss:$12 sps:$4 sm:$0xff]  }
 0x16c   : > { %4905 = vst [vmem:[#allocation5_spill] sm:$0xff] %v4212_v22  ;;  %v1849_v29 = vpop.f32.mrb[39].mxu0  ;;  %v2233_v30 = vpop.f32.mrb[39].mxu1  ;;  %v3793_v22 = vld [vmem:[%s3880_s28 + $0x424] ss:$12 sps:$4 sm:$0xff]  }
 0x16e   : > { %2059 = vmatmul.mubr.bf16.gmra.mrb[144].mxu0 %v3756_v17  ;;  %3450 = vmatmul.mubr.msk.bf16.gmra.mrb[144].mxu1 %vm1545_vm0, %v3757_v18 }
 0x16f   : > { %2066 = vmatprep.mubr.bf16.mxu0 %v3758_v27  ;;  %3453 = vmatprep.mubr.msk.bf16.mxu1 %vm1545_vm0, %v3760_v28  ;;  %v3768_v27 = vld [vmem:[%s3880_s28 + $0x3ac] ss:$12 sps:$4 sm:$0xff]  }
 0x170   : > { %v3770_v28 = vld [vmem:[%s3880_s28 + $0x458] ss:$12 sps:$4 sm:$0xff]  }
 0x171   : > { %v4218_v35 = vpop.f32.mrb[40].mxu0  ;;  %v4220_v36 = vpop.f32.mrb[40].mxu1 }
 0x172   : > { %4906 = vst [vmem:[#allocation6_spill] sm:$0xff] %v4220_v36  ;;  %v1854_v39 = vpop.f32.mrb[41].mxu0  ;;  %v2238_v40 = vpop.f32.mrb[41].mxu1 }
 0x173   : > { %v4224_v47 = vpop.f32.mrb[42].mxu0  ;;  %v4226_v48 = vpop.f32.mrb[42].mxu1 }
 0x174   : > { %4907 = vst [vmem:[#allocation7_spill] sm:$0xff] %v4226_v48  ;;  %v1857_v57 = vpop.f32.mrb[43].mxu0  ;;  %v2241_v58 = vpop.f32.mrb[43].mxu1 }
 0x176   : > { %2067 = vmatmul.mubr.bf16.gmra.mrb[148].mxu0 %v3761_v45  ;;  %3454 = vmatmul.mubr.msk.bf16.gmra.mrb[148].mxu1 %vm1545_vm0, %v3762_v46 }
 0x177   : > { %2074 = vmatprep.mubr.bf16.mxu0 %v3763_v53  ;;  %3457 = vmatprep.mubr.msk.bf16.mxu1 %vm1545_vm0, %v3765_v54  ;;  %v3771_v53 = vld [vmem:[%s3880_s28 + $0x3a8] ss:$12 sps:$4 sm:$0xff]   ;;  %v3772_v54 = vld [vmem:[%s3880_s28 + $0x470] ss:$12 sps:$4 sm:$0xff]  }
 0x179   : > { %v4232_v63 = vpop.f32.mrb[44].mxu0  ;;  %v4234_v0 = vpop.f32.mrb[44].mxu1 }
 0x17a   : > { %4908 = vst [vmem:[#allocation8_spill] sm:$0xff] %v4234_v0  ;;  %v1862_v3 = vpop.f32.mrb[45].mxu0  ;;  %v2246_v4 = vpop.f32.mrb[45].mxu1 }
 0x17b   : > { %v4238_v17 = vpop.f32.mrb[46].mxu0  ;;  %v4240_v18 = vpop.f32.mrb[46].mxu1  ;;  %v3773_v3 = vld [vmem:[%s3880_s28 + $0x3c4] ss:$12 sps:$4 sm:$0xff]   ;;  %v3775_v4 = vld [vmem:[%s3880_s28 + $0x488] ss:$12 sps:$4 sm:$0xff]  }
 0x17c   : > { %4909 = vst [vmem:[#allocation9_spill] sm:$0xff] %v4240_v18  ;;  %v1865_v29 = vpop.f32.mrb[47].mxu0  ;;  %v2249_v30 = vpop.f32.mrb[47].mxu1  ;;  %v3787_v18 = vld [vmem:[%s3880_s28 + $0x500] ss:$12 sps:$4 sm:$0xff]  }
 0x17e   : > { %2075 = vmatmul.mubr.bf16.gmra.mrb[152].mxu0 %v3766_v11  ;;  %3458 = vmatmul.mubr.msk.bf16.gmra.mrb[152].mxu1 %vm1545_vm0, %v3767_v12 }
 0x17f   : > { %2082 = vmatprep.mubr.bf16.mxu0 %v3768_v27  ;;  %3461 = vmatprep.mubr.msk.bf16.mxu1 %vm1545_vm0, %v3770_v28 }
 0x181   : > { %v4246_v39 = vpop.f32.mrb[48].mxu0  ;;  %v4248_v40 = vpop.f32.mrb[48].mxu1 }
 0x182   : > { %4910 = vst [vmem:[#allocation10_spill] sm:$0xff] %v4248_v40  ;;  %v1870_v45 = vpop.f32.mrb[49].mxu0  ;;  %v2254_v46 = vpop.f32.mrb[49].mxu1 }
 0x183   : > { %v4252_v57 = vpop.f32.mrb[50].mxu0  ;;  %v4254_v58 = vpop.f32.mrb[50].mxu1  ;;  %v3776_v45 = vld [vmem:[%s3880_s28 + $0x3c0] ss:$12 sps:$4 sm:$0xff]  }
 0x184   : > { %4911 = vst [vmem:[#allocation11_spill] sm:$0xff] %v4254_v58  ;;  %v1873_v11 = vpop.f32.mrb[51].mxu0  ;;  %v2257_v12 = vpop.f32.mrb[51].mxu1  ;;  %v3777_v46 = vld [vmem:[%s3880_s28 + $0x4a0] ss:$12 sps:$4 sm:$0xff]  }
 0x186   : > { %2083 = vmatmul.mubr.bf16.gmra.mrb[156].mxu0 %v3771_v53  ;;  %3462 = vmatmul.mubr.msk.bf16.gmra.mrb[156].mxu1 %vm1545_vm0, %v3772_v54  ;;  %v3778_v53 = vld [vmem:[%s3880_s28 + $0x3dc] ss:$12 sps:$4 sm:$0xff]   ;;  %v3780_v54 = vld [vmem:[%s3880_s28 + $0x4b8] ss:$12 sps:$4 sm:$0xff]  }
 0x187   : > { %2090 = vmatprep.mubr.bf16.mxu0 %v3773_v3  ;;  %3465 = vmatprep.mubr.msk.bf16.mxu1 %vm1545_vm0, %v3775_v4 }
 0x189   : > { %v4260_v27 = vpop.f32.mrb[52].mxu0  ;;  %v4262_v28 = vpop.f32.mrb[52].mxu1 }
 0x18a   : > { %4912 = vst [vmem:[#allocation12_spill] sm:$0xff] %v4262_v28  ;;  %v1878_v29 = vpop.f32.mrb[53].mxu0  ;;  %v2262_v30 = vpop.f32.mrb[53].mxu1  ;;  %v3781_v28 = vld [vmem:[%s3880_s28 + $0x3d8] ss:$12 sps:$4 sm:$0xff]  }
 0x18b   : > { %v4266_v58 = vpop.f32.mrb[54].mxu0  ;;  %v4268_v11 = vpop.f32.mrb[54].mxu1 }
 0x18c   : > { %4913 = vst [vmem:[#allocation13_spill] sm:$0xff] %v4268_v11  ;;  %v1881_v3 = vpop.f32.mrb[55].mxu0  ;;  %v2265_v4 = vpop.f32.mrb[55].mxu1  ;;  %v3782_v11 = vld [vmem:[%s3880_s28 + $0x4d0] ss:$12 sps:$4 sm:$0xff]  }
 0x18e   : > { %2091 = vmatmul.mubr.bf16.gmra.mrb[160].mxu0 %v3776_v45  ;;  %3466 = vmatmul.mubr.msk.bf16.gmra.mrb[160].mxu1 %vm1545_vm0, %v3777_v46  ;;  %v3783_v45 = vld [vmem:[%s3880_s28 + $0x3f4] ss:$12 sps:$4 sm:$0xff]  }
 0x18f   : > { %2098 = vmatprep.mubr.bf16.mxu0 %v3778_v53  ;;  %3469 = vmatprep.mubr.msk.bf16.mxu1 %vm1545_vm0, %v3780_v54  ;;  %v3785_v46 = vld [vmem:[%s3880_s28 + $0x4e8] ss:$12 sps:$4 sm:$0xff]  }
 0x191   : > { %v4274_v12 = vpop.f32.mrb[56].mxu0  ;;  %v4276_v29 = vpop.f32.mrb[56].mxu1 }
 0x192   : > { %4914 = vst [vmem:[#allocation14_spill] sm:$0xff] %v4276_v29  ;;  %v1886_v30 = vpop.f32.mrb[57].mxu0  ;;  %v2270_v40 = vpop.f32.mrb[57].mxu1 }
 0x193   : > { %v4280_v48 = vpop.f32.mrb[58].mxu0  ;;  %v4282_v3 = vpop.f32.mrb[58].mxu1 }
 0x194   : > { %4915 = vst [vmem:[#allocation15_spill] sm:$0xff] %v4282_v3  ;;  %v1889_v53 = vpop.f32.mrb[59].mxu0  ;;  %v2273_v54 = vpop.f32.mrb[59].mxu1  ;;  %v3786_v3 = vld [vmem:[%s3880_s28 + $0x3f0] ss:$12 sps:$4 sm:$0xff]  }
 0x195   : > { %v3788_v53 = vld [vmem:[%s3880_s28 + $0x40c] ss:$12 sps:$4 sm:$0xff]  }
 0x196   : > { %2099 = vmatmul.mubr.bf16.gmra.mrb[164].mxu0 %v3781_v28  ;;  %3470 = vmatmul.mubr.msk.bf16.gmra.mrb[164].mxu1 %vm1545_vm0, %v3782_v11  ;;  %v3790_v28 = vld [vmem:[%s3880_s28 + $0x518] ss:$12 sps:$4 sm:$0xff]  }
 0x197   : > { %2106 = vmatprep.mubr.bf16.mxu0 %v3783_v45  ;;  %3473 = vmatprep.mubr.msk.bf16.mxu1 %vm1545_vm0, %v3785_v46  ;;  %v4303_v45 = vld [vmem:[%s4900_s2] ss:$0 sm:$0xff] }
 0x198   : > { %v1773_v46 = vadd.f32 %v4303_v45, %v4078_v1  ;;  %v3791_v1 = vld [vmem:[%s3880_s28 + $0x408] ss:$12 sps:$4 sm:$0xff]  }
 0x199   : > { %v4288_v40 = vpop.f32.mrb[60].mxu0  ;;  %v4290_v4 = vpop.f32.mrb[60].mxu1 }
 0x19a   : > { %4916 = vst [vmem:[#allocation16_spill] sm:$0xff] %v4290_v4  ;;  %v1894_v30 = vpop.f32.mrb[61].mxu0  ;;  %v2278_v29 = vpop.f32.mrb[61].mxu1 }
 0x19b   : > { %v4294_v36 = vpop.f32.mrb[62].mxu0  ;;  %v4296_v0 = vpop.f32.mrb[62].mxu1  ;;  %v1781_v29 = vadd.f32 %v4303_v45, %v4092_v13 }
 0x19c   : > { %4917 = vst [vmem:[#allocation17_spill] sm:$0xff] %v4296_v0  ;;  %v1897_v54 = vpop.f32.mrb[63].mxu0  ;;  %v2281_v11 = vpop.f32.mrb[63].mxu1 }
 0x19d   : > { %v3792_v54 = vld [vmem:[%s3880_s28 + $0x530] ss:$12 sps:$4 sm:$0xff]   ;;  %v1776_v11 = vadd.f32 %v4303_v45, %v4084_v7  ;;  %v1797_v7 = vadd.f32 %v4303_v45, %v4120_v37  ;;  %v1792_v37 = vadd.f32 %v4303_v45, %v4112_v31  ;;  %v1813_v31 = vadd.f32 %v4303_v45, %v4148_v61 }
 0x19e   : > { %2107 = vmatmul.mubr.bf16.gmra.mrb[168].mxu0 %v3786_v3  ;;  %3474 = vmatmul.mubr.msk.bf16.gmra.mrb[168].mxu1 %vm1545_vm0, %v3787_v18  ;;  %v1784_v3 = vadd.f32 %v4303_v45, %v4098_v19  ;;  %v1808_v61 = vadd.f32 %v4303_v45, %v4140_v55  ;;  %v1829_v55 = vadd.f32 %v4303_v45, %v4176_v33 }
 0x19f   : > { %2114 = vmatprep.mubr.bf16.mxu0 %v3788_v53  ;;  %3477 = vmatprep.mubr.msk.bf16.mxu1 %vm1545_vm0, %v3790_v28  ;;  %v1824_v33 = vadd.f32 %v4303_v45, %v4168_v23  ;;  %v1845_v23 = vadd.f32 %v4303_v45, %v4204_v9  ;;  %v1840_v9 = vadd.f32 %v4303_v45, %v4196_v59 }
 0x1a0   : > { %v1861_v59 = vadd.f32 %v4303_v45, %v4232_v63 }
 0x1a1   : > { %v4312_v30 = vpop.f32.mrb[64].mxu0  ;;  %v3371_v18 = vpop.f32.mrb[64].mxu1 }
 0x1a2   : > { %v2326_v13 = vadd.f32 %v3371_v18, %v1781_v29  ;;  %v1902_v53 = vpop.f32.mrb[65].mxu0  ;;  %v2317_v28 = vpop.f32.mrb[65].mxu1 }
 0x1a3   : > { %v2318_v0 = vadd.f32 %v2317_v28, %v1773_v46  ;;  %v4325_v4 = vpop.f32.mrb[66].mxu0  ;;  %v3372_v60 = vpop.f32.mrb[66].mxu1  ;;  %v1800_v46 = vadd.f32 %v4303_v45, %v4126_v43  ;;  %v3797_v53 = vld [vmem:[%s3880_s28 + $0x560] ss:$12 sps:$4 sm:$0xff]  }
 0x1a4   : > { %2831 = vst.msk [vmem:[%s4317_s9 + $0x10] sm:$0xff] %vm2828_vm1, %v2326_v13  ;;  %v2329_v19 = vadd.f32 %v3372_v60, %v1784_v3  ;;  %v1905_v10 = vpop.f32.mrb[67].mxu0  ;;  %v2320_v29 = vpop.f32.mrb[67].mxu1  ;;  %v1789_v60 = vadd.f32 %v4303_v45, %v4106_v25 }
 0x1a5   : > { %2829 = vst.msk [vmem:[%s4317_s9] sm:$0xff] %vm2828_vm1, %v2318_v0  ;;  %v2321_v18 = vadd.f32 %v2320_v29, %v1776_v11  ;;  %v3800_v11 = vld [vmem:[%s3880_s28 + $0x578] ss:$12 sps:$4 sm:$0xff]  }
 0x1a6   : > { %2832 = vst.msk [vmem:[%s4317_s9 + $0x18] sm:$0xff] %vm2828_vm1, %v2329_v19  ;;  %2115 = vmatmul.mubr.bf16.gmra.mrb[172].mxu0 %v3791_v1  ;;  %3478 = vmatmul.mubr.msk.bf16.gmra.mrb[172].mxu1 %vm1545_vm0, %v3792_v54  ;;  %v3798_v54 = vld [vmem:[%s3880_s28 + $0x43c] ss:$12 sps:$4 sm:$0xff]  }
 0x1a7   : > { %2830 = vst.msk [vmem:[%s4317_s9 + $0x8] sm:$0xff] %vm2828_vm1, %v2321_v18  ;;  %2122 = vmatprep.mubr.bf16.mxu0 %v3793_v22  ;;  %3481 = vmatprep.mubr.msk.bf16.mxu1 %vm1545_vm0, %v3795_v52  ;;  %v3796_v52 = vld [vmem:[%s3880_s28 + $0x420] ss:$12 sps:$4 sm:$0xff]  }
 0x1a9   : > { %v4343_v10 = vpop.f32.mrb[68].mxu0  ;;  %v3375_v0 = vpop.f32.mrb[68].mxu1 }
 0x1aa   : > { %v2342_v3 = vadd.f32 %v3375_v0, %v1797_v7  ;;  %v1910_v22 = vpop.f32.mrb[69].mxu0  ;;  %v2333_v13 = vpop.f32.mrb[69].mxu1  ;;  %v1805_v7 = vadd.f32 %v4303_v45, %v4134_v49 }
 0x1ab   : > { %v2334_v28 = vadd.f32 %v2333_v13, %v1789_v60  ;;  %v4351_v1 = vpop.f32.mrb[70].mxu0  ;;  %v3376_v25 = vpop.f32.mrb[70].mxu1 }
 0x1ac   : > { %2835 = vst.msk [vmem:[%s4317_s9 + $0x30] sm:$0xff] %vm2828_vm1, %v2342_v3  ;;  %v2345_v43 = vadd.f32 %v3376_v25, %v1800_v46  ;;  %v1913_v19 = vpop.f32.mrb[71].mxu0  ;;  %v2336_v29 = vpop.f32.mrb[71].mxu1  ;;  %v1816_v46 = vadd.f32 %v4303_v45, %v4154_v5  ;;  %v3803_v25 = vld [vmem:[%s3880_s28 + $0x454] ss:$12 sps:$4 sm:$0xff]  }
 0x1ad   : > { %2833 = vst.msk [vmem:[%s4317_s9 + $0x20] sm:$0xff] %vm2828_vm1, %v2334_v28  ;;  %v2337_v18 = vadd.f32 %v2336_v29, %v1792_v37  ;;  %v1821_v29 = vadd.f32 %v4303_v45, %v4162_v15 }
 0x1ae   : > { %2836 = vst.msk [vmem:[%s4317_s9 + $0x38] sm:$0xff] %vm2828_vm1, %v2345_v43  ;;  %2123 = vmatmul.mubr.bf16.gmra.mrb[176].mxu0 %v3796_v52  ;;  %3482 = vmatmul.mubr.msk.bf16.gmra.mrb[176].mxu1 %vm1545_vm0, %v3797_v53  ;;  %v3801_v52 = vld [vmem:[%s3880_s28 + $0x438] ss:$12 sps:$4 sm:$0xff]   ;;  %v3802_v53 = vld [vmem:[%s3880_s28 + $0x590] ss:$12 sps:$4 sm:$0xff]  }
 0x1af   : > { %2834 = vst.msk [vmem:[%s4317_s9 + $0x28] sm:$0xff] %vm2828_vm1, %v2337_v18  ;;  %2130 = vmatprep.mubr.bf16.mxu0 %v3798_v54  ;;  %3485 = vmatprep.mubr.msk.bf16.mxu1 %vm1545_vm0, %v3800_v11  ;;  %v3805_v54 = vld [vmem:[%s3880_s28 + $0x5a8] ss:$12 sps:$4 sm:$0xff]  }
 0x1b1   : > { %v4369_v60 = vpop.f32.mrb[72].mxu0  ;;  %v3379_v0 = vpop.f32.mrb[72].mxu1 }
 0x1b2   : > { %v2358_v3 = vadd.f32 %v3379_v0, %v1813_v31  ;;  %v1918_v22 = vpop.f32.mrb[73].mxu0  ;;  %v2349_v13 = vpop.f32.mrb[73].mxu1 }
 0x1b3   : > { %v2350_v37 = vadd.f32 %v2349_v13, %v1805_v7  ;;  %v4377_v28 = vpop.f32.mrb[74].mxu0  ;;  %v3380_v49 = vpop.f32.mrb[74].mxu1  ;;  %v1832_v7 = vadd.f32 %v4303_v45, %v4182_v41  ;;  %v3806_v22 = vld [vmem:[%s3880_s28 + $0x450] ss:$12 sps:$4 sm:$0xff]   ;;  %v3807_v13 = vld [vmem:[%s3880_s28 + $0x5c0] ss:$12 sps:$4 sm:$0xff]  }
 0x1b4   : > { %2839 = vst.msk [vmem:[%s4317_s9 + $0x50] sm:$0xff] %vm2828_vm1, %v2358_v3  ;;  %v2361_v5 = vadd.f32 %v3380_v49, %v1816_v46  ;;  %v1921_v11 = vpop.f32.mrb[75].mxu0  ;;  %v2352_v43 = vpop.f32.mrb[75].mxu1 }
 0x1b5   : > { %2837 = vst.msk [vmem:[%s4317_s9 + $0x40] sm:$0xff] %vm2828_vm1, %v2350_v37  ;;  %v2353_v19 = vadd.f32 %v2352_v43, %v1808_v61  ;;  %v3808_v61 = vld [vmem:[%s3880_s28 + $0x46c] ss:$12 sps:$4 sm:$0xff]  }
 0x1b6   : > { %2840 = vst.msk [vmem:[%s4317_s9 + $0x58] sm:$0xff] %vm2828_vm1, %v2361_v5  ;;  %2131 = vmatmul.mubr.bf16.gmra.mrb[180].mxu0 %v3801_v52  ;;  %3486 = vmatmul.mubr.msk.bf16.gmra.mrb[180].mxu1 %vm1545_vm0, %v3802_v53  ;;  %v3810_v37 = vld [vmem:[%s3880_s28 + $0x5d8] ss:$12 sps:$4 sm:$0xff]   ;;  %v1837_v5 = vadd.f32 %v4303_v45, %v4190_v51 }
 0x1b7   : > { %2838 = vst.msk [vmem:[%s4317_s9 + $0x48] sm:$0xff] %vm2828_vm1, %v2353_v19  ;;  %2138 = vmatprep.mubr.bf16.mxu0 %v3803_v25  ;;  %3489 = vmatprep.mubr.msk.bf16.mxu1 %vm1545_vm0, %v3805_v54  ;;  %v1848_v19 = vadd.f32 %v4303_v45, %v4210_v21 }
 0x1b9   : > { %v4395_v18 = vpop.f32.mrb[76].mxu0  ;;  %v3383_v31 = vpop.f32.mrb[76].mxu1 }
 0x1ba   : > { %v2374_v0 = vadd.f32 %v3383_v31, %v1829_v55  ;;  %v1926_v46 = vpop.f32.mrb[77].mxu0  ;;  %v2365_v3 = vpop.f32.mrb[77].mxu1 }
 0x1bb   : > { %v2366_v52 = vadd.f32 %v2365_v3, %v1821_v29  ;;  %v4403_v53 = vpop.f32.mrb[78].mxu0  ;;  %v3384_v15 = vpop.f32.mrb[78].mxu1 }
 0x1bc   : > { %2843 = vst.msk [vmem:[%s4317_s9 + $0x70] sm:$0xff] %vm2828_vm1, %v2374_v0  ;;  %v2377_v41 = vadd.f32 %v3384_v15, %v1832_v7  ;;  %v1929_v49 = vpop.f32.mrb[79].mxu0  ;;  %v2368_v25 = vpop.f32.mrb[79].mxu1  ;;  %v3811_v7 = vld [vmem:[%s3880_s28 + $0x468] ss:$12 sps:$4 sm:$0xff]  }
 0x1bd   : > { %2841 = vst.msk [vmem:[%s4317_s9 + $0x60] sm:$0xff] %vm2828_vm1, %v2366_v52  ;;  %v2369_v54 = vadd.f32 %v2368_v25, %v1824_v33  ;;  %v3812_v0 = vld [vmem:[%s3880_s28 + $0x5f0] ss:$12 sps:$4 sm:$0xff]   ;;  %v1853_v52 = vadd.f32 %v4303_v45, %v4218_v35 }
 0x1be   : > { %2844 = vst.msk [vmem:[%s4317_s9 + $0x78] sm:$0xff] %vm2828_vm1, %v2377_v41  ;;  %2139 = vmatmul.mubr.bf16.gmra.mrb[184].mxu0 %v3806_v22  ;;  %3490 = vmatmul.mubr.msk.bf16.gmra.mrb[184].mxu1 %vm1545_vm0, %v3807_v13 }
 0x1bf   : > { %2842 = vst.msk [vmem:[%s4317_s9 + $0x68] sm:$0xff] %vm2828_vm1, %v2369_v54  ;;  %2146 = vmatprep.mubr.bf16.mxu0 %v3808_v61  ;;  %3493 = vmatprep.mubr.msk.bf16.mxu1 %vm1545_vm0, %v3810_v37  ;;  %v1864_v37 = vadd.f32 %v4303_v45, %v4238_v17  ;;  %v1856_v54 = vadd.f32 %v4303_v45, %v4224_v47 }
 0x1c0   : > { %v1877_v47 = vadd.f32 %v4303_v45, %v4260_v27  ;;  %v1869_v17 = vadd.f32 %v4303_v45, %v4246_v39 }
 0x1c1   : > { %v4421_v11 = vpop.f32.mrb[80].mxu0  ;;  %v3387_v43 = vpop.f32.mrb[80].mxu1 }
 0x1c2   : > { %v2390_v55 = vadd.f32 %v3387_v43, %v1845_v23  ;;  %v1934_v29 = vpop.f32.mrb[81].mxu0  ;;  %v2381_v31 = vpop.f32.mrb[81].mxu1 }
 0x1c3   : > { %v2382_v46 = vadd.f32 %v2381_v31, %v1837_v5  ;;  %v4429_v3 = vpop.f32.mrb[82].mxu0  ;;  %v3388_v51 = vpop.f32.mrb[82].mxu1 }
 0x1c4   : > { %2847 = vst.msk [vmem:[%s4317_s9 + $0x90] sm:$0xff] %vm2828_vm1, %v2390_v55  ;;  %v2393_v22 = vadd.f32 %v3388_v51, %v1848_v19  ;;  %v1937_v13 = vpop.f32.mrb[83].mxu0  ;;  %v2384_v33 = vpop.f32.mrb[83].mxu1  ;;  %v1872_v51 = vadd.f32 %v4303_v45, %v4252_v57  ;;  %v1893_v57 = vadd.f32 %v4303_v45, %v4288_v40 }
 0x1c5   : > { %2845 = vst.msk [vmem:[%s4317_s9 + $0x80] sm:$0xff] %vm2828_vm1, %v2382_v46  ;;  %v2385_v21 = vadd.f32 %v2384_v33, %v1840_v9 }
 0x1c6   : > { %2848 = vst.msk [vmem:[%s4317_s9 + $0x98] sm:$0xff] %vm2828_vm1, %v2393_v22  ;;  %2147 = vmatmul.mubr.bf16.gmra.mrb[188].mxu0 %v3811_v7  ;;  %3494 = vmatmul.mubr.msk.bf16.gmra.mrb[188].mxu1 %vm1545_vm0, %v3812_v0  ;;  %v1880_v7 = vadd.f32 %v4303_v45, %v4266_v58  ;;  %v1885_v58 = vadd.f32 %v4303_v45, %v4274_v12 }
 0x1c7   : > { %2846 = vst.msk [vmem:[%s4317_s9 + $0x88] sm:$0xff] %vm2828_vm1, %v2385_v21 }
 0x1c9   : > { %v4444_v15 = vpop.f32.mrb[84].mxu0  ;;  %v3391_v61 = vpop.f32.mrb[84].mxu1 }
 0x1ca   : > { %v2406_v41 = vadd.f32 %v3391_v61, %v1861_v59  ;;  %v1942_v49 = vpop.f32.mrb[85].mxu0  ;;  %v2397_v25 = vpop.f32.mrb[85].mxu1 }
 0x1cb   : > { %v2398_v23 = vadd.f32 %v2397_v25, %v1853_v52  ;;  %v4450_v63 = vpop.f32.mrb[86].mxu0  ;;  %v3392_v5 = vpop.f32.mrb[86].mxu1 }
 0x1cc   : > { %2851 = vst.msk [vmem:[%s4317_s9 + $0xb0] sm:$0xff] %vm2828_vm1, %v2406_v41  ;;  %v2409_v35 = vadd.f32 %v3392_v5, %v1864_v37  ;;  %v1945_v43 = vpop.f32.mrb[87].mxu0  ;;  %v2400_v19 = vpop.f32.mrb[87].mxu1  ;;  %v1896_v37 = vadd.f32 %v4303_v45, %v4294_v36  ;;  %v1909_v36 = vadd.f32 %v4303_v45, %v4343_v10 }
 0x1cd   : > { %2849 = vst.msk [vmem:[%s4317_s9 + $0xa0] sm:$0xff] %vm2828_vm1, %v2398_v23  ;;  %v2401_v55 = vadd.f32 %v2400_v19, %v1856_v54  ;;  %v1888_v54 = vadd.f32 %v4303_v45, %v4280_v48  ;;  %v1901_v48 = vadd.f32 %v4303_v45, %v4312_v30 }
 0x1ce   : > { %2852 = vst.msk [vmem:[%s4317_s9 + $0xb8] sm:$0xff] %vm2828_vm1, %v2409_v35 }
 0x1cf   : > { %2850 = vst.msk [vmem:[%s4317_s9 + $0xa8] sm:$0xff] %vm2828_vm1, %v2401_v55 }
 0x1d1   : > { %v4464_v29 = vpop.f32.mrb[88].mxu0  ;;  %v3395_v31 = vpop.f32.mrb[88].mxu1 }
 0x1d2   : > { %v2422_v0 = vadd.f32 %v3395_v31, %v1877_v47  ;;  %v1950_v9 = vpop.f32.mrb[89].mxu0  ;;  %v2413_v46 = vpop.f32.mrb[89].mxu1 }
 0x1d3   : > { %v2414_v22 = vadd.f32 %v2413_v46, %v1869_v17  ;;  %v4470_v27 = vpop.f32.mrb[90].mxu0  ;;  %v3396_v13 = vpop.f32.mrb[90].mxu1  ;;  %v1912_v17 = vadd.f32 %v4303_v45, %v4351_v1  ;;  %v1904_v9 = vadd.f32 %v4303_v45, %v4325_v4  ;;  %v1925_v4 = vadd.f32 %v4303_v45, %v4395_v18 }
 0x1d4   : > { %2855 = vst.msk [vmem:[%s4317_s9 + $0xd0] sm:$0xff] %vm2828_vm1, %v2422_v0  ;;  %v2425_v39 = vadd.f32 %v3396_v13, %v1880_v7  ;;  %v1953_v33 = vpop.f32.mrb[91].mxu0  ;;  %v2416_v21 = vpop.f32.mrb[91].mxu1  ;;  %v1917_v1 = vadd.f32 %v4303_v45, %v4369_v60 }
 0x1d5   : > { %2853 = vst.msk [vmem:[%s4317_s9 + $0xc0] sm:$0xff] %vm2828_vm1, %v2414_v22  ;;  %v2417_v59 = vadd.f32 %v2416_v21, %v1872_v51 }
 0x1d6   : > { %2856 = vst.msk [vmem:[%s4317_s9 + $0xd8] sm:$0xff] %vm2828_vm1, %v2425_v39 }
 0x1d7   : > { %2854 = vst.msk [vmem:[%s4317_s9 + $0xc8] sm:$0xff] %vm2828_vm1, %v2417_v59  ;;  %v1928_v59 = vadd.f32 %v4303_v45, %v4403_v53  ;;  %v1941_v53 = vadd.f32 %v4303_v45, %v4444_v15 }
 0x1d9   : > { %v4484_v52 = vpop.f32.mrb[92].mxu0  ;;  %v3399_v61 = vpop.f32.mrb[92].mxu1 }
 0x1da   : > { %v2438_v41 = vadd.f32 %v3399_v61, %v1893_v57  ;;  %v1958_v49 = vpop.f32.mrb[93].mxu0  ;;  %v2429_v25 = vpop.f32.mrb[93].mxu1 }
 0x1db   : > { %v2430_v23 = vadd.f32 %v2429_v25, %v1885_v58  ;;  %v4490_v40 = vpop.f32.mrb[94].mxu0  ;;  %v3400_v5 = vpop.f32.mrb[94].mxu1 }
 0x1dc   : > { %2859 = vst.msk [vmem:[%s4317_s9 + $0xf0] sm:$0xff] %vm2828_vm1, %v2438_v41  ;;  %v2441_v12 = vadd.f32 %v3400_v5, %v1896_v37  ;;  %v1961_v35 = vpop.f32.mrb[95].mxu0  ;;  %v2432_v43 = vpop.f32.mrb[95].mxu1  ;;  %v1920_v37 = vadd.f32 %v4303_v45, %v4377_v28  ;;  %v1933_v28 = vadd.f32 %v4303_v45, %v4421_v11 }
 0x1dd   : > { %2857 = vst.msk [vmem:[%s4317_s9 + $0xe0] sm:$0xff] %vm2828_vm1, %v2430_v23  ;;  %v2433_v19 = vadd.f32 %v2432_v43, %v1888_v54  ;;  %v1944_v35 = vadd.f32 %v4303_v45, %v4450_v63  ;;  %v1957_v63 = vadd.f32 %v4303_v45, %v4484_v52 }
 0x1de   : > { %2860 = vst.msk [vmem:[%s4317_s9 + $0xf8] sm:$0xff] %vm2828_vm1, %v2441_v12 }
 0x1df   : > { %2858 = vst.msk [vmem:[%s4317_s9 + $0xe8] sm:$0xff] %vm2828_vm1, %v2433_v19 }
 0x1e1   : > { %v4504_v55 = vpop.f32.mrb[96].mxu0  ;;  %v3403_v47 = vpop.f32.mrb[96].mxu1 }
 0x1e2   : > { %v2454_v31 = vadd.f32 %v3403_v47, %v1909_v36  ;;  %v1966_v7 = vpop.f32.mrb[97].mxu0  ;;  %v2445_v0 = vpop.f32.mrb[97].mxu1 }
 0x1e3   : > { %v2446_v46 = vadd.f32 %v2445_v0, %v1901_v48  ;;  %v4510_v10 = vpop.f32.mrb[98].mxu0  ;;  %v3404_v51 = vpop.f32.mrb[98].mxu1  ;;  %v1936_v48 = vadd.f32 %v4303_v45, %v4429_v3  ;;  %v1949_v3 = vadd.f32 %v4303_v45, %v4464_v29 }
 0x1e4   : > { %2863 = vst.msk [vmem:[%s4317_s9 + $0x110] sm:$0xff] %vm2828_vm1, %v2454_v31  ;;  %v2457_v30 = vadd.f32 %v3404_v51, %v1912_v17  ;;  %v1969_v22 = vpop.f32.mrb[99].mxu0  ;;  %v2448_v13 = vpop.f32.mrb[99].mxu1  ;;  %v1960_v51 = vadd.f32 %v4303_v45, %v4490_v40 }
 0x1e5   : > { %2861 = vst.msk [vmem:[%s4317_s9 + $0x100] sm:$0xff] %vm2828_vm1, %v2446_v46  ;;  %v2449_v39 = vadd.f32 %v2448_v13, %v1904_v9 }
 0x1e6   : > { %2864 = vst.msk [vmem:[%s4317_s9 + $0x118] sm:$0xff] %vm2828_vm1, %v2457_v30 }
 0x1e7   : > { %2862 = vst.msk [vmem:[%s4317_s9 + $0x108] sm:$0xff] %vm2828_vm1, %v2449_v39  ;;  %v1952_v39 = vadd.f32 %v4303_v45, %v4470_v27  ;;  %v1965_v27 = vadd.f32 %v4303_v45, %v4504_v55 }
 0x1e9   : > { %v1972_v33 = vpop.f32.mrb[100].mxu0  ;;  %v3407_v21 = vpop.f32.mrb[100].mxu1 }
 0x1ea   : > { %v2470_v57 = vadd.f32 %v3407_v21, %v1925_v4  ;;  %v1974_v58 = vpop.f32.mrb[101].mxu0  ;;  %v2461_v61 = vpop.f32.mrb[101].mxu1  ;;  %v1973_v40 = vadd.f32 %v4303_v45, %v1972_v33 }
 0x1eb   : > { %v2462_v41 = vadd.f32 %v2461_v61, %v1917_v1  ;;  %v1975_v49 = vpop.f32.mrb[102].mxu0  ;;  %v3408_v18 = vpop.f32.mrb[102].mxu1 }
 0x1ec   : > { %2867 = vst.msk [vmem:[%s4317_s9 + $0x130] sm:$0xff] %vm2828_vm1, %v2470_v57  ;;  %v2473_v25 = vadd.f32 %v3408_v18, %v1928_v59  ;;  %v1977_v60 = vpop.f32.mrb[103].mxu0  ;;  %v2464_v54 = vpop.f32.mrb[103].mxu1 }
 0x1ed   : > { %2865 = vst.msk [vmem:[%s4317_s9 + $0x120] sm:$0xff] %vm2828_vm1, %v2462_v41  ;;  %v2465_v23 = vadd.f32 %v2464_v54, %v1920_v37  ;;  %v1976_v37 = vadd.f32 %v4303_v45, %v1975_v49  ;;  %v1968_v60 = vadd.f32 %v4303_v45, %v4510_v10 }
 0x1ee   : > { %2868 = vst.msk [vmem:[%s4317_s9 + $0x138] sm:$0xff] %vm2828_vm1, %v2473_v25 }
 0x1ef   : > { %2866 = vst.msk [vmem:[%s4317_s9 + $0x128] sm:$0xff] %vm2828_vm1, %v2465_v23 }
 0x1f1   : > { %v1980_v5 = vpop.f32.mrb[104].mxu0  ;;  %v3411_v12 = vpop.f32.mrb[104].mxu1 }
 0x1f2   : > { %v2486_v43 = vadd.f32 %v3411_v12, %v1941_v53  ;;  %v1982_v19 = vpop.f32.mrb[105].mxu0  ;;  %v2477_v36 = vpop.f32.mrb[105].mxu1  ;;  %v1981_v10 = vadd.f32 %v4303_v45, %v1980_v5 }
 0x1f3   : > { %v2478_v47 = vadd.f32 %v2477_v36, %v1933_v28  ;;  %v1983_v17 = vpop.f32.mrb[106].mxu0  ;;  %v3412_v15 = vpop.f32.mrb[106].mxu1 }
 0x1f4   : > { %2871 = vst.msk [vmem:[%s4317_s9 + $0x150] sm:$0xff] %vm2828_vm1, %v2486_v43  ;;  %v2489_v31 = vadd.f32 %v3412_v15, %v1944_v35  ;;  %v1985_v11 = vpop.f32.mrb[107].mxu0  ;;  %v2480_v7 = vpop.f32.mrb[107].mxu1  ;;  %v1984_v15 = vadd.f32 %v4303_v45, %v1983_v17 }
 0x1f5   : > { %2869 = vst.msk [vmem:[%s4317_s9 + $0x140] sm:$0xff] %vm2828_vm1, %v2478_v47  ;;  %v2481_v0 = vadd.f32 %v2480_v7, %v1936_v48 }
 0x1f6   : > { %2872 = vst.msk [vmem:[%s4317_s9 + $0x158] sm:$0xff] %vm2828_vm1, %v2489_v31 }
 0x1f7   : > { %2870 = vst.msk [vmem:[%s4317_s9 + $0x148] sm:$0xff] %vm2828_vm1, %v2481_v0 }
 0x1f9   : > { %v1988_v9 = vpop.f32.mrb[108].mxu0  ;;  %v3415_v46 = vpop.f32.mrb[108].mxu1 }
 0x1fa   : > { %v2502_v30 = vadd.f32 %v3415_v46, %v1957_v63  ;;  %v1990_v22 = vpop.f32.mrb[109].mxu0  ;;  %v2493_v13 = vpop.f32.mrb[109].mxu1  ;;  %v1989_v49 = vadd.f32 %v4303_v45, %v1988_v9 }
 0x1fb   : > { %v2494_v4 = vadd.f32 %v2493_v13, %v1949_v3  ;;  %v1991_v1 = vpop.f32.mrb[110].mxu0  ;;  %v3416_v52 = vpop.f32.mrb[110].mxu1 }
 0x1fc   : > { %2875 = vst.msk [vmem:[%s4317_s9 + $0x170] sm:$0xff] %vm2828_vm1, %v2502_v30  ;;  %v2505_v21 = vadd.f32 %v3416_v52, %v1960_v51  ;;  %v1993_v29 = vpop.f32.mrb[111].mxu0  ;;  %v2496_v59 = vpop.f32.mrb[111].mxu1  ;;  %v1992_v19 = vadd.f32 %v4303_v45, %v1991_v1 }
 0x1fd   : > { %2873 = vst.msk [vmem:[%s4317_s9 + $0x160] sm:$0xff] %vm2828_vm1, %v2494_v4  ;;  %v2497_v57 = vadd.f32 %v2496_v59, %v1952_v39 }
 0x1fe   : > { %2876 = vst.msk [vmem:[%s4317_s9 + $0x178] sm:$0xff] %vm2828_vm1, %v2505_v21 }
 0x1ff   : > { %2874 = vst.msk [vmem:[%s4317_s9 + $0x168] sm:$0xff] %vm2828_vm1, %v2497_v57 }
 0x201   : > { %v1996_v58 = vpop.f32.mrb[112].mxu0  ;;  %v3419_v61 = vpop.f32.mrb[112].mxu1 }
 0x202   : > { %v2518_v41 = vadd.f32 %v3419_v61, %v1973_v40  ;;  %v1998_v18 = vpop.f32.mrb[113].mxu0  ;;  %v2509_v25 = vpop.f32.mrb[113].mxu1  ;;  %v1997_v17 = vadd.f32 %v4303_v45, %v1996_v58 }
 0x203   : > { %v2510_v54 = vadd.f32 %v2509_v25, %v1965_v27  ;;  %v1999_v23 = vpop.f32.mrb[114].mxu0  ;;  %v3420_v53 = vpop.f32.mrb[114].mxu1 }
 0x204   : > { %2879 = vst.msk [vmem:[%s4317_s9 + $0x190] sm:$0xff] %vm2828_vm1, %v2518_v41  ;;  %v2521_v33 = vadd.f32 %v3420_v53, %v1976_v37  ;;  %v2001_v28 = vpop.f32.mrb[115].mxu0  ;;  %v2512_v55 = vpop.f32.mrb[115].mxu1  ;;  %v2000_v4 = vadd.f32 %v4303_v45, %v1999_v23 }
 0x205   : > { %2877 = vst.msk [vmem:[%s4317_s9 + $0x180] sm:$0xff] %vm2828_vm1, %v2510_v54  ;;  %v2513_v12 = vadd.f32 %v2512_v55, %v1968_v60 }
 0x206   : > { %2880 = vst.msk [vmem:[%s4317_s9 + $0x198] sm:$0xff] %vm2828_vm1, %v2521_v33 }
 0x207   : > { %2878 = vst.msk [vmem:[%s4317_s9 + $0x188] sm:$0xff] %vm2828_vm1, %v2513_v12 }
 0x209   : > { %v2004_v35 = vpop.f32.mrb[116].mxu0  ;;  %v3423_v43 = vpop.f32.mrb[116].mxu1 }
 0x20a   : > { %v2534_v36 = vadd.f32 %v3423_v43, %v1989_v49  ;;  %v2006_v48 = vpop.f32.mrb[117].mxu0  ;;  %v2525_v47 = vpop.f32.mrb[117].mxu1  ;;  %v2005_v9 = vadd.f32 %v4303_v45, %v2004_v35 }
 0x20b   : > { %v2526_v31 = vadd.f32 %v2525_v47, %v1981_v10  ;;  %v2007_v11 = vpop.f32.mrb[118].mxu0  ;;  %v3424_v7 = vpop.f32.mrb[118].mxu1 }
 0x20c   : > { %2883 = vst.msk [vmem:[%s4317_s9 + $0x1b0] sm:$0xff] %vm2828_vm1, %v2534_v36  ;;  %v2537_v0 = vadd.f32 %v3424_v7, %v1992_v19  ;;  %v2009_v63 = vpop.f32.mrb[119].mxu0  ;;  %v2528_v3 = vpop.f32.mrb[119].mxu1  ;;  %v2008_v30 = vadd.f32 %v4303_v45, %v2007_v11 }
 0x20d   : > { %2881 = vst.msk [vmem:[%s4317_s9 + $0x1a0] sm:$0xff] %vm2828_vm1, %v2526_v31  ;;  %v2529_v5 = vadd.f32 %v2528_v3, %v1984_v15 }
 0x20e   : > { %2884 = vst.msk [vmem:[%s4317_s9 + $0x1b8] sm:$0xff] %vm2828_vm1, %v2537_v0 }
 0x20f   : > { %2882 = vst.msk [vmem:[%s4317_s9 + $0x1a8] sm:$0xff] %vm2828_vm1, %v2529_v5 }
 0x211   : > { %v2012_v46 = vpop.f32.mrb[120].mxu0  ;;  %v3427_v51 = vpop.f32.mrb[120].mxu1 }
 0x212   : > { %v2550_v22 = vadd.f32 %v3427_v51, %v2005_v9  ;;  %v2014_v13 = vpop.f32.mrb[121].mxu0  ;;  %v2541_v39 = vpop.f32.mrb[121].mxu1  ;;  %v2013_v27 = vadd.f32 %v4303_v45, %v2012_v46 }
 0x213   : > { %v2542_v1 = vadd.f32 %v2541_v39, %v1997_v17  ;;  %v2015_v52 = vpop.f32.mrb[122].mxu0  ;;  %v3428_v21 = vpop.f32.mrb[122].mxu1 }
 0x214   : > { %2887 = vst.msk [vmem:[%s4317_s9 + $0x1d0] sm:$0xff] %vm2828_vm1, %v2550_v22  ;;  %v2553_v29 = vadd.f32 %v3428_v21, %v2008_v30  ;;  %v2017_v59 = vpop.f32.mrb[123].mxu0  ;;  %v2544_v57 = vpop.f32.mrb[123].mxu1  ;;  %v2016_v25 = vadd.f32 %v4303_v45, %v2015_v52 }
 0x215   : > { %2885 = vst.msk [vmem:[%s4317_s9 + $0x1c0] sm:$0xff] %vm2828_vm1, %v2542_v1  ;;  %v2545_v40 = vadd.f32 %v2544_v57, %v2000_v4 }
 0x216   : > { %2888 = vst.msk [vmem:[%s4317_s9 + $0x1d8] sm:$0xff] %vm2828_vm1, %v2553_v29 }
 0x217   : > { %2886 = vst.msk [vmem:[%s4317_s9 + $0x1c8] sm:$0xff] %vm2828_vm1, %v2545_v40 }
 0x219   : > { %v2020_v58 = vpop.f32.mrb[124].mxu0  ;;  %v3431_v61 = vpop.f32.mrb[124].mxu1 }
 0x21a   : > { %v2021_v37 = vadd.f32 %v4303_v45, %v2020_v58  ;;  %v2022_v41 = vpop.f32.mrb[125].mxu0  ;;  %v2557_v18 = vpop.f32.mrb[125].mxu1 }
 0x21b   : > { %v2558_v60 = vadd.f32 %v2557_v18, %v2013_v27  ;;  %v2023_v54 = vpop.f32.mrb[126].mxu0  ;;  %v3432_v23 = vpop.f32.mrb[126].mxu1 }
 0x21c   : > { %v2566_v53 = vadd.f32 %v3431_v61, %v2021_v37  ;;  %v2024_v33 = vadd.f32 %v4303_v45, %v2023_v54  ;;  %v2025_v28 = vpop.f32.mrb[127].mxu0  ;;  %v2560_v55 = vpop.f32.mrb[127].mxu1 }
 0x21d   : > { %2889 = vst.msk [vmem:[%s4317_s9 + $0x1e0] sm:$0xff] %vm2828_vm1, %v2558_v60  ;;  %v2561_v12 = vadd.f32 %v2560_v55, %v2016_v25 }
 0x21e   : > { %2891 = vst.msk [vmem:[%s4317_s9 + $0x1f0] sm:$0xff] %vm2828_vm1, %v2566_v53  ;;  %v2569_v49 = vadd.f32 %v3432_v23, %v2024_v33 }
 0x21f   : > { %2890 = vst.msk [vmem:[%s4317_s9 + $0x1e8] sm:$0xff] %vm2828_vm1, %v2561_v12 }
 0x220   : > { %2892 = vst.msk [vmem:[%s4317_s9 + $0x1f8] sm:$0xff] %vm2828_vm1, %v2569_v49 }
 0x221   : > { %v2028_v10 = vpop.f32.mrb[128].mxu0  ;;  %v3435_v35 = vpop.f32.mrb[128].mxu1 }
 0x222   : > { %v2029_v43 = vadd.f32 %v4303_v45, %v2028_v10  ;;  %v2030_v19 = vpop.f32.mrb[129].mxu0  ;;  %v2573_v36 = vpop.f32.mrb[129].mxu1 }
 0x223   : > { %v2031_v48 = vpop.f32.mrb[130].mxu0  ;;  %v3436_v47 = vpop.f32.mrb[130].mxu1 }
 0x224   : > { %v2574_v15 = vadd.f32 %v2573_v36, %v2029_v43  ;;  %v2032_v31 = vadd.f32 %v4303_v45, %v2031_v48  ;;  %v2033_v11 = vpop.f32.mrb[131].mxu0  ;;  %v2576_v7 = vpop.f32.mrb[131].mxu1 }
 0x226   : > { %2893 = vst.msk [vmem:[%s4317_s9 + $0x200] sm:$0xff] %vm2828_vm1, %v2574_v15  ;;  %v2577_v0 = vadd.f32 %v2576_v7, %v2032_v31 }
 0x228   : > { %2894 = vst.msk [vmem:[%s4317_s9 + $0x208] sm:$0xff] %vm2828_vm1, %v2577_v0 }
 0x229   : > { %v2036_v63 = vpop.f32.mrb[132].mxu0  ;;  %v3439_v3 = vpop.f32.mrb[132].mxu1 }
 0x22a   : > { %v2037_v5 = vadd.f32 %v4303_v45, %v2036_v63  ;;  %v2038_v9 = vpop.f32.mrb[133].mxu0  ;;  %v2589_v17 = vpop.f32.mrb[133].mxu1 }
 0x22b   : > { %v2039_v46 = vpop.f32.mrb[134].mxu0  ;;  %v3440_v51 = vpop.f32.mrb[134].mxu1 }
 0x22c   : > { %v2582_v30 = vadd.f32 %v3435_v35, %v2037_v5  ;;  %v2040_v22 = vadd.f32 %v4303_v45, %v2039_v46  ;;  %v2041_v13 = vpop.f32.mrb[135].mxu0  ;;  %v2592_v39 = vpop.f32.mrb[135].mxu1 }
 0x22e   : > { %2895 = vst.msk [vmem:[%s4317_s9 + $0x210] sm:$0xff] %vm2828_vm1, %v2582_v30  ;;  %v2585_v4 = vadd.f32 %v3436_v47, %v2040_v22 }
 0x230   : > { %2896 = vst.msk [vmem:[%s4317_s9 + $0x218] sm:$0xff] %vm2828_vm1, %v2585_v4 }
 0x231   : > { %v2044_v1 = vpop.f32.mrb[136].mxu0  ;;  %v3443_v52 = vpop.f32.mrb[136].mxu1 }
 0x232   : > { %v2045_v21 = vadd.f32 %v4303_v45, %v2044_v1  ;;  %v2046_v29 = vpop.f32.mrb[137].mxu0  ;;  %v2605_v59 = vpop.f32.mrb[137].mxu1 }
 0x233   : > { %v2047_v57 = vpop.f32.mrb[138].mxu0  ;;  %v3444_v40 = vpop.f32.mrb[138].mxu1 }
 0x234   : > { %v2590_v27 = vadd.f32 %v2589_v17, %v2045_v21  ;;  %v2048_v58 = vadd.f32 %v4303_v45, %v2047_v57  ;;  %v2049_v61 = vpop.f32.mrb[139].mxu0  ;;  %v2608_v37 = vpop.f32.mrb[139].mxu1 }
 0x236   : > { %2897 = vst.msk [vmem:[%s4317_s9 + $0x220] sm:$0xff] %vm2828_vm1, %v2590_v27  ;;  %v2593_v41 = vadd.f32 %v2592_v39, %v2048_v58 }
 0x238   : > { %2898 = vst.msk [vmem:[%s4317_s9 + $0x228] sm:$0xff] %vm2828_vm1, %v2593_v41 }
 0x239   : > { %v2052_v18 = vpop.f32.mrb[140].mxu0  ;;  %v3447_v25 = vpop.f32.mrb[140].mxu1 }
 0x23a   : > { %v2053_v60 = vadd.f32 %v4303_v45, %v2052_v18  ;;  %v2054_v54 = vpop.f32.mrb[141].mxu0  ;;  %v2621_v23 = vpop.f32.mrb[141].mxu1 }
 0x23b   : > { %v2055_v53 = vpop.f32.mrb[142].mxu0  ;;  %v3448_v33 = vpop.f32.mrb[142].mxu1 }
 0x23c   : > { %v2598_v28 = vadd.f32 %v3439_v3, %v2053_v60  ;;  %v2056_v55 = vadd.f32 %v4303_v45, %v2055_v53  ;;  %v2057_v12 = vpop.f32.mrb[143].mxu0  ;;  %v2624_v49 = vpop.f32.mrb[143].mxu1 }
 0x23e   : > { %2899 = vst.msk [vmem:[%s4317_s9 + $0x230] sm:$0xff] %vm2828_vm1, %v2598_v28  ;;  %v2601_v10 = vadd.f32 %v3440_v51, %v2056_v55 }
 0x240   : > { %2900 = vst.msk [vmem:[%s4317_s9 + $0x238] sm:$0xff] %vm2828_vm1, %v2601_v10 }
 0x241   : > { %v2060_v35 = vpop.f32.mrb[144].mxu0  ;;  %v4642_v43 = vpop.f32.mrb[144].mxu1 }
 0x242   : > { %v2061_v19 = vadd.f32 %v4303_v45, %v2060_v35  ;;  %v2062_v36 = vpop.f32.mrb[145].mxu0  ;;  %v4645_v48 = vpop.f32.mrb[145].mxu1 }
 0x243   : > { %v2063_v47 = vpop.f32.mrb[146].mxu0  ;;  %v4647_v15 = vpop.f32.mrb[146].mxu1 }
 0x244   : > { %v2606_v31 = vadd.f32 %v2605_v59, %v2061_v19  ;;  %v2064_v11 = vadd.f32 %v4303_v45, %v2063_v47  ;;  %v2065_v7 = vpop.f32.mrb[147].mxu0  ;;  %v4650_v0 = vpop.f32.mrb[147].mxu1  ;;  %v2165_v47 = vadd.f32 %v4303_v45, %v4094_v14  ;;  %v2160_v14 = vadd.f32 %v4303_v45, %v4086_v8 }
 0x246   : > { %2901 = vst.msk [vmem:[%s4317_s9 + $0x240] sm:$0xff] %vm2828_vm1, %v2606_v31  ;;  %v2609_v63 = vadd.f32 %v2608_v37, %v2064_v11  ;;  %v2157_v31 = vadd.f32 %v4303_v45, %v4080_v2 }
 0x248   : > { %2902 = vst.msk [vmem:[%s4317_s9 + $0x248] sm:$0xff] %vm2828_vm1, %v2609_v63 }
 0x249   : > { %v2068_v3 = vpop.f32.mrb[148].mxu0  ;;  %v4656_v5 = vpop.f32.mrb[148].mxu1 }
 0x24a   : > { %v2069_v9 = vadd.f32 %v4303_v45, %v2068_v3  ;;  %v2070_v17 = vpop.f32.mrb[149].mxu0  ;;  %v4659_v46 = vpop.f32.mrb[149].mxu1 }
 0x24b   : > { %v2071_v51 = vpop.f32.mrb[150].mxu0  ;;  %v4661_v30 = vpop.f32.mrb[150].mxu1 }
 0x24c   : > { %v2614_v22 = vadd.f32 %v3443_v52, %v2069_v9  ;;  %v2072_v13 = vadd.f32 %v4303_v45, %v2071_v51  ;;  %v2073_v39 = vpop.f32.mrb[151].mxu0  ;;  %v4664_v4 = vpop.f32.mrb[151].mxu1 }
 0x24e   : > { %2903 = vst.msk [vmem:[%s4317_s9 + $0x250] sm:$0xff] %vm2828_vm1, %v2614_v22  ;;  %v2617_v1 = vadd.f32 %v3444_v40, %v2072_v13 }
 0x250   : > { %2904 = vst.msk [vmem:[%s4317_s9 + $0x258] sm:$0xff] %vm2828_vm1, %v2617_v1 }
 0x251   : > { %v2076_v21 = vpop.f32.mrb[152].mxu0  ;;  %v4670_v29 = vpop.f32.mrb[152].mxu1 }
 0x252   : > { %v2077_v59 = vadd.f32 %v4303_v45, %v2076_v21  ;;  %v2078_v57 = vpop.f32.mrb[153].mxu0  ;;  %v4673_v27 = vpop.f32.mrb[153].mxu1 }
 0x253   : > { %v2079_v52 = vpop.f32.mrb[154].mxu0  ;;  %v4675_v58 = vpop.f32.mrb[154].mxu1 }
 0x254   : > { %v2622_v61 = vadd.f32 %v2621_v23, %v2077_v59  ;;  %v2080_v37 = vadd.f32 %v4303_v45, %v2079_v52  ;;  %v2081_v41 = vpop.f32.mrb[155].mxu0  ;;  %v4678_v18 = vpop.f32.mrb[155].mxu1  ;;  %v2173_v59 = vadd.f32 %v4303_v45, %v4108_v26 }
 0x256   : > { %2905 = vst.msk [vmem:[%s4317_s9 + $0x260] sm:$0xff] %vm2828_vm1, %v2622_v61  ;;  %v2625_v40 = vadd.f32 %v2624_v49, %v2080_v37  ;;  %v2184_v61 = vadd.f32 %v4303_v45, %v4128_v44  ;;  %v4737_v44 = vld [vmem:[%s4900_s2] ss:$0 sm:$0xff] }
 0x258   : > { %2906 = vst.msk [vmem:[%s4317_s9 + $0x268] sm:$0xff] %vm2828_vm1, %v2625_v40 }
 0x259   : > { %v2084_v60 = vpop.f32.mrb[156].mxu0  ;;  %v4684_v54 = vpop.f32.mrb[156].mxu1 }
 0x25a   : > { %v2085_v53 = vadd.f32 %v4303_v45, %v2084_v60  ;;  %v2086_v28 = vpop.f32.mrb[157].mxu0  ;;  %v4687_v55 = vpop.f32.mrb[157].mxu1 }
 0x25b   : > { %v2087_v23 = vpop.f32.mrb[158].mxu0  ;;  %v4689_v12 = vpop.f32.mrb[158].mxu1 }
 0x25c   : > { %v2630_v10 = vadd.f32 %v3447_v25, %v2085_v53  ;;  %v2088_v35 = vadd.f32 %v4303_v45, %v2087_v23  ;;  %v2089_v19 = vpop.f32.mrb[159].mxu0  ;;  %v4692_v36 = vpop.f32.mrb[159].mxu1  ;;  %v2168_v25 = vadd.f32 %v4303_v45, %v4100_v20 }
 0x25e   : > { %2907 = vst.msk [vmem:[%s4317_s9 + $0x270] sm:$0xff] %vm2828_vm1, %v2630_v10  ;;  %v2633_v49 = vadd.f32 %v3448_v33, %v2088_v35 }
 0x260   : > { %2908 = vst.msk [vmem:[%s4317_s9 + $0x278] sm:$0xff] %vm2828_vm1, %v2633_v49  ;;  %v2189_v49 = vadd.f32 %v4737_v44, %v4136_v50 }
 0x261   : > { %v2092_v11 = vpop.f32.mrb[160].mxu0  ;;  %v3467_v7 = vpop.f32.mrb[160].mxu1 }
 0x262   : > { %v2093_v63 = vadd.f32 %v4303_v45, %v2092_v11  ;;  %v2710_v3 = vadd.f32 %v3467_v7, %v2165_v47  ;;  %v2094_v33 = vpop.f32.mrb[161].mxu0  ;;  %v2701_v9 = vpop.f32.mrb[161].mxu1  ;;  %v2200_v11 = vadd.f32 %v4737_v44, %v4156_v6 }
 0x263   : > { %v2702_v17 = vadd.f32 %v2701_v9, %v2157_v31  ;;  %v2095_v2 = vpop.f32.mrb[162].mxu0  ;;  %v3468_v51 = vpop.f32.mrb[162].mxu1 }
 0x264   : > { %v2638_v22 = vadd.f32 %v4645_v48, %v2093_v63  ;;  %2927 = vst.msk [vmem:[%s4317_s9 + $0x310] sm:$0xff] %vm2828_vm1, %v2710_v3  ;;  %v2096_v20 = vadd.f32 %v4303_v45, %v2095_v2  ;;  %v2713_v13 = vadd.f32 %v3468_v51, %v2168_v25  ;;  %v2097_v39 = vpop.f32.mrb[163].mxu0  ;;  %v2704_v1 = vpop.f32.mrb[163].mxu1  ;;  %v2181_v48 = vadd.f32 %v4303_v45, %v4122_v38 }
 0x265   : > { %2925 = vst.msk [vmem:[%s4317_s9 + $0x300] sm:$0xff] %vm2828_vm1, %v2702_v17  ;;  %v2705_v21 = vadd.f32 %v2704_v1, %v2160_v14  ;;  %v2176_v38 = vadd.f32 %v4303_v45, %v4114_v32  ;;  %v2216_v39 = vadd.f32 %v4737_v44, %v4184_v42 }
 0x266   : > { %2909 = vst.msk [vmem:[%s4317_s9 + $0x280] sm:$0xff] %vm2828_vm1, %v2638_v22  ;;  %v2641_v8 = vadd.f32 %v4650_v0, %v2096_v20  ;;  %2928 = vst.msk [vmem:[%s4317_s9 + $0x318] sm:$0xff] %vm2828_vm1, %v2713_v13  ;;  %v2205_v22 = vadd.f32 %v4737_v44, %v4164_v16 }
 0x267   : > { %2926 = vst.msk [vmem:[%s4317_s9 + $0x308] sm:$0xff] %vm2828_vm1, %v2705_v21 }
 0x268   : > { %2910 = vst.msk [vmem:[%s4317_s9 + $0x288] sm:$0xff] %vm2828_vm1, %v2641_v8 }
 0x269   : > { %v2100_v57 = vpop.f32.mrb[164].mxu0  ;;  %v3471_v52 = vpop.f32.mrb[164].mxu1 }
 0x26a   : > { %v2101_v0 = vadd.f32 %v4303_v45, %v2100_v57  ;;  %v2726_v37 = vadd.f32 %v3471_v52, %v2181_v48  ;;  %v2102_v41 = vpop.f32.mrb[165].mxu0  ;;  %v2717_v40 = vpop.f32.mrb[165].mxu1 }
 0x26b   : > { %v2718_v60 = vadd.f32 %v2717_v40, %v2173_v59  ;;  %v2103_v53 = vpop.f32.mrb[166].mxu0  ;;  %v3472_v26 = vpop.f32.mrb[166].mxu1  ;;  %v4918_v41 = vld [vmem:[#allocation4_spill] sm:$0xff]  ;;  %v4919_v40 = vld [vmem:[#allocation2_spill] sm:$0xff] }
 0x26c   : > { %v2646_v28 = vadd.f32 %v4642_v43, %v2101_v0  ;;  %2931 = vst.msk [vmem:[%s4317_s9 + $0x330] sm:$0xff] %vm2828_vm1, %v2726_v37  ;;  %v2104_v23 = vadd.f32 %v4737_v44, %v2103_v53  ;;  %v2729_v10 = vadd.f32 %v3472_v26, %v2184_v61  ;;  %v2105_v35 = vpop.f32.mrb[167].mxu0  ;;  %v2720_v19 = vpop.f32.mrb[167].mxu1  ;;  %v2197_v43 = vadd.f32 %v4737_v44, %v4150_v62  ;;  %v4920_v26 = vld [vmem:[#allocation5_spill] sm:$0xff] }
 0x26d   : > { %2929 = vst.msk [vmem:[%s4317_s9 + $0x320] sm:$0xff] %vm2828_vm1, %v2718_v60  ;;  %v2721_v32 = vadd.f32 %v2720_v19, %v2176_v38  ;;  %v2192_v62 = vadd.f32 %v4737_v44, %v4142_v56  ;;  %v2221_v38 = vadd.f32 %v4737_v44, %v4919_v40  ;;  %v4921_v19 = vld [vmem:[#allocation3_spill] sm:$0xff] }
 0x26e   : > { %2911 = vst.msk [vmem:[%s4317_s9 + $0x290] sm:$0xff] %vm2828_vm1, %v2646_v28  ;;  %v2649_v45 = vadd.f32 %v4647_v15, %v2104_v23  ;;  %2932 = vst.msk [vmem:[%s4317_s9 + $0x338] sm:$0xff] %vm2828_vm1, %v2729_v10  ;;  %v2232_v28 = vadd.f32 %v4737_v44, %v4920_v26 }
 0x26f   : > { %2930 = vst.msk [vmem:[%s4317_s9 + $0x328] sm:$0xff] %vm2828_vm1, %v2721_v32  ;;  %v2224_v32 = vadd.f32 %v4737_v44, %v4921_v19 }
 0x270   : > { %2912 = vst.msk [vmem:[%s4317_s9 + $0x298] sm:$0xff] %vm2828_vm1, %v2649_v45 }
 0x271   : > { %v2108_v47 = vpop.f32.mrb[168].mxu0  ;;  %v3475_v31 = vpop.f32.mrb[168].mxu1 }
 0x272   : > { %v2109_v15 = vadd.f32 %v4737_v44, %v2108_v47  ;;  %v2742_v7 = vadd.f32 %v3475_v31, %v2197_v43  ;;  %v2110_v25 = vpop.f32.mrb[169].mxu0  ;;  %v2733_v63 = vpop.f32.mrb[169].mxu1 }
 0x273   : > { %v2734_v3 = vadd.f32 %v2733_v63, %v2189_v49  ;;  %v2111_v50 = vpop.f32.mrb[170].mxu0  ;;  %v3476_v33 = vpop.f32.mrb[170].mxu1 }
 0x274   : > { %v2654_v9 = vadd.f32 %v4659_v46, %v2109_v15  ;;  %2935 = vst.msk [vmem:[%s4317_s9 + $0x350] sm:$0xff] %vm2828_vm1, %v2742_v7  ;;  %v2112_v6 = vadd.f32 %v4737_v44, %v2111_v50  ;;  %v2745_v14 = vadd.f32 %v3476_v33, %v2200_v11  ;;  %v2113_v17 = vpop.f32.mrb[171].mxu0  ;;  %v2736_v2 = vpop.f32.mrb[171].mxu1  ;;  %v2213_v46 = vadd.f32 %v4737_v44, %v4178_v34 }
 0x275   : > { %2933 = vst.msk [vmem:[%s4317_s9 + $0x340] sm:$0xff] %vm2828_vm1, %v2734_v3  ;;  %v2737_v51 = vadd.f32 %v2736_v2, %v2192_v62  ;;  %v2208_v34 = vadd.f32 %v4737_v44, %v4170_v24  ;;  %v4922_v62 = vld [vmem:[#allocation8_spill] sm:$0xff]  ;;  %v4923_v3 = vld [vmem:[#allocation6_spill] sm:$0xff] }
 0x276   : > { %2913 = vst.msk [vmem:[%s4317_s9 + $0x2a0] sm:$0xff] %vm2828_vm1, %v2654_v9  ;;  %v2657_v56 = vadd.f32 %v4664_v4, %v2112_v6  ;;  %2936 = vst.msk [vmem:[%s4317_s9 + $0x358] sm:$0xff] %vm2828_vm1, %v2745_v14  ;;  %v2237_v50 = vadd.f32 %v4737_v44, %v4923_v3  ;;  %v4924_v6 = vld [vmem:[#allocation9_spill] sm:$0xff] }
 0x277   : > { %2934 = vst.msk [vmem:[%s4317_s9 + $0x348] sm:$0xff] %vm2828_vm1, %v2737_v51  ;;  %v2248_v14 = vadd.f32 %v4737_v44, %v4924_v6 }
 0x278   : > { %2914 = vst.msk [vmem:[%s4317_s9 + $0x2a8] sm:$0xff] %vm2828_vm1, %v2657_v56  ;;  %v4925_v56 = vld [vmem:[#allocation7_spill] sm:$0xff] }
 0x279   : > { %v2116_v20 = vpop.f32.mrb[172].mxu0  ;;  %v3479_v13 = vpop.f32.mrb[172].mxu1 }
 0x27a   : > { %v2117_v4 = vadd.f32 %v4737_v44, %v2116_v20  ;;  %v2758_v1 = vadd.f32 %v3479_v13, %v2213_v46  ;;  %v2118_v21 = vpop.f32.mrb[173].mxu0  ;;  %v2749_v8 = vpop.f32.mrb[173].mxu1  ;;  %v2240_v46 = vadd.f32 %v4737_v44, %v4925_v56 }
 0x27b   : > { %v2750_v48 = vadd.f32 %v2749_v8, %v2205_v22  ;;  %v2119_v16 = vpop.f32.mrb[174].mxu0  ;;  %v3480_v59 = vpop.f32.mrb[174].mxu1 }
 0x27c   : > { %v2662_v57 = vadd.f32 %v4656_v5, %v2117_v4  ;;  %2939 = vst.msk [vmem:[%s4317_s9 + $0x370] sm:$0xff] %vm2828_vm1, %v2758_v1  ;;  %v2120_v42 = vadd.f32 %v4737_v44, %v2119_v16  ;;  %v2761_v52 = vadd.f32 %v3480_v59, %v2216_v39  ;;  %v2121_v61 = vpop.f32.mrb[175].mxu0  ;;  %v2752_v0 = vpop.f32.mrb[175].mxu1  ;;  %v2229_v5 = vadd.f32 %v4737_v44, %v4918_v41  ;;  %v4926_v16 = vld [vmem:[#allocation12_spill] sm:$0xff]  ;;  %v4927_v59 = vld [vmem:[#allocation10_spill] sm:$0xff] }
 0x27d   : > { %2937 = vst.msk [vmem:[%s4317_s9 + $0x360] sm:$0xff] %vm2828_vm1, %v2750_v48  ;;  %v2753_v37 = vadd.f32 %v2752_v0, %v2208_v34  ;;  %v4928_v61 = vld [vmem:[#allocation13_spill] sm:$0xff] }
 0x27e   : > { %2915 = vst.msk [vmem:[%s4317_s9 + $0x2b0] sm:$0xff] %vm2828_vm1, %v2662_v57  ;;  %v2665_v24 = vadd.f32 %v4661_v30, %v2120_v42  ;;  %2940 = vst.msk [vmem:[%s4317_s9 + $0x378] sm:$0xff] %vm2828_vm1, %v2761_v52  ;;  %v2253_v57 = vadd.f32 %v4737_v44, %v4927_v59  ;;  %v2264_v0 = vadd.f32 %v4737_v44, %v4928_v61 }
 0x27f   : > { %2938 = vst.msk [vmem:[%s4317_s9 + $0x368] sm:$0xff] %vm2828_vm1, %v2753_v37 }
 0x280   : > { %2916 = vst.msk [vmem:[%s4317_s9 + $0x2b8] sm:$0xff] %vm2828_vm1, %v2665_v24 }
 0x281   : > { %v2124_v60 = vpop.f32.mrb[176].mxu0  ;;  %v3483_v53 = vpop.f32.mrb[176].mxu1 }
 0x282   : > { %v2125_v30 = vadd.f32 %v4737_v44, %v2124_v60  ;;  %v2774_v23 = vadd.f32 %v3483_v53, %v2229_v5  ;;  %v2126_v10 = vpop.f32.mrb[177].mxu0  ;;  %v2765_v35 = vpop.f32.mrb[177].mxu1  ;;  %v4929_v5 = vld [vmem:[#allocation11_spill] sm:$0xff] }
 0x283   : > { %v2766_v45 = vadd.f32 %v2765_v35, %v2221_v38  ;;  %v2127_v43 = vpop.f32.mrb[178].mxu0  ;;  %v3484_v49 = vpop.f32.mrb[178].mxu1  ;;  %v2256_v40 = vadd.f32 %v4737_v44, %v4929_v5 }
 0x284   : > { %v2670_v47 = vadd.f32 %v4673_v27, %v2125_v30  ;;  %2943 = vst.msk [vmem:[%s4317_s9 + $0x390] sm:$0xff] %vm2828_vm1, %v2774_v23  ;;  %v2128_v31 = vadd.f32 %v4737_v44, %v2127_v43  ;;  %v2777_v11 = vadd.f32 %v3484_v49, %v2232_v28  ;;  %v2129_v15 = vpop.f32.mrb[179].mxu0  ;;  %v2768_v7 = vpop.f32.mrb[179].mxu1  ;;  %v2245_v27 = vadd.f32 %v4737_v44, %v4922_v62 }
 0x285   : > { %2941 = vst.msk [vmem:[%s4317_s9 + $0x380] sm:$0xff] %vm2828_vm1, %v2766_v45  ;;  %v2769_v25 = vadd.f32 %v2768_v7, %v2224_v32  ;;  %v4930_v32 = vld [vmem:[#allocation16_spill] sm:$0xff]  ;;  %v4931_v45 = vld [vmem:[#allocation14_spill] sm:$0xff] }
 0x286   : > { %2917 = vst.msk [vmem:[%s4317_s9 + $0x2c0] sm:$0xff] %vm2828_vm1, %v2670_v47  ;;  %v2673_v63 = vadd.f32 %v4678_v18, %v2128_v31  ;;  %2944 = vst.msk [vmem:[%s4317_s9 + $0x398] sm:$0xff] %vm2828_vm1, %v2777_v11  ;;  %v2269_v43 = vadd.f32 %v4737_v44, %v4931_v45  ;;  %v4932_v31 = vld [vmem:[#allocation17_spill] sm:$0xff] }
 0x287   : > { %2942 = vst.msk [vmem:[%s4317_s9 + $0x388] sm:$0xff] %vm2828_vm1, %v2769_v25  ;;  %v2280_v11 = vadd.f32 %v4737_v44, %v4932_v31 }
 0x288   : > { %2918 = vst.msk [vmem:[%s4317_s9 + $0x2c8] sm:$0xff] %vm2828_vm1, %v2673_v63  ;;  %v4933_v63 = vld [vmem:[#allocation15_spill] sm:$0xff] }
 0x289   : > { %v2132_v33 = vpop.f32.mrb[180].mxu0  ;;  %v3487_v9 = vpop.f32.mrb[180].mxu1  ;;  %v2272_v62 = vadd.f32 %v4737_v44, %v4933_v63 }
 0x28a   : > { %v2133_v18 = vadd.f32 %v4737_v44, %v2132_v33  ;;  %v2790_v17 = vadd.f32 %v3487_v9, %v2245_v27  ;;  %v2134_v2 = vpop.f32.mrb[181].mxu0  ;;  %v2781_v51 = vpop.f32.mrb[181].mxu1 }
 0x28b   : > { %v2782_v22 = vadd.f32 %v2781_v51, %v2237_v50  ;;  %v2135_v20 = vpop.f32.mrb[182].mxu0  ;;  %v3488_v13 = vpop.f32.mrb[182].mxu1 }
 0x28c   : > { %v2678_v39 = vadd.f32 %v4670_v29, %v2133_v18  ;;  %2947 = vst.msk [vmem:[%s4317_s9 + $0x3b0] sm:$0xff] %vm2828_vm1, %v2790_v17  ;;  %v2136_v4 = vadd.f32 %v4737_v44, %v2135_v20  ;;  %v2793_v1 = vadd.f32 %v3488_v13, %v2248_v14  ;;  %v2137_v21 = vpop.f32.mrb[183].mxu0  ;;  %v2784_v8 = vpop.f32.mrb[183].mxu1  ;;  %v2261_v29 = vadd.f32 %v4737_v44, %v4926_v16 }
 0x28d   : > { %2945 = vst.msk [vmem:[%s4317_s9 + $0x3a0] sm:$0xff] %vm2828_vm1, %v2782_v22  ;;  %v2785_v34 = vadd.f32 %v2784_v8, %v2240_v46 }
 0x28e   : > { %2919 = vst.msk [vmem:[%s4317_s9 + $0x2d0] sm:$0xff] %vm2828_vm1, %v2678_v39  ;;  %v2681_v48 = vadd.f32 %v4675_v58, %v2136_v4  ;;  %2948 = vst.msk [vmem:[%s4317_s9 + $0x3b8] sm:$0xff] %vm2828_vm1, %v2793_v1 }
 0x28f   : > { %2946 = vst.msk [vmem:[%s4317_s9 + $0x3a8] sm:$0xff] %vm2828_vm1, %v2785_v34 }
 0x290   : > { %2920 = vst.msk [vmem:[%s4317_s9 + $0x2d8] sm:$0xff] %vm2828_vm1, %v2681_v48 }
 0x291   : > { %v2140_v42 = vpop.f32.mrb[184].mxu0  ;;  %v3491_v52 = vpop.f32.mrb[184].mxu1 }
 0x292   : > { %v2141_v58 = vadd.f32 %v4737_v44, %v2140_v42  ;;  %v2806_v37 = vadd.f32 %v3491_v52, %v2261_v29  ;;  %v2142_v24 = vpop.f32.mrb[185].mxu0  ;;  %v2797_v41 = vpop.f32.mrb[185].mxu1 }
 0x293   : > { %v2798_v38 = vadd.f32 %v2797_v41, %v2253_v57  ;;  %v2143_v60 = vpop.f32.mrb[186].mxu0  ;;  %v3492_v53 = vpop.f32.mrb[186].mxu1 }
 0x294   : > { %v2686_v26 = vadd.f32 %v4687_v55, %v2141_v58  ;;  %2951 = vst.msk [vmem:[%s4317_s9 + $0x3d0] sm:$0xff] %vm2828_vm1, %v2806_v37  ;;  %v2144_v28 = vadd.f32 %v4737_v44, %v2143_v60  ;;  %v2809_v30 = vadd.f32 %v3492_v53, %v2264_v0  ;;  %v2145_v23 = vpop.f32.mrb[187].mxu0  ;;  %v2800_v10 = vpop.f32.mrb[187].mxu1  ;;  %v2277_v55 = vadd.f32 %v4737_v44, %v4930_v32 }
 0x295   : > { %2949 = vst.msk [vmem:[%s4317_s9 + $0x3c0] sm:$0xff] %vm2828_vm1, %v2798_v38  ;;  %v2801_v35 = vadd.f32 %v2800_v10, %v2256_v40 }
 0x296   : > { %2921 = vst.msk [vmem:[%s4317_s9 + $0x2e0] sm:$0xff] %vm2828_vm1, %v2686_v26  ;;  %v2689_v19 = vadd.f32 %v4692_v36, %v2144_v28  ;;  %2952 = vst.msk [vmem:[%s4317_s9 + $0x3d8] sm:$0xff] %vm2828_vm1, %v2809_v30 }
 0x297   : > { %2950 = vst.msk [vmem:[%s4317_s9 + $0x3c8] sm:$0xff] %vm2828_vm1, %v2801_v35 }
 0x298   : > { %2922 = vst.msk [vmem:[%s4317_s9 + $0x2e8] sm:$0xff] %vm2828_vm1, %v2689_v19 }
 0x299   : > { %v2148_v49 = vpop.f32.mrb[188].mxu0  ;;  %v3495_v47 = vpop.f32.mrb[188].mxu1 }
 0x29a   : > { %v2149_v36 = vadd.f32 %v4737_v44, %v2148_v49  ;;  %v2822_v15 = vadd.f32 %v3495_v47, %v2277_v55  ;;  %v2150_v7 = vpop.f32.mrb[189].mxu0  ;;  %v2813_v25 = vpop.f32.mrb[189].mxu1 }
 0x29b   : > { %v2814_v27 = vadd.f32 %v2813_v25, %v2269_v43  ;;  %v2151_v3 = vpop.f32.mrb[190].mxu0  ;;  %v3496_v50 = vpop.f32.mrb[190].mxu1 }
 0x29c   : > { %v2694_v33 = vadd.f32 %v4684_v54, %v2149_v36  ;;  %2955 = vst.msk [vmem:[%s4317_s9 + $0x3f0] sm:$0xff] %vm2828_vm1, %v2822_v15  ;;  %v2152_v9 = vadd.f32 %v4737_v44, %v2151_v3  ;;  %v2825_v6 = vadd.f32 %v3496_v50, %v2280_v11  ;;  %v2153_v14 = vpop.f32.mrb[191].mxu0  ;;  %v2816_v18 = vpop.f32.mrb[191].mxu1 }
 0x29d   : > { %2953 = vst.msk [vmem:[%s4317_s9 + $0x3e0] sm:$0xff] %vm2828_vm1, %v2814_v27  ;;  %v2817_v17 = vadd.f32 %v2816_v18, %v2272_v62 }
 0x29e   : > { %2923 = vst.msk [vmem:[%s4317_s9 + $0x2f0] sm:$0xff] %vm2828_vm1, %v2694_v33  ;;  %v2697_v2 = vadd.f32 %v4689_v12, %v2152_v9  ;;  %2956 = vst.msk [vmem:[%s4317_s9 + $0x3f8] sm:$0xff] %vm2828_vm1, %v2825_v6 }
 0x29f   : > { %2954 = vst.msk [vmem:[%s4317_s9 + $0x3e8] sm:$0xff] %vm2828_vm1, %v2817_v17 }
 0x2a0   : > { %2924 = vst.msk [vmem:[%s4317_s9 + $0x2f8] sm:$0xff] %vm2828_vm1, %v2697_v2 }
 0x2a1 PF: > { %s13_s12 = sadd.s32 1, %s3820_s12  }
 0x2a2   : > { %p10_p4 = scmp.ge.s32.totalorder %s13_s12, 4  }
 0x2a4   :  { %12 = sbr.rel (!%p10_p4) target bundleno = 1 (0x1), region = 62 }

</bundles_post_ra>
